<compile_context>
chip_gen: v7x
topology: tpu7x:2x2x1
jax: 0.10.0
libtpu: 0.0.40
codegen_flags: <defaults>
</compile_context>

<pallas_src>
import functools

import jax
import jax.numpy as jnp
import numpy as np
from jax.experimental import pallas as pl
from jax.experimental.pallas import tpu as pltpu


# ---------------------------------------------------------------------------
# Fused forward kernel
# ---------------------------------------------------------------------------

def _layernorm(x, gamma, beta, eps):
    mean = jnp.mean(x, axis=-1, keepdims=True)
    var = jnp.mean(jnp.square(x - mean), axis=-1, keepdims=True)
    return (x - mean) * jax.lax.rsqrt(var + eps) * gamma + beta


def _fused_forward_kernel(*refs, seq_len, num_fc, num_layers, num_heads,
                          d_model, eps):
    """One grid step = one batch element (seq_len rows); everything stays in VMEM."""
    it = iter(refs)
    x_ref = next(it)                                     # [S, C, H*W]   f32
    pe_ref = next(it)                                    # [S, d_model]  f32
    fc = [(next(it), next(it)) for _ in range(num_fc)]   # bf16 W, f32 [1,N] bias
    ve_w_ref, ve_b_ref = next(it), next(it)
    if num_layers > 0:
        (ln_g_ref, ln_b_ref, wqkv_ref, bqkv_ref, wo_ref, bo_ref,
         w1_ref, b1_ref, w2_ref, b2_ref) = [next(it) for _ in range(10)]
    emb_w_ref, emb_b_ref = next(it), next(it)
    o_ref = next(it)

    f32, bf16 = jnp.float32, jnp.bfloat16

    # --- AdaptiveMaxPool2d(1) + flatten: [S, C, HW] -> [S, C] ----------------
    # Per-row 2-D lane reduction (keepdims) + one tiny 2-D transpose: only
    # well-supported Mosaic patterns, and no host-side HBM transpose pass.
    cols = [jnp.max(x_ref[m], axis=-1, keepdims=True) for m in range(seq_len)]
    x = jnp.concatenate(cols, axis=-1).T                 # [S, C] f32

    # --- fc_layers: Dropout(id) + Linear + BatchNorm(folded, eval) + ReLU ----
    for w_ref, b_ref in fc:
        x = jnp.dot(x.astype(bf16), w_ref[...], preferred_element_type=f32)
        x = jnp.maximum(x + b_ref[...], 0.0)

    # --- video_emb Linear + fused sin/cos positional-encoding add ------------
    x = (jnp.dot(x.astype(bf16), ve_w_ref[...], preferred_element_type=f32)
         + ve_b_ref[...] + pe_ref[...])

    # --- pre-norm Transformer encoder stack (weights resident in VMEM) -------
    # TODO(synk): src_mask / video_masks path not implemented (mask is None).
    d_k = d_model // num_heads
    scale = 1.0 / float(np.sqrt(d_k))
    for l in range(num_layers):
        ln_g = ln_g_ref[l]                               # [2, d_model]
        ln_b = ln_b_ref[l]
        # sublayer 0: LN -> fused QKV GEMM -> per-head attention -> out-proj + res
        y = _layernorm(x, ln_g[0:1, :], ln_b[0:1, :], eps)
        qkv = (jnp.dot(y.astype(bf16), wqkv_ref[l], preferred_element_type=f32)
               + bqkv_ref[l])                            # [S, 3*d_model]
        heads = []
        for h in range(num_heads):
            q_h = qkv[:, h * d_k:(h + 1) * d_k].astype(bf16)
            k_h = qkv[:, d_model + h * d_k:d_model + (h + 1) * d_k].astype(bf16)
            v_h = qkv[:, 2 * d_model + h * d_k:
                      2 * d_model + (h + 1) * d_k].astype(bf16)
            s = jnp.dot(q_h, k_h.T, preferred_element_type=f32) * scale
            s = s - jnp.max(s, axis=-1, keepdims=True)
            p = jnp.exp(s)
            p = p * pl.reciprocal(jnp.sum(p, axis=-1, keepdims=True), approx=True)
            heads.append(jnp.dot(p.astype(bf16), v_h, preferred_element_type=f32))
        att = jnp.concatenate(heads, axis=-1)            # [S, d_model] lane-dense
        x = (jnp.dot(att.astype(bf16), wo_ref[l], preferred_element_type=f32)
             + bo_ref[l] + x)
        # sublayer 1: LN -> fc1 + ReLU -> fc2 + res
        y = _layernorm(x, ln_g[1:2, :], ln_b[1:2, :], eps)
        hdn = jnp.maximum(
            jnp.dot(y.astype(bf16), w1_ref[l], preferred_element_type=f32)
            + b1_ref[l], 0.0)
        x = (jnp.dot(hdn.astype(bf16), w2_ref[l], preferred_element_type=f32)
             + b2_ref[l] + x)

    # --- embedding Linear -----------------------------------------------------
    out = (jnp.dot(x.astype(bf16), emb_w_ref[...], preferred_element_type=f32)
           + emb_b_ref[...])
    o_ref[...] = out.astype(o_ref.dtype)


# ---------------------------------------------------------------------------
# Positional encoding (faithful port of generate_sincos_embedding)
# ---------------------------------------------------------------------------

def generate_sincos_embedding(seq_len, d_model, train_len=None):
    odds = np.arange(0, d_model, 2)
    evens = np.arange(1, d_model, 2)
    pos_enc_mat = np.zeros((seq_len, d_model))
    if train_len is None:
        pos_list = np.arange(seq_len)
    else:
        pos_list = np.linspace(0, train_len - 1, num=seq_len)
    for i, pos in enumerate(pos_list):
        pos_enc_mat[i, odds] = np.sin(pos / 10000 ** (odds / d_model))
        pos_enc_mat[i, evens] = np.cos(pos / 10000 ** (evens / d_model))
    return jnp.asarray(pos_enc_mat, jnp.float32)         # [S, d_model]


def positional_encoding(S, d_model, train_seq_len):
    if S != train_seq_len:
        return generate_sincos_embedding(S, d_model, train_seq_len)
    return generate_sincos_embedding(S, d_model)


# ---------------------------------------------------------------------------
# Forward wrapper: one pallas_call for the whole model
# ---------------------------------------------------------------------------

def transformer_emb_forward(params, x, cfg):
    """x: [batch, num_steps, C, H, W] -> [batch, num_steps, embedding_size]."""
    B, T, C, Hh, Ww = x.shape
    d_model = cfg["hidden_size"]
    E = cfg["embedding_size"]
    L = cfg["num_layers"]

    x2 = x.reshape(B * T, C, Hh * Ww)                        # pure reshape, no copy
    pe = positional_encoding(T, d_model, cfg["num_steps"])   # [T, d_model] constant

    def whole(arr):  # weight block = full array, same block index every grid step
        zeros = (0,) * arr.ndim
        return pl.BlockSpec(arr.shape, lambda b, _z=zeros: _z)

    operands = [x2, pe]
    in_specs = [pl.BlockSpec((T, C, Hh * Ww), lambda b: (b, 0, 0)),
                pl.BlockSpec((T, d_model), lambda b: (0, 0))]
    for w, bias in params["fc"]:
        operands += [w, bias]
        in_specs += [whole(w), whole(bias)]
    operands += list(params["video_emb"])
    in_specs += [whole(t) for t in params["video_emb"]]
    if L > 0:
        enc = params["enc"]
        for name in ("ln_g", "ln_b", "wqkv", "bqkv", "wo", "bo",
                     "w1", "b1", "w2", "b2"):
            operands.append(enc[name])
            in_specs.append(whole(enc[name]))
    operands += list(params["emb"])
    in_specs += [whole(t) for t in params["emb"]]

    kernel = functools.partial(
        _fused_forward_kernel, seq_len=T, num_fc=len(params["fc"]),
        num_layers=L, num_heads=cfg["num_heads"], d_model=d_model, eps=1e-5)

    out = pl.pallas_call(
        kernel,
        out_shape=jax.ShapeDtypeStruct((B * T, E), jnp.float32),
        grid_spec=pltpu.PrefetchScalarGridSpec(
            num_scalar_prefetch=0,
            grid=(B,),                                   # batch-parallel (2 TCs on v7x)
            in_specs=in_specs,
            out_specs=pl.BlockSpec((T, E), lambda b: (b, 0)),
        ),
        compiler_params=pltpu.CompilerParams(
            dimension_semantics=("parallel",)),
    )(*operands)
    return out.reshape(B, T, E)


# ---------------------------------------------------------------------------
# Deterministic parameter construction (weights pre-cast to bf16 once)
# ---------------------------------------------------------------------------

def make_linear(key, din, dout):
    k1, k2 = jax.random.split(key)
    lim = float(np.sqrt(6.0 / (din + dout)))              # xavier-uniform-ish
    w = jax.random.uniform(k1, (din, dout), jnp.float32, -lim, lim)
    b = 0.01 * jax.random.normal(k2, (dout,), jnp.float32)
    return w, b


def make_fc_bn(key, din, dout, eps=1e-5):
    """Linear(din,dout) with BatchNorm1d folded in (inference running stats)."""
    kl, kg, kb, km, kv = jax.random.split(key, 5)
    w, b = make_linear(kl, din, dout)
    gamma = 1.0 + 0.1 * jax.random.normal(kg, (dout,), jnp.float32)
    beta = 0.1 * jax.random.normal(kb, (dout,), jnp.float32)
    mean = 0.1 * jax.random.normal(km, (dout,), jnp.float32)
    var = jnp.abs(jax.random.normal(kv, (dout,), jnp.float32)) + 1.0
    s = gamma / jnp.sqrt(var + eps)
    return w * s[None, :], (b - mean) * s + beta


def make_layernorm(key, d):
    k1, k2 = jax.random.split(key)
    gamma = 1.0 + 0.1 * jax.random.normal(k1, (d,), jnp.float32)
    beta = 0.1 * jax.random.normal(k2, (d,), jnp.float32)
    return gamma, beta


def init_params(key, cfg):
    d_model = cfg["hidden_size"]
    d_ff = cfg["d_ff"]
    L = cfg["num_layers"]
    keys = iter(jax.random.split(key, 64))
    nk = lambda: next(keys)
    bf16 = jnp.bfloat16

    params = {}
    in_ch = cfg["in_channels"]
    fc = []
    for channels, _activate in cfg["fc_layers"]:
        channels = channels * cfg["cap_scalar"]
        w, b = make_fc_bn(nk(), in_ch, channels)
        fc.append((w.astype(bf16), b.reshape(1, channels)))
        in_ch = channels
    params["fc"] = fc

    w, b = make_linear(nk(), in_ch, d_model)
    params["video_emb"] = (w.astype(bf16), b.reshape(1, d_model))

    if L > 0:
        ln_g, ln_b = [], []
        wqkv, bqkv, wo, bo, w1, b1, w2, b2 = ([] for _ in range(8))
        for _ in range(L):
            g0, be0 = make_layernorm(nk(), d_model)
            g1, be1 = make_layernorm(nk(), d_model)
            ln_g.append(jnp.stack([g0, g1]))
            ln_b.append(jnp.stack([be0, be1]))
            wq, bq = make_linear(nk(), d_model, d_model)
            wk, bk = make_linear(nk(), d_model, d_model)
            wv, bv = make_linear(nk(), d_model, d_model)
            wqkv.append(jnp.concatenate([wq, wk, wv], axis=1).astype(bf16))
            bqkv.append(jnp.concatenate([bq, bk, bv]).reshape(1, 3 * d_model))
            w, b = make_linear(nk(), d_model, d_model)
            wo.append(w.astype(bf16)); bo.append(b.reshape(1, d_model))
            w, b = make_linear(nk(), d_model, d_ff)
            w1.append(w.astype(bf16)); b1.append(b.reshape(1, d_ff))
            w, b = make_linear(nk(), d_ff, d_model)
            w2.append(w.astype(bf16)); b2.append(b.reshape(1, d_model))
        params["enc"] = {
            "ln_g": jnp.stack(ln_g), "ln_b": jnp.stack(ln_b),
            "wqkv": jnp.stack(wqkv), "bqkv": jnp.stack(bqkv),
            "wo": jnp.stack(wo), "bo": jnp.stack(bo),
            "w1": jnp.stack(w1), "b1": jnp.stack(b1),
            "w2": jnp.stack(w2), "b2": jnp.stack(b2),
        }

    w, b = make_linear(nk(), d_model, cfg["embedding_size"])
    params["emb"] = (w.astype(bf16), b.reshape(1, cfg["embedding_size"]))
    return params


# ---------------------------------------------------------------------------

if __name__ == "__main__":
    CFG = dict(
        in_channels=256,        # cfg.arch.base_model.out_channel
        drop_rate=0.0,          # inference -> dropout is identity
        cap_scalar=1,
        fc_layers=[(256, True), (256, True)],
        embedding_size=128,
        hidden_size=256,
        num_layers=2,
        num_heads=8,
        d_ff=1024,
        num_steps=8,            # cfg.data_loader.num_steps
    )

    key = jax.random.PRNGKey(0)
    pkey, xkey = jax.random.split(key)
    params = init_params(pkey, CFG)

    batch, num_steps, c, h, w = 2, CFG["num_steps"], CFG["in_channels"], 8, 8
    x = jax.random.normal(xkey, (batch, num_steps, c, h, w), jnp.float32)

    fwd = jax.jit(functools.partial(transformer_emb_forward, cfg=CFG))
    out = jax.block_until_ready(fwd(params, x))

    expected = (batch, num_steps, CFG["embedding_size"])
    assert out.shape == expected, (out.shape, expected)
    assert bool(jnp.all(jnp.isfinite(out)))
    print("KERNEL_OK")
</pallas_src>

<mosaic_0001>
module attributes {stable_mosaic.version = 11 : i64} {
  func.func @_fused_forward_kernel(%arg0: i32, %arg1: memref<8x256x64xf32, #tpu.memory_space<vmem>>, %arg2: memref<8x256xf32, #tpu.memory_space<vmem>>, %arg3: memref<256x256xbf16, #tpu.memory_space<vmem>>, %arg4: memref<1x256xf32, #tpu.memory_space<vmem>>, %arg5: memref<256x256xbf16, #tpu.memory_space<vmem>>, %arg6: memref<1x256xf32, #tpu.memory_space<vmem>>, %arg7: memref<256x256xbf16, #tpu.memory_space<vmem>>, %arg8: memref<1x256xf32, #tpu.memory_space<vmem>>, %arg9: memref<2x2x256xf32, #tpu.memory_space<vmem>>, %arg10: memref<2x2x256xf32, #tpu.memory_space<vmem>>, %arg11: memref<2x256x768xbf16, #tpu.memory_space<vmem>>, %arg12: memref<2x1x768xf32, #tpu.memory_space<vmem>>, %arg13: memref<2x256x256xbf16, #tpu.memory_space<vmem>>, %arg14: memref<2x1x256xf32, #tpu.memory_space<vmem>>, %arg15: memref<2x256x1024xbf16, #tpu.memory_space<vmem>>, %arg16: memref<2x1x1024xf32, #tpu.memory_space<vmem>>, %arg17: memref<2x1024x256xbf16, #tpu.memory_space<vmem>>, %arg18: memref<2x1x256xf32, #tpu.memory_space<vmem>>, %arg19: memref<256x128xbf16, #tpu.memory_space<vmem>>, %arg20: memref<1x128xf32, #tpu.memory_space<vmem>>, %arg21: memref<8x128xf32, #tpu.memory_space<vmem>>) attributes {dimension_semantics = [#tpu.dimension_semantics<parallel>], iteration_bounds = array<i64: 2>, scalar_prefetch = 0 : i64, scratch_operands = 0 : i64, tpu.core_type = #tpu.core_type<tc>, window_params = [{transform_indices = @transform_0, window_bounds = array<i64: 8, 256, 64>}, {pipeline_mode = #tpu.pipeline_mode<synchronous>, transform_indices = @transform_1, window_bounds = array<i64: 8, 256>}, {pipeline_mode = #tpu.pipeline_mode<synchronous>, transform_indices = @transform_2, window_bounds = array<i64: 256, 256>}, {pipeline_mode = #tpu.pipeline_mode<synchronous>, transform_indices = @transform_3, window_bounds = array<i64: 1, 256>}, {pipeline_mode = #tpu.pipeline_mode<synchronous>, transform_indices = @transform_4, window_bounds = array<i64: 256, 256>}, {pipeline_mode = #tpu.pipeline_mode<synchronous>, transform_indices = @transform_5, window_bounds = array<i64: 1, 256>}, {pipeline_mode = #tpu.pipeline_mode<synchronous>, transform_indices = @transform_6, window_bounds = array<i64: 256, 256>}, {pipeline_mode = #tpu.pipeline_mode<synchronous>, transform_indices = @transform_7, window_bounds = array<i64: 1, 256>}, {pipeline_mode = #tpu.pipeline_mode<synchronous>, transform_indices = @transform_8, window_bounds = array<i64: 2, 2, 256>}, {pipeline_mode = #tpu.pipeline_mode<synchronous>, transform_indices = @transform_9, window_bounds = array<i64: 2, 2, 256>}, {pipeline_mode = #tpu.pipeline_mode<synchronous>, transform_indices = @transform_10, window_bounds = array<i64: 2, 256, 768>}, {pipeline_mode = #tpu.pipeline_mode<synchronous>, transform_indices = @transform_11, window_bounds = array<i64: 2, 1, 768>}, {pipeline_mode = #tpu.pipeline_mode<synchronous>, transform_indices = @transform_12, window_bounds = array<i64: 2, 256, 256>}, {pipeline_mode = #tpu.pipeline_mode<synchronous>, transform_indices = @transform_13, window_bounds = array<i64: 2, 1, 256>}, {pipeline_mode = #tpu.pipeline_mode<synchronous>, transform_indices = @transform_14, window_bounds = array<i64: 2, 256, 1024>}, {pipeline_mode = #tpu.pipeline_mode<synchronous>, transform_indices = @transform_15, window_bounds = array<i64: 2, 1, 1024>}, {pipeline_mode = #tpu.pipeline_mode<synchronous>, transform_indices = @transform_16, window_bounds = array<i64: 2, 1024, 256>}, {pipeline_mode = #tpu.pipeline_mode<synchronous>, transform_indices = @transform_17, window_bounds = array<i64: 2, 1, 256>}, {pipeline_mode = #tpu.pipeline_mode<synchronous>, transform_indices = @transform_18, window_bounds = array<i64: 256, 128>}, {pipeline_mode = #tpu.pipeline_mode<synchronous>, transform_indices = @transform_19, window_bounds = array<i64: 1, 128>}, {transform_indices = @transform_20, window_bounds = array<i64: 8, 128>}]} {
    %c0 = arith.constant 0 : index
    %c0_0 = arith.constant 0 : index
    %c0_1 = arith.constant 0 : index
    %0 = vector.load %arg1[%c0, %c0_0, %c0_1] : memref<8x256x64xf32, #tpu.memory_space<vmem>>, vector<1x256x64xf32>
    %1 = vector.shape_cast %0 : vector<1x256x64xf32> to vector<256x64xf32>
    %cst = arith.constant dense<0xFF800000> : vector<256xf32>
    %2 = vector.multi_reduction <maximumf>, %1, %cst [1] : vector<256x64xf32> to vector<256xf32>
    %3 = vector.shape_cast %2 : vector<256xf32> to vector<256x1xf32>
    %c1 = arith.constant 1 : index
    %c0_2 = arith.constant 0 : index
    %c0_3 = arith.constant 0 : index
    %4 = vector.load %arg1[%c1, %c0_2, %c0_3] : memref<8x256x64xf32, #tpu.memory_space<vmem>>, vector<1x256x64xf32>
    %5 = vector.shape_cast %4 : vector<1x256x64xf32> to vector<256x64xf32>
    %cst_4 = arith.constant dense<0xFF800000> : vector<256xf32>
    %6 = vector.multi_reduction <maximumf>, %5, %cst_4 [1] : vector<256x64xf32> to vector<256xf32>
    %7 = vector.shape_cast %6 : vector<256xf32> to vector<256x1xf32>
    %c2 = arith.constant 2 : index
    %c0_5 = arith.constant 0 : index
    %c0_6 = arith.constant 0 : index
    %8 = vector.load %arg1[%c2, %c0_5, %c0_6] : memref<8x256x64xf32, #tpu.memory_space<vmem>>, vector<1x256x64xf32>
    %9 = vector.shape_cast %8 : vector<1x256x64xf32> to vector<256x64xf32>
    %cst_7 = arith.constant dense<0xFF800000> : vector<256xf32>
    %10 = vector.multi_reduction <maximumf>, %9, %cst_7 [1] : vector<256x64xf32> to vector<256xf32>
    %11 = vector.shape_cast %10 : vector<256xf32> to vector<256x1xf32>
    %c3 = arith.constant 3 : index
    %c0_8 = arith.constant 0 : index
    %c0_9 = arith.constant 0 : index
    %12 = vector.load %arg1[%c3, %c0_8, %c0_9] : memref<8x256x64xf32, #tpu.memory_space<vmem>>, vector<1x256x64xf32>
    %13 = vector.shape_cast %12 : vector<1x256x64xf32> to vector<256x64xf32>
    %cst_10 = arith.constant dense<0xFF800000> : vector<256xf32>
    %14 = vector.multi_reduction <maximumf>, %13, %cst_10 [1] : vector<256x64xf32> to vector<256xf32>
    %15 = vector.shape_cast %14 : vector<256xf32> to vector<256x1xf32>
    %c4 = arith.constant 4 : index
    %c0_11 = arith.constant 0 : index
    %c0_12 = arith.constant 0 : index
    %16 = vector.load %arg1[%c4, %c0_11, %c0_12] : memref<8x256x64xf32, #tpu.memory_space<vmem>>, vector<1x256x64xf32>
    %17 = vector.shape_cast %16 : vector<1x256x64xf32> to vector<256x64xf32>
    %cst_13 = arith.constant dense<0xFF800000> : vector<256xf32>
    %18 = vector.multi_reduction <maximumf>, %17, %cst_13 [1] : vector<256x64xf32> to vector<256xf32>
    %19 = vector.shape_cast %18 : vector<256xf32> to vector<256x1xf32>
    %c5 = arith.constant 5 : index
    %c0_14 = arith.constant 0 : index
    %c0_15 = arith.constant 0 : index
    %20 = vector.load %arg1[%c5, %c0_14, %c0_15] : memref<8x256x64xf32, #tpu.memory_space<vmem>>, vector<1x256x64xf32>
    %21 = vector.shape_cast %20 : vector<1x256x64xf32> to vector<256x64xf32>
    %cst_16 = arith.constant dense<0xFF800000> : vector<256xf32>
    %22 = vector.multi_reduction <maximumf>, %21, %cst_16 [1] : vector<256x64xf32> to vector<256xf32>
    %23 = vector.shape_cast %22 : vector<256xf32> to vector<256x1xf32>
    %c6 = arith.constant 6 : index
    %c0_17 = arith.constant 0 : index
    %c0_18 = arith.constant 0 : index
    %24 = vector.load %arg1[%c6, %c0_17, %c0_18] : memref<8x256x64xf32, #tpu.memory_space<vmem>>, vector<1x256x64xf32>
    %25 = vector.shape_cast %24 : vector<1x256x64xf32> to vector<256x64xf32>
    %cst_19 = arith.constant dense<0xFF800000> : vector<256xf32>
    %26 = vector.multi_reduction <maximumf>, %25, %cst_19 [1] : vector<256x64xf32> to vector<256xf32>
    %27 = vector.shape_cast %26 : vector<256xf32> to vector<256x1xf32>
    %c7 = arith.constant 7 : index
    %c0_20 = arith.constant 0 : index
    %c0_21 = arith.constant 0 : index
    %28 = vector.load %arg1[%c7, %c0_20, %c0_21] : memref<8x256x64xf32, #tpu.memory_space<vmem>>, vector<1x256x64xf32>
    %29 = vector.shape_cast %28 : vector<1x256x64xf32> to vector<256x64xf32>
    %cst_22 = arith.constant dense<0xFF800000> : vector<256xf32>
    %30 = vector.multi_reduction <maximumf>, %29, %cst_22 [1] : vector<256x64xf32> to vector<256xf32>
    %31 = vector.shape_cast %30 : vector<256xf32> to vector<256x1xf32>
    %32 = tpu.concatenate %3, %7, %11, %15, %19, %23, %27, %31 in 1 : vector<256x1xf32>, vector<256x1xf32>, vector<256x1xf32>, vector<256x1xf32>, vector<256x1xf32>, vector<256x1xf32>, vector<256x1xf32>, vector<256x1xf32> -> vector<256x8xf32>
    %33 = tpu.transpose %32, [1, 0] : vector<256x8xf32> -> vector<8x256xf32>
    %34 = arith.truncf %33 : vector<8x256xf32> to vector<8x256xbf16>
    %c0_23 = arith.constant 0 : index
    %c0_24 = arith.constant 0 : index
    %35 = vector.load %arg3[%c0_23, %c0_24] : memref<256x256xbf16, #tpu.memory_space<vmem>>, vector<256x256xbf16>
    %cst_25 = arith.constant dense<0.000000e+00> : vector<8x256xf32>
    %36 = tpu.matmul %34, %35, %cst_25 {dimension_numbers = #tpu.dot_dimension_numbers<[1], [0], [0], [1], [0, 0, 1, 1], [], []>} : vector<8x256xbf16>, vector<256x256xbf16>, vector<8x256xf32> -> vector<8x256xf32>
    %c0_26 = arith.constant 0 : index
    %c0_27 = arith.constant 0 : index
    %37 = vector.load %arg4[%c0_26, %c0_27] : memref<1x256xf32, #tpu.memory_space<vmem>>, vector<1x256xf32>
    %38 = vector.broadcast %37 : vector<1x256xf32> to vector<8x256xf32>
    %39 = arith.addf %36, %38 : vector<8x256xf32>
    %cst_28 = arith.constant 0.000000e+00 : f32
    %40 = vector.broadcast %cst_28 : f32 to vector<8x256xf32>
    %41 = arith.maximumf %39, %40 : vector<8x256xf32>
    %42 = arith.truncf %41 : vector<8x256xf32> to vector<8x256xbf16>
    %c0_29 = arith.constant 0 : index
    %c0_30 = arith.constant 0 : index
    %43 = vector.load %arg5[%c0_29, %c0_30] : memref<256x256xbf16, #tpu.memory_space<vmem>>, vector<256x256xbf16>
    %cst_31 = arith.constant dense<0.000000e+00> : vector<8x256xf32>
    %44 = tpu.matmul %42, %43, %cst_31 {dimension_numbers = #tpu.dot_dimension_numbers<[1], [0], [0], [1], [0, 0, 1, 1], [], []>} : vector<8x256xbf16>, vector<256x256xbf16>, vector<8x256xf32> -> vector<8x256xf32>
    %c0_32 = arith.constant 0 : index
    %c0_33 = arith.constant 0 : index
    %45 = vector.load %arg6[%c0_32, %c0_33] : memref<1x256xf32, #tpu.memory_space<vmem>>, vector<1x256xf32>
    %46 = vector.broadcast %45 : vector<1x256xf32> to vector<8x256xf32>
    %47 = arith.addf %44, %46 : vector<8x256xf32>
    %cst_34 = arith.constant 0.000000e+00 : f32
    %48 = vector.broadcast %cst_34 : f32 to vector<8x256xf32>
    %49 = arith.maximumf %47, %48 : vector<8x256xf32>
    %50 = arith.truncf %49 : vector<8x256xf32> to vector<8x256xbf16>
    %c0_35 = arith.constant 0 : index
    %c0_36 = arith.constant 0 : index
    %51 = vector.load %arg7[%c0_35, %c0_36] : memref<256x256xbf16, #tpu.memory_space<vmem>>, vector<256x256xbf16>
    %cst_37 = arith.constant dense<0.000000e+00> : vector<8x256xf32>
    %52 = tpu.matmul %50, %51, %cst_37 {dimension_numbers = #tpu.dot_dimension_numbers<[1], [0], [0], [1], [0, 0, 1, 1], [], []>} : vector<8x256xbf16>, vector<256x256xbf16>, vector<8x256xf32> -> vector<8x256xf32>
    %c0_38 = arith.constant 0 : index
    %c0_39 = arith.constant 0 : index
    %53 = vector.load %arg8[%c0_38, %c0_39] : memref<1x256xf32, #tpu.memory_space<vmem>>, vector<1x256xf32>
    %54 = vector.broadcast %53 : vector<1x256xf32> to vector<8x256xf32>
    %55 = arith.addf %52, %54 : vector<8x256xf32>
    %c0_40 = arith.constant 0 : index
    %c0_41 = arith.constant 0 : index
    %56 = vector.load %arg2[%c0_40, %c0_41] : memref<8x256xf32, #tpu.memory_space<vmem>>, vector<8x256xf32>
    %57 = arith.addf %55, %56 : vector<8x256xf32>
    %c0_42 = arith.constant 0 : index
    %c0_43 = arith.constant 0 : index
    %c0_44 = arith.constant 0 : index
    %58 = vector.load %arg9[%c0_42, %c0_43, %c0_44] : memref<2x2x256xf32, #tpu.memory_space<vmem>>, vector<1x2x256xf32>
    %59 = vector.shape_cast %58 : vector<1x2x256xf32> to vector<2x256xf32>
    %c0_45 = arith.constant 0 : index
    %c0_46 = arith.constant 0 : index
    %c0_47 = arith.constant 0 : index
    %60 = vector.load %arg10[%c0_45, %c0_46, %c0_47] : memref<2x2x256xf32, #tpu.memory_space<vmem>>, vector<1x2x256xf32>
    %61 = vector.shape_cast %60 : vector<1x2x256xf32> to vector<2x256xf32>
    %62 = vector.extract_strided_slice %59 {offsets = [0, 0], sizes = [1, 256], strides = [1, 1]} : vector<2x256xf32> to vector<1x256xf32>
    %63 = vector.extract_strided_slice %61 {offsets = [0, 0], sizes = [1, 256], strides = [1, 1]} : vector<2x256xf32> to vector<1x256xf32>
    %cst_48 = arith.constant dense<0.000000e+00> : vector<8xf32>
    %64 = vector.multi_reduction <add>, %57, %cst_48 [1] : vector<8x256xf32> to vector<8xf32>
    %65 = vector.shape_cast %64 : vector<8xf32> to vector<8x1xf32>
    %cst_49 = arith.constant 2.560000e+02 : f32
    %66 = vector.broadcast %cst_49 : f32 to vector<8x1xf32>
    %67 = arith.divf %65, %66 : vector<8x1xf32>
    %68 = vector.broadcast %67 : vector<8x1xf32> to vector<8x256xf32>
    %69 = arith.subf %57, %68 : vector<8x256xf32>
    %70 = arith.mulf %69, %69 : vector<8x256xf32>
    %cst_50 = arith.constant dense<0.000000e+00> : vector<8xf32>
    %71 = vector.multi_reduction <add>, %70, %cst_50 [1] : vector<8x256xf32> to vector<8xf32>
    %72 = vector.shape_cast %71 : vector<8xf32> to vector<8x1xf32>
    %cst_51 = arith.constant 2.560000e+02 : f32
    %73 = vector.broadcast %cst_51 : f32 to vector<8x1xf32>
    %74 = arith.divf %72, %73 : vector<8x1xf32>
    %75 = vector.broadcast %67 : vector<8x1xf32> to vector<8x256xf32>
    %76 = arith.subf %57, %75 : vector<8x256xf32>
    %cst_52 = arith.constant 9.99999974E-6 : f32
    %77 = vector.broadcast %cst_52 : f32 to vector<8x1xf32>
    %78 = arith.addf %74, %77 : vector<8x1xf32>
    %79 = math.rsqrt %78 : vector<8x1xf32>
    %80 = vector.broadcast %79 : vector<8x1xf32> to vector<8x256xf32>
    %81 = arith.mulf %76, %80 : vector<8x256xf32>
    %82 = vector.broadcast %62 : vector<1x256xf32> to vector<8x256xf32>
    %83 = arith.mulf %81, %82 : vector<8x256xf32>
    %84 = vector.broadcast %63 : vector<1x256xf32> to vector<8x256xf32>
    %85 = arith.addf %83, %84 : vector<8x256xf32>
    %86 = arith.truncf %85 : vector<8x256xf32> to vector<8x256xbf16>
    %c0_53 = arith.constant 0 : index
    %c0_54 = arith.constant 0 : index
    %c0_55 = arith.constant 0 : index
    %87 = vector.load %arg11[%c0_53, %c0_54, %c0_55] : memref<2x256x768xbf16, #tpu.memory_space<vmem>>, vector<1x256x768xbf16>
    %88 = vector.shape_cast %87 : vector<1x256x768xbf16> to vector<256x768xbf16>
    %cst_56 = arith.constant dense<0.000000e+00> : vector<8x768xf32>
    %89 = tpu.matmul %86, %88, %cst_56 {dimension_numbers = #tpu.dot_dimension_numbers<[1], [0], [0], [1], [0, 0, 1, 1], [], []>} : vector<8x256xbf16>, vector<256x768xbf16>, vector<8x768xf32> -> vector<8x768xf32>
    %c0_57 = arith.constant 0 : index
    %c0_58 = arith.constant 0 : index
    %c0_59 = arith.constant 0 : index
    %90 = vector.load %arg12[%c0_57, %c0_58, %c0_59] : memref<2x1x768xf32, #tpu.memory_space<vmem>>, vector<1x1x768xf32>
    %91 = vector.shape_cast %90 : vector<1x1x768xf32> to vector<1x768xf32>
    %92 = vector.broadcast %91 : vector<1x768xf32> to vector<8x768xf32>
    %93 = arith.addf %89, %92 : vector<8x768xf32>
    %94 = vector.extract_strided_slice %93 {offsets = [0, 0], sizes = [8, 32], strides = [1, 1]} : vector<8x768xf32> to vector<8x32xf32>
    %95 = arith.truncf %94 : vector<8x32xf32> to vector<8x32xbf16>
    %96 = vector.extract_strided_slice %93 {offsets = [0, 256], sizes = [8, 32], strides = [1, 1]} : vector<8x768xf32> to vector<8x32xf32>
    %97 = arith.truncf %96 : vector<8x32xf32> to vector<8x32xbf16>
    %98 = vector.extract_strided_slice %93 {offsets = [0, 512], sizes = [8, 32], strides = [1, 1]} : vector<8x768xf32> to vector<8x32xf32>
    %99 = arith.truncf %98 : vector<8x32xf32> to vector<8x32xbf16>
    %100 = tpu.transpose %97, [1, 0] : vector<8x32xbf16> -> vector<32x8xbf16>
    %cst_60 = arith.constant dense<0.000000e+00> : vector<8x8xf32>
    %101 = tpu.matmul %95, %100, %cst_60 {dimension_numbers = #tpu.dot_dimension_numbers<[1], [0], [0], [1], [0, 0, 1, 1], [], []>} : vector<8x32xbf16>, vector<32x8xbf16>, vector<8x8xf32> -> vector<8x8xf32>
    %cst_61 = arith.constant 0.176776692 : f32
    %102 = vector.broadcast %cst_61 : f32 to vector<8x8xf32>
    %103 = arith.mulf %101, %102 : vector<8x8xf32>
    %cst_62 = arith.constant dense<0xFF800000> : vector<8xf32>
    %104 = vector.multi_reduction <maximumf>, %103, %cst_62 [1] : vector<8x8xf32> to vector<8xf32>
    %105 = vector.shape_cast %104 : vector<8xf32> to vector<8x1xf32>
    %106 = vector.broadcast %105 : vector<8x1xf32> to vector<8x8xf32>
    %107 = arith.subf %103, %106 : vector<8x8xf32>
    %108 = math.exp %107 : vector<8x8xf32>
    %cst_63 = arith.constant dense<0.000000e+00> : vector<8xf32>
    %109 = vector.multi_reduction <add>, %108, %cst_63 [1] : vector<8x8xf32> to vector<8xf32>
    %110 = vector.shape_cast %109 : vector<8xf32> to vector<8x1xf32>
    %111 = tpu.reciprocal %110 {approx = true} : vector<8x1xf32> -> vector<8x1xf32>
    %112 = vector.broadcast %111 : vector<8x1xf32> to vector<8x8xf32>
    %113 = arith.mulf %108, %112 : vector<8x8xf32>
    %114 = arith.truncf %113 : vector<8x8xf32> to vector<8x8xbf16>
    %cst_64 = arith.constant dense<0.000000e+00> : vector<8x32xf32>
    %115 = tpu.matmul %114, %99, %cst_64 {dimension_numbers = #tpu.dot_dimension_numbers<[1], [0], [0], [1], [0, 0, 1, 1], [], []>} : vector<8x8xbf16>, vector<8x32xbf16>, vector<8x32xf32> -> vector<8x32xf32>
    %116 = vector.extract_strided_slice %93 {offsets = [0, 32], sizes = [8, 32], strides = [1, 1]} : vector<8x768xf32> to vector<8x32xf32>
    %117 = arith.truncf %116 : vector<8x32xf32> to vector<8x32xbf16>
    %118 = vector.extract_strided_slice %93 {offsets = [0, 288], sizes = [8, 32], strides = [1, 1]} : vector<8x768xf32> to vector<8x32xf32>
    %119 = arith.truncf %118 : vector<8x32xf32> to vector<8x32xbf16>
    %120 = vector.extract_strided_slice %93 {offsets = [0, 544], sizes = [8, 32], strides = [1, 1]} : vector<8x768xf32> to vector<8x32xf32>
    %121 = arith.truncf %120 : vector<8x32xf32> to vector<8x32xbf16>
    %122 = tpu.transpose %119, [1, 0] : vector<8x32xbf16> -> vector<32x8xbf16>
    %cst_65 = arith.constant dense<0.000000e+00> : vector<8x8xf32>
    %123 = tpu.matmul %117, %122, %cst_65 {dimension_numbers = #tpu.dot_dimension_numbers<[1], [0], [0], [1], [0, 0, 1, 1], [], []>} : vector<8x32xbf16>, vector<32x8xbf16>, vector<8x8xf32> -> vector<8x8xf32>
    %cst_66 = arith.constant 0.176776692 : f32
    %124 = vector.broadcast %cst_66 : f32 to vector<8x8xf32>
    %125 = arith.mulf %123, %124 : vector<8x8xf32>
    %cst_67 = arith.constant dense<0xFF800000> : vector<8xf32>
    %126 = vector.multi_reduction <maximumf>, %125, %cst_67 [1] : vector<8x8xf32> to vector<8xf32>
    %127 = vector.shape_cast %126 : vector<8xf32> to vector<8x1xf32>
    %128 = vector.broadcast %127 : vector<8x1xf32> to vector<8x8xf32>
    %129 = arith.subf %125, %128 : vector<8x8xf32>
    %130 = math.exp %129 : vector<8x8xf32>
    %cst_68 = arith.constant dense<0.000000e+00> : vector<8xf32>
    %131 = vector.multi_reduction <add>, %130, %cst_68 [1] : vector<8x8xf32> to vector<8xf32>
    %132 = vector.shape_cast %131 : vector<8xf32> to vector<8x1xf32>
    %133 = tpu.reciprocal %132 {approx = true} : vector<8x1xf32> -> vector<8x1xf32>
    %134 = vector.broadcast %133 : vector<8x1xf32> to vector<8x8xf32>
    %135 = arith.mulf %130, %134 : vector<8x8xf32>
    %136 = arith.truncf %135 : vector<8x8xf32> to vector<8x8xbf16>
    %cst_69 = arith.constant dense<0.000000e+00> : vector<8x32xf32>
    %137 = tpu.matmul %136, %121, %cst_69 {dimension_numbers = #tpu.dot_dimension_numbers<[1], [0], [0], [1], [0, 0, 1, 1], [], []>} : vector<8x8xbf16>, vector<8x32xbf16>, vector<8x32xf32> -> vector<8x32xf32>
    %138 = vector.extract_strided_slice %93 {offsets = [0, 64], sizes = [8, 32], strides = [1, 1]} : vector<8x768xf32> to vector<8x32xf32>
    %139 = arith.truncf %138 : vector<8x32xf32> to vector<8x32xbf16>
    %140 = vector.extract_strided_slice %93 {offsets = [0, 320], sizes = [8, 32], strides = [1, 1]} : vector<8x768xf32> to vector<8x32xf32>
    %141 = arith.truncf %140 : vector<8x32xf32> to vector<8x32xbf16>
    %142 = vector.extract_strided_slice %93 {offsets = [0, 576], sizes = [8, 32], strides = [1, 1]} : vector<8x768xf32> to vector<8x32xf32>
    %143 = arith.truncf %142 : vector<8x32xf32> to vector<8x32xbf16>
    %144 = tpu.transpose %141, [1, 0] : vector<8x32xbf16> -> vector<32x8xbf16>
    %cst_70 = arith.constant dense<0.000000e+00> : vector<8x8xf32>
    %145 = tpu.matmul %139, %144, %cst_70 {dimension_numbers = #tpu.dot_dimension_numbers<[1], [0], [0], [1], [0, 0, 1, 1], [], []>} : vector<8x32xbf16>, vector<32x8xbf16>, vector<8x8xf32> -> vector<8x8xf32>
    %cst_71 = arith.constant 0.176776692 : f32
    %146 = vector.broadcast %cst_71 : f32 to vector<8x8xf32>
    %147 = arith.mulf %145, %146 : vector<8x8xf32>
    %cst_72 = arith.constant dense<0xFF800000> : vector<8xf32>
    %148 = vector.multi_reduction <maximumf>, %147, %cst_72 [1] : vector<8x8xf32> to vector<8xf32>
    %149 = vector.shape_cast %148 : vector<8xf32> to vector<8x1xf32>
    %150 = vector.broadcast %149 : vector<8x1xf32> to vector<8x8xf32>
    %151 = arith.subf %147, %150 : vector<8x8xf32>
    %152 = math.exp %151 : vector<8x8xf32>
    %cst_73 = arith.constant dense<0.000000e+00> : vector<8xf32>
    %153 = vector.multi_reduction <add>, %152, %cst_73 [1] : vector<8x8xf32> to vector<8xf32>
    %154 = vector.shape_cast %153 : vector<8xf32> to vector<8x1xf32>
    %155 = tpu.reciprocal %154 {approx = true} : vector<8x1xf32> -> vector<8x1xf32>
    %156 = vector.broadcast %155 : vector<8x1xf32> to vector<8x8xf32>
    %157 = arith.mulf %152, %156 : vector<8x8xf32>
    %158 = arith.truncf %157 : vector<8x8xf32> to vector<8x8xbf16>
    %cst_74 = arith.constant dense<0.000000e+00> : vector<8x32xf32>
    %159 = tpu.matmul %158, %143, %cst_74 {dimension_numbers = #tpu.dot_dimension_numbers<[1], [0], [0], [1], [0, 0, 1, 1], [], []>} : vector<8x8xbf16>, vector<8x32xbf16>, vector<8x32xf32> -> vector<8x32xf32>
    %160 = vector.extract_strided_slice %93 {offsets = [0, 96], sizes = [8, 32], strides = [1, 1]} : vector<8x768xf32> to vector<8x32xf32>
    %161 = arith.truncf %160 : vector<8x32xf32> to vector<8x32xbf16>
    %162 = vector.extract_strided_slice %93 {offsets = [0, 352], sizes = [8, 32], strides = [1, 1]} : vector<8x768xf32> to vector<8x32xf32>
    %163 = arith.truncf %162 : vector<8x32xf32> to vector<8x32xbf16>
    %164 = vector.extract_strided_slice %93 {offsets = [0, 608], sizes = [8, 32], strides = [1, 1]} : vector<8x768xf32> to vector<8x32xf32>
    %165 = arith.truncf %164 : vector<8x32xf32> to vector<8x32xbf16>
    %166 = tpu.transpose %163, [1, 0] : vector<8x32xbf16> -> vector<32x8xbf16>
    %cst_75 = arith.constant dense<0.000000e+00> : vector<8x8xf32>
    %167 = tpu.matmul %161, %166, %cst_75 {dimension_numbers = #tpu.dot_dimension_numbers<[1], [0], [0], [1], [0, 0, 1, 1], [], []>} : vector<8x32xbf16>, vector<32x8xbf16>, vector<8x8xf32> -> vector<8x8xf32>
    %cst_76 = arith.constant 0.176776692 : f32
    %168 = vector.broadcast %cst_76 : f32 to vector<8x8xf32>
    %169 = arith.mulf %167, %168 : vector<8x8xf32>
    %cst_77 = arith.constant dense<0xFF800000> : vector<8xf32>
    %170 = vector.multi_reduction <maximumf>, %169, %cst_77 [1] : vector<8x8xf32> to vector<8xf32>
    %171 = vector.shape_cast %170 : vector<8xf32> to vector<8x1xf32>
    %172 = vector.broadcast %171 : vector<8x1xf32> to vector<8x8xf32>
    %173 = arith.subf %169, %172 : vector<8x8xf32>
    %174 = math.exp %173 : vector<8x8xf32>
    %cst_78 = arith.constant dense<0.000000e+00> : vector<8xf32>
    %175 = vector.multi_reduction <add>, %174, %cst_78 [1] : vector<8x8xf32> to vector<8xf32>
    %176 = vector.shape_cast %175 : vector<8xf32> to vector<8x1xf32>
    %177 = tpu.reciprocal %176 {approx = true} : vector<8x1xf32> -> vector<8x1xf32>
    %178 = vector.broadcast %177 : vector<8x1xf32> to vector<8x8xf32>
    %179 = arith.mulf %174, %178 : vector<8x8xf32>
    %180 = arith.truncf %179 : vector<8x8xf32> to vector<8x8xbf16>
    %cst_79 = arith.constant dense<0.000000e+00> : vector<8x32xf32>
    %181 = tpu.matmul %180, %165, %cst_79 {dimension_numbers = #tpu.dot_dimension_numbers<[1], [0], [0], [1], [0, 0, 1, 1], [], []>} : vector<8x8xbf16>, vector<8x32xbf16>, vector<8x32xf32> -> vector<8x32xf32>
    %182 = vector.extract_strided_slice %93 {offsets = [0, 128], sizes = [8, 32], strides = [1, 1]} : vector<8x768xf32> to vector<8x32xf32>
    %183 = arith.truncf %182 : vector<8x32xf32> to vector<8x32xbf16>
    %184 = vector.extract_strided_slice %93 {offsets = [0, 384], sizes = [8, 32], strides = [1, 1]} : vector<8x768xf32> to vector<8x32xf32>
    %185 = arith.truncf %184 : vector<8x32xf32> to vector<8x32xbf16>
    %186 = vector.extract_strided_slice %93 {offsets = [0, 640], sizes = [8, 32], strides = [1, 1]} : vector<8x768xf32> to vector<8x32xf32>
    %187 = arith.truncf %186 : vector<8x32xf32> to vector<8x32xbf16>
    %188 = tpu.transpose %185, [1, 0] : vector<8x32xbf16> -> vector<32x8xbf16>
    %cst_80 = arith.constant dense<0.000000e+00> : vector<8x8xf32>
    %189 = tpu.matmul %183, %188, %cst_80 {dimension_numbers = #tpu.dot_dimension_numbers<[1], [0], [0], [1], [0, 0, 1, 1], [], []>} : vector<8x32xbf16>, vector<32x8xbf16>, vector<8x8xf32> -> vector<8x8xf32>
    %cst_81 = arith.constant 0.176776692 : f32
    %190 = vector.broadcast %cst_81 : f32 to vector<8x8xf32>
    %191 = arith.mulf %189, %190 : vector<8x8xf32>
    %cst_82 = arith.constant dense<0xFF800000> : vector<8xf32>
    %192 = vector.multi_reduction <maximumf>, %191, %cst_82 [1] : vector<8x8xf32> to vector<8xf32>
    %193 = vector.shape_cast %192 : vector<8xf32> to vector<8x1xf32>
    %194 = vector.broadcast %193 : vector<8x1xf32> to vector<8x8xf32>
    %195 = arith.subf %191, %194 : vector<8x8xf32>
    %196 = math.exp %195 : vector<8x8xf32>
    %cst_83 = arith.constant dense<0.000000e+00> : vector<8xf32>
    %197 = vector.multi_reduction <add>, %196, %cst_83 [1] : vector<8x8xf32> to vector<8xf32>
    %198 = vector.shape_cast %197 : vector<8xf32> to vector<8x1xf32>
    %199 = tpu.reciprocal %198 {approx = true} : vector<8x1xf32> -> vector<8x1xf32>
    %200 = vector.broadcast %199 : vector<8x1xf32> to vector<8x8xf32>
    %201 = arith.mulf %196, %200 : vector<8x8xf32>
    %202 = arith.truncf %201 : vector<8x8xf32> to vector<8x8xbf16>
    %cst_84 = arith.constant dense<0.000000e+00> : vector<8x32xf32>
    %203 = tpu.matmul %202, %187, %cst_84 {dimension_numbers = #tpu.dot_dimension_numbers<[1], [0], [0], [1], [0, 0, 1, 1], [], []>} : vector<8x8xbf16>, vector<8x32xbf16>, vector<8x32xf32> -> vector<8x32xf32>
    %204 = vector.extract_strided_slice %93 {offsets = [0, 160], sizes = [8, 32], strides = [1, 1]} : vector<8x768xf32> to vector<8x32xf32>
    %205 = arith.truncf %204 : vector<8x32xf32> to vector<8x32xbf16>
    %206 = vector.extract_strided_slice %93 {offsets = [0, 416], sizes = [8, 32], strides = [1, 1]} : vector<8x768xf32> to vector<8x32xf32>
    %207 = arith.truncf %206 : vector<8x32xf32> to vector<8x32xbf16>
    %208 = vector.extract_strided_slice %93 {offsets = [0, 672], sizes = [8, 32], strides = [1, 1]} : vector<8x768xf32> to vector<8x32xf32>
    %209 = arith.truncf %208 : vector<8x32xf32> to vector<8x32xbf16>
    %210 = tpu.transpose %207, [1, 0] : vector<8x32xbf16> -> vector<32x8xbf16>
    %cst_85 = arith.constant dense<0.000000e+00> : vector<8x8xf32>
    %211 = tpu.matmul %205, %210, %cst_85 {dimension_numbers = #tpu.dot_dimension_numbers<[1], [0], [0], [1], [0, 0, 1, 1], [], []>} : vector<8x32xbf16>, vector<32x8xbf16>, vector<8x8xf32> -> vector<8x8xf32>
    %cst_86 = arith.constant 0.176776692 : f32
    %212 = vector.broadcast %cst_86 : f32 to vector<8x8xf32>
    %213 = arith.mulf %211, %212 : vector<8x8xf32>
    %cst_87 = arith.constant dense<0xFF800000> : vector<8xf32>
    %214 = vector.multi_reduction <maximumf>, %213, %cst_87 [1] : vector<8x8xf32> to vector<8xf32>
    %215 = vector.shape_cast %214 : vector<8xf32> to vector<8x1xf32>
    %216 = vector.broadcast %215 : vector<8x1xf32> to vector<8x8xf32>
    %217 = arith.subf %213, %216 : vector<8x8xf32>
    %218 = math.exp %217 : vector<8x8xf32>
    %cst_88 = arith.constant dense<0.000000e+00> : vector<8xf32>
    %219 = vector.multi_reduction <add>, %218, %cst_88 [1] : vector<8x8xf32> to vector<8xf32>
    %220 = vector.shape_cast %219 : vector<8xf32> to vector<8x1xf32>
    %221 = tpu.reciprocal %220 {approx = true} : vector<8x1xf32> -> vector<8x1xf32>
    %222 = vector.broadcast %221 : vector<8x1xf32> to vector<8x8xf32>
    %223 = arith.mulf %218, %222 : vector<8x8xf32>
    %224 = arith.truncf %223 : vector<8x8xf32> to vector<8x8xbf16>
    %cst_89 = arith.constant dense<0.000000e+00> : vector<8x32xf32>
    %225 = tpu.matmul %224, %209, %cst_89 {dimension_numbers = #tpu.dot_dimension_numbers<[1], [0], [0], [1], [0, 0, 1, 1], [], []>} : vector<8x8xbf16>, vector<8x32xbf16>, vector<8x32xf32> -> vector<8x32xf32>
    %226 = vector.extract_strided_slice %93 {offsets = [0, 192], sizes = [8, 32], strides = [1, 1]} : vector<8x768xf32> to vector<8x32xf32>
    %227 = arith.truncf %226 : vector<8x32xf32> to vector<8x32xbf16>
    %228 = vector.extract_strided_slice %93 {offsets = [0, 448], sizes = [8, 32], strides = [1, 1]} : vector<8x768xf32> to vector<8x32xf32>
    %229 = arith.truncf %228 : vector<8x32xf32> to vector<8x32xbf16>
    %230 = vector.extract_strided_slice %93 {offsets = [0, 704], sizes = [8, 32], strides = [1, 1]} : vector<8x768xf32> to vector<8x32xf32>
    %231 = arith.truncf %230 : vector<8x32xf32> to vector<8x32xbf16>
    %232 = tpu.transpose %229, [1, 0] : vector<8x32xbf16> -> vector<32x8xbf16>
    %cst_90 = arith.constant dense<0.000000e+00> : vector<8x8xf32>
    %233 = tpu.matmul %227, %232, %cst_90 {dimension_numbers = #tpu.dot_dimension_numbers<[1], [0], [0], [1], [0, 0, 1, 1], [], []>} : vector<8x32xbf16>, vector<32x8xbf16>, vector<8x8xf32> -> vector<8x8xf32>
    %cst_91 = arith.constant 0.176776692 : f32
    %234 = vector.broadcast %cst_91 : f32 to vector<8x8xf32>
    %235 = arith.mulf %233, %234 : vector<8x8xf32>
    %cst_92 = arith.constant dense<0xFF800000> : vector<8xf32>
    %236 = vector.multi_reduction <maximumf>, %235, %cst_92 [1] : vector<8x8xf32> to vector<8xf32>
    %237 = vector.shape_cast %236 : vector<8xf32> to vector<8x1xf32>
    %238 = vector.broadcast %237 : vector<8x1xf32> to vector<8x8xf32>
    %239 = arith.subf %235, %238 : vector<8x8xf32>
    %240 = math.exp %239 : vector<8x8xf32>
    %cst_93 = arith.constant dense<0.000000e+00> : vector<8xf32>
    %241 = vector.multi_reduction <add>, %240, %cst_93 [1] : vector<8x8xf32> to vector<8xf32>
    %242 = vector.shape_cast %241 : vector<8xf32> to vector<8x1xf32>
    %243 = tpu.reciprocal %242 {approx = true} : vector<8x1xf32> -> vector<8x1xf32>
    %244 = vector.broadcast %243 : vector<8x1xf32> to vector<8x8xf32>
    %245 = arith.mulf %240, %244 : vector<8x8xf32>
    %246 = arith.truncf %245 : vector<8x8xf32> to vector<8x8xbf16>
    %cst_94 = arith.constant dense<0.000000e+00> : vector<8x32xf32>
    %247 = tpu.matmul %246, %231, %cst_94 {dimension_numbers = #tpu.dot_dimension_numbers<[1], [0], [0], [1], [0, 0, 1, 1], [], []>} : vector<8x8xbf16>, vector<8x32xbf16>, vector<8x32xf32> -> vector<8x32xf32>
    %248 = vector.extract_strided_slice %93 {offsets = [0, 224], sizes = [8, 32], strides = [1, 1]} : vector<8x768xf32> to vector<8x32xf32>
    %249 = arith.truncf %248 : vector<8x32xf32> to vector<8x32xbf16>
    %250 = vector.extract_strided_slice %93 {offsets = [0, 480], sizes = [8, 32], strides = [1, 1]} : vector<8x768xf32> to vector<8x32xf32>
    %251 = arith.truncf %250 : vector<8x32xf32> to vector<8x32xbf16>
    %252 = vector.extract_strided_slice %93 {offsets = [0, 736], sizes = [8, 32], strides = [1, 1]} : vector<8x768xf32> to vector<8x32xf32>
    %253 = arith.truncf %252 : vector<8x32xf32> to vector<8x32xbf16>
    %254 = tpu.transpose %251, [1, 0] : vector<8x32xbf16> -> vector<32x8xbf16>
    %cst_95 = arith.constant dense<0.000000e+00> : vector<8x8xf32>
    %255 = tpu.matmul %249, %254, %cst_95 {dimension_numbers = #tpu.dot_dimension_numbers<[1], [0], [0], [1], [0, 0, 1, 1], [], []>} : vector<8x32xbf16>, vector<32x8xbf16>, vector<8x8xf32> -> vector<8x8xf32>
    %cst_96 = arith.constant 0.176776692 : f32
    %256 = vector.broadcast %cst_96 : f32 to vector<8x8xf32>
    %257 = arith.mulf %255, %256 : vector<8x8xf32>
    %cst_97 = arith.constant dense<0xFF800000> : vector<8xf32>
    %258 = vector.multi_reduction <maximumf>, %257, %cst_97 [1] : vector<8x8xf32> to vector<8xf32>
    %259 = vector.shape_cast %258 : vector<8xf32> to vector<8x1xf32>
    %260 = vector.broadcast %259 : vector<8x1xf32> to vector<8x8xf32>
    %261 = arith.subf %257, %260 : vector<8x8xf32>
    %262 = math.exp %261 : vector<8x8xf32>
    %cst_98 = arith.constant dense<0.000000e+00> : vector<8xf32>
    %263 = vector.multi_reduction <add>, %262, %cst_98 [1] : vector<8x8xf32> to vector<8xf32>
    %264 = vector.shape_cast %263 : vector<8xf32> to vector<8x1xf32>
    %265 = tpu.reciprocal %264 {approx = true} : vector<8x1xf32> -> vector<8x1xf32>
    %266 = vector.broadcast %265 : vector<8x1xf32> to vector<8x8xf32>
    %267 = arith.mulf %262, %266 : vector<8x8xf32>
    %268 = arith.truncf %267 : vector<8x8xf32> to vector<8x8xbf16>
    %cst_99 = arith.constant dense<0.000000e+00> : vector<8x32xf32>
    %269 = tpu.matmul %268, %253, %cst_99 {dimension_numbers = #tpu.dot_dimension_numbers<[1], [0], [0], [1], [0, 0, 1, 1], [], []>} : vector<8x8xbf16>, vector<8x32xbf16>, vector<8x32xf32> -> vector<8x32xf32>
    %270 = tpu.concatenate %115, %137, %159, %181, %203, %225, %247, %269 in 1 : vector<8x32xf32>, vector<8x32xf32>, vector<8x32xf32>, vector<8x32xf32>, vector<8x32xf32>, vector<8x32xf32>, vector<8x32xf32>, vector<8x32xf32> -> vector<8x256xf32>
    %271 = arith.truncf %270 : vector<8x256xf32> to vector<8x256xbf16>
    %c0_100 = arith.constant 0 : index
    %c0_101 = arith.constant 0 : index
    %c0_102 = arith.constant 0 : index
    %272 = vector.load %arg13[%c0_100, %c0_101, %c0_102] : memref<2x256x256xbf16, #tpu.memory_space<vmem>>, vector<1x256x256xbf16>
    %273 = vector.shape_cast %272 : vector<1x256x256xbf16> to vector<256x256xbf16>
    %cst_103 = arith.constant dense<0.000000e+00> : vector<8x256xf32>
    %274 = tpu.matmul %271, %273, %cst_103 {dimension_numbers = #tpu.dot_dimension_numbers<[1], [0], [0], [1], [0, 0, 1, 1], [], []>} : vector<8x256xbf16>, vector<256x256xbf16>, vector<8x256xf32> -> vector<8x256xf32>
    %c0_104 = arith.constant 0 : index
    %c0_105 = arith.constant 0 : index
    %c0_106 = arith.constant 0 : index
    %275 = vector.load %arg14[%c0_104, %c0_105, %c0_106] : memref<2x1x256xf32, #tpu.memory_space<vmem>>, vector<1x1x256xf32>
    %276 = vector.shape_cast %275 : vector<1x1x256xf32> to vector<1x256xf32>
    %277 = vector.broadcast %276 : vector<1x256xf32> to vector<8x256xf32>
    %278 = arith.addf %274, %277 : vector<8x256xf32>
    %279 = arith.addf %278, %57 : vector<8x256xf32>
    %280 = vector.extract_strided_slice %59 {offsets = [1, 0], sizes = [1, 256], strides = [1, 1]} : vector<2x256xf32> to vector<1x256xf32>
    %281 = vector.extract_strided_slice %61 {offsets = [1, 0], sizes = [1, 256], strides = [1, 1]} : vector<2x256xf32> to vector<1x256xf32>
    %cst_107 = arith.constant dense<0.000000e+00> : vector<8xf32>
    %282 = vector.multi_reduction <add>, %279, %cst_107 [1] : vector<8x256xf32> to vector<8xf32>
    %283 = vector.shape_cast %282 : vector<8xf32> to vector<8x1xf32>
    %cst_108 = arith.constant 2.560000e+02 : f32
    %284 = vector.broadcast %cst_108 : f32 to vector<8x1xf32>
    %285 = arith.divf %283, %284 : vector<8x1xf32>
    %286 = vector.broadcast %285 : vector<8x1xf32> to vector<8x256xf32>
    %287 = arith.subf %279, %286 : vector<8x256xf32>
    %288 = arith.mulf %287, %287 : vector<8x256xf32>
    %cst_109 = arith.constant dense<0.000000e+00> : vector<8xf32>
    %289 = vector.multi_reduction <add>, %288, %cst_109 [1] : vector<8x256xf32> to vector<8xf32>
    %290 = vector.shape_cast %289 : vector<8xf32> to vector<8x1xf32>
    %cst_110 = arith.constant 2.560000e+02 : f32
    %291 = vector.broadcast %cst_110 : f32 to vector<8x1xf32>
    %292 = arith.divf %290, %291 : vector<8x1xf32>
    %293 = vector.broadcast %285 : vector<8x1xf32> to vector<8x256xf32>
    %294 = arith.subf %279, %293 : vector<8x256xf32>
    %cst_111 = arith.constant 9.99999974E-6 : f32
    %295 = vector.broadcast %cst_111 : f32 to vector<8x1xf32>
    %296 = arith.addf %292, %295 : vector<8x1xf32>
    %297 = math.rsqrt %296 : vector<8x1xf32>
    %298 = vector.broadcast %297 : vector<8x1xf32> to vector<8x256xf32>
    %299 = arith.mulf %294, %298 : vector<8x256xf32>
    %300 = vector.broadcast %280 : vector<1x256xf32> to vector<8x256xf32>
    %301 = arith.mulf %299, %300 : vector<8x256xf32>
    %302 = vector.broadcast %281 : vector<1x256xf32> to vector<8x256xf32>
    %303 = arith.addf %301, %302 : vector<8x256xf32>
    %304 = arith.truncf %303 : vector<8x256xf32> to vector<8x256xbf16>
    %c0_112 = arith.constant 0 : index
    %c0_113 = arith.constant 0 : index
    %c0_114 = arith.constant 0 : index
    %305 = vector.load %arg15[%c0_112, %c0_113, %c0_114] : memref<2x256x1024xbf16, #tpu.memory_space<vmem>>, vector<1x256x1024xbf16>
    %306 = vector.shape_cast %305 : vector<1x256x1024xbf16> to vector<256x1024xbf16>
    %cst_115 = arith.constant dense<0.000000e+00> : vector<8x1024xf32>
    %307 = tpu.matmul %304, %306, %cst_115 {dimension_numbers = #tpu.dot_dimension_numbers<[1], [0], [0], [1], [0, 0, 1, 1], [], []>} : vector<8x256xbf16>, vector<256x1024xbf16>, vector<8x1024xf32> -> vector<8x1024xf32>
    %c0_116 = arith.constant 0 : index
    %c0_117 = arith.constant 0 : index
    %c0_118 = arith.constant 0 : index
    %308 = vector.load %arg16[%c0_116, %c0_117, %c0_118] : memref<2x1x1024xf32, #tpu.memory_space<vmem>>, vector<1x1x1024xf32>
    %309 = vector.shape_cast %308 : vector<1x1x1024xf32> to vector<1x1024xf32>
    %310 = vector.broadcast %309 : vector<1x1024xf32> to vector<8x1024xf32>
    %311 = arith.addf %307, %310 : vector<8x1024xf32>
    %cst_119 = arith.constant 0.000000e+00 : f32
    %312 = vector.broadcast %cst_119 : f32 to vector<8x1024xf32>
    %313 = arith.maximumf %311, %312 : vector<8x1024xf32>
    %314 = arith.truncf %313 : vector<8x1024xf32> to vector<8x1024xbf16>
    %c0_120 = arith.constant 0 : index
    %c0_121 = arith.constant 0 : index
    %c0_122 = arith.constant 0 : index
    %315 = vector.load %arg17[%c0_120, %c0_121, %c0_122] : memref<2x1024x256xbf16, #tpu.memory_space<vmem>>, vector<1x1024x256xbf16>
    %316 = vector.shape_cast %315 : vector<1x1024x256xbf16> to vector<1024x256xbf16>
    %cst_123 = arith.constant dense<0.000000e+00> : vector<8x256xf32>
    %317 = tpu.matmul %314, %316, %cst_123 {dimension_numbers = #tpu.dot_dimension_numbers<[1], [0], [0], [1], [0, 0, 1, 1], [], []>} : vector<8x1024xbf16>, vector<1024x256xbf16>, vector<8x256xf32> -> vector<8x256xf32>
    %c0_124 = arith.constant 0 : index
    %c0_125 = arith.constant 0 : index
    %c0_126 = arith.constant 0 : index
    %318 = vector.load %arg18[%c0_124, %c0_125, %c0_126] : memref<2x1x256xf32, #tpu.memory_space<vmem>>, vector<1x1x256xf32>
    %319 = vector.shape_cast %318 : vector<1x1x256xf32> to vector<1x256xf32>
    %320 = vector.broadcast %319 : vector<1x256xf32> to vector<8x256xf32>
    %321 = arith.addf %317, %320 : vector<8x256xf32>
    %322 = arith.addf %321, %279 : vector<8x256xf32>
    %c1_127 = arith.constant 1 : index
    %c0_128 = arith.constant 0 : index
    %c0_129 = arith.constant 0 : index
    %323 = vector.load %arg9[%c1_127, %c0_128, %c0_129] : memref<2x2x256xf32, #tpu.memory_space<vmem>>, vector<1x2x256xf32>
    %324 = vector.shape_cast %323 : vector<1x2x256xf32> to vector<2x256xf32>
    %c1_130 = arith.constant 1 : index
    %c0_131 = arith.constant 0 : index
    %c0_132 = arith.constant 0 : index
    %325 = vector.load %arg10[%c1_130, %c0_131, %c0_132] : memref<2x2x256xf32, #tpu.memory_space<vmem>>, vector<1x2x256xf32>
    %326 = vector.shape_cast %325 : vector<1x2x256xf32> to vector<2x256xf32>
    %327 = vector.extract_strided_slice %324 {offsets = [0, 0], sizes = [1, 256], strides = [1, 1]} : vector<2x256xf32> to vector<1x256xf32>
    %328 = vector.extract_strided_slice %326 {offsets = [0, 0], sizes = [1, 256], strides = [1, 1]} : vector<2x256xf32> to vector<1x256xf32>
    %cst_133 = arith.constant dense<0.000000e+00> : vector<8xf32>
    %329 = vector.multi_reduction <add>, %322, %cst_133 [1] : vector<8x256xf32> to vector<8xf32>
    %330 = vector.shape_cast %329 : vector<8xf32> to vector<8x1xf32>
    %cst_134 = arith.constant 2.560000e+02 : f32
    %331 = vector.broadcast %cst_134 : f32 to vector<8x1xf32>
    %332 = arith.divf %330, %331 : vector<8x1xf32>
    %333 = vector.broadcast %332 : vector<8x1xf32> to vector<8x256xf32>
    %334 = arith.subf %322, %333 : vector<8x256xf32>
    %335 = arith.mulf %334, %334 : vector<8x256xf32>
    %cst_135 = arith.constant dense<0.000000e+00> : vector<8xf32>
    %336 = vector.multi_reduction <add>, %335, %cst_135 [1] : vector<8x256xf32> to vector<8xf32>
    %337 = vector.shape_cast %336 : vector<8xf32> to vector<8x1xf32>
    %cst_136 = arith.constant 2.560000e+02 : f32
    %338 = vector.broadcast %cst_136 : f32 to vector<8x1xf32>
    %339 = arith.divf %337, %338 : vector<8x1xf32>
    %340 = vector.broadcast %332 : vector<8x1xf32> to vector<8x256xf32>
    %341 = arith.subf %322, %340 : vector<8x256xf32>
    %cst_137 = arith.constant 9.99999974E-6 : f32
    %342 = vector.broadcast %cst_137 : f32 to vector<8x1xf32>
    %343 = arith.addf %339, %342 : vector<8x1xf32>
    %344 = math.rsqrt %343 : vector<8x1xf32>
    %345 = vector.broadcast %344 : vector<8x1xf32> to vector<8x256xf32>
    %346 = arith.mulf %341, %345 : vector<8x256xf32>
    %347 = vector.broadcast %327 : vector<1x256xf32> to vector<8x256xf32>
    %348 = arith.mulf %346, %347 : vector<8x256xf32>
    %349 = vector.broadcast %328 : vector<1x256xf32> to vector<8x256xf32>
    %350 = arith.addf %348, %349 : vector<8x256xf32>
    %351 = arith.truncf %350 : vector<8x256xf32> to vector<8x256xbf16>
    %c1_138 = arith.constant 1 : index
    %c0_139 = arith.constant 0 : index
    %c0_140 = arith.constant 0 : index
    %352 = vector.load %arg11[%c1_138, %c0_139, %c0_140] : memref<2x256x768xbf16, #tpu.memory_space<vmem>>, vector<1x256x768xbf16>
    %353 = vector.shape_cast %352 : vector<1x256x768xbf16> to vector<256x768xbf16>
    %cst_141 = arith.constant dense<0.000000e+00> : vector<8x768xf32>
    %354 = tpu.matmul %351, %353, %cst_141 {dimension_numbers = #tpu.dot_dimension_numbers<[1], [0], [0], [1], [0, 0, 1, 1], [], []>} : vector<8x256xbf16>, vector<256x768xbf16>, vector<8x768xf32> -> vector<8x768xf32>
    %c1_142 = arith.constant 1 : index
    %c0_143 = arith.constant 0 : index
    %c0_144 = arith.constant 0 : index
    %355 = vector.load %arg12[%c1_142, %c0_143, %c0_144] : memref<2x1x768xf32, #tpu.memory_space<vmem>>, vector<1x1x768xf32>
    %356 = vector.shape_cast %355 : vector<1x1x768xf32> to vector<1x768xf32>
    %357 = vector.broadcast %356 : vector<1x768xf32> to vector<8x768xf32>
    %358 = arith.addf %354, %357 : vector<8x768xf32>
    %359 = vector.extract_strided_slice %358 {offsets = [0, 0], sizes = [8, 32], strides = [1, 1]} : vector<8x768xf32> to vector<8x32xf32>
    %360 = arith.truncf %359 : vector<8x32xf32> to vector<8x32xbf16>
    %361 = vector.extract_strided_slice %358 {offsets = [0, 256], sizes = [8, 32], strides = [1, 1]} : vector<8x768xf32> to vector<8x32xf32>
    %362 = arith.truncf %361 : vector<8x32xf32> to vector<8x32xbf16>
    %363 = vector.extract_strided_slice %358 {offsets = [0, 512], sizes = [8, 32], strides = [1, 1]} : vector<8x768xf32> to vector<8x32xf32>
    %364 = arith.truncf %363 : vector<8x32xf32> to vector<8x32xbf16>
    %365 = tpu.transpose %362, [1, 0] : vector<8x32xbf16> -> vector<32x8xbf16>
    %cst_145 = arith.constant dense<0.000000e+00> : vector<8x8xf32>
    %366 = tpu.matmul %360, %365, %cst_145 {dimension_numbers = #tpu.dot_dimension_numbers<[1], [0], [0], [1], [0, 0, 1, 1], [], []>} : vector<8x32xbf16>, vector<32x8xbf16>, vector<8x8xf32> -> vector<8x8xf32>
    %cst_146 = arith.constant 0.176776692 : f32
    %367 = vector.broadcast %cst_146 : f32 to vector<8x8xf32>
    %368 = arith.mulf %366, %367 : vector<8x8xf32>
    %cst_147 = arith.constant dense<0xFF800000> : vector<8xf32>
    %369 = vector.multi_reduction <maximumf>, %368, %cst_147 [1] : vector<8x8xf32> to vector<8xf32>
    %370 = vector.shape_cast %369 : vector<8xf32> to vector<8x1xf32>
    %371 = vector.broadcast %370 : vector<8x1xf32> to vector<8x8xf32>
    %372 = arith.subf %368, %371 : vector<8x8xf32>
    %373 = math.exp %372 : vector<8x8xf32>
    %cst_148 = arith.constant dense<0.000000e+00> : vector<8xf32>
    %374 = vector.multi_reduction <add>, %373, %cst_148 [1] : vector<8x8xf32> to vector<8xf32>
    %375 = vector.shape_cast %374 : vector<8xf32> to vector<8x1xf32>
    %376 = tpu.reciprocal %375 {approx = true} : vector<8x1xf32> -> vector<8x1xf32>
    %377 = vector.broadcast %376 : vector<8x1xf32> to vector<8x8xf32>
    %378 = arith.mulf %373, %377 : vector<8x8xf32>
    %379 = arith.truncf %378 : vector<8x8xf32> to vector<8x8xbf16>
    %cst_149 = arith.constant dense<0.000000e+00> : vector<8x32xf32>
    %380 = tpu.matmul %379, %364, %cst_149 {dimension_numbers = #tpu.dot_dimension_numbers<[1], [0], [0], [1], [0, 0, 1, 1], [], []>} : vector<8x8xbf16>, vector<8x32xbf16>, vector<8x32xf32> -> vector<8x32xf32>
    %381 = vector.extract_strided_slice %358 {offsets = [0, 32], sizes = [8, 32], strides = [1, 1]} : vector<8x768xf32> to vector<8x32xf32>
    %382 = arith.truncf %381 : vector<8x32xf32> to vector<8x32xbf16>
    %383 = vector.extract_strided_slice %358 {offsets = [0, 288], sizes = [8, 32], strides = [1, 1]} : vector<8x768xf32> to vector<8x32xf32>
    %384 = arith.truncf %383 : vector<8x32xf32> to vector<8x32xbf16>
    %385 = vector.extract_strided_slice %358 {offsets = [0, 544], sizes = [8, 32], strides = [1, 1]} : vector<8x768xf32> to vector<8x32xf32>
    %386 = arith.truncf %385 : vector<8x32xf32> to vector<8x32xbf16>
    %387 = tpu.transpose %384, [1, 0] : vector<8x32xbf16> -> vector<32x8xbf16>
    %cst_150 = arith.constant dense<0.000000e+00> : vector<8x8xf32>
    %388 = tpu.matmul %382, %387, %cst_150 {dimension_numbers = #tpu.dot_dimension_numbers<[1], [0], [0], [1], [0, 0, 1, 1], [], []>} : vector<8x32xbf16>, vector<32x8xbf16>, vector<8x8xf32> -> vector<8x8xf32>
    %cst_151 = arith.constant 0.176776692 : f32
    %389 = vector.broadcast %cst_151 : f32 to vector<8x8xf32>
    %390 = arith.mulf %388, %389 : vector<8x8xf32>
    %cst_152 = arith.constant dense<0xFF800000> : vector<8xf32>
    %391 = vector.multi_reduction <maximumf>, %390, %cst_152 [1] : vector<8x8xf32> to vector<8xf32>
    %392 = vector.shape_cast %391 : vector<8xf32> to vector<8x1xf32>
    %393 = vector.broadcast %392 : vector<8x1xf32> to vector<8x8xf32>
    %394 = arith.subf %390, %393 : vector<8x8xf32>
    %395 = math.exp %394 : vector<8x8xf32>
    %cst_153 = arith.constant dense<0.000000e+00> : vector<8xf32>
    %396 = vector.multi_reduction <add>, %395, %cst_153 [1] : vector<8x8xf32> to vector<8xf32>
    %397 = vector.shape_cast %396 : vector<8xf32> to vector<8x1xf32>
    %398 = tpu.reciprocal %397 {approx = true} : vector<8x1xf32> -> vector<8x1xf32>
    %399 = vector.broadcast %398 : vector<8x1xf32> to vector<8x8xf32>
    %400 = arith.mulf %395, %399 : vector<8x8xf32>
    %401 = arith.truncf %400 : vector<8x8xf32> to vector<8x8xbf16>
    %cst_154 = arith.constant dense<0.000000e+00> : vector<8x32xf32>
    %402 = tpu.matmul %401, %386, %cst_154 {dimension_numbers = #tpu.dot_dimension_numbers<[1], [0], [0], [1], [0, 0, 1, 1], [], []>} : vector<8x8xbf16>, vector<8x32xbf16>, vector<8x32xf32> -> vector<8x32xf32>
    %403 = vector.extract_strided_slice %358 {offsets = [0, 64], sizes = [8, 32], strides = [1, 1]} : vector<8x768xf32> to vector<8x32xf32>
    %404 = arith.truncf %403 : vector<8x32xf32> to vector<8x32xbf16>
    %405 = vector.extract_strided_slice %358 {offsets = [0, 320], sizes = [8, 32], strides = [1, 1]} : vector<8x768xf32> to vector<8x32xf32>
    %406 = arith.truncf %405 : vector<8x32xf32> to vector<8x32xbf16>
    %407 = vector.extract_strided_slice %358 {offsets = [0, 576], sizes = [8, 32], strides = [1, 1]} : vector<8x768xf32> to vector<8x32xf32>
    %408 = arith.truncf %407 : vector<8x32xf32> to vector<8x32xbf16>
    %409 = tpu.transpose %406, [1, 0] : vector<8x32xbf16> -> vector<32x8xbf16>
    %cst_155 = arith.constant dense<0.000000e+00> : vector<8x8xf32>
    %410 = tpu.matmul %404, %409, %cst_155 {dimension_numbers = #tpu.dot_dimension_numbers<[1], [0], [0], [1], [0, 0, 1, 1], [], []>} : vector<8x32xbf16>, vector<32x8xbf16>, vector<8x8xf32> -> vector<8x8xf32>
    %cst_156 = arith.constant 0.176776692 : f32
    %411 = vector.broadcast %cst_156 : f32 to vector<8x8xf32>
    %412 = arith.mulf %410, %411 : vector<8x8xf32>
    %cst_157 = arith.constant dense<0xFF800000> : vector<8xf32>
    %413 = vector.multi_reduction <maximumf>, %412, %cst_157 [1] : vector<8x8xf32> to vector<8xf32>
    %414 = vector.shape_cast %413 : vector<8xf32> to vector<8x1xf32>
    %415 = vector.broadcast %414 : vector<8x1xf32> to vector<8x8xf32>
    %416 = arith.subf %412, %415 : vector<8x8xf32>
    %417 = math.exp %416 : vector<8x8xf32>
    %cst_158 = arith.constant dense<0.000000e+00> : vector<8xf32>
    %418 = vector.multi_reduction <add>, %417, %cst_158 [1] : vector<8x8xf32> to vector<8xf32>
    %419 = vector.shape_cast %418 : vector<8xf32> to vector<8x1xf32>
    %420 = tpu.reciprocal %419 {approx = true} : vector<8x1xf32> -> vector<8x1xf32>
    %421 = vector.broadcast %420 : vector<8x1xf32> to vector<8x8xf32>
    %422 = arith.mulf %417, %421 : vector<8x8xf32>
    %423 = arith.truncf %422 : vector<8x8xf32> to vector<8x8xbf16>
    %cst_159 = arith.constant dense<0.000000e+00> : vector<8x32xf32>
    %424 = tpu.matmul %423, %408, %cst_159 {dimension_numbers = #tpu.dot_dimension_numbers<[1], [0], [0], [1], [0, 0, 1, 1], [], []>} : vector<8x8xbf16>, vector<8x32xbf16>, vector<8x32xf32> -> vector<8x32xf32>
    %425 = vector.extract_strided_slice %358 {offsets = [0, 96], sizes = [8, 32], strides = [1, 1]} : vector<8x768xf32> to vector<8x32xf32>
    %426 = arith.truncf %425 : vector<8x32xf32> to vector<8x32xbf16>
    %427 = vector.extract_strided_slice %358 {offsets = [0, 352], sizes = [8, 32], strides = [1, 1]} : vector<8x768xf32> to vector<8x32xf32>
    %428 = arith.truncf %427 : vector<8x32xf32> to vector<8x32xbf16>
    %429 = vector.extract_strided_slice %358 {offsets = [0, 608], sizes = [8, 32], strides = [1, 1]} : vector<8x768xf32> to vector<8x32xf32>
    %430 = arith.truncf %429 : vector<8x32xf32> to vector<8x32xbf16>
    %431 = tpu.transpose %428, [1, 0] : vector<8x32xbf16> -> vector<32x8xbf16>
    %cst_160 = arith.constant dense<0.000000e+00> : vector<8x8xf32>
    %432 = tpu.matmul %426, %431, %cst_160 {dimension_numbers = #tpu.dot_dimension_numbers<[1], [0], [0], [1], [0, 0, 1, 1], [], []>} : vector<8x32xbf16>, vector<32x8xbf16>, vector<8x8xf32> -> vector<8x8xf32>
    %cst_161 = arith.constant 0.176776692 : f32
    %433 = vector.broadcast %cst_161 : f32 to vector<8x8xf32>
    %434 = arith.mulf %432, %433 : vector<8x8xf32>
    %cst_162 = arith.constant dense<0xFF800000> : vector<8xf32>
    %435 = vector.multi_reduction <maximumf>, %434, %cst_162 [1] : vector<8x8xf32> to vector<8xf32>
    %436 = vector.shape_cast %435 : vector<8xf32> to vector<8x1xf32>
    %437 = vector.broadcast %436 : vector<8x1xf32> to vector<8x8xf32>
    %438 = arith.subf %434, %437 : vector<8x8xf32>
    %439 = math.exp %438 : vector<8x8xf32>
    %cst_163 = arith.constant dense<0.000000e+00> : vector<8xf32>
    %440 = vector.multi_reduction <add>, %439, %cst_163 [1] : vector<8x8xf32> to vector<8xf32>
    %441 = vector.shape_cast %440 : vector<8xf32> to vector<8x1xf32>
    %442 = tpu.reciprocal %441 {approx = true} : vector<8x1xf32> -> vector<8x1xf32>
    %443 = vector.broadcast %442 : vector<8x1xf32> to vector<8x8xf32>
    %444 = arith.mulf %439, %443 : vector<8x8xf32>
    %445 = arith.truncf %444 : vector<8x8xf32> to vector<8x8xbf16>
    %cst_164 = arith.constant dense<0.000000e+00> : vector<8x32xf32>
    %446 = tpu.matmul %445, %430, %cst_164 {dimension_numbers = #tpu.dot_dimension_numbers<[1], [0], [0], [1], [0, 0, 1, 1], [], []>} : vector<8x8xbf16>, vector<8x32xbf16>, vector<8x32xf32> -> vector<8x32xf32>
    %447 = vector.extract_strided_slice %358 {offsets = [0, 128], sizes = [8, 32], strides = [1, 1]} : vector<8x768xf32> to vector<8x32xf32>
    %448 = arith.truncf %447 : vector<8x32xf32> to vector<8x32xbf16>
    %449 = vector.extract_strided_slice %358 {offsets = [0, 384], sizes = [8, 32], strides = [1, 1]} : vector<8x768xf32> to vector<8x32xf32>
    %450 = arith.truncf %449 : vector<8x32xf32> to vector<8x32xbf16>
    %451 = vector.extract_strided_slice %358 {offsets = [0, 640], sizes = [8, 32], strides = [1, 1]} : vector<8x768xf32> to vector<8x32xf32>
    %452 = arith.truncf %451 : vector<8x32xf32> to vector<8x32xbf16>
    %453 = tpu.transpose %450, [1, 0] : vector<8x32xbf16> -> vector<32x8xbf16>
    %cst_165 = arith.constant dense<0.000000e+00> : vector<8x8xf32>
    %454 = tpu.matmul %448, %453, %cst_165 {dimension_numbers = #tpu.dot_dimension_numbers<[1], [0], [0], [1], [0, 0, 1, 1], [], []>} : vector<8x32xbf16>, vector<32x8xbf16>, vector<8x8xf32> -> vector<8x8xf32>
    %cst_166 = arith.constant 0.176776692 : f32
    %455 = vector.broadcast %cst_166 : f32 to vector<8x8xf32>
    %456 = arith.mulf %454, %455 : vector<8x8xf32>
    %cst_167 = arith.constant dense<0xFF800000> : vector<8xf32>
    %457 = vector.multi_reduction <maximumf>, %456, %cst_167 [1] : vector<8x8xf32> to vector<8xf32>
    %458 = vector.shape_cast %457 : vector<8xf32> to vector<8x1xf32>
    %459 = vector.broadcast %458 : vector<8x1xf32> to vector<8x8xf32>
    %460 = arith.subf %456, %459 : vector<8x8xf32>
    %461 = math.exp %460 : vector<8x8xf32>
    %cst_168 = arith.constant dense<0.000000e+00> : vector<8xf32>
    %462 = vector.multi_reduction <add>, %461, %cst_168 [1] : vector<8x8xf32> to vector<8xf32>
    %463 = vector.shape_cast %462 : vector<8xf32> to vector<8x1xf32>
    %464 = tpu.reciprocal %463 {approx = true} : vector<8x1xf32> -> vector<8x1xf32>
    %465 = vector.broadcast %464 : vector<8x1xf32> to vector<8x8xf32>
    %466 = arith.mulf %461, %465 : vector<8x8xf32>
    %467 = arith.truncf %466 : vector<8x8xf32> to vector<8x8xbf16>
    %cst_169 = arith.constant dense<0.000000e+00> : vector<8x32xf32>
    %468 = tpu.matmul %467, %452, %cst_169 {dimension_numbers = #tpu.dot_dimension_numbers<[1], [0], [0], [1], [0, 0, 1, 1], [], []>} : vector<8x8xbf16>, vector<8x32xbf16>, vector<8x32xf32> -> vector<8x32xf32>
    %469 = vector.extract_strided_slice %358 {offsets = [0, 160], sizes = [8, 32], strides = [1, 1]} : vector<8x768xf32> to vector<8x32xf32>
    %470 = arith.truncf %469 : vector<8x32xf32> to vector<8x32xbf16>
    %471 = vector.extract_strided_slice %358 {offsets = [0, 416], sizes = [8, 32], strides = [1, 1]} : vector<8x768xf32> to vector<8x32xf32>
    %472 = arith.truncf %471 : vector<8x32xf32> to vector<8x32xbf16>
    %473 = vector.extract_strided_slice %358 {offsets = [0, 672], sizes = [8, 32], strides = [1, 1]} : vector<8x768xf32> to vector<8x32xf32>
    %474 = arith.truncf %473 : vector<8x32xf32> to vector<8x32xbf16>
    %475 = tpu.transpose %472, [1, 0] : vector<8x32xbf16> -> vector<32x8xbf16>
    %cst_170 = arith.constant dense<0.000000e+00> : vector<8x8xf32>
    %476 = tpu.matmul %470, %475, %cst_170 {dimension_numbers = #tpu.dot_dimension_numbers<[1], [0], [0], [1], [0, 0, 1, 1], [], []>} : vector<8x32xbf16>, vector<32x8xbf16>, vector<8x8xf32> -> vector<8x8xf32>
    %cst_171 = arith.constant 0.176776692 : f32
    %477 = vector.broadcast %cst_171 : f32 to vector<8x8xf32>
    %478 = arith.mulf %476, %477 : vector<8x8xf32>
    %cst_172 = arith.constant dense<0xFF800000> : vector<8xf32>
    %479 = vector.multi_reduction <maximumf>, %478, %cst_172 [1] : vector<8x8xf32> to vector<8xf32>
    %480 = vector.shape_cast %479 : vector<8xf32> to vector<8x1xf32>
    %481 = vector.broadcast %480 : vector<8x1xf32> to vector<8x8xf32>
    %482 = arith.subf %478, %481 : vector<8x8xf32>
    %483 = math.exp %482 : vector<8x8xf32>
    %cst_173 = arith.constant dense<0.000000e+00> : vector<8xf32>
    %484 = vector.multi_reduction <add>, %483, %cst_173 [1] : vector<8x8xf32> to vector<8xf32>
    %485 = vector.shape_cast %484 : vector<8xf32> to vector<8x1xf32>
    %486 = tpu.reciprocal %485 {approx = true} : vector<8x1xf32> -> vector<8x1xf32>
    %487 = vector.broadcast %486 : vector<8x1xf32> to vector<8x8xf32>
    %488 = arith.mulf %483, %487 : vector<8x8xf32>
    %489 = arith.truncf %488 : vector<8x8xf32> to vector<8x8xbf16>
    %cst_174 = arith.constant dense<0.000000e+00> : vector<8x32xf32>
    %490 = tpu.matmul %489, %474, %cst_174 {dimension_numbers = #tpu.dot_dimension_numbers<[1], [0], [0], [1], [0, 0, 1, 1], [], []>} : vector<8x8xbf16>, vector<8x32xbf16>, vector<8x32xf32> -> vector<8x32xf32>
    %491 = vector.extract_strided_slice %358 {offsets = [0, 192], sizes = [8, 32], strides = [1, 1]} : vector<8x768xf32> to vector<8x32xf32>
    %492 = arith.truncf %491 : vector<8x32xf32> to vector<8x32xbf16>
    %493 = vector.extract_strided_slice %358 {offsets = [0, 448], sizes = [8, 32], strides = [1, 1]} : vector<8x768xf32> to vector<8x32xf32>
    %494 = arith.truncf %493 : vector<8x32xf32> to vector<8x32xbf16>
    %495 = vector.extract_strided_slice %358 {offsets = [0, 704], sizes = [8, 32], strides = [1, 1]} : vector<8x768xf32> to vector<8x32xf32>
    %496 = arith.truncf %495 : vector<8x32xf32> to vector<8x32xbf16>
    %497 = tpu.transpose %494, [1, 0] : vector<8x32xbf16> -> vector<32x8xbf16>
    %cst_175 = arith.constant dense<0.000000e+00> : vector<8x8xf32>
    %498 = tpu.matmul %492, %497, %cst_175 {dimension_numbers = #tpu.dot_dimension_numbers<[1], [0], [0], [1], [0, 0, 1, 1], [], []>} : vector<8x32xbf16>, vector<32x8xbf16>, vector<8x8xf32> -> vector<8x8xf32>
    %cst_176 = arith.constant 0.176776692 : f32
    %499 = vector.broadcast %cst_176 : f32 to vector<8x8xf32>
    %500 = arith.mulf %498, %499 : vector<8x8xf32>
    %cst_177 = arith.constant dense<0xFF800000> : vector<8xf32>
    %501 = vector.multi_reduction <maximumf>, %500, %cst_177 [1] : vector<8x8xf32> to vector<8xf32>
    %502 = vector.shape_cast %501 : vector<8xf32> to vector<8x1xf32>
    %503 = vector.broadcast %502 : vector<8x1xf32> to vector<8x8xf32>
    %504 = arith.subf %500, %503 : vector<8x8xf32>
    %505 = math.exp %504 : vector<8x8xf32>
    %cst_178 = arith.constant dense<0.000000e+00> : vector<8xf32>
    %506 = vector.multi_reduction <add>, %505, %cst_178 [1] : vector<8x8xf32> to vector<8xf32>
    %507 = vector.shape_cast %506 : vector<8xf32> to vector<8x1xf32>
    %508 = tpu.reciprocal %507 {approx = true} : vector<8x1xf32> -> vector<8x1xf32>
    %509 = vector.broadcast %508 : vector<8x1xf32> to vector<8x8xf32>
    %510 = arith.mulf %505, %509 : vector<8x8xf32>
    %511 = arith.truncf %510 : vector<8x8xf32> to vector<8x8xbf16>
    %cst_179 = arith.constant dense<0.000000e+00> : vector<8x32xf32>
    %512 = tpu.matmul %511, %496, %cst_179 {dimension_numbers = #tpu.dot_dimension_numbers<[1], [0], [0], [1], [0, 0, 1, 1], [], []>} : vector<8x8xbf16>, vector<8x32xbf16>, vector<8x32xf32> -> vector<8x32xf32>
    %513 = vector.extract_strided_slice %358 {offsets = [0, 224], sizes = [8, 32], strides = [1, 1]} : vector<8x768xf32> to vector<8x32xf32>
    %514 = arith.truncf %513 : vector<8x32xf32> to vector<8x32xbf16>
    %515 = vector.extract_strided_slice %358 {offsets = [0, 480], sizes = [8, 32], strides = [1, 1]} : vector<8x768xf32> to vector<8x32xf32>
    %516 = arith.truncf %515 : vector<8x32xf32> to vector<8x32xbf16>
    %517 = vector.extract_strided_slice %358 {offsets = [0, 736], sizes = [8, 32], strides = [1, 1]} : vector<8x768xf32> to vector<8x32xf32>
    %518 = arith.truncf %517 : vector<8x32xf32> to vector<8x32xbf16>
    %519 = tpu.transpose %516, [1, 0] : vector<8x32xbf16> -> vector<32x8xbf16>
    %cst_180 = arith.constant dense<0.000000e+00> : vector<8x8xf32>
    %520 = tpu.matmul %514, %519, %cst_180 {dimension_numbers = #tpu.dot_dimension_numbers<[1], [0], [0], [1], [0, 0, 1, 1], [], []>} : vector<8x32xbf16>, vector<32x8xbf16>, vector<8x8xf32> -> vector<8x8xf32>
    %cst_181 = arith.constant 0.176776692 : f32
    %521 = vector.broadcast %cst_181 : f32 to vector<8x8xf32>
    %522 = arith.mulf %520, %521 : vector<8x8xf32>
    %cst_182 = arith.constant dense<0xFF800000> : vector<8xf32>
    %523 = vector.multi_reduction <maximumf>, %522, %cst_182 [1] : vector<8x8xf32> to vector<8xf32>
    %524 = vector.shape_cast %523 : vector<8xf32> to vector<8x1xf32>
    %525 = vector.broadcast %524 : vector<8x1xf32> to vector<8x8xf32>
    %526 = arith.subf %522, %525 : vector<8x8xf32>
    %527 = math.exp %526 : vector<8x8xf32>
    %cst_183 = arith.constant dense<0.000000e+00> : vector<8xf32>
    %528 = vector.multi_reduction <add>, %527, %cst_183 [1] : vector<8x8xf32> to vector<8xf32>
    %529 = vector.shape_cast %528 : vector<8xf32> to vector<8x1xf32>
    %530 = tpu.reciprocal %529 {approx = true} : vector<8x1xf32> -> vector<8x1xf32>
    %531 = vector.broadcast %530 : vector<8x1xf32> to vector<8x8xf32>
    %532 = arith.mulf %527, %531 : vector<8x8xf32>
    %533 = arith.truncf %532 : vector<8x8xf32> to vector<8x8xbf16>
    %cst_184 = arith.constant dense<0.000000e+00> : vector<8x32xf32>
    %534 = tpu.matmul %533, %518, %cst_184 {dimension_numbers = #tpu.dot_dimension_numbers<[1], [0], [0], [1], [0, 0, 1, 1], [], []>} : vector<8x8xbf16>, vector<8x32xbf16>, vector<8x32xf32> -> vector<8x32xf32>
    %535 = tpu.concatenate %380, %402, %424, %446, %468, %490, %512, %534 in 1 : vector<8x32xf32>, vector<8x32xf32>, vector<8x32xf32>, vector<8x32xf32>, vector<8x32xf32>, vector<8x32xf32>, vector<8x32xf32>, vector<8x32xf32> -> vector<8x256xf32>
    %536 = arith.truncf %535 : vector<8x256xf32> to vector<8x256xbf16>
    %c1_185 = arith.constant 1 : index
    %c0_186 = arith.constant 0 : index
    %c0_187 = arith.constant 0 : index
    %537 = vector.load %arg13[%c1_185, %c0_186, %c0_187] : memref<2x256x256xbf16, #tpu.memory_space<vmem>>, vector<1x256x256xbf16>
    %538 = vector.shape_cast %537 : vector<1x256x256xbf16> to vector<256x256xbf16>
    %cst_188 = arith.constant dense<0.000000e+00> : vector<8x256xf32>
    %539 = tpu.matmul %536, %538, %cst_188 {dimension_numbers = #tpu.dot_dimension_numbers<[1], [0], [0], [1], [0, 0, 1, 1], [], []>} : vector<8x256xbf16>, vector<256x256xbf16>, vector<8x256xf32> -> vector<8x256xf32>
    %c1_189 = arith.constant 1 : index
    %c0_190 = arith.constant 0 : index
    %c0_191 = arith.constant 0 : index
    %540 = vector.load %arg14[%c1_189, %c0_190, %c0_191] : memref<2x1x256xf32, #tpu.memory_space<vmem>>, vector<1x1x256xf32>
    %541 = vector.shape_cast %540 : vector<1x1x256xf32> to vector<1x256xf32>
    %542 = vector.broadcast %541 : vector<1x256xf32> to vector<8x256xf32>
    %543 = arith.addf %539, %542 : vector<8x256xf32>
    %544 = arith.addf %543, %322 : vector<8x256xf32>
    %545 = vector.extract_strided_slice %324 {offsets = [1, 0], sizes = [1, 256], strides = [1, 1]} : vector<2x256xf32> to vector<1x256xf32>
    %546 = vector.extract_strided_slice %326 {offsets = [1, 0], sizes = [1, 256], strides = [1, 1]} : vector<2x256xf32> to vector<1x256xf32>
    %cst_192 = arith.constant dense<0.000000e+00> : vector<8xf32>
    %547 = vector.multi_reduction <add>, %544, %cst_192 [1] : vector<8x256xf32> to vector<8xf32>
    %548 = vector.shape_cast %547 : vector<8xf32> to vector<8x1xf32>
    %cst_193 = arith.constant 2.560000e+02 : f32
    %549 = vector.broadcast %cst_193 : f32 to vector<8x1xf32>
    %550 = arith.divf %548, %549 : vector<8x1xf32>
    %551 = vector.broadcast %550 : vector<8x1xf32> to vector<8x256xf32>
    %552 = arith.subf %544, %551 : vector<8x256xf32>
    %553 = arith.mulf %552, %552 : vector<8x256xf32>
    %cst_194 = arith.constant dense<0.000000e+00> : vector<8xf32>
    %554 = vector.multi_reduction <add>, %553, %cst_194 [1] : vector<8x256xf32> to vector<8xf32>
    %555 = vector.shape_cast %554 : vector<8xf32> to vector<8x1xf32>
    %cst_195 = arith.constant 2.560000e+02 : f32
    %556 = vector.broadcast %cst_195 : f32 to vector<8x1xf32>
    %557 = arith.divf %555, %556 : vector<8x1xf32>
    %558 = vector.broadcast %550 : vector<8x1xf32> to vector<8x256xf32>
    %559 = arith.subf %544, %558 : vector<8x256xf32>
    %cst_196 = arith.constant 9.99999974E-6 : f32
    %560 = vector.broadcast %cst_196 : f32 to vector<8x1xf32>
    %561 = arith.addf %557, %560 : vector<8x1xf32>
    %562 = math.rsqrt %561 : vector<8x1xf32>
    %563 = vector.broadcast %562 : vector<8x1xf32> to vector<8x256xf32>
    %564 = arith.mulf %559, %563 : vector<8x256xf32>
    %565 = vector.broadcast %545 : vector<1x256xf32> to vector<8x256xf32>
    %566 = arith.mulf %564, %565 : vector<8x256xf32>
    %567 = vector.broadcast %546 : vector<1x256xf32> to vector<8x256xf32>
    %568 = arith.addf %566, %567 : vector<8x256xf32>
    %569 = arith.truncf %568 : vector<8x256xf32> to vector<8x256xbf16>
    %c1_197 = arith.constant 1 : index
    %c0_198 = arith.constant 0 : index
    %c0_199 = arith.constant 0 : index
    %570 = vector.load %arg15[%c1_197, %c0_198, %c0_199] : memref<2x256x1024xbf16, #tpu.memory_space<vmem>>, vector<1x256x1024xbf16>
    %571 = vector.shape_cast %570 : vector<1x256x1024xbf16> to vector<256x1024xbf16>
    %cst_200 = arith.constant dense<0.000000e+00> : vector<8x1024xf32>
    %572 = tpu.matmul %569, %571, %cst_200 {dimension_numbers = #tpu.dot_dimension_numbers<[1], [0], [0], [1], [0, 0, 1, 1], [], []>} : vector<8x256xbf16>, vector<256x1024xbf16>, vector<8x1024xf32> -> vector<8x1024xf32>
    %c1_201 = arith.constant 1 : index
    %c0_202 = arith.constant 0 : index
    %c0_203 = arith.constant 0 : index
    %573 = vector.load %arg16[%c1_201, %c0_202, %c0_203] : memref<2x1x1024xf32, #tpu.memory_space<vmem>>, vector<1x1x1024xf32>
    %574 = vector.shape_cast %573 : vector<1x1x1024xf32> to vector<1x1024xf32>
    %575 = vector.broadcast %574 : vector<1x1024xf32> to vector<8x1024xf32>
    %576 = arith.addf %572, %575 : vector<8x1024xf32>
    %cst_204 = arith.constant 0.000000e+00 : f32
    %577 = vector.broadcast %cst_204 : f32 to vector<8x1024xf32>
    %578 = arith.maximumf %576, %577 : vector<8x1024xf32>
    %579 = arith.truncf %578 : vector<8x1024xf32> to vector<8x1024xbf16>
    %c1_205 = arith.constant 1 : index
    %c0_206 = arith.constant 0 : index
    %c0_207 = arith.constant 0 : index
    %580 = vector.load %arg17[%c1_205, %c0_206, %c0_207] : memref<2x1024x256xbf16, #tpu.memory_space<vmem>>, vector<1x1024x256xbf16>
    %581 = vector.shape_cast %580 : vector<1x1024x256xbf16> to vector<1024x256xbf16>
    %cst_208 = arith.constant dense<0.000000e+00> : vector<8x256xf32>
    %582 = tpu.matmul %579, %581, %cst_208 {dimension_numbers = #tpu.dot_dimension_numbers<[1], [0], [0], [1], [0, 0, 1, 1], [], []>} : vector<8x1024xbf16>, vector<1024x256xbf16>, vector<8x256xf32> -> vector<8x256xf32>
    %c1_209 = arith.constant 1 : index
    %c0_210 = arith.constant 0 : index
    %c0_211 = arith.constant 0 : index
    %583 = vector.load %arg18[%c1_209, %c0_210, %c0_211] : memref<2x1x256xf32, #tpu.memory_space<vmem>>, vector<1x1x256xf32>
    %584 = vector.shape_cast %583 : vector<1x1x256xf32> to vector<1x256xf32>
    %585 = vector.broadcast %584 : vector<1x256xf32> to vector<8x256xf32>
    %586 = arith.addf %582, %585 : vector<8x256xf32>
    %587 = arith.addf %586, %544 : vector<8x256xf32>
    %588 = arith.truncf %587 : vector<8x256xf32> to vector<8x256xbf16>
    %c0_212 = arith.constant 0 : index
    %c0_213 = arith.constant 0 : index
    %589 = vector.load %arg19[%c0_212, %c0_213] : memref<256x128xbf16, #tpu.memory_space<vmem>>, vector<256x128xbf16>
    %cst_214 = arith.constant dense<0.000000e+00> : vector<8x128xf32>
    %590 = tpu.matmul %588, %589, %cst_214 {dimension_numbers = #tpu.dot_dimension_numbers<[1], [0], [0], [1], [0, 0, 1, 1], [], []>} : vector<8x256xbf16>, vector<256x128xbf16>, vector<8x128xf32> -> vector<8x128xf32>
    %c0_215 = arith.constant 0 : index
    %c0_216 = arith.constant 0 : index
    %591 = vector.load %arg20[%c0_215, %c0_216] : memref<1x128xf32, #tpu.memory_space<vmem>>, vector<1x128xf32>
    %592 = vector.broadcast %591 : vector<1x128xf32> to vector<8x128xf32>
    %593 = arith.addf %590, %592 : vector<8x128xf32>
    %c0_217 = arith.constant 0 : index
    %c0_218 = arith.constant 0 : index
    %594 = vector.load %arg21[%c0_217, %c0_218] : memref<8x128xf32, #tpu.memory_space<vmem>>, vector<8x128xf32>
    tpu.vector_store %arg21[%c0_217, %c0_218], %593 {strides = array<i32>} : memref<8x128xf32, #tpu.memory_space<vmem>>, vector<8x128xf32>,
    return
  }
  func.func @transform_0(%arg0: i32) -> (i32, i32, i32) {
    %c0_i32 = arith.constant 0 : i32
    %c0_i32_0 = arith.constant 0 : i32
    %c0_i32_1 = arith.constant 0 : i32
    return %arg0, %c0_i32, %c0_i32_0 : i32, i32, i32
  }
  func.func @transform_1(%arg0: i32) -> (i32, i32) {
    %c0_i32 = arith.constant 0 : i32
    %c0_i32_0 = arith.constant 0 : i32
    %c0_i32_1 = arith.constant 0 : i32
    return %c0_i32, %c0_i32_0 : i32, i32
  }
  func.func @transform_2(%arg0: i32) -> (i32, i32) {
    %c0_i32 = arith.constant 0 : i32
    %c0_i32_0 = arith.constant 0 : i32
    %c0_i32_1 = arith.constant 0 : i32
    return %c0_i32, %c0_i32_0 : i32, i32
  }
  func.func @transform_3(%arg0: i32) -> (i32, i32) {
    %c0_i32 = arith.constant 0 : i32
    %c0_i32_0 = arith.constant 0 : i32
    %c0_i32_1 = arith.constant 0 : i32
    return %c0_i32, %c0_i32_0 : i32, i32
  }
  func.func @transform_4(%arg0: i32) -> (i32, i32) {
    %c0_i32 = arith.constant 0 : i32
    %c0_i32_0 = arith.constant 0 : i32
    %c0_i32_1 = arith.constant 0 : i32
    return %c0_i32, %c0_i32_0 : i32, i32
  }
  func.func @transform_5(%arg0: i32) -> (i32, i32) {
    %c0_i32 = arith.constant 0 : i32
    %c0_i32_0 = arith.constant 0 : i32
    %c0_i32_1 = arith.constant 0 : i32
    return %c0_i32, %c0_i32_0 : i32, i32
  }
  func.func @transform_6(%arg0: i32) -> (i32, i32) {
    %c0_i32 = arith.constant 0 : i32
    %c0_i32_0 = arith.constant 0 : i32
    %c0_i32_1 = arith.constant 0 : i32
    return %c0_i32, %c0_i32_0 : i32, i32
  }
  func.func @transform_7(%arg0: i32) -> (i32, i32) {
    %c0_i32 = arith.constant 0 : i32
    %c0_i32_0 = arith.constant 0 : i32
    %c0_i32_1 = arith.constant 0 : i32
    return %c0_i32, %c0_i32_0 : i32, i32
  }
  func.func @transform_8(%arg0: i32) -> (i32, i32, i32) {
    %c0_i32 = arith.constant 0 : i32
    %c0_i32_0 = arith.constant 0 : i32
    %c0_i32_1 = arith.constant 0 : i32
    %c0_i32_2 = arith.constant 0 : i32
    return %c0_i32, %c0_i32_0, %c0_i32_1 : i32, i32, i32
  }
  func.func @transform_9(%arg0: i32) -> (i32, i32, i32) {
    %c0_i32 = arith.constant 0 : i32
    %c0_i32_0 = arith.constant 0 : i32
    %c0_i32_1 = arith.constant 0 : i32
    %c0_i32_2 = arith.constant 0 : i32
    return %c0_i32, %c0_i32_0, %c0_i32_1 : i32, i32, i32
  }
  func.func @transform_10(%arg0: i32) -> (i32, i32, i32) {
    %c0_i32 = arith.constant 0 : i32
    %c0_i32_0 = arith.constant 0 : i32
    %c0_i32_1 = arith.constant 0 : i32
    %c0_i32_2 = arith.constant 0 : i32
    return %c0_i32, %c0_i32_0, %c0_i32_1 : i32, i32, i32
  }
  func.func @transform_11(%arg0: i32) -> (i32, i32, i32) {
    %c0_i32 = arith.constant 0 : i32
    %c0_i32_0 = arith.constant 0 : i32
    %c0_i32_1 = arith.constant 0 : i32
    %c0_i32_2 = arith.constant 0 : i32
    return %c0_i32, %c0_i32_0, %c0_i32_1 : i32, i32, i32
  }
  func.func @transform_12(%arg0: i32) -> (i32, i32, i32) {
    %c0_i32 = arith.constant 0 : i32
    %c0_i32_0 = arith.constant 0 : i32
    %c0_i32_1 = arith.constant 0 : i32
    %c0_i32_2 = arith.constant 0 : i32
    return %c0_i32, %c0_i32_0, %c0_i32_1 : i32, i32, i32
  }
  func.func @transform_13(%arg0: i32) -> (i32, i32, i32) {
    %c0_i32 = arith.constant 0 : i32
    %c0_i32_0 = arith.constant 0 : i32
    %c0_i32_1 = arith.constant 0 : i32
    %c0_i32_2 = arith.constant 0 : i32
    return %c0_i32, %c0_i32_0, %c0_i32_1 : i32, i32, i32
  }
  func.func @transform_14(%arg0: i32) -> (i32, i32, i32) {
    %c0_i32 = arith.constant 0 : i32
    %c0_i32_0 = arith.constant 0 : i32
    %c0_i32_1 = arith.constant 0 : i32
    %c0_i32_2 = arith.constant 0 : i32
    return %c0_i32, %c0_i32_0, %c0_i32_1 : i32, i32, i32
  }
  func.func @transform_15(%arg0: i32) -> (i32, i32, i32) {
    %c0_i32 = arith.constant 0 : i32
    %c0_i32_0 = arith.constant 0 : i32
    %c0_i32_1 = arith.constant 0 : i32
    %c0_i32_2 = arith.constant 0 : i32
    return %c0_i32, %c0_i32_0, %c0_i32_1 : i32, i32, i32
  }
  func.func @transform_16(%arg0: i32) -> (i32, i32, i32) {
    %c0_i32 = arith.constant 0 : i32
    %c0_i32_0 = arith.constant 0 : i32
    %c0_i32_1 = arith.constant 0 : i32
    %c0_i32_2 = arith.constant 0 : i32
    return %c0_i32, %c0_i32_0, %c0_i32_1 : i32, i32, i32
  }
  func.func @transform_17(%arg0: i32) -> (i32, i32, i32) {
    %c0_i32 = arith.constant 0 : i32
    %c0_i32_0 = arith.constant 0 : i32
    %c0_i32_1 = arith.constant 0 : i32
    %c0_i32_2 = arith.constant 0 : i32
    return %c0_i32, %c0_i32_0, %c0_i32_1 : i32, i32, i32
  }
  func.func @transform_18(%arg0: i32) -> (i32, i32) {
    %c0_i32 = arith.constant 0 : i32
    %c0_i32_0 = arith.constant 0 : i32
    %c0_i32_1 = arith.constant 0 : i32
    return %c0_i32, %c0_i32_0 : i32, i32
  }
  func.func @transform_19(%arg0: i32) -> (i32, i32) {
    %c0_i32 = arith.constant 0 : i32
    %c0_i32_0 = arith.constant 0 : i32
    %c0_i32_1 = arith.constant 0 : i32
    return %c0_i32, %c0_i32_0 : i32, i32
  }
  func.func @transform_20(%arg0: i32) -> (i32, i32) {
    %c0_i32 = arith.constant 0 : i32
    %c0_i32_0 = arith.constant 0 : i32
    return %arg0, %c0_i32 : i32, i32
  }
}

</mosaic_0001>

<bundles_post_ra>
// kernel: transformer_emb_forward.1
= control target key start
LH: loop header
LB: loop body
LE: loop exit
PB: predicated region body
PF: predicated region fallthrough
CT: control target
= control target key end

     0   :  { %s18668_s0 = inlined_call_operand.vmem [shape: f32[16,256,64], index: 0, kind: input, shape index: {}]   ;;  %s18669_s1 = inlined_call_operand.vmem [shape: f32[8,256], index: 1, kind: input, shape index: {}]   ;;  %s18670_s2 = inlined_call_operand.hbm [shape: bf16[256,256], index: 2, kind: input, shape index: {}]   ;;  %s18671_s3 = inlined_call_operand.vmem [shape: f32[1,256], index: 3, kind: input, shape index: {}]   ;;  %s18672_s4 = inlined_call_operand.hbm [shape: bf16[256,256], index: 4, kind: input, shape index: {}]   ;;  %s18673_s5 = inlined_call_operand.vmem [shape: f32[1,256], index: 5, kind: input, shape index: {}]   ;;  %s18674_s6 = inlined_call_operand.hbm [shape: bf16[256,256], index: 6, kind: input, shape index: {}]   ;;  %s18675_s7 = inlined_call_operand.vmem [shape: f32[1,256], index: 7, kind: input, shape index: {}]   ;;  %s18676_s8 = inlined_call_operand.vmem [shape: f32[2,2,256], index: 8, kind: input, shape index: {}]   ;;  %s18677_s9 = inlined_call_operand.vmem [shape: f32[2,2,256], index: 9, kind: input, shape index: {}]   ;;  %s18678_s10 = inlined_call_operand.vmem [shape: bf16[2,256,768], index: 10, kind: input, shape index: {}]   ;;  %s18679_s11 = inlined_call_operand.vmem [shape: f32[2,1,768], index: 11, kind: input, shape index: {}]   ;;  %s18680_s12 = inlined_call_operand.vmem [shape: bf16[2,256,256], index: 12, kind: input, shape index: {}]   ;;  %s18681_s13 = inlined_call_operand.hbm [shape: f32[2,1,256], index: 13, kind: input, shape index: {}]   ;;  %s18682_s14 = inlined_call_operand.vmem [shape: bf16[2,256,1024], index: 14, kind: input, shape index: {}]   ;;  %s18683_s15 = inlined_call_operand.vmem [shape: f32[2,1,1024], index: 15, kind: input, shape index: {}]   ;;  %s18684_s16 = inlined_call_operand.vmem [shape: bf16[2,1024,256], index: 16, kind: input, shape index: {}]   ;;  %s18685_s17 = inlined_call_operand.hbm [shape: f32[2,1,256], index: 17, kind: input, shape index: {}]   ;;  %s18686_s18 = inlined_call_operand.hbm [shape: bf16[256,128], index: 18, kind: input, shape index: {}]   ;;  %s18687_s19 = inlined_call_operand.vmem [shape: f32[1,128], index: 19, kind: input, shape index: {}]   ;;  %s18688_s20 = inlined_call_operand.hbm [shape: f32[16,128], index: 20, kind: output, shape index: {}]  }
   0x1   :  { %18715 = sst [smem:[#allocation31_spill]] %s18668_s0 }
   0x2   :  { %18716 = sst [smem:[#allocation32_spill]] %s18669_s1 }
   0x3   :  { %18717 = sst [smem:[#allocation33_spill]] %s18670_s2 }
   0x4   :  { %18718 = sst [smem:[#allocation34_spill]] %s18671_s3 }
   0x5   :  { %18719 = sst [smem:[#allocation35_spill]] %s18672_s4 }
   0x6   :  { %18720 = sst [smem:[#allocation36_spill]] %s18682_s14 }
   0x7   :  { %18721 = sst [smem:[#allocation37_spill]] %s18683_s15 }
   0x8   :  { %18722 = sst [smem:[#allocation38_spill]] %s18684_s16 }
   0x9   :  { %18723 = sst [smem:[#allocation39_spill]] %s18687_s19 }
   0xa   :  { %18724 = sst [smem:[#allocation40_spill]] %s18688_s20 }
   0xb   :  { %25 = vsyncpa [#allocation3], 0 }
   0xc   :  { %26 = vsyncpa [#allocation6], 0 }
   0xd   :  { %27 = vsyncpa [#allocation9], 0 }
   0xe   :  { %28 = vsyncpa [#allocation12], 0 }
   0xf   :  { %29 = vsyncpa [#allocation4], 0 }
  0x10   :  { %31 = vsyncpa [#allocation4 + $0x1], 0  ;;  %s14413_s1 = smov 0   ;;  %s14415_s22 = smov 0  }
  0x11   :  { %s14417_s23 = smov 0   ;;  %s14419_s24 = smov 0  }
  0x12   :  { %18725 = sst [smem:[#allocation19_spill]] %s14419_s24 }
  0x13 LB: > { %s18727_s24 = sld [smem:[#allocation19_spill]]  ;;  %18729 = sst [smem:[#allocation20_spill]] %s14280_s22  ;;  %s14284_s23 = sphi %s14417_s23, %s18795_s23   ;;  %s14280_s22 = sphi %s14415_s22, %s18794_s22   ;;  %s14276_s1 = sphi %s14413_s1, %s18797_s1  }
  0x14   : > { %18728 = sst [smem:[#allocation19_spill]] %s14276_s1  ;;  %s469_s26 = sadd.s32 1, %s14284_s23 }
  0x15   : > { %18730 = sst [smem:[#allocation21_spill]] %s14284_s23  ;;  %p479_p0 = scmp.ne.s32.totalorder %s14284_s23, %s14280_s22 }
  0x16   : > { %p485_p3 = scmp.ne.s32.totalorder %s14280_s22, %s14276_s1  ;;  %s14290_s0 = smov [#allocation5]  }
  0x17   : > { %s524_s21 = sshll.u32 %s14290_s0, 4  ;;  %s525_s21 = int_to_ptr.vmem [resolvable:$true] %s524_s21 }
  0x19   : > { %18731 = sst [smem:[#allocation22_spill]] %s18727_s24  ;;  %s14434_s2 = sadd.s32 4294967295, %s18727_s24  }
  0x1a   : > { %s11032_s25 = sadd.s32 4294967294, %s18727_s24   ;;  %s14438_s3 = sadd.s32 1, %s18727_s24  }
  0x1b   : > { %18732 = sst [smem:[#allocation23_spill]] %s14438_s3  ;;  %s466_s27 = ssub.s32 %s18727_s24, %s14438_s3 }
  0x1c   : > { %p467_p1 = scmp.eq.s32.totalorder %s466_s27, 0  ;;  %p480_p2 = scmp.eq.s32.totalorder %s14434_s2, 1 }
  0x1d   : > { %p486_p4 = scmp.eq.s32.totalorder %s11032_s25, 1  ;;  %p11033_p7 = scmp.ge.s32.totalorder %s18727_s24, 1 }
  0x1e   : > { %s14449_s28 = scalar_select %p467_p1, %s14284_s23, %s469_s26  }
  0x1f   : > { %p14451_p5 = por %p480_p2, %p479_p0  ;;  %p14455_p6 = por %p486_p4, %p485_p3 }
  0x20   : > { %18733 = sst [smem:[#allocation24_spill]] %s14449_s28  ;;  %p493_p8 = scmp.lt.s32.totalorder %s18727_s24, 3 }
  0x21   : > { %s18734_s4 = scalar_select %p14451_p5, 1, 0 }
  0x22   : > { %s18736_s29 = scalar_select %p14455_p6, 1, 0 }
  0x23   : > { %18735 = sst [smem:[#allocation25_spill]] %s18734_s4  ;;  %p18699_p9 = scmp.eq.s32.totalorder %s14434_s2, 0 }
  0x24   : > { %18737 = sst [smem:[#allocation26_spill]] %s18736_s29  ;;  %p14462_p10 = pnand %p11033_p7, %p493_p8 }
  0x25   : > { %s14291_s26 = smov [#allocation8]   ;;  %s18740_s3 = sld [smem:[#allocation35_spill]] }
  0x26   : > { %s18738_s30 = scalar_select %p14462_p10, 1, 0 }
  0x27   : > { %p12886_p11 = pneg %p14462_p10  ;;  %s571_s27 = sshll.u32 %s14291_s26, 4  ;;  %s14474_s27 = int_to_ptr.vmem [resolvable:$true] %s571_s27 }
  0x29   : > { %p14470_p12 = pnand %p18699_p9, %p12886_p11 }
  0x2b   : > { %s14042_s29 = scalar_lea.hbm %s18740_s3, 4096  ;;  %p14484_p0 = pneg %p14470_p12 }
  0x2c   : > { %p14043_p13 = scmp.ne.s32.totalorder %s18740_s3, %s14042_s29  ;;  %p14049_p3 = scmp.lt.u32.totalorder %s14042_s29, %s18740_s3 }
  0x2e   : > { %p14045_p1 = pnand %p14484_p0, %p14043_p13 }
  0x30   : > { %p14046_p2 = pneg %p14045_p1 }
  0x32   : > { %p14051_p4 = pnand %p14049_p3, %p14046_p2 }
  0x34   : > { %14054 = shalt.err (!%p14051_p4)
}
  0x35   : > { %s14055_s23 = scalar_lea.vmem %s525_s21, 4096  ;;  %p14063_p9 = scmp.lt.s32.totalorder %s525_s21, %s525_s21 }
  0x36   : > { %p14056_p7 = scmp.ne.s32.totalorder %s525_s21, %s14055_s23  ;;  %p14064_p6 = scmp.lt.s32.totalorder %s14055_s23, %s14055_s23 }
  0x38   : > { %p14058_p8 = pnand %p14056_p7, %p14484_p0  ;;  %p14065_p5 = por %p14064_p6, %p14063_p9 }
  0x3a   : > { %p14059_p11 = pneg %p14058_p8 }
  0x3c   : > { %p14066_p10 = pnand %p14065_p5, %p14059_p11 }
  0x3e   : > { %14069 = shalt.err (!%p14066_p10)
}
  0x3f   : > { %s18706_s1 = smov 128   ;;  %s18708_s24 = smov 8  }
  0x40   : > { %12892 = dma.hbm_to_vmem [thread:$0]  (!%p14470_p12), %s18740_s3, 4096, %s525_s21, [#allocation6], %s18706_s1, %s18706_s1, %s18708_s24  }
  0x41   : > { %s14070_s4 = scalar_lea.hbm %s18681_s13, 64 }
  0x42   : > { %p14071_p5 = scmp.ne.s32.totalorder %s18681_s13, %s14070_s4  ;;  %p14077_p10 = scmp.lt.u32.totalorder %s14070_s4, %s18681_s13 }
  0x44   : > { %p14073_p6 = pnand %p14071_p5, %p14484_p0 }
  0x46   : > { %p14074_p9 = pneg %p14073_p6 }
  0x48   : > { %p14079_p13 = pnand %p14077_p10, %p14074_p9 }
  0x4a   : > { %14082 = shalt.err (!%p14079_p13)
}
  0x4b   : > { %s14083_s21 = scalar_lea.vmem %s14474_s27, 64  ;;  %p14091_p4 = scmp.lt.s32.totalorder %s14474_s27, %s14474_s27 }
  0x4c   : > { %p14084_p1 = scmp.ne.s32.totalorder %s14474_s27, %s14083_s21  ;;  %p14092_p7 = scmp.lt.s32.totalorder %s14083_s21, %s14083_s21 }
  0x4e   : > { %p14086_p2 = pnand %p14084_p1, %p14484_p0  ;;  %p14093_p8 = por %p14092_p7, %p14091_p4 }
  0x50   : > { %p14087_p3 = pneg %p14086_p2 }
  0x52   : > { %p14094_p11 = pnand %p14093_p8, %p14087_p3 }
  0x54   : > { %14097 = shalt.err (!%p14094_p11)
}
  0x55   : > { %s18713_s19 = smov 32   ;;  %s14295_s15 = smov 2  }
  0x56   : > { %12898 = dma.hbm_to_vmem [thread:$0]  (!%p14470_p12), %s18681_s13, 64, %s14474_s27, [#allocation9], %s18713_s19, %s18713_s19, %s14295_s15  }
  0x57   : > { %s14296_s20 = smov [#allocation2]   ;;  %s14297_s29 = smov [#allocation7]  }
  0x58   : > { %s508_s28 = sshll.u32 %s14296_s20, 4  ;;  %s540_s26 = sshll.u32 %s14297_s29, 4  ;;  %s509_s28 = int_to_ptr.vmem [resolvable:$true] %s508_s28  ;;  %s14529_s26 = int_to_ptr.vmem [resolvable:$true] %s540_s26 }
  0x59   : > { %s18742_s1 = sld [smem:[#allocation33_spill]] }
  0x5f   : > { %s18743_s24 = smov %s18742_s1  ;;  %s14098_s3 = scalar_lea.hbm %s18742_s1, 4096 }
  0x60   : > { %p14099_p5 = scmp.ne.s32.totalorder %s18743_s24, %s14098_s3  ;;  %p14105_p10 = scmp.lt.u32.totalorder %s14098_s3, %s18743_s24 }
  0x62   : > { %p14101_p6 = pnand %p14099_p5, %p14484_p0 }
  0x64   : > { %p14102_p9 = pneg %p14101_p6 }
  0x66   : > { %p14107_p13 = pnand %p14105_p10, %p14102_p9 }
  0x68   : > { %14110 = shalt.err (!%p14107_p13)
}
  0x69   : > { %s14111_s4 = scalar_lea.vmem %s509_s28, 4096  ;;  %p14119_p4 = scmp.lt.s32.totalorder %s509_s28, %s509_s28 }
  0x6a   : > { %p14112_p1 = scmp.ne.s32.totalorder %s509_s28, %s14111_s4  ;;  %p14120_p7 = scmp.lt.s32.totalorder %s14111_s4, %s14111_s4 }
  0x6c   : > { %p14114_p2 = pnand %p14112_p1, %p14484_p0  ;;  %p14121_p8 = por %p14120_p7, %p14119_p4 }
  0x6e   : > { %p14115_p3 = pneg %p14114_p2 }
  0x70   : > { %p14122_p11 = pnand %p14121_p8, %p14115_p3 }
  0x72   : > { %14125 = shalt.err (!%p14122_p11)
}
  0x73   : > { %s18744_s14 = smov 8   ;;  %s18745_s16 = smov 128  }
  0x74   : > { %12889 = dma.hbm_to_vmem [thread:$0]  (!%p14470_p12), %s18743_s24, 4096, %s509_s28, [#allocation3], %s18745_s16, %s18745_s16, %s18744_s14  }
  0x75   : > { %s14126_s23 = scalar_lea.hbm %s18674_s6, 4096 }
  0x76   : > { %p14127_p5 = scmp.ne.s32.totalorder %s18674_s6, %s14126_s23  ;;  %p14133_p10 = scmp.lt.u32.totalorder %s14126_s23, %s18674_s6 }
  0x78   : > { %p14129_p6 = pnand %p14127_p5, %p14484_p0 }
  0x7a   : > { %p14130_p9 = pneg %p14129_p6 }
  0x7c   : > { %p14135_p13 = pnand %p14133_p10, %p14130_p9 }
  0x7e   : > { %14138 = shalt.err (!%p14135_p13)
}
  0x7f   : > { %s14139_s28 = scalar_lea.vmem %s14529_s26, 4096  ;;  %p14147_p4 = scmp.lt.s32.totalorder %s14529_s26, %s14529_s26 }
  0x80   : > { %p14140_p1 = scmp.ne.s32.totalorder %s14529_s26, %s14139_s28  ;;  %p14148_p7 = scmp.lt.s32.totalorder %s14139_s28, %s14139_s28 }
  0x82   : > { %p14142_p2 = pnand %p14140_p1, %p14484_p0  ;;  %p14149_p8 = por %p14148_p7, %p14147_p4 }
  0x84   : > { %p14143_p3 = pneg %p14142_p2 }
  0x86   : > { %p14150_p11 = pnand %p14149_p8, %p14143_p3 }
  0x88   : > { %14153 = shalt.err (!%p14150_p11)
}
  0x89   : > { %12895 = dma.hbm_to_vmem [thread:$0]  (!%p14470_p12), %s18674_s6, 4096, %s14529_s26, [#allocation6], %s18745_s16, %s18745_s16, %s18744_s14  }
  0x8a   : > { %s14298_s20 = smov [#allocation10]   ;;  %s14299_s23 = smov [#allocation11]  }
  0x8b   : > { %s593_s29 = sshll.u32 %s14298_s20, 4  ;;  %s606_s21 = sshll.u32 %s14299_s23, 4  ;;  %s594_s29 = int_to_ptr.vmem [resolvable:$true] %s593_s29  ;;  %s14578_s21 = int_to_ptr.vmem [resolvable:$true] %s606_s21 }
  0x8c   : > { %s14154_s4 = scalar_lea.hbm %s18685_s17, 64 }
  0x8d   : > { %p14155_p5 = scmp.ne.s32.totalorder %s18685_s17, %s14154_s4  ;;  %p14161_p10 = scmp.lt.u32.totalorder %s14154_s4, %s18685_s17 }
  0x8f   : > { %p14157_p6 = pnand %p14155_p5, %p14484_p0 }
  0x91   : > { %p14158_p9 = pneg %p14157_p6 }
  0x93   : > { %p14163_p13 = pnand %p14161_p10, %p14158_p9 }
  0x95   : > { %14166 = shalt.err (!%p14163_p13)
}
  0x96   : > { %s14167_s14 = scalar_lea.vmem %s594_s29, 64  ;;  %p14175_p4 = scmp.lt.s32.totalorder %s594_s29, %s594_s29 }
  0x97   : > { %p14168_p1 = scmp.ne.s32.totalorder %s594_s29, %s14167_s14  ;;  %p14176_p7 = scmp.lt.s32.totalorder %s14167_s14, %s14167_s14 }
  0x99   : > { %p14170_p2 = pnand %p14168_p1, %p14484_p0  ;;  %p14177_p8 = por %p14176_p7, %p14175_p4 }
  0x9b   : > { %p14171_p3 = pneg %p14170_p2 }
  0x9d   : > { %p14178_p11 = pnand %p14177_p8, %p14171_p3 }
  0x9f   : > { %14181 = shalt.err (!%p14178_p11)
}
  0xa0   : > { %s18746_s19 = smov 32   ;;  %s14182_s22 = scalar_lea.hbm %s18686_s18, 2048 }
  0xa1   : > { %12901 = dma.hbm_to_vmem [thread:$0]  (!%p14470_p12), %s18685_s17, 64, %s594_s29, [#allocation9], %s18746_s19, %s18746_s19, %s14295_s15  }
  0xa2   : > { %p14183_p5 = scmp.ne.s32.totalorder %s18686_s18, %s14182_s22  ;;  %p14189_p10 = scmp.lt.u32.totalorder %s14182_s22, %s18686_s18 }
  0xa4   : > { %p14185_p6 = pnand %p14183_p5, %p14484_p0 }
  0xa6   : > { %p14186_p9 = pneg %p14185_p6 }
  0xa8   : > { %p14191_p13 = pnand %p14189_p10, %p14186_p9 }
  0xaa   : > { %14194 = shalt.err (!%p14191_p13)
}
  0xab   : > { %s14195_s15 = scalar_lea.vmem %s14578_s21, 2048  ;;  %p14203_p4 = scmp.lt.s32.totalorder %s14578_s21, %s14578_s21 }
  0xac   : > { %p14196_p1 = scmp.ne.s32.totalorder %s14578_s21, %s14195_s15  ;;  %p14204_p7 = scmp.lt.s32.totalorder %s14195_s15, %s14195_s15 }
  0xae   : > { %p14198_p2 = pnand %p14196_p1, %p14484_p0  ;;  %p14205_p8 = por %p14204_p7, %p14203_p4 }
  0xb0   : > { %p14199_p3 = pneg %p14198_p2 }
  0xb2   : > { %p14206_p11 = pnand %p14205_p8, %p14199_p3 }
  0xb4   : > { %14209 = shalt.err (!%p14206_p11)
}
  0xb5   : > { %s14300_s29 = smov 64   ;;  %s14301_s26 = smov 4  }
  0xb6   : > { %12904 = dma.hbm_to_vmem [thread:$0]  (!%p14470_p12), %s18686_s18, 2048, %s14578_s21, [#allocation12], %s14300_s29, %s14300_s29, %s14301_s26  }
  0xb7   : > { %p18747_p5 = scmp.ne.s32.totalorder %s18738_s30, 0 }
  0xb9   : > { %635 = sbr.rel (%p18747_p5) target bundleno = 7539 (0x1d73), region = 100 }
  0xc0   : > { %p18748_p0 = scmp.eq.s32.totalorder %s14434_s2, 0 }
  0xc2   : > { %14255 = dma.done.wait (%p18748_p0), [#allocation3], 4096   ;;  %p18749_p6 = pmov %p18748_p0 }
  0xc3   : > { %p18750_p9 = pmov %p18748_p0 }
  0xc4   : > { %14257 = vsyncadd (%p18749_p6), [#allocation3], 4294963200 }
  0xc5   : > { %14259 = dma.done.wait (%p18750_p9), [#allocation6], 8192   ;;  %p18751_p10 = pmov %p18748_p0 }
  0xc6   : > { %p18752_p13 = pmov %p18748_p0 }
  0xc7   : > { %14261 = vsyncadd (%p18751_p10), [#allocation6], 4294959104 }
  0xc8   : > { %14263 = dma.done.wait (%p18752_p13), [#allocation9], 128   ;;  %p18753_p12 = pmov %p18748_p0 }
  0xc9   : > { %p18754_p1 = pmov %p18748_p0 }
  0xca   : > { %14265 = vsyncadd (%p18753_p12), [#allocation9], 4294967168 }
  0xcb   : > { %14267 = dma.done.wait (%p18754_p1), [#allocation12], 2048   ;;  %p18755_p2 = pmov %p18748_p0 }
  0xcc   : > { %s11049_s30 = sshll.u32 %s14434_s2, 3  ;;  %vm754_vm0 = vcmask 523264   ;;  %s18756_s16 = sld [smem:[#allocation31_spill]]  ;;  %vm1754_vm1 = vcmask 7168   ;;  %vm1787_vm2 = vcmask 15360   ;;  %vm1820_vm3 = vcmask 23552  }
  0xcd   : > { %14269 = vsyncadd (%p18755_p2), [#allocation12], 4294965248  ;;  %p715_p3 = scmp.lt.s32.totalorder %s11049_s30, 15  ;;  %vm1853_vm4 = vcmask 31744   ;;  %vm1886_vm5 = vcmask 39936   ;;  %vm1919_vm6 = vcmask 48128  }
  0xce   : > { %vm1952_vm7 = vcmask 56320   ;;  %s18775_s22 = sld [smem:[#allocation34_spill]]  ;;  %s18776_s26 = sld [smem:[#allocation32_spill]]  ;;  %vm14303_vm8 = vmmov 0   ;;  %vm3595_vm9 = vcmask 261120   ;;  %vm3659_vm10 = vcmask 1043456  }
  0xcf   : > { %s18800_s30 = smov (!%p715_p3, %s11049_s30), 15  ;;  %vm3643_vm11 = vcmask 64512   ;;  %s14304_s28 = smov 96   ;;  %vm4509_vm12 = vcmask 785408  }
  0xd0   : > { %s12581_s25 = sshll.u32 %s18800_s30, 8  ;;  %s14305_s1 = smov 64  }
  0xd1   : > { %s14306_s15 = smov 32   ;;  %s18777_s23 = sld [smem:[#allocation36_spill]] }
  0xd2   : > { %s14646_s3 = scalar_lea.vmem %s18756_s16, %s12581_s25  ;;  %s18781_s29 = sld [smem:[#allocation37_spill]] }
  0xd3   : > { %v738_v0 = vld [vmem:[%s14646_s3 + $0x80] sm:$0xff]  ;;  %v739_v9 = vld [vmem:[%s14646_s3 + $0x88] sm:$0xff]  ;;  %v740_v28 = vld [vmem:[%s14646_s3 + $0x90] sm:$0xff]  ;;  %s18783_s25 = sld [smem:[#allocation39_spill]]  ;;  %s12578_s21 = sshll.u32 %s14434_s2, 7 }
  0xd4   : > { %v722_v1 = vld [vmem:[%s14646_s3] sm:$0xff]  ;;  %v803_v3 = vsel %vm754_vm0, %v738_v0, -inf  ;;  %v806_v11 = vsel %vm754_vm0, %v739_v9, -inf  ;;  %v11069_v12 = vld [vmem:[%s14646_s3 + $0x188] sm:$0xff]  ;;  %v11070_v29 = vld [vmem:[%s14646_s3 + $0x190] sm:$0xff]  ;;  %v809_v30 = vsel %vm754_vm0, %v740_v28, -inf }
  0xd5   : > { %v11068_v2 = vld [vmem:[%s14646_s3 + $0x180] sm:$0xff]  ;;  %v755_v4 = vsel %vm754_vm0, %v722_v1, -inf  ;;  %804 = vmax.xlane.f32.xlu0 %v803_v3  ;;  %v935_v14 = vsel %vm754_vm0, %v11069_v12, -inf  ;;  %v723_v17 = vld [vmem:[%s14646_s3 + $0x8] sm:$0xff]  ;;  %v938_v31 = vsel %vm754_vm0, %v11070_v29, -inf  ;;  %v724_v40 = vld [vmem:[%s14646_s3 + $0x10] sm:$0xff] }
  0xd6   : > { %v11052_v5 = vld [vmem:[%s14646_s3 + $0x100] sm:$0xff]  ;;  %756 = vmax.xlane.f32.xlu1 %v755_v4  ;;  %v932_v6 = vsel %vm754_vm0, %v11068_v2, -inf  ;;  %v758_v19 = vsel %vm754_vm0, %v723_v17, -inf  ;;  %v11053_v20 = vld [vmem:[%s14646_s3 + $0x108] sm:$0xff]  ;;  %v11054_v41 = vld [vmem:[%s14646_s3 + $0x110] sm:$0xff]  ;;  %v761_v42 = vsel %vm754_vm0, %v724_v40, -inf }
  0xd7   : > { %v884_v7 = vsel %vm754_vm0, %v11052_v5, -inf  ;;  %v11100_v8 = vld [vmem:[%s14646_s3 + $0x280] sm:$0xff]  ;;  %v11101_v21 = vld [vmem:[%s14646_s3 + $0x288] sm:$0xff]  ;;  %v887_v22 = vsel %vm754_vm0, %v11053_v20, -inf  ;;  %v890_v43 = vsel %vm754_vm0, %v11054_v41, -inf  ;;  %v11102_v44 = vld [vmem:[%s14646_s3 + $0x290] sm:$0xff]  ;;  %s18778_s27 = smov %s18777_s23 }
  0xd8   : > { %v1061_v10 = vsel %vm754_vm0, %v11100_v8, -inf  ;;  %v11084_v13 = vld [vmem:[%s14646_s3 + $0x200] sm:$0xff]  ;;  %v1064_v23 = vsel %vm754_vm0, %v11101_v21, -inf  ;;  %v11085_v32 = vld [vmem:[%s14646_s3 + $0x208] sm:$0xff]  ;;  %v1067_v46 = vsel %vm754_vm0, %v11102_v44, -inf  ;;  %v741_v53 = vld [vmem:[%s14646_s3 + $0x98] sm:$0xff] }
  0xd9   : > { %933 = vmax.xlane.f32.xlu0 %v932_v6  ;;  %v1013_v15 = vsel %vm754_vm0, %v11084_v13, -inf  ;;  %v11132_v16 = vld [vmem:[%s14646_s3 + $0x380] sm:$0xff]  ;;  %v11133_v33 = vld [vmem:[%s14646_s3 + $0x388] sm:$0xff]  ;;  %v1016_v34 = vsel %vm754_vm0, %v11085_v32, -inf  ;;  %v812_v55 = vsel %vm754_vm0, %v741_v53, -inf  ;;  %v11071_v56 = vld [vmem:[%s14646_s3 + $0x198] sm:$0xff] }
  0xda   : > { %885 = vmax.xlane.f32.xlu1 %v884_v7  ;;  %v1190_v18 = vsel %vm754_vm0, %v11132_v16, -inf  ;;  %v11116_v24 = vld [vmem:[%s14646_s3 + $0x300] sm:$0xff]  ;;  %v1193_v35 = vsel %vm754_vm0, %v11133_v33, -inf  ;;  %v11117_v45 = vld [vmem:[%s14646_s3 + $0x308] sm:$0xff]  ;;  %v11086_v57 = vld [vmem:[%s14646_s3 + $0x210] sm:$0xff]  ;;  %v941_v58 = vsel %vm754_vm0, %v11071_v56, -inf }
  0xdb   : > { %v11164_v25 = vld [vmem:[%s14646_s3 + $0x480] sm:$0xff]  ;;  %v1142_v26 = vsel %vm754_vm0, %v11116_v24, -inf  ;;  %v1145_v47 = vsel %vm754_vm0, %v11117_v45, -inf  ;;  %v11165_v48 = vld [vmem:[%s14646_s3 + $0x488] sm:$0xff]  ;;  %v1019_v59 = vsel %vm754_vm0, %v11086_v57, -inf  ;;  %v11134_v60 = vld [vmem:[%s14646_s3 + $0x390] sm:$0xff] }
  0xdc   : > { %v1319_v27 = vsel %vm754_vm0, %v11164_v25, -inf  ;;  %v11148_v36 = vld [vmem:[%s14646_s3 + $0x400] sm:$0xff]  ;;  %v1322_v50 = vsel %vm754_vm0, %v11165_v48, -inf  ;;  %v11149_v61 = vld [vmem:[%s14646_s3 + $0x408] sm:$0xff]  ;;  %v1196_v62 = vsel %vm754_vm0, %v11134_v60, -inf  ;;  %v725_v5 = vld [vmem:[%s14646_s3 + $0x18] sm:$0xff] }
  0xdd   : > { %1062 = vmax.xlane.f32.xlu0 %v1061_v10  ;;  %v11196_v37 = vld [vmem:[%s14646_s3 + $0x580] sm:$0xff]  ;;  %v1271_v38 = vsel %vm754_vm0, %v11148_v36, -inf  ;;  %v1274_v63 = vsel %vm754_vm0, %v11149_v61, -inf  ;;  %v11197_v0 = vld [vmem:[%s14646_s3 + $0x588] sm:$0xff]  ;;  %v764_v7 = vsel %vm754_vm0, %v725_v5, -inf  ;;  %v11055_v8 = vld [vmem:[%s14646_s3 + $0x118] sm:$0xff] }
  0xde   : > { %807 = vmax.xlane.f32.xlu1 %v806_v11  ;;  %v1448_v39 = vsel %vm754_vm0, %v11196_v37, -inf  ;;  %v11180_v49 = vld [vmem:[%s14646_s3 + $0x500] sm:$0xff]  ;;  %v1451_v2 = vsel %vm754_vm0, %v11197_v0, -inf  ;;  %v11103_v9 = vld [vmem:[%s14646_s3 + $0x298] sm:$0xff]  ;;  %v893_v10 = vsel %vm754_vm0, %v11055_v8, -inf  ;;  %v11118_v12 = vld [vmem:[%s14646_s3 + $0x310] sm:$0xff] }
  0xdf   : > { %v1400_v51 = vsel %vm754_vm0, %v11180_v49, -inf  ;;  %v11228_v52 = vld [vmem:[%s14646_s3 + $0x680] sm:$0xff]  ;;  %v1070_v11 = vsel %vm754_vm0, %v11103_v9, -inf  ;;  %v11166_v13 = vld [vmem:[%s14646_s3 + $0x490] sm:$0xff]  ;;  %v11181_v16 = vld [vmem:[%s14646_s3 + $0x508] sm:$0xff]  ;;  %s18784_s0 = sld [smem:[#allocation25_spill]] }
  0xe0   : > { %v1577_v54 = vsel %vm754_vm0, %v11228_v52, -inf  ;;  %v11212_v1 = vld [vmem:[%s14646_s3 + $0x600] sm:$0xff]  ;;  %v11229_v17 = vld [vmem:[%s14646_s3 + $0x688] sm:$0xff]  ;;  %v11087_v25 = vld [vmem:[%s14646_s3 + $0x218] sm:$0xff]  ;;  %s14307_s2 = smov [#allocation13]  }
  0xe1   : > { %936 = vmax.xlane.f32.xlu0 %v935_v14  ;;  %v1529_v3 = vsel %vm754_vm0, %v11212_v1, -inf  ;;  %v11260_v4 = vld [vmem:[%s14646_s3 + $0x780] sm:$0xff]  ;;  %v1148_v14 = vsel %vm754_vm0, %v11118_v12, -inf  ;;  %v11135_v28 = vld [vmem:[%s14646_s3 + $0x398] sm:$0xff]  ;;  %v11150_v29 = vld [vmem:[%s14646_s3 + $0x410] sm:$0xff] }
  0xe2   : > { %1014 = vmax.xlane.f32.xlu1 %v1013_v15  ;;  %v1706_v6 = vsel %vm754_vm0, %v11260_v4, -inf  ;;  %v1325_v15 = vsel %vm754_vm0, %v11166_v13, -inf  ;;  %v11244_v20 = vld [vmem:[%s14646_s3 + $0x700] sm:$0xff]  ;;  %v11198_v32 = vld [vmem:[%s14646_s3 + $0x590] sm:$0xff]  ;;  %v11213_v33 = vld [vmem:[%s14646_s3 + $0x608] sm:$0xff] }
  0xe3   : > { %v742_v21 = vld [vmem:[%s14646_s3 + $0xa0] sm:$0xff]  ;;  %v11261_v36 = vld [vmem:[%s14646_s3 + $0x788] sm:$0xff]  ;;  %v11119_v44 = vld [vmem:[%s14646_s3 + $0x318] sm:$0xff] }
  0xe4   : > { %v11072_v24 = vld [vmem:[%s14646_s3 + $0x1a0] sm:$0xff]  ;;  %v11167_v45 = vld [vmem:[%s14646_s3 + $0x498] sm:$0xff]  ;;  %v11182_v48 = vld [vmem:[%s14646_s3 + $0x510] sm:$0xff] }
  0xe5   : > { %1191 = vmax.xlane.f32.xlu0 %v1190_v18  ;;  %v1403_v18 = vsel %vm754_vm0, %v11181_v16, -inf  ;;  %v726_v37 = vld [vmem:[%s14646_s3 + $0x20] sm:$0xff]  ;;  %v11230_v49 = vld [vmem:[%s14646_s3 + $0x690] sm:$0xff]  ;;  %v11245_v52 = vld [vmem:[%s14646_s3 + $0x708] sm:$0xff]  ;;  %p18787_p7 = scmp.ne.s32.totalorder %s18784_s0, 0 }
  0xe6   : > { %759 = vmax.xlane.f32.xlu1 %v758_v19  ;;  %v1580_v19 = vsel %vm754_vm0, %v11229_v17, -inf  ;;  %v11056_v40 = vld [vmem:[%s14646_s3 + $0x120] sm:$0xff]  ;;  %v743_v53 = vld [vmem:[%s14646_s3 + $0xa8] sm:$0xff]  ;;  %v11151_v61 = vld [vmem:[%s14646_s3 + $0x418] sm:$0xff] }
  0xe7   : > { %v11104_v41 = vld [vmem:[%s14646_s3 + $0x2a0] sm:$0xff]  ;;  %v11073_v56 = vld [vmem:[%s14646_s3 + $0x1a8] sm:$0xff]  ;;  %v11199_v0 = vld [vmem:[%s14646_s3 + $0x598] sm:$0xff] }
  0xe8   : > { %v11088_v57 = vld [vmem:[%s14646_s3 + $0x220] sm:$0xff]  ;;  %v11214_v1 = vld [vmem:[%s14646_s3 + $0x610] sm:$0xff]  ;;  %v727_v5 = vld [vmem:[%s14646_s3 + $0x28] sm:$0xff] }
  0xe9   : > { %888 = vmax.xlane.f32.xlu0 %v887_v22  ;;  %v1658_v22 = vsel %vm754_vm0, %v11244_v20, -inf  ;;  %v11136_v60 = vld [vmem:[%s14646_s3 + $0x3a0] sm:$0xff]  ;;  %v11262_v4 = vld [vmem:[%s14646_s3 + $0x790] sm:$0xff]  ;;  %v11057_v8 = vld [vmem:[%s14646_s3 + $0x128] sm:$0xff] }
  0xea   : > { %1065 = vmax.xlane.f32.xlu1 %v1064_v23  ;;  %v815_v23 = vsel %vm754_vm0, %v742_v21, -inf  ;;  %v11105_v9 = vld [vmem:[%s14646_s3 + $0x2a8] sm:$0xff]  ;;  %v11120_v12 = vld [vmem:[%s14646_s3 + $0x320] sm:$0xff]  ;;  %v11183_v16 = vld [vmem:[%s14646_s3 + $0x518] sm:$0xff] }
  0xeb   : > { %v11168_v13 = vld [vmem:[%s14646_s3 + $0x4a0] sm:$0xff]  ;;  %v11231_v17 = vld [vmem:[%s14646_s3 + $0x698] sm:$0xff]  ;;  %v1409_v20 = vsel %vm754_vm0, %v11183_v16, -inf }
  0xec   : > { %v1586_v21 = vsel %vm754_vm0, %v11231_v17, -inf }
  0xed   : > { %1143 = vmax.xlane.f32.xlu0 %v1142_v26  ;;  %v944_v26 = vsel %vm754_vm0, %v11072_v24, -inf }
  0xee   : > { %1320 = vmax.xlane.f32.xlu1 %v1319_v27  ;;  %v1022_v27 = vsel %vm754_vm0, %v11087_v25, -inf }
  0xf1   : > { %810 = vmax.xlane.f32.xlu0 %v809_v30  ;;  %v1199_v30 = vsel %vm754_vm0, %v11135_v28, -inf }
  0xf2   : > { %939 = vmax.xlane.f32.xlu1 %v938_v31  ;;  %v1277_v31 = vsel %vm754_vm0, %v11150_v29, -inf }
  0xf5   : > { %1017 = vmax.xlane.f32.xlu0 %v1016_v34  ;;  %v1454_v34 = vsel %vm754_vm0, %v11198_v32, -inf }
  0xf6   : > { %1194 = vmax.xlane.f32.xlu1 %v1193_v35  ;;  %v1532_v35 = vsel %vm754_vm0, %v11213_v33, -inf }
  0xf9   : > { %1272 = vmax.xlane.f32.xlu0 %v1271_v38  ;;  %v1709_v38 = vsel %vm754_vm0, %v11261_v36, -inf }
  0xfa   : > { %1449 = vmax.xlane.f32.xlu1 %v1448_v39  ;;  %v767_v39 = vsel %vm754_vm0, %v726_v37, -inf  ;;  %v11137_v37 = vld [vmem:[%s14646_s3 + $0x3a8] sm:$0xff] }
  0xfd   : > { %762 = vmax.xlane.f32.xlu0 %v761_v42  ;;  %v896_v42 = vsel %vm754_vm0, %v11056_v40, -inf }
  0xfe   : > { %891 = vmax.xlane.f32.xlu1 %v890_v43  ;;  %v1073_v43 = vsel %vm754_vm0, %v11104_v41, -inf  ;;  %v1205_v41 = vsel %vm754_vm0, %v11137_v37, -inf }
 0x101   : > { %1068 = vmax.xlane.f32.xlu0 %v1067_v46  ;;  %v1151_v46 = vsel %vm754_vm0, %v11119_v44, -inf }
 0x102   : > { %1146 = vmax.xlane.f32.xlu1 %v1145_v47  ;;  %v1328_v47 = vsel %vm754_vm0, %v11167_v45, -inf  ;;  %v11200_v45 = vld [vmem:[%s14646_s3 + $0x5a0] sm:$0xff] }
 0x105   : > { %1323 = vmax.xlane.f32.xlu0 %v1322_v50  ;;  %v1406_v50 = vsel %vm754_vm0, %v11182_v48, -inf }
 0x106   : > { %1401 = vmax.xlane.f32.xlu1 %v1400_v51  ;;  %v1583_v51 = vsel %vm754_vm0, %v11230_v49, -inf  ;;  %v1460_v49 = vsel %vm754_vm0, %v11200_v45, -inf }
 0x109   : > { %1578 = vmax.xlane.f32.xlu0 %v1577_v54  ;;  %v1661_v54 = vsel %vm754_vm0, %v11245_v52, -inf  ;;  %v11263_v52 = vld [vmem:[%s14646_s3 + $0x798] sm:$0xff] }
 0x10a   : > { %813 = vmax.xlane.f32.xlu1 %v812_v55  ;;  %v818_v55 = vsel %vm754_vm0, %v743_v53, -inf  ;;  %v728_v53 = vld [vmem:[%s14646_s3 + $0x30] sm:$0xff] }
 0x10d   : > { %942 = vmax.xlane.f32.xlu0 %v941_v58  ;;  %v947_v58 = vsel %vm754_vm0, %v11073_v56, -inf  ;;  %v1715_v56 = vsel %vm754_vm0, %v11263_v52, -inf }
 0x10e   : > { %1020 = vmax.xlane.f32.xlu1 %v1019_v59  ;;  %v1025_v59 = vsel %vm754_vm0, %v11088_v57, -inf  ;;  %v773_v57 = vsel %vm754_vm0, %v728_v53, -inf }
 0x111   : > { %1197 = vmax.xlane.f32.xlu0 %v1196_v62  ;;  %v1202_v62 = vsel %vm754_vm0, %v11136_v60, -inf  ;;  %v11058_v60 = vld [vmem:[%s14646_s3 + $0x130] sm:$0xff] }
 0x112   : > { %1275 = vmax.xlane.f32.xlu1 %v1274_v63  ;;  %v1280_v63 = vsel %vm754_vm0, %v11151_v61, -inf  ;;  %v11106_v61 = vld [vmem:[%s14646_s3 + $0x2b0] sm:$0xff] }
 0x115   : > { %1452 = vmax.xlane.f32.xlu0 %v1451_v2  ;;  %v1457_v2 = vsel %vm754_vm0, %v11199_v0, -inf  ;;  %v902_v0 = vsel %vm754_vm0, %v11058_v60, -inf }
 0x116   : > { %1530 = vmax.xlane.f32.xlu1 %v1529_v3  ;;  %v1535_v3 = vsel %vm754_vm0, %v11214_v1, -inf  ;;  %v1079_v1 = vsel %vm754_vm0, %v11106_v61, -inf }
 0x119   : > { %1707 = vmax.xlane.f32.xlu0 %v1706_v6  ;;  %v1712_v6 = vsel %vm754_vm0, %v11262_v4, -inf  ;;  %v11121_v4 = vld [vmem:[%s14646_s3 + $0x328] sm:$0xff] }
 0x11a   : > { %765 = vmax.xlane.f32.xlu1 %v764_v7  ;;  %v770_v7 = vsel %vm754_vm0, %v727_v5, -inf  ;;  %v11169_v5 = vld [vmem:[%s14646_s3 + $0x4a8] sm:$0xff] }
 0x11d   : > { %894 = vmax.xlane.f32.xlu0 %v893_v10  ;;  %v899_v10 = vsel %vm754_vm0, %v11057_v8, -inf  ;;  %v1157_v8 = vsel %vm754_vm0, %v11121_v4, -inf }
 0x11e   : > { %1071 = vmax.xlane.f32.xlu1 %v1070_v11  ;;  %v1076_v11 = vsel %vm754_vm0, %v11105_v9, -inf  ;;  %v1334_v9 = vsel %vm754_vm0, %v11169_v5, -inf }
 0x121   : > { %1149 = vmax.xlane.f32.xlu0 %v1148_v14  ;;  %v1154_v14 = vsel %vm754_vm0, %v11120_v12, -inf  ;;  %v11232_v12 = vld [vmem:[%s14646_s3 + $0x6a0] sm:$0xff] }
 0x122   : > { %1326 = vmax.xlane.f32.xlu1 %v1325_v15  ;;  %v1331_v15 = vsel %vm754_vm0, %v11168_v13, -inf  ;;  %v1589_v16 = vsel %vm754_vm0, %v11232_v12, -inf }
 0x125   : > { %1404 = vmax.xlane.f32.xlu0 %v1403_v18 }
 0x126   : > { %1581 = vmax.xlane.f32.xlu1 %v1580_v19 }
 0x129   : > { %1659 = vmax.xlane.f32.xlu0 %v1658_v22  ;;  %v11246_v22 = vld [vmem:[%s14646_s3 + $0x710] sm:$0xff] }
 0x12a   : > { %816 = vmax.xlane.f32.xlu1 %v815_v23  ;;  %v744_v23 = vld [vmem:[%s14646_s3 + $0xb0] sm:$0xff] }
 0x12d   : > { %945 = vmax.xlane.f32.xlu0 %v944_v26  ;;  %v1664_v26 = vsel %vm754_vm0, %v11246_v22, -inf }
 0x12e   : > { %1023 = vmax.xlane.f32.xlu1 %v1022_v27  ;;  %v821_v27 = vsel %vm754_vm0, %v744_v23, -inf }
 0x131   : > { %1200 = vmax.xlane.f32.xlu0 %v1199_v30  ;;  %v11074_v30 = vld [vmem:[%s14646_s3 + $0x1b0] sm:$0xff] }
 0x132   : > { %1278 = vmax.xlane.f32.xlu1 %v1277_v31  ;;  %v11089_v31 = vld [vmem:[%s14646_s3 + $0x228] sm:$0xff] }
 0x135   : > { %1455 = vmax.xlane.f32.xlu0 %v1454_v34  ;;  %v950_v34 = vsel %vm754_vm0, %v11074_v30, -inf }
 0x136   : > { %1533 = vmax.xlane.f32.xlu1 %v1532_v35  ;;  %v1028_v35 = vsel %vm754_vm0, %v11089_v31, -inf }
 0x139   : > { %1710 = vmax.xlane.f32.xlu0 %v1709_v38  ;;  %v11152_v38 = vld [vmem:[%s14646_s3 + $0x420] sm:$0xff] }
 0x13a   : > { %768 = vmax.xlane.f32.xlu1 %v767_v39 }
 0x13d   : > { %897 = vmax.xlane.f32.xlu0 %v896_v42  ;;  %v1283_v42 = vsel %vm754_vm0, %v11152_v38, -inf }
 0x13e   : > { %1074 = vmax.xlane.f32.xlu1 %v1073_v43 }
 0x141   : > { %1152 = vmax.xlane.f32.xlu0 %v1151_v46  ;;  %v11215_v46 = vld [vmem:[%s14646_s3 + $0x618] sm:$0xff] }
 0x142   : > { %1329 = vmax.xlane.f32.xlu1 %v1328_v47 }
 0x145   : > { %1407 = vmax.xlane.f32.xlu0 %v1406_v50  ;;  %v1538_v50 = vsel %vm754_vm0, %v11215_v46, -inf }
 0x146   : > { %1584 = vmax.xlane.f32.xlu1 %v1583_v51 }
 0x149   : > { %1662 = vmax.xlane.f32.xlu0 %v1661_v54 }
 0x14a   : > { %819 = vmax.xlane.f32.xlu1 %v818_v55 }
 0x14d   : > { %948 = vmax.xlane.f32.xlu0 %v947_v58 }
 0x14e   : > { %1026 = vmax.xlane.f32.xlu1 %v1025_v59 }
 0x151   : > { %1203 = vmax.xlane.f32.xlu0 %v1202_v62 }
 0x152   : > { %1281 = vmax.xlane.f32.xlu1 %v1280_v63 }
 0x155   : > { %1458 = vmax.xlane.f32.xlu0 %v1457_v2 }
 0x156   : > { %1536 = vmax.xlane.f32.xlu1 %v1535_v3 }
 0x159   : > { %1713 = vmax.xlane.f32.xlu0 %v1712_v6 }
 0x15a   : > { %771 = vmax.xlane.f32.xlu1 %v770_v7 }
 0x15d   : > { %900 = vmax.xlane.f32.xlu0 %v899_v10 }
 0x15e   : > { %1077 = vmax.xlane.f32.xlu1 %v1076_v11  ;;  %v11184_v11 = vld [vmem:[%s14646_s3 + $0x520] sm:$0xff] }
 0x161   : > { %1155 = vmax.xlane.f32.xlu0 %v1154_v14 }
 0x162   : > { %1332 = vmax.xlane.f32.xlu1 %v1331_v15  ;;  %v805_v18 = vpop.xlane.xlu0 %804  ;;  %v1412_v15 = vsel %vm754_vm0, %v11184_v11, -inf }
 0x163   : > { %v757_v19 = vpop.xlane.xlu1 %756 }
 0x165   : > { %1410 = vmax.xlane.f32.xlu0 %v1409_v20  ;;  %v745_v20 = vld [vmem:[%s14646_s3 + $0xb8] sm:$0xff] }
 0x166   : > { %1587 = vmax.xlane.f32.xlu1 %v1586_v21  ;;  %v934_v24 = vpop.xlane.xlu0 %933 }
 0x167   : > { %v886_v25 = vpop.xlane.xlu1 %885  ;;  %v1771_v28 = vsel %vm1754_vm1, %v805_v18, %v934_v24  ;;  %v824_v24 = vsel %vm754_vm0, %v745_v20, -inf }
 0x168   : > { %v1755_v29 = vsel %vm1754_vm1, %v757_v19, %v886_v25  ;;  %v11247_v19 = vld [vmem:[%s14646_s3 + $0x718] sm:$0xff] }
 0x169   : > { %1665 = vmax.xlane.f32.xlu0 %v1664_v26  ;;  %v1667_v23 = vsel %vm754_vm0, %v11247_v19, -inf }
 0x16a   : > { %822 = vmax.xlane.f32.xlu1 %v821_v27  ;;  %v1063_v32 = vpop.xlane.xlu0 %1062  ;;  %v11075_v27 = vld [vmem:[%s14646_s3 + $0x1b8] sm:$0xff] }
 0x16b   : > { %v808_v33 = vpop.xlane.xlu1 %807  ;;  %v1804_v36 = vsel %vm1787_vm2, %v1771_v28, %v1063_v32  ;;  %v11090_v28 = vld [vmem:[%s14646_s3 + $0x230] sm:$0xff]  ;;  %v953_v31 = vsel %vm754_vm0, %v11075_v27, -inf }
 0x16c   : > { %v1031_v32 = vsel %vm754_vm0, %v11090_v28, -inf }
 0x16d   : > { %951 = vmax.xlane.f32.xlu0 %v950_v34  ;;  %v11138_v34 = vld [vmem:[%s14646_s3 + $0x3b0] sm:$0xff] }
 0x16e   : > { %1029 = vmax.xlane.f32.xlu1 %v1028_v35  ;;  %v937_v39 = vpop.xlane.xlu0 %936  ;;  %v11153_v35 = vld [vmem:[%s14646_s3 + $0x428] sm:$0xff]  ;;  %v1208_v38 = vsel %vm754_vm0, %v11138_v34, -inf }
 0x16f   : > { %v1015_v40 = vpop.xlane.xlu1 %1014  ;;  %v1772_v43 = vsel %vm1754_vm1, %v808_v33, %v937_v39  ;;  %v1286_v39 = vsel %vm754_vm0, %v11153_v35, -inf }
 0x170   : > { %v1788_v44 = vsel %vm1787_vm2, %v1755_v29, %v1015_v40 }
 0x171   : > { %1206 = vmax.xlane.f32.xlu0 %v1205_v41 }
 0x172   : > { %1284 = vmax.xlane.f32.xlu1 %v1283_v42  ;;  %v1192_v47 = vpop.xlane.xlu0 %1191  ;;  %v11201_v42 = vld [vmem:[%s14646_s3 + $0x5a8] sm:$0xff] }
 0x173   : > { %v760_v48 = vpop.xlane.xlu1 %759  ;;  %v1837_v51 = vsel %vm1820_vm3, %v1804_v36, %v1192_v47  ;;  %v1463_v46 = vsel %vm754_vm0, %v11201_v42, -inf }
 0x175   : > { %1461 = vmax.xlane.f32.xlu0 %v1460_v49 }
 0x176   : > { %1539 = vmax.xlane.f32.xlu1 %v1538_v50  ;;  %v889_v54 = vpop.xlane.xlu0 %888  ;;  %v11264_v50 = vld [vmem:[%s14646_s3 + $0x7a0] sm:$0xff] }
 0x177   : > { %v1066_v55 = vpop.xlane.xlu1 %1065  ;;  %v1756_v58 = vsel %vm1754_vm1, %v760_v48, %v889_v54  ;;  %v1718_v54 = vsel %vm754_vm0, %v11264_v50, -inf }
 0x178   : > { %v1805_v59 = vsel %vm1787_vm2, %v1772_v43, %v1066_v55  ;;  %v11216_v43 = vld [vmem:[%s14646_s3 + $0x620] sm:$0xff] }
 0x179   : > { %1716 = vmax.xlane.f32.xlu0 %v1715_v56  ;;  %v1541_v47 = vsel %vm754_vm0, %v11216_v43, -inf }
 0x17a   : > { %774 = vmax.xlane.f32.xlu1 %v773_v57  ;;  %v1144_v62 = vpop.xlane.xlu0 %1143  ;;  %v11059_v57 = vld [vmem:[%s14646_s3 + $0x138] sm:$0xff] }
 0x17b   : > { %v1321_v63 = vpop.xlane.xlu1 %1320  ;;  %v1821_v2 = vsel %vm1820_vm3, %v1788_v44, %v1144_v62  ;;  %v905_v61 = vsel %vm754_vm0, %v11059_v57, -inf  ;;  %v13053_v57 = vld [vmem:[#allocation2 + $0x54] ss:$8 sps:$4 sm:$0xff]  }
 0x17c   : > { %v1870_v3 = vsel %vm1853_vm4, %v1837_v51, %v1321_v63  ;;  %v729_v51 = vld [vmem:[%s14646_s3 + $0x38] sm:$0xff] }
 0x17d   : > { %903 = vmax.xlane.f32.xlu0 %v902_v0  ;;  %v776_v55 = vsel %vm754_vm0, %v729_v51, -inf }
 0x17e   : > { %1080 = vmax.xlane.f32.xlu1 %v1079_v1  ;;  %v811_v6 = vpop.xlane.xlu0 %810  ;;  %v11122_v1 = vld [vmem:[%s14646_s3 + $0x330] sm:$0xff] }
 0x17f   : > { %v940_v7 = vpop.xlane.xlu1 %939  ;;  %v1160_v5 = vsel %vm754_vm0, %v11122_v1, -inf  ;;  %v11171_v1 = vld [vmem:[%s14646_s3 + $0x4b8] sm:$0xff] }
 0x180   : > { %v1773_v10 = vsel %vm1754_vm1, %v811_v6, %v940_v7 }
 0x181   : > { %1158 = vmax.xlane.f32.xlu0 %v1157_v8 }
 0x182   : > { %1335 = vmax.xlane.f32.xlu1 %v1334_v9  ;;  %v1018_v13 = vpop.xlane.xlu0 %1017  ;;  %v11185_v9 = vld [vmem:[%s14646_s3 + $0x528] sm:$0xff] }
 0x183   : > { %v1195_v14 = vpop.xlane.xlu1 %1194  ;;  %v1789_v17 = vsel %vm1787_vm2, %v1756_v58, %v1018_v13  ;;  %v11107_v58 = vld [vmem:[%s14646_s3 + $0x2b8] sm:$0xff]  ;;  %v1415_v13 = vsel %vm754_vm0, %v11185_v9, -inf  ;;  %v11234_v9 = vld [vmem:[%s14646_s3 + $0x6b0] sm:$0xff] }
 0x184   : > { %v1838_v18 = vsel %vm1820_vm3, %v1805_v59, %v1195_v14  ;;  %v1082_v62 = vsel %vm754_vm0, %v11107_v58, -inf }
 0x185   : > { %1413 = vmax.xlane.f32.xlu0 %v1412_v15 }
 0x186   : > { %1590 = vmax.xlane.f32.xlu1 %v1589_v16  ;;  %v1273_v21 = vpop.xlane.xlu0 %1272 }
 0x187   : > { %v1450_v22 = vpop.xlane.xlu1 %1449  ;;  %v1854_v25 = vsel %vm1853_vm4, %v1821_v2, %v1273_v21  ;;  %v11170_v2 = vld [vmem:[%s14646_s3 + $0x4b0] sm:$0xff] }
 0x188   : > { %v1903_v26 = vsel %vm1886_vm5, %v1870_v3, %v1450_v22  ;;  %v1337_v6 = vsel %vm754_vm0, %v11170_v2, -inf }
 0x189   : > { %1668 = vmax.xlane.f32.xlu0 %v1667_v23 }
 0x18a   : > { %825 = vmax.xlane.f32.xlu1 %v824_v24  ;;  %v763_v29 = vpop.xlane.xlu0 %762  ;;  %v11076_v24 = vld [vmem:[%s14646_s3 + $0x1c0] sm:$0xff] }
 0x18b   : > { %v892_v30 = vpop.xlane.xlu1 %891  ;;  %v956_v28 = vsel %vm754_vm0, %v11076_v24, -inf  ;;  %v11077_v24 = vld [vmem:[%s14646_s3 + $0x1c8] sm:$0xff] }
 0x18c   : > { %v1757_v33 = vsel %vm1754_vm1, %v763_v29, %v892_v30 }
 0x18d   : > { %954 = vmax.xlane.f32.xlu0 %v953_v31 }
 0x18e   : > { %1032 = vmax.xlane.f32.xlu1 %v1031_v32  ;;  %v1069_v36 = vpop.xlane.xlu0 %1068  ;;  %v11139_v32 = vld [vmem:[%s14646_s3 + $0x3b8] sm:$0xff] }
 0x18f   : > { %v1147_v37 = vpop.xlane.xlu1 %1146  ;;  %v1806_v40 = vsel %vm1787_vm2, %v1773_v10, %v1069_v36  ;;  %v11233_v10 = vld [vmem:[%s14646_s3 + $0x6a8] sm:$0xff]  ;;  %v1211_v36 = vsel %vm754_vm0, %v11139_v32, -inf  ;;  %v11140_v32 = vld [vmem:[%s14646_s3 + $0x3c0] sm:$0xff] }
 0x190   : > { %v1822_v41 = vsel %vm1820_vm3, %v1789_v17, %v1147_v37  ;;  %v1592_v14 = vsel %vm754_vm0, %v11233_v10, -inf  ;;  %v11248_v17 = vld [vmem:[%s14646_s3 + $0x720] sm:$0xff] }
 0x191   : > { %1209 = vmax.xlane.f32.xlu0 %v1208_v38  ;;  %v1670_v21 = vsel %vm754_vm0, %v11248_v17, -inf  ;;  %v747_v17 = vld [vmem:[%s14646_s3 + $0xc8] sm:$0xff] }
 0x192   : > { %1287 = vmax.xlane.f32.xlu1 %v1286_v39  ;;  %v1324_v44 = vpop.xlane.xlu0 %1323 }
 0x193   : > { %v1402_v45 = vpop.xlane.xlu1 %1401  ;;  %v1871_v48 = vsel %vm1853_vm4, %v1838_v18, %v1324_v44  ;;  %v746_v18 = vld [vmem:[%s14646_s3 + $0xc0] sm:$0xff] }
 0x194   : > { %v1887_v49 = vsel %vm1886_vm5, %v1854_v25, %v1402_v45  ;;  %v827_v22 = vsel %vm754_vm0, %v746_v18, -inf  ;;  %v11091_v25 = vld [vmem:[%s14646_s3 + $0x238] sm:$0xff] }
 0x195   : > { %1464 = vmax.xlane.f32.xlu0 %v1463_v46  ;;  %v1034_v29 = vsel %vm754_vm0, %v11091_v25, -inf  ;;  %v11092_v25 = vld [vmem:[%s14646_s3 + $0x240] sm:$0xff] }
 0x196   : > { %1542 = vmax.xlane.f32.xlu1 %v1541_v47  ;;  %v1579_v52 = vpop.xlane.xlu0 %1578 }
 0x197   : > { %v814_v53 = vpop.xlane.xlu1 %813  ;;  %v1936_v56 = vsel %vm1919_vm6, %v1903_v26, %v1579_v52 }
 0x199   : > { %1719 = vmax.xlane.f32.xlu0 %v1718_v54 }
 0x19a   : > { %777 = vmax.xlane.f32.xlu1 %v776_v55  ;;  %v943_v59 = vpop.xlane.xlu0 %942  ;;  %v11060_v55 = vld [vmem:[%s14646_s3 + $0x140] sm:$0xff] }
 0x19b   : > { %v1021_v60 = vpop.xlane.xlu1 %1020  ;;  %v1774_v63 = vsel %vm1754_vm1, %v814_v53, %v943_v59 }
 0x19c   : > { %v1790_v0 = vsel %vm1787_vm2, %v1757_v33, %v1021_v60  ;;  %v11154_v33 = vld [vmem:[%s14646_s3 + $0x430] sm:$0xff]  ;;  %v908_v60 = vsel %vm754_vm0, %v11060_v55, -inf }
 0x19d   : > { %906 = vmax.xlane.f32.xlu0 %v905_v61  ;;  %v1289_v37 = vsel %vm754_vm0, %v11154_v33, -inf  ;;  %v11155_v33 = vld [vmem:[%s14646_s3 + $0x438] sm:$0xff] }
 0x19e   : > { %1083 = vmax.xlane.f32.xlu1 %v1082_v62  ;;  %v1198_v3 = vpop.xlane.xlu0 %1197 }
 0x19f   : > { %v1276_v4 = vpop.xlane.xlu1 %1275  ;;  %v1839_v7 = vsel %vm1820_vm3, %v1806_v40, %v1198_v3  ;;  %v11202_v40 = vld [vmem:[%s14646_s3 + $0x5b0] sm:$0xff] }
 0x1a0   : > { %v1855_v8 = vsel %vm1853_vm4, %v1822_v41, %v1276_v4  ;;  %v11217_v41 = vld [vmem:[%s14646_s3 + $0x628] sm:$0xff]  ;;  %v1466_v44 = vsel %vm754_vm0, %v11202_v40, -inf  ;;  %v11203_v40 = vld [vmem:[%s14646_s3 + $0x5b8] sm:$0xff] }
 0x1a1   : > { %1161 = vmax.xlane.f32.xlu0 %v1160_v5  ;;  %v1544_v45 = vsel %vm754_vm0, %v11217_v41, -inf  ;;  %v1340_v5 = vsel %vm754_vm0, %v11171_v1, -inf  ;;  %v11218_v41 = vld [vmem:[%s14646_s3 + $0x630] sm:$0xff] }
 0x1a2   : > { %1338 = vmax.xlane.f32.xlu1 %v1337_v6  ;;  %v1453_v11 = vpop.xlane.xlu0 %1452 }
 0x1a3   : > { %v1531_v12 = vpop.xlane.xlu1 %1530  ;;  %v1904_v15 = vsel %vm1886_vm5, %v1871_v48, %v1453_v11  ;;  %v11265_v48 = vld [vmem:[%s14646_s3 + $0x7a8] sm:$0xff] }
 0x1a4   : > { %v1920_v16 = vsel %vm1919_vm6, %v1887_v49, %v1531_v12  ;;  %v730_v49 = vld [vmem:[%s14646_s3 + $0x40] sm:$0xff]  ;;  %v1721_v52 = vsel %vm754_vm0, %v11265_v48, -inf  ;;  %v11266_v48 = vld [vmem:[%s14646_s3 + $0x7b0] sm:$0xff] }
 0x1a5   : > { %1416 = vmax.xlane.f32.xlu0 %v1415_v13  ;;  %v779_v53 = vsel %vm754_vm0, %v730_v49, -inf  ;;  %v1595_v13 = vsel %vm754_vm0, %v11234_v9, -inf  ;;  %v731_v49 = vld [vmem:[%s14646_s3 + $0x48] sm:$0xff] }
 0x1a6   : > { %1593 = vmax.xlane.f32.xlu1 %v1592_v14  ;;  %v1708_v19 = vpop.xlane.xlu0 %1707 }
 0x1a7   : > { %v766_v20 = vpop.xlane.xlu1 %765  ;;  %v14892_v23 = vsel %vm1952_vm7, %v1936_v56, %v1708_v19  ;;  %v11108_v56 = vld [vmem:[%s14646_s3 + $0x2c0] sm:$0xff] }
 0x1a8   : > { %v1085_v61 = vsel %vm754_vm0, %v11108_v56, -inf  ;;  %v11061_v56 = vld [vmem:[%s14646_s3 + $0x148] sm:$0xff] }
 0x1a9   : > { %1671 = vmax.xlane.f32.xlu0 %v1670_v21  ;;  %v830_v21 = vsel %vm754_vm0, %v747_v17, -inf }
 0x1aa   : > { %828 = vmax.xlane.f32.xlu1 %v827_v22  ;;  %v895_v26 = vpop.xlane.xlu0 %894 }
 0x1ab   : > { %v1072_v27 = vpop.xlane.xlu1 %1071  ;;  %v1758_v30 = vsel %vm1754_vm1, %v766_v20, %v895_v26 }
 0x1ac   : > { %v1807_v31 = vsel %vm1787_vm2, %v1774_v63, %v1072_v27 }
 0x1ad   : > { %957 = vmax.xlane.f32.xlu0 %v956_v28  ;;  %v959_v28 = vsel %vm754_vm0, %v11077_v24, -inf }
 0x1ae   : > { %1035 = vmax.xlane.f32.xlu1 %v1034_v29  ;;  %v1150_v34 = vpop.xlane.xlu0 %1149  ;;  %v1037_v29 = vsel %vm754_vm0, %v11092_v25, -inf  ;;  %v11093_v25 = vld [vmem:[%s14646_s3 + $0x248] sm:$0xff] }
 0x1af   : > { %v1327_v35 = vpop.xlane.xlu1 %1326  ;;  %v1823_v38 = vsel %vm1820_vm3, %v1790_v0, %v1150_v34  ;;  %v11123_v0 = vld [vmem:[%s14646_s3 + $0x338] sm:$0xff] }
 0x1b0   : > { %v1872_v39 = vsel %vm1853_vm4, %v1839_v7, %v1327_v35  ;;  %v1163_v4 = vsel %vm754_vm0, %v11123_v0, -inf  ;;  %v911_v0 = vsel %vm754_vm0, %v11061_v56, -inf }
 0x1b1   : > { %1212 = vmax.xlane.f32.xlu0 %v1211_v36  ;;  %v1214_v36 = vsel %vm754_vm0, %v11140_v32, -inf }
 0x1b2   : > { %1290 = vmax.xlane.f32.xlu1 %v1289_v37  ;;  %v1405_v42 = vpop.xlane.xlu0 %1404  ;;  %v1292_v37 = vsel %vm754_vm0, %v11155_v33, -inf }
 0x1b3   : > { %v1582_v43 = vpop.xlane.xlu1 %1581  ;;  %v1888_v46 = vsel %vm1886_vm5, %v1855_v8, %v1405_v42  ;;  %v11186_v8 = vld [vmem:[%s14646_s3 + $0x530] sm:$0xff] }
 0x1b4   : > { %v1937_v47 = vsel %vm1919_vm6, %v1904_v15, %v1582_v43  ;;  %v1418_v12 = vsel %vm754_vm0, %v11186_v8, -inf }
 0x1b5   : > { %1467 = vmax.xlane.f32.xlu0 %v1466_v44  ;;  %v1469_v44 = vsel %vm754_vm0, %v11203_v40, -inf }
 0x1b6   : > { %1545 = vmax.xlane.f32.xlu1 %v1544_v45  ;;  %v1660_v50 = vpop.xlane.xlu0 %1659  ;;  %v1547_v45 = vsel %vm754_vm0, %v11218_v41, -inf }
 0x1b7   : > { %v817_v51 = vpop.xlane.xlu1 %816  ;;  %v14917_v54 = vsel %vm1952_vm7, %v1920_v16, %v1660_v50  ;;  %v11249_v16 = vld [vmem:[%s14646_s3 + $0x728] sm:$0xff] }
 0x1b8   : > { %v1673_v20 = vsel %vm754_vm0, %v11249_v16, -inf }
 0x1b9   : > { %1722 = vmax.xlane.f32.xlu0 %v1721_v52  ;;  %v1724_v52 = vsel %vm754_vm0, %v11266_v48, -inf }
 0x1ba   : > { %780 = vmax.xlane.f32.xlu1 %v779_v53  ;;  %v946_v58 = vpop.xlane.xlu0 %945  ;;  %v782_v53 = vsel %vm754_vm0, %v731_v49, -inf }
 0x1bb   : > { %v1024_v59 = vpop.xlane.xlu1 %1023  ;;  %v1775_v62 = vsel %vm1754_vm1, %v817_v51, %v946_v58  ;;  %v11109_v58 = vld [vmem:[%s14646_s3 + $0x2c8] sm:$0xff] }
 0x1bc   : > { %v1791_v63 = vsel %vm1787_vm2, %v1758_v30, %v1024_v59  ;;  %v1088_v1 = vsel %vm754_vm0, %v11109_v58, -inf  ;;  %v13052_v59 = vld [vmem:[#allocation2 + $0x40] ss:$8 sps:$4 sm:$0xff]  }
 0x1bd   : > { %909 = vmax.xlane.f32.xlu0 %v908_v60  ;;  %v11124_v60 = vld [vmem:[%s14646_s3 + $0x340] sm:$0xff] }
 0x1be   : > { %1086 = vmax.xlane.f32.xlu1 %v1085_v61  ;;  %v1201_v2 = vpop.xlane.xlu0 %1200  ;;  %v11172_v61 = vld [vmem:[%s14646_s3 + $0x4c0] sm:$0xff]  ;;  %v1166_v8 = vsel %vm754_vm0, %v11124_v60, -inf }
 0x1bf   : > { %v1279_v3 = vpop.xlane.xlu1 %1278  ;;  %v1840_v6 = vsel %vm1820_vm3, %v1807_v31, %v1201_v2  ;;  %v1343_v9 = vsel %vm754_vm0, %v11172_v61, -inf }
 0x1c0   : > { %v1856_v7 = vsel %vm1853_vm4, %v1823_v38, %v1279_v3 }
 0x1c1   : > { %1164 = vmax.xlane.f32.xlu0 %v1163_v4  ;;  %v11187_v4 = vld [vmem:[%s14646_s3 + $0x538] sm:$0xff] }
 0x1c2   : > { %1341 = vmax.xlane.f32.xlu1 %v1340_v5  ;;  %v1456_v10 = vpop.xlane.xlu0 %1455  ;;  %v11235_v5 = vld [vmem:[%s14646_s3 + $0x6b8] sm:$0xff] }
 0x1c3   : > { %v1534_v11 = vpop.xlane.xlu1 %1533  ;;  %v1905_v14 = vsel %vm1886_vm5, %v1872_v39, %v1456_v10 }
 0x1c4   : > { %v1921_v15 = vsel %vm1919_vm6, %v1888_v46, %v1534_v11 }
 0x1c5   : > { %1419 = vmax.xlane.f32.xlu0 %v1418_v12  ;;  %v11250_v12 = vld [vmem:[%s14646_s3 + $0x730] sm:$0xff] }
 0x1c6   : > { %1596 = vmax.xlane.f32.xlu1 %v1595_v13  ;;  %v1711_v18 = vpop.xlane.xlu0 %1710  ;;  %v748_v13 = vld [vmem:[%s14646_s3 + $0xd0] sm:$0xff] }
 0x1c7   : > { %v769_v19 = vpop.xlane.xlu1 %768  ;;  %v14944_v22 = vsel %vm1952_vm7, %v1937_v47, %v1711_v18  ;;  %v833_v24 = vsel %vm754_vm0, %v748_v13, -inf }
 0x1c9   : > { %1674 = vmax.xlane.f32.xlu0 %v1673_v20  ;;  %v1676_v20 = vsel %vm754_vm0, %v11250_v12, -inf }
 0x1ca   : > { %831 = vmax.xlane.f32.xlu1 %v830_v21  ;;  %v898_v26 = vpop.xlane.xlu0 %897  ;;  %v11078_v21 = vld [vmem:[%s14646_s3 + $0x1d0] sm:$0xff] }
 0x1cb   : > { %v1075_v27 = vpop.xlane.xlu1 %1074  ;;  %v1759_v30 = vsel %vm1754_vm1, %v769_v19, %v898_v26 }
 0x1cc   : > { %v1808_v31 = vsel %vm1787_vm2, %v1775_v62, %v1075_v27 }
 0x1cd   : > { %960 = vmax.xlane.f32.xlu0 %v959_v28 }
 0x1ce   : > { %1038 = vmax.xlane.f32.xlu1 %v1037_v29  ;;  %v1153_v34 = vpop.xlane.xlu0 %1152  ;;  %v962_v29 = vsel %vm754_vm0, %v11078_v21, -inf }
 0x1cf   : > { %v1330_v35 = vpop.xlane.xlu1 %1329  ;;  %v1824_v38 = vsel %vm1820_vm3, %v1791_v63, %v1153_v34 }
 0x1d0   : > { %v1873_v39 = vsel %vm1853_vm4, %v1840_v6, %v1330_v35  ;;  %v11141_v35 = vld [vmem:[%s14646_s3 + $0x3c8] sm:$0xff] }
 0x1d1   : > { %1215 = vmax.xlane.f32.xlu0 %v1214_v36  ;;  %v11156_v36 = vld [vmem:[%s14646_s3 + $0x440] sm:$0xff] }
 0x1d2   : > { %1293 = vmax.xlane.f32.xlu1 %v1292_v37  ;;  %v1408_v42 = vpop.xlane.xlu0 %1407  ;;  %v1295_v40 = vsel %vm754_vm0, %v11156_v36, -inf }
 0x1d3   : > { %v1585_v43 = vpop.xlane.xlu1 %1584  ;;  %v1889_v46 = vsel %vm1886_vm5, %v1856_v7, %v1408_v42 }
 0x1d4   : > { %v1938_v47 = vsel %vm1919_vm6, %v1905_v14, %v1585_v43  ;;  %v1421_v14 = vsel %vm754_vm0, %v11187_v4, -inf  ;;  %v11204_v43 = vld [vmem:[%s14646_s3 + $0x5c0] sm:$0xff] }
 0x1d5   : > { %1470 = vmax.xlane.f32.xlu0 %v1469_v44  ;;  %v11219_v44 = vld [vmem:[%s14646_s3 + $0x638] sm:$0xff] }
 0x1d6   : > { %1548 = vmax.xlane.f32.xlu1 %v1547_v45  ;;  %v1663_v50 = vpop.xlane.xlu0 %1662  ;;  %v1550_v48 = vsel %vm754_vm0, %v11219_v44, -inf }
 0x1d7   : > { %v820_v51 = vpop.xlane.xlu1 %819  ;;  %v14969_v55 = vsel %vm1952_vm7, %v1921_v15, %v1663_v50  ;;  %v1598_v15 = vsel %vm754_vm0, %v11235_v5, -inf }
 0x1d9   : > { %1725 = vmax.xlane.f32.xlu0 %v1724_v52  ;;  %v732_v52 = vld [vmem:[%s14646_s3 + $0x50] sm:$0xff] }
 0x1da   : > { %783 = vmax.xlane.f32.xlu1 %v782_v53  ;;  %v949_v62 = vpop.xlane.xlu0 %948  ;;  %v785_v60 = vsel %vm754_vm0, %v732_v52, -inf }
 0x1db   : > { %v1027_v63 = vpop.xlane.xlu1 %1026  ;;  %v1776_v2 = vsel %vm1754_vm1, %v820_v51, %v949_v62  ;;  %v11267_v51 = vld [vmem:[%s14646_s3 + $0x7b8] sm:$0xff]  ;;  %v11062_v62 = vld [vmem:[%s14646_s3 + $0x150] sm:$0xff] }
 0x1dc   : > { %v1792_v3 = vsel %vm1787_vm2, %v1759_v30, %v1027_v63  ;;  %v1040_v30 = vsel %vm754_vm0, %v11093_v25, -inf  ;;  %v1727_v58 = vsel %vm754_vm0, %v11267_v51, -inf  ;;  %v11110_v63 = vld [vmem:[%s14646_s3 + $0x2d0] sm:$0xff]  ;;  %v11251_v25 = vld [vmem:[%s14646_s3 + $0x738] sm:$0xff] }
 0x1dd   : > { %912 = vmax.xlane.f32.xlu0 %v911_v0  ;;  %v1091_v4 = vsel %vm754_vm0, %v11110_v63, -inf  ;;  %v733_v63 = vld [vmem:[%s14646_s3 + $0x58] sm:$0xff] }
 0x1de   : > { %1089 = vmax.xlane.f32.xlu1 %v1088_v1  ;;  %v1204_v6 = vpop.xlane.xlu0 %1203 }
 0x1df   : > { %v1282_v7 = vpop.xlane.xlu1 %1281  ;;  %v1841_v10 = vsel %vm1820_vm3, %v1808_v31, %v1204_v6 }
 0x1e0   : > { %v1857_v11 = vsel %vm1853_vm4, %v1824_v38, %v1282_v7  ;;  %v11125_v7 = vld [vmem:[%s14646_s3 + $0x348] sm:$0xff] }
 0x1e1   : > { %1167 = vmax.xlane.f32.xlu0 %v1166_v8  ;;  %v11173_v8 = vld [vmem:[%s14646_s3 + $0x4c8] sm:$0xff] }
 0x1e2   : > { %1344 = vmax.xlane.f32.xlu1 %v1343_v9  ;;  %v1459_v16 = vpop.xlane.xlu0 %1458  ;;  %v1346_v12 = vsel %vm754_vm0, %v11173_v8, -inf  ;;  %v13049_v8 = vld [vmem:[#allocation2 + $0x30] ss:$8 sps:$4 sm:$0xff]  }
 0x1e3   : > { %v1537_v17 = vpop.xlane.xlu1 %1536  ;;  %v1906_v18 = vsel %vm1886_vm5, %v1873_v39, %v1459_v16  ;;  %v1217_v39 = vsel %vm754_vm0, %v11141_v35, -inf  ;;  %v11236_v16 = vld [vmem:[%s14646_s3 + $0x6c0] sm:$0xff] }
 0x1e4   : > { %v1922_v19 = vsel %vm1919_vm6, %v1889_v46, %v1537_v17 }
 0x1e5   : > { %1422 = vmax.xlane.f32.xlu0 %v1421_v14 }
 0x1e6   : > { %1599 = vmax.xlane.f32.xlu1 %v1598_v15  ;;  %v1714_v26 = vpop.xlane.xlu0 %1713  ;;  %v11188_v15 = vld [vmem:[%s14646_s3 + $0x540] sm:$0xff] }
 0x1e7   : > { %v772_v27 = vpop.xlane.xlu1 %771  ;;  %v14998_v28 = vsel %vm1952_vm7, %v1938_v47, %v1714_v26  ;;  %v1472_v47 = vsel %vm754_vm0, %v11204_v43, -inf  ;;  %v749_v26 = vld [vmem:[%s14646_s3 + $0xd8] sm:$0xff] }
 0x1e9   : > { %1677 = vmax.xlane.f32.xlu0 %v1676_v20  ;;  %v1601_v20 = vsel %vm754_vm0, %v11236_v16, -inf  ;;  %v11174_v16 = vld [vmem:[%s14646_s3 + $0x4d0] sm:$0xff] }
 0x1ea   : > { %834 = vmax.xlane.f32.xlu1 %v833_v24  ;;  %v901_v31 = vpop.xlane.xlu0 %900 }
 0x1eb   : > { %v1078_v32 = vpop.xlane.xlu1 %1077  ;;  %v1760_v33 = vsel %vm1754_vm1, %v772_v27, %v901_v31  ;;  %v836_v31 = vsel %vm754_vm0, %v749_v26, -inf  ;;  %v11237_v26 = vld [vmem:[%s14646_s3 + $0x6c8] sm:$0xff] }
 0x1ec   : > { %v1809_v34 = vsel %vm1787_vm2, %v1776_v2, %v1078_v32 }
 0x1ed   : > { %963 = vmax.xlane.f32.xlu0 %v962_v29 }
 0x1ee   : > { %1041 = vmax.xlane.f32.xlu1 %v1040_v30  ;;  %v1156_v37 = vpop.xlane.xlu0 %1155  ;;  %v1679_v30 = vsel %vm754_vm0, %v11251_v25, -inf  ;;  %v11189_v25 = vld [vmem:[%s14646_s3 + $0x548] sm:$0xff] }
 0x1ef   : > { %v1333_v38 = vpop.xlane.xlu1 %1332  ;;  %v1825_v41 = vsel %vm1820_vm3, %v1792_v3, %v1156_v37  ;;  %v914_v3 = vsel %vm754_vm0, %v11062_v62, -inf  ;;  %v11268_v62 = vld [vmem:[%s14646_s3 + $0x7c0] sm:$0xff] }
 0x1f0   : > { %v1874_v42 = vsel %vm1853_vm4, %v1841_v10, %v1333_v38 }
 0x1f1   : > { %1218 = vmax.xlane.f32.xlu0 %v1217_v39 }
 0x1f2   : > { %1296 = vmax.xlane.f32.xlu1 %v1295_v40  ;;  %v1411_v45 = vpop.xlane.xlu0 %1410 }
 0x1f3   : > { %v1588_v46 = vpop.xlane.xlu1 %1587  ;;  %v1890_v49 = vsel %vm1886_vm5, %v1857_v11, %v1411_v45  ;;  %v1169_v11 = vsel %vm754_vm0, %v11125_v7, -inf  ;;  %v11111_v7 = vld [vmem:[%s14646_s3 + $0x2d8] sm:$0xff] }
 0x1f4   : > { %v1939_v50 = vsel %vm1919_vm6, %v1906_v18, %v1588_v46 }
 0x1f5   : > { %1473 = vmax.xlane.f32.xlu0 %v1472_v47 }
 0x1f6   : > { %1551 = vmax.xlane.f32.xlu1 %v1550_v48  ;;  %v1666_v53 = vpop.xlane.xlu0 %1665 }
 0x1f7   : > { %v823_v56 = vpop.xlane.xlu1 %822  ;;  %v15021_v61 = vsel %vm1952_vm7, %v1922_v19, %v1666_v53  ;;  %v1424_v19 = vsel %vm754_vm0, %v11188_v15, -inf  ;;  %v11126_v15 = vld [vmem:[%s14646_s3 + $0x350] sm:$0xff] }
 0x1f9   : > { %1728 = vmax.xlane.f32.xlu0 %v1727_v58 }
 0x1fa   : > { %786 = vmax.xlane.f32.xlu1 %v785_v60  ;;  %v952_v1 = vpop.xlane.xlu0 %951 }
 0x1fb   : > { %v1030_v2 = vpop.xlane.xlu1 %1029  ;;  %v1777_v5 = vsel %vm1754_vm1, %v823_v56, %v952_v1 }
 0x1fc   : > { %v1793_v6 = vsel %vm1787_vm2, %v1760_v33, %v1030_v2  ;;  %v11079_v33 = vld [vmem:[%s14646_s3 + $0x1d8] sm:$0xff] }
 0x1fd   : > { %915 = vmax.xlane.f32.xlu0 %v914_v3  ;;  %v965_v37 = vsel %vm754_vm0, %v11079_v33, -inf  ;;  %v1730_v3 = vsel %vm754_vm0, %v11268_v62, -inf }
 0x1fe   : > { %1092 = vmax.xlane.f32.xlu1 %v1091_v4  ;;  %v1207_v9 = vpop.xlane.xlu0 %1206  ;;  %v788_v4 = vsel %vm754_vm0, %v733_v63, -inf  ;;  %v11206_v63 = vld [vmem:[%s14646_s3 + $0x5d0] sm:$0xff] }
 0x1ff   : > { %v1285_v10 = vpop.xlane.xlu1 %1284  ;;  %v1842_v13 = vsel %vm1820_vm3, %v1809_v34, %v1207_v9  ;;  %v11094_v34 = vld [vmem:[%s14646_s3 + $0x250] sm:$0xff] }
 0x200   : > { %v1858_v14 = vsel %vm1853_vm4, %v1825_v41, %v1285_v10  ;;  %v1043_v38 = vsel %vm754_vm0, %v11094_v34, -inf  ;;  %v11142_v41 = vld [vmem:[%s14646_s3 + $0x3d0] sm:$0xff] }
 0x201   : > { %1170 = vmax.xlane.f32.xlu0 %v1169_v11  ;;  %v1220_v45 = vsel %vm754_vm0, %v11142_v41, -inf }
 0x202   : > { %1347 = vmax.xlane.f32.xlu1 %v1346_v12  ;;  %v1462_v17 = vpop.xlane.xlu0 %1461  ;;  %v1094_v12 = vsel %vm754_vm0, %v11111_v7, -inf }
 0x203   : > { %v1540_v18 = vpop.xlane.xlu1 %1539  ;;  %v1907_v21 = vsel %vm1886_vm5, %v1874_v42, %v1462_v17  ;;  %v11157_v42 = vld [vmem:[%s14646_s3 + $0x448] sm:$0xff] }
 0x204   : > { %v1923_v24 = vsel %vm1919_vm6, %v1890_v49, %v1540_v18  ;;  %v1298_v46 = vsel %vm754_vm0, %v11157_v42, -inf  ;;  %v11205_v49 = vld [vmem:[%s14646_s3 + $0x5c8] sm:$0xff]  ;;  %v11080_v42 = vld [vmem:[%s14646_s3 + $0x1e0] sm:$0xff] }
 0x205   : > { %1425 = vmax.xlane.f32.xlu0 %v1424_v19  ;;  %v1475_v53 = vsel %vm754_vm0, %v11205_v49, -inf  ;;  %v1172_v19 = vsel %vm754_vm0, %v11126_v15, -inf }
 0x206   : > { %1602 = vmax.xlane.f32.xlu1 %v1601_v20  ;;  %v1717_v27 = vpop.xlane.xlu0 %1716  ;;  %v1349_v20 = vsel %vm754_vm0, %v11174_v16, -inf }
 0x207   : > { %v775_v29 = vpop.xlane.xlu1 %774  ;;  %v15048_v32 = vsel %vm1952_vm7, %v1939_v50, %v1717_v27  ;;  %v11220_v50 = vld [vmem:[%s14646_s3 + $0x640] sm:$0xff] }
 0x208   : > { %v1553_v56 = vsel %vm754_vm0, %v11220_v50, -inf  ;;  %v11143_v50 = vld [vmem:[%s14646_s3 + $0x3d8] sm:$0xff] }
 0x209   : > { %1680 = vmax.xlane.f32.xlu0 %v1679_v30  ;;  %v1427_v30 = vsel %vm754_vm0, %v11189_v25, -inf }
 0x20a   : > { %837 = vmax.xlane.f32.xlu1 %v836_v31  ;;  %v904_v35 = vpop.xlane.xlu0 %903  ;;  %v1604_v31 = vsel %vm754_vm0, %v11237_v26, -inf }
 0x20b   : > { %v1081_v36 = vpop.xlane.xlu1 %1080  ;;  %v1761_v39 = vsel %vm1754_vm1, %v775_v29, %v904_v35  ;;  %v11252_v35 = vld [vmem:[%s14646_s3 + $0x740] sm:$0xff] }
 0x20c   : > { %v1810_v40 = vsel %vm1787_vm2, %v1777_v5, %v1081_v36  ;;  %v750_v36 = vld [vmem:[%s14646_s3 + $0xe0] sm:$0xff] }
 0x20d   : > { %966 = vmax.xlane.f32.xlu0 %v965_v37 }
 0x20e   : > { %1044 = vmax.xlane.f32.xlu1 %v1043_v38  ;;  %v1159_v43 = vpop.xlane.xlu0 %1158 }
 0x20f   : > { %v1336_v44 = vpop.xlane.xlu1 %1335  ;;  %v1826_v47 = vsel %vm1820_vm3, %v1793_v6, %v1159_v43  ;;  %v11063_v6 = vld [vmem:[%s14646_s3 + $0x158] sm:$0xff] }
 0x210   : > { %v1875_v48 = vsel %vm1853_vm4, %v1842_v13, %v1336_v44  ;;  %v917_v11 = vsel %vm754_vm0, %v11063_v6, -inf  ;;  %v11095_v43 = vld [vmem:[%s14646_s3 + $0x258] sm:$0xff] }
 0x211   : > { %1221 = vmax.xlane.f32.xlu0 %v1220_v45 }
 0x212   : > { %1299 = vmax.xlane.f32.xlu1 %v1298_v46  ;;  %v1414_v51 = vpop.xlane.xlu0 %1413  ;;  %v968_v46 = vsel %vm754_vm0, %v11080_v42, -inf }
 0x213   : > { %v1591_v52 = vpop.xlane.xlu1 %1590  ;;  %v1891_v58 = vsel %vm1886_vm5, %v1858_v14, %v1414_v51  ;;  %v11158_v51 = vld [vmem:[%s14646_s3 + $0x450] sm:$0xff] }
 0x214   : > { %v1940_v60 = vsel %vm1919_vm6, %v1907_v21, %v1591_v52 }
 0x215   : > { %1476 = vmax.xlane.f32.xlu0 %v1475_v53 }
 0x216   : > { %1554 = vmax.xlane.f32.xlu1 %v1553_v56  ;;  %v1669_v1 = vpop.xlane.xlu0 %1668  ;;  %v1223_v56 = vsel %vm754_vm0, %v11143_v50, -inf }
 0x217   : > { %v826_v2 = vpop.xlane.xlu1 %825  ;;  %v15073_v5 = vsel %vm1952_vm7, %v1923_v24, %v1669_v1  ;;  %v11221_v1 = vld [vmem:[%s14646_s3 + $0x648] sm:$0xff] }
 0x218   : > { %v1556_v6 = vsel %vm754_vm0, %v11221_v1, -inf }
 0x219   : > { %1731 = vmax.xlane.f32.xlu0 %v1730_v3 }
 0x21a   : > { %789 = vmax.xlane.f32.xlu1 %v788_v4  ;;  %v955_v9 = vpop.xlane.xlu0 %954  ;;  %v1478_v4 = vsel %vm754_vm0, %v11206_v63, -inf }
 0x21b   : > { %v1033_v10 = vpop.xlane.xlu1 %1032  ;;  %v1778_v13 = vsel %vm1754_vm1, %v826_v2, %v955_v9 }
 0x21c   : > { %v1794_v14 = vsel %vm1787_vm2, %v1761_v39, %v1033_v10  ;;  %v1682_v39 = vsel %vm754_vm0, %v11252_v35, -inf  ;;  %v11269_v10 = vld [vmem:[%s14646_s3 + $0x7c8] sm:$0xff] }
 0x21d   : > { %918 = vmax.xlane.f32.xlu0 %v917_v11  ;;  %v734_v11 = vld [vmem:[%s14646_s3 + $0x60] sm:$0xff] }
 0x21e   : > { %1095 = vmax.xlane.f32.xlu1 %v1094_v12  ;;  %v1210_v17 = vpop.xlane.xlu0 %1209  ;;  %v791_v15 = vsel %vm754_vm0, %v734_v11, -inf }
 0x21f   : > { %v1288_v18 = vpop.xlane.xlu1 %1287  ;;  %v1843_v21 = vsel %vm1820_vm3, %v1810_v40, %v1210_v17  ;;  %v839_v40 = vsel %vm754_vm0, %v750_v36, -inf  ;;  %v11064_v17 = vld [vmem:[%s14646_s3 + $0x160] sm:$0xff] }
 0x220   : > { %v1859_v24 = vsel %vm1853_vm4, %v1826_v47, %v1288_v18  ;;  %v1046_v47 = vsel %vm754_vm0, %v11095_v43, -inf  ;;  %v11112_v18 = vld [vmem:[%s14646_s3 + $0x2e0] sm:$0xff] }
 0x221   : > { %1173 = vmax.xlane.f32.xlu0 %v1172_v19  ;;  %v1097_v25 = vsel %vm754_vm0, %v11112_v18, -inf  ;;  %v13047_v19 = vld [vmem:[#allocation2 + $0x34] ss:$8 sps:$4 sm:$0xff]  }
 0x222   : > { %1350 = vmax.xlane.f32.xlu1 %v1349_v20  ;;  %v1465_v27 = vpop.xlane.xlu0 %1464 }
 0x223   : > { %v1543_v29 = vpop.xlane.xlu1 %1542  ;;  %v1908_v33 = vsel %vm1886_vm5, %v1875_v48, %v1465_v27 }
 0x224   : > { %v1924_v34 = vsel %vm1919_vm6, %v1891_v58, %v1543_v29  ;;  %v1301_v58 = vsel %vm754_vm0, %v11158_v51, -inf  ;;  %v11127_v29 = vld [vmem:[%s14646_s3 + $0x358] sm:$0xff] }
 0x225   : > { %1428 = vmax.xlane.f32.xlu0 %v1427_v30  ;;  %v11175_v30 = vld [vmem:[%s14646_s3 + $0x4d8] sm:$0xff] }
 0x226   : > { %1605 = vmax.xlane.f32.xlu1 %v1604_v31  ;;  %v1720_v37 = vpop.xlane.xlu0 %1719  ;;  %v1352_v35 = vsel %vm754_vm0, %v11175_v30, -inf }
 0x227   : > { %v778_v38 = vpop.xlane.xlu1 %777  ;;  %v15100_v41 = vsel %vm1952_vm7, %v1940_v60, %v1720_v37 }
 0x229   : > { %1683 = vmax.xlane.f32.xlu0 %v1682_v39  ;;  %v11238_v39 = vld [vmem:[%s14646_s3 + $0x6d0] sm:$0xff] }
 0x22a   : > { %840 = vmax.xlane.f32.xlu1 %v839_v40  ;;  %v907_v44 = vpop.xlane.xlu0 %906 }
 0x22b   : > { %v1084_v45 = vpop.xlane.xlu1 %1083  ;;  %v1762_v48 = vsel %vm1754_vm1, %v778_v38, %v907_v44  ;;  %v11190_v38 = vld [vmem:[%s14646_s3 + $0x550] sm:$0xff]  ;;  %v1607_v44 = vsel %vm754_vm0, %v11238_v39, -inf }
 0x22c   : > { %v1811_v49 = vsel %vm1787_vm2, %v1778_v13, %v1084_v45  ;;  %v1430_v43 = vsel %vm754_vm0, %v11190_v38, -inf }
 0x22d   : > { %969 = vmax.xlane.f32.xlu0 %v968_v46 }
 0x22e   : > { %1047 = vmax.xlane.f32.xlu1 %v1046_v47  ;;  %v1162_v52 = vpop.xlane.xlu0 %1161  ;;  %v11253_v47 = vld [vmem:[%s14646_s3 + $0x748] sm:$0xff] }
 0x22f   : > { %v1339_v53 = vpop.xlane.xlu1 %1338  ;;  %v1827_v60 = vsel %vm1820_vm3, %v1794_v14, %v1162_v52  ;;  %v1733_v14 = vsel %vm754_vm0, %v11269_v10, -inf  ;;  %v1685_v51 = vsel %vm754_vm0, %v11253_v47, -inf }
 0x230   : > { %v1876_v62 = vsel %vm1853_vm4, %v1843_v21, %v1339_v53 }
 0x231   : > { %1224 = vmax.xlane.f32.xlu0 %v1223_v56  ;;  %v11081_v56 = vld [vmem:[%s14646_s3 + $0x1e8] sm:$0xff] }
 0x232   : > { %1302 = vmax.xlane.f32.xlu1 %v1301_v58  ;;  %v1417_v2 = vpop.xlane.xlu0 %1416  ;;  %v11096_v58 = vld [vmem:[%s14646_s3 + $0x260] sm:$0xff]  ;;  %v971_v63 = vsel %vm754_vm0, %v11081_v56, -inf  ;;  %v11191_v56 = vld [vmem:[%s14646_s3 + $0x558] sm:$0xff] }
 0x233   : > { %v1594_v3 = vpop.xlane.xlu1 %1593  ;;  %v1892_v7 = vsel %vm1886_vm5, %v1859_v24, %v1417_v2  ;;  %v920_v24 = vsel %vm754_vm0, %v11064_v17, -inf  ;;  %v1049_v1 = vsel %vm754_vm0, %v11096_v58, -inf  ;;  %v11239_v58 = vld [vmem:[%s14646_s3 + $0x6d8] sm:$0xff] }
 0x234   : > { %v1941_v9 = vsel %vm1919_vm6, %v1908_v33, %v1594_v3 }
 0x235   : > { %1479 = vmax.xlane.f32.xlu0 %v1478_v4  ;;  %v11144_v4 = vld [vmem:[%s14646_s3 + $0x3e0] sm:$0xff] }
 0x236   : > { %1557 = vmax.xlane.f32.xlu1 %v1556_v6  ;;  %v1672_v12 = vpop.xlane.xlu0 %1671  ;;  %v11159_v6 = vld [vmem:[%s14646_s3 + $0x458] sm:$0xff]  ;;  %v1226_v10 = vsel %vm754_vm0, %v11144_v4, -inf }
 0x237   : > { %v829_v13 = vpop.xlane.xlu1 %828  ;;  %v15125_v16 = vsel %vm1952_vm7, %v1924_v34, %v1672_v12  ;;  %v1175_v34 = vsel %vm754_vm0, %v11127_v29, -inf  ;;  %v1304_v11 = vsel %vm754_vm0, %v11159_v6, -inf  ;;  %v11254_v6 = vld [vmem:[%s14646_s3 + $0x750] sm:$0xff] }
 0x239   : > { %1734 = vmax.xlane.f32.xlu0 %v1733_v14  ;;  %v11207_v14 = vld [vmem:[%s14646_s3 + $0x5d8] sm:$0xff] }
 0x23a   : > { %792 = vmax.xlane.f32.xlu1 %v791_v15  ;;  %v958_v20 = vpop.xlane.xlu0 %957  ;;  %v11222_v15 = vld [vmem:[%s14646_s3 + $0x650] sm:$0xff] }
 0x23b   : > { %v1036_v21 = vpop.xlane.xlu1 %1035  ;;  %v1779_v26 = vsel %vm1754_vm1, %v829_v13, %v958_v20  ;;  %v1481_v20 = vsel %vm754_vm0, %v11207_v14, -inf  ;;  %v11082_v14 = vld [vmem:[%s14646_s3 + $0x1f0] sm:$0xff] }
 0x23c   : > { %v1795_v27 = vsel %vm1787_vm2, %v1762_v48, %v1036_v21  ;;  %v751_v48 = vld [vmem:[%s14646_s3 + $0xe8] sm:$0xff]  ;;  %v1559_v21 = vsel %vm754_vm0, %v11222_v15, -inf }
 0x23d   : > { %921 = vmax.xlane.f32.xlu0 %v920_v24  ;;  %v842_v52 = vsel %vm754_vm0, %v751_v48, -inf  ;;  %v11097_v15 = vld [vmem:[%s14646_s3 + $0x268] sm:$0xff] }
 0x23e   : > { %1098 = vmax.xlane.f32.xlu1 %v1097_v25  ;;  %v1213_v31 = vpop.xlane.xlu0 %1212 }
 0x23f   : > { %v1291_v33 = vpop.xlane.xlu1 %1290  ;;  %v1844_v36 = vsel %vm1820_vm3, %v1811_v49, %v1213_v31 }
 0x240   : > { %v1860_v37 = vsel %vm1853_vm4, %v1827_v60, %v1291_v33 }
 0x241   : > { %1176 = vmax.xlane.f32.xlu0 %v1175_v34 }
 0x242   : > { %1353 = vmax.xlane.f32.xlu1 %v1352_v35  ;;  %v1468_v40 = vpop.xlane.xlu0 %1467  ;;  %v11065_v35 = vld [vmem:[%s14646_s3 + $0x168] sm:$0xff] }
 0x243   : > { %v1546_v42 = vpop.xlane.xlu1 %1545  ;;  %v1909_v45 = vsel %vm1886_vm5, %v1876_v62, %v1468_v40  ;;  %v923_v40 = vsel %vm754_vm0, %v11065_v35, -inf }
 0x244   : > { %v1925_v46 = vsel %vm1919_vm6, %v1892_v7, %v1546_v42 }
 0x245   : > { %1431 = vmax.xlane.f32.xlu0 %v1430_v43 }
 0x246   : > { %1608 = vmax.xlane.f32.xlu1 %v1607_v44  ;;  %v1723_v49 = vpop.xlane.xlu0 %1722 }
 0x247   : > { %v781_v50 = vpop.xlane.xlu1 %780  ;;  %v15152_v53 = vsel %vm1952_vm7, %v1941_v9, %v1723_v49 }
 0x249   : > { %1686 = vmax.xlane.f32.xlu0 %v1685_v51 }
 0x24a   : > { %843 = vmax.xlane.f32.xlu1 %v842_v52  ;;  %v910_v60 = vpop.xlane.xlu0 %909 }
 0x24b   : > { %v1087_v62 = vpop.xlane.xlu1 %1086  ;;  %v1763_v2 = vsel %vm1754_vm1, %v781_v50, %v910_v60 }
 0x24c   : > { %v1812_v3 = vsel %vm1787_vm2, %v1779_v26, %v1087_v62  ;;  %v11270_v26 = vld [vmem:[%s14646_s3 + $0x7d0] sm:$0xff] }
 0x24d   : > { %972 = vmax.xlane.f32.xlu0 %v971_v63  ;;  %v1736_v31 = vsel %vm754_vm0, %v11270_v26, -inf  ;;  %v1433_v63 = vsel %vm754_vm0, %v11191_v56, -inf  ;;  %v11145_v26 = vld [vmem:[%s14646_s3 + $0x3e8] sm:$0xff] }
 0x24e   : > { %1050 = vmax.xlane.f32.xlu1 %v1049_v1  ;;  %v1165_v7 = vpop.xlane.xlu0 %1164  ;;  %v1610_v1 = vsel %vm754_vm0, %v11239_v58, -inf  ;;  %v11066_v58 = vld [vmem:[%s14646_s3 + $0x170] sm:$0xff] }
 0x24f   : > { %v1342_v9 = vpop.xlane.xlu1 %1341  ;;  %v1828_v12 = vsel %vm1820_vm3, %v1795_v27, %v1165_v7  ;;  %v735_v27 = vld [vmem:[%s14646_s3 + $0x68] sm:$0xff] }
 0x250   : > { %v1877_v13 = vsel %vm1853_vm4, %v1844_v36, %v1342_v9  ;;  %v794_v33 = vsel %vm754_vm0, %v735_v27, -inf  ;;  %v11113_v36 = vld [vmem:[%s14646_s3 + $0x2e8] sm:$0xff]  ;;  %v11160_v27 = vld [vmem:[%s14646_s3 + $0x460] sm:$0xff] }
 0x251   : > { %1227 = vmax.xlane.f32.xlu0 %v1226_v10  ;;  %v1100_v42 = vsel %vm754_vm0, %v11113_v36, -inf  ;;  %v1688_v10 = vsel %vm754_vm0, %v11254_v6, -inf  ;;  %v11208_v36 = vld [vmem:[%s14646_s3 + $0x5e0] sm:$0xff] }
 0x252   : > { %1305 = vmax.xlane.f32.xlu1 %v1304_v11  ;;  %v1420_v17 = vpop.xlane.xlu0 %1419 }
 0x253   : > { %v1597_v18 = vpop.xlane.xlu1 %1596  ;;  %v1893_v24 = vsel %vm1886_vm5, %v1860_v37, %v1420_v17 }
 0x254   : > { %v1942_v25 = vsel %vm1919_vm6, %v1909_v45, %v1597_v18  ;;  %v11128_v45 = vld [vmem:[%s14646_s3 + $0x360] sm:$0xff]  ;;  %v974_v18 = vsel %vm754_vm0, %v11082_v14, -inf }
 0x255   : > { %1482 = vmax.xlane.f32.xlu0 %v1481_v20  ;;  %v1178_v49 = vsel %vm754_vm0, %v11128_v45, -inf  ;;  %v1052_v20 = vsel %vm754_vm0, %v11097_v15, -inf }
 0x256   : > { %1560 = vmax.xlane.f32.xlu1 %v1559_v21  ;;  %v1675_v29 = vpop.xlane.xlu0 %1674 }
 0x257   : > { %v832_v30 = vpop.xlane.xlu1 %831  ;;  %v15177_v34 = vsel %vm1952_vm7, %v1925_v46, %v1675_v29  ;;  %v11176_v46 = vld [vmem:[%s14646_s3 + $0x4e0] sm:$0xff] }
 0x258   : > { %v1355_v50 = vsel %vm754_vm0, %v11176_v46, -inf }
 0x259   : > { %1737 = vmax.xlane.f32.xlu0 %v1736_v31  ;;  %v1307_v31 = vsel %vm754_vm0, %v11160_v27, -inf }
 0x25a   : > { %795 = vmax.xlane.f32.xlu1 %v794_v33  ;;  %v961_v38 = vpop.xlane.xlu0 %960 }
 0x25b   : > { %v1039_v39 = vpop.xlane.xlu1 %1038  ;;  %v1780_v43 = vsel %vm1754_vm1, %v832_v30, %v961_v38  ;;  %v1229_v30 = vsel %vm754_vm0, %v11145_v26, -inf  ;;  %v11223_v38 = vld [vmem:[%s14646_s3 + $0x658] sm:$0xff] }
 0x25c   : > { %v1796_v44 = vsel %vm1787_vm2, %v1763_v2, %v1039_v39 }
 0x25d   : > { %924 = vmax.xlane.f32.xlu0 %v923_v40 }
 0x25e   : > { %1101 = vmax.xlane.f32.xlu1 %v1100_v42  ;;  %v1216_v47 = vpop.xlane.xlu0 %1215  ;;  %v1484_v42 = vsel %vm754_vm0, %v11208_v36, -inf }
 0x25f   : > { %v1294_v48 = vpop.xlane.xlu1 %1293  ;;  %v1845_v51 = vsel %vm1820_vm3, %v1812_v3, %v1216_v47  ;;  %v752_v3 = vld [vmem:[%s14646_s3 + $0xf0] sm:$0xff]  ;;  %v11271_v47 = vld [vmem:[%s14646_s3 + $0x7d8] sm:$0xff] }
 0x260   : > { %v1861_v52 = vsel %vm1853_vm4, %v1828_v12, %v1294_v48  ;;  %v845_v11 = vsel %vm754_vm0, %v752_v3, -inf  ;;  %v11129_v3 = vld [vmem:[%s14646_s3 + $0x368] sm:$0xff] }
 0x261   : > { %1179 = vmax.xlane.f32.xlu0 %v1178_v49 }
 0x262   : > { %1356 = vmax.xlane.f32.xlu1 %v1355_v50  ;;  %v1471_v60 = vpop.xlane.xlu0 %1470  ;;  %v1739_v50 = vsel %vm754_vm0, %v11271_v47, -inf }
 0x263   : > { %v1549_v62 = vpop.xlane.xlu1 %1548  ;;  %v1910_v2 = vsel %vm1886_vm5, %v1877_v13, %v1471_v60  ;;  %v11114_v60 = vld [vmem:[%s14646_s3 + $0x2f0] sm:$0xff] }
 0x264   : > { %v1926_v4 = vsel %vm1919_vm6, %v1893_v24, %v1549_v62 }
 0x265   : > { %1434 = vmax.xlane.f32.xlu0 %v1433_v63 }
 0x266   : > { %1611 = vmax.xlane.f32.xlu1 %v1610_v1  ;;  %v1726_v7 = vpop.xlane.xlu0 %1725  ;;  %v926_v1 = vsel %vm754_vm0, %v11066_v58, -inf }
 0x267   : > { %v784_v9 = vpop.xlane.xlu1 %783  ;;  %v15204_v12 = vsel %vm1952_vm7, %v1942_v25, %v1726_v7  ;;  %v11177_v7 = vld [vmem:[%s14646_s3 + $0x4e8] sm:$0xff] }
 0x268   : > { %v1358_v14 = vsel %vm754_vm0, %v11177_v7, -inf }
 0x269   : > { %1689 = vmax.xlane.f32.xlu0 %v1688_v10 }
 0x26a   : > { %846 = vmax.xlane.f32.xlu1 %v845_v11  ;;  %v913_v13 = vpop.xlane.xlu0 %912  ;;  %v1181_v11 = vsel %vm754_vm0, %v11129_v3, -inf }
 0x26b   : > { %v1090_v17 = vpop.xlane.xlu1 %1089  ;;  %v1764_v21 = vsel %vm1754_vm1, %v784_v9, %v913_v13 }
 0x26c   : > { %v1813_v24 = vsel %vm1787_vm2, %v1780_v43, %v1090_v17  ;;  %v1562_v43 = vsel %vm754_vm0, %v11223_v38, -inf  ;;  %v11192_v17 = vld [vmem:[%s14646_s3 + $0x560] sm:$0xff] }
 0x26d   : > { %975 = vmax.xlane.f32.xlu0 %v974_v18  ;;  %v11240_v18 = vld [vmem:[%s14646_s3 + $0x6e0] sm:$0xff]  ;;  %v1436_v26 = vsel %vm754_vm0, %v11192_v17, -inf }
 0x26e   : > { %1053 = vmax.xlane.f32.xlu1 %v1052_v20  ;;  %v1168_v25 = vpop.xlane.xlu0 %1167  ;;  %v1613_v27 = vsel %vm754_vm0, %v11240_v18, -inf }
 0x26f   : > { %v1345_v29 = vpop.xlane.xlu1 %1344  ;;  %v1829_v33 = vsel %vm1820_vm3, %v1796_v44, %v1168_v25  ;;  %v736_v44 = vld [vmem:[%s14646_s3 + $0x70] sm:$0xff] }
 0x270   : > { %v1878_v35 = vsel %vm1853_vm4, %v1845_v51, %v1345_v29  ;;  %v797_v51 = vsel %vm754_vm0, %v736_v44, -inf }
 0x271   : > { %1230 = vmax.xlane.f32.xlu0 %v1229_v30  ;;  %v11255_v30 = vld [vmem:[%s14646_s3 + $0x758] sm:$0xff] }
 0x272   : > { %1308 = vmax.xlane.f32.xlu1 %v1307_v31  ;;  %v1423_v39 = vpop.xlane.xlu0 %1422  ;;  %v1691_v36 = vsel %vm754_vm0, %v11255_v30, -inf }
 0x273   : > { %v1600_v40 = vpop.xlane.xlu1 %1599  ;;  %v1894_v45 = vsel %vm1886_vm5, %v1861_v52, %v1423_v39 }
 0x274   : > { %v1943_v46 = vsel %vm1919_vm6, %v1910_v2, %v1600_v40  ;;  %v1103_v2 = vsel %vm754_vm0, %v11114_v60, -inf  ;;  %v11083_v40 = vld [vmem:[%s14646_s3 + $0x1f8] sm:$0xff] }
 0x275   : > { %1485 = vmax.xlane.f32.xlu0 %v1484_v42  ;;  %v11098_v42 = vld [vmem:[%s14646_s3 + $0x270] sm:$0xff] }
 0x276   : > { %1563 = vmax.xlane.f32.xlu1 %v1562_v43  ;;  %v1678_v48 = vpop.xlane.xlu0 %1677  ;;  %v1055_v47 = vsel %vm754_vm0, %v11098_v42, -inf }
 0x277   : > { %v835_v49 = vpop.xlane.xlu1 %834  ;;  %v15229_v56 = vsel %vm1952_vm7, %v1926_v4, %v1678_v48 }
 0x279   : > { %1740 = vmax.xlane.f32.xlu0 %v1739_v50 }
 0x27a   : > { %798 = vmax.xlane.f32.xlu1 %v797_v51  ;;  %v964_v62 = vpop.xlane.xlu0 %963 }
 0x27b   : > { %v1042_v63 = vpop.xlane.xlu1 %1041  ;;  %v1781_v6 = vsel %vm1754_vm1, %v835_v49, %v964_v62  ;;  %v11146_v49 = vld [vmem:[%s14646_s3 + $0x3f0] sm:$0xff] }
 0x27c   : > { %v1797_v4 = vsel %vm1787_vm2, %v1764_v21, %v1042_v63  ;;  %v1232_v58 = vsel %vm754_vm0, %v11146_v49, -inf }
 0x27d   : > { %927 = vmax.xlane.f32.xlu0 %v926_v1  ;;  %v11209_v1 = vld [vmem:[%s14646_s3 + $0x5e8] sm:$0xff] }
 0x27e   : > { %1104 = vmax.xlane.f32.xlu1 %v1103_v2  ;;  %v1219_v9 = vpop.xlane.xlu0 %1218  ;;  %v11224_v2 = vld [vmem:[%s14646_s3 + $0x660] sm:$0xff]  ;;  %v1487_v7 = vsel %vm754_vm0, %v11209_v1, -inf }
 0x27f   : > { %v1297_v10 = vpop.xlane.xlu1 %1296  ;;  %v1846_v15 = vsel %vm1820_vm3, %v1813_v24, %v1219_v9  ;;  %v753_v24 = vld [vmem:[%s14646_s3 + $0xf8] sm:$0xff]  ;;  %v1565_v9 = vsel %vm754_vm0, %v11224_v2, -inf }
 0x280   : > { %v1862_v13 = vsel %vm1853_vm4, %v1829_v33, %v1297_v10  ;;  %v848_v38 = vsel %vm754_vm0, %v753_v24, -inf }
 0x281   : > { %1182 = vmax.xlane.f32.xlu0 %v1181_v11  ;;  %v11272_v11 = vld [vmem:[%s14646_s3 + $0x7e0] sm:$0xff] }
 0x282   : > { %1359 = vmax.xlane.f32.xlu1 %v1358_v14  ;;  %v1474_v20 = vpop.xlane.xlu0 %1473  ;;  %v737_v14 = vld [vmem:[%s14646_s3 + $0x78] sm:$0xff]  ;;  %v1742_v18 = vsel %vm754_vm0, %v11272_v11, -inf }
 0x283   : > { %v1552_v21 = vpop.xlane.xlu1 %1551  ;;  %v1911_v25 = vsel %vm1886_vm5, %v1878_v35, %v1474_v20  ;;  %v800_v20 = vsel %vm754_vm0, %v737_v14, -inf }
 0x284   : > { %v1927_v29 = vsel %vm1919_vm6, %v1894_v45, %v1552_v21  ;;  %v977_v45 = vsel %vm754_vm0, %v11083_v40, -inf }
 0x285   : > { %1437 = vmax.xlane.f32.xlu0 %v1436_v26  ;;  %v11115_v26 = vld [vmem:[%s14646_s3 + $0x2f8] sm:$0xff] }
 0x286   : > { %1614 = vmax.xlane.f32.xlu1 %v1613_v27  ;;  %v1729_v31 = vpop.xlane.xlu0 %1728  ;;  %v13046_v27 = vld [vmem:[#allocation2 + $0x20] ss:$8 sps:$4 sm:$0xff]  }
 0x287   : > { %v787_v33 = vpop.xlane.xlu1 %786  ;;  %v15256_v39 = vsel %vm1952_vm7, %v1943_v46, %v1729_v31  ;;  %v11161_v46 = vld [vmem:[%s14646_s3 + $0x468] sm:$0xff]  ;;  %v1106_v31 = vsel %vm754_vm0, %v11115_v26, -inf }
 0x288   : > { %v1310_v60 = vsel %vm754_vm0, %v11161_v46, -inf }
 0x289   : > { %1692 = vmax.xlane.f32.xlu0 %v1691_v36  ;;  %v11130_v36 = vld [vmem:[%s14646_s3 + $0x370] sm:$0xff] }
 0x28a   : > { %849 = vmax.xlane.f32.xlu1 %v848_v38  ;;  %v916_v35 = vpop.xlane.xlu0 %915  ;;  %v11178_v38 = vld [vmem:[%s14646_s3 + $0x4f0] sm:$0xff] }
 0x28b   : > { %v1093_v43 = vpop.xlane.xlu1 %1092  ;;  %v1765_v44 = vsel %vm1754_vm1, %v787_v33, %v916_v35  ;;  %v1184_v35 = vsel %vm754_vm0, %v11130_v36, -inf }
 0x28c   : > { %v15264_v48 = vsel %vm1787_vm2, %v1781_v6, %v1093_v43  ;;  %v1361_v43 = vsel %vm754_vm0, %v11178_v38, -inf }
 0x28d   : > { %978 = vmax.xlane.f32.xlu0 %v977_v45  ;;  %v11193_v45 = vld [vmem:[%s14646_s3 + $0x568] sm:$0xff] }
 0x28e   : > { %1056 = vmax.xlane.f32.xlu1 %v1055_v47  ;;  %v1171_v50 = vpop.xlane.xlu0 %1170  ;;  %v11241_v47 = vld [vmem:[%s14646_s3 + $0x6e8] sm:$0xff]  ;;  %v1439_v46 = vsel %vm754_vm0, %v11193_v45, -inf  ;;  %v11194_v45 = vld [vmem:[%s14646_s3 + $0x570] sm:$0xff] }
 0x28f   : > { %v1348_v51 = vpop.xlane.xlu1 %1347  ;;  %v15271_v62 = vsel %vm1820_vm3, %v1797_v4, %v1171_v50  ;;  %v1616_v50 = vsel %vm754_vm0, %v11241_v47, -inf }
 0x290   : > { %v15274_v63 = vsel %vm1853_vm4, %v1846_v15, %v1348_v51  ;;  %v11256_v51 = vld [vmem:[%s14646_s3 + $0x760] sm:$0xff] }
 0x291   : > { %1233 = vmax.xlane.f32.xlu0 %v1232_v58  ;;  %v11099_v58 = vld [vmem:[%s14646_s3 + $0x278] sm:$0xff]  ;;  %v1694_v2 = vsel %vm754_vm0, %v11256_v51, -inf }
 0x292   : > { %1311 = vmax.xlane.f32.xlu1 %v1310_v60  ;;  %v1426_v6 = vpop.xlane.xlu0 %1425 }
 0x293   : > { %v1603_v3 = vpop.xlane.xlu1 %1602  ;;  %v15281_v10 = vsel %vm1886_vm5, %v1862_v13, %v1426_v6  ;;  %v11067_v13 = vld [vmem:[%s14646_s3 + $0x178] sm:$0xff]  ;;  %v1058_v6 = vsel %vm754_vm0, %v11099_v58, -inf  ;;  %v1442_v58 = vsel %vm754_vm0, %v11194_v45, -inf }
 0x294   : > { %v15284_v4 = vsel %vm1919_vm6, %v1911_v25, %v1603_v3  ;;  %v929_v24 = vsel %vm754_vm0, %v11067_v13, -inf  ;;  %v11147_v3 = vld [vmem:[%s14646_s3 + $0x3f8] sm:$0xff] }
 0x295   : > { %1488 = vmax.xlane.f32.xlu0 %v1487_v7  ;;  %v11162_v7 = vld [vmem:[%s14646_s3 + $0x470] sm:$0xff]  ;;  %v1235_v14 = vsel %vm754_vm0, %v11147_v3, -inf }
 0x296   : > { %1566 = vmax.xlane.f32.xlu1 %v1565_v9  ;;  %v1681_v15 = vpop.xlane.xlu0 %1680  ;;  %v11242_v3 = vld [vmem:[%s14646_s3 + $0x6f0] sm:$0xff] }
 0x297   : > { %v838_v17 = vpop.xlane.xlu1 %837  ;;  %v15291_v21 = vsel %vm1952_vm7, %v1927_v29, %v1681_v15  ;;  %v1313_v15 = vsel %vm754_vm0, %v11162_v7, -inf  ;;  %v11257_v7 = vld [vmem:[%s14646_s3 + $0x768] sm:$0xff] }
 0x299   : > { %1743 = vmax.xlane.f32.xlu0 %v1742_v18  ;;  %v11225_v18 = vld [vmem:[%s14646_s3 + $0x668] sm:$0xff] }
 0x29a   : > { %801 = vmax.xlane.f32.xlu1 %v800_v20  ;;  %v967_v25 = vpop.xlane.xlu0 %966 }
 0x29b   : > { %v1045_v30 = vpop.xlane.xlu1 %1044  ;;  %v15300_v33 = vsel %vm1754_vm1, %v838_v17, %v967_v25  ;;  %v11210_v17 = vld [vmem:[%s14646_s3 + $0x5f0] sm:$0xff]  ;;  %v1568_v25 = vsel %vm754_vm0, %v11225_v18, -inf }
 0x29c   : > { %v15303_v29 = vsel %vm1787_vm2, %v1765_v44, %v1045_v30  ;;  %v1490_v26 = vsel %vm754_vm0, %v11210_v17, -inf  ;;  %v11273_v30 = vld [vmem:[%s14646_s3 + $0x7e8] sm:$0xff]  ;;  %v11211_v17 = vld [vmem:[%s14646_s3 + $0x5f8] sm:$0xff] }
 0x29d   : > { %930 = vmax.xlane.f32.xlu0 %v929_v24  ;;  %v11131_v24 = vld [vmem:[%s14646_s3 + $0x378] sm:$0xff]  ;;  %v1745_v38 = vsel %vm754_vm0, %v11273_v30, -inf  ;;  %v1493_v30 = vsel %vm754_vm0, %v11211_v17, -inf }
 0x29e   : > { %1107 = vmax.xlane.f32.xlu1 %v1106_v31  ;;  %v15307_v40 = vpop.xlane.xlu0 %1221 }
 0x29f   : > { %v15309_v42 = vpop.xlane.xlu1 %1299 }
 0x2a1   : > { %1185 = vmax.xlane.f32.xlu0 %v1184_v35  ;;  %v1187_v35 = vsel %vm754_vm0, %v11131_v24, -inf  ;;  %v11226_v24 = vld [vmem:[%s14646_s3 + $0x670] sm:$0xff] }
 0x2a2   : > { %1362 = vmax.xlane.f32.xlu1 %v1361_v43  ;;  %v15315_v44 = vpop.xlane.xlu0 %1476  ;;  %v11179_v43 = vld [vmem:[%s14646_s3 + $0x4f8] sm:$0xff]  ;;  %v1571_v45 = vsel %vm754_vm0, %v11226_v24, -inf }
 0x2a3   : > { %v1555_v49 = vpop.xlane.xlu1 %1554  ;;  %v1364_v51 = vsel %vm754_vm0, %v11179_v43, -inf }
 0x2a4   : > { %v1928_v47 = vsel %vm1919_vm6, %v15281_v10, %v1555_v49 }
 0x2a5   : > { %1440 = vmax.xlane.f32.xlu0 %v1439_v46 }
 0x2a6   : > { %1617 = vmax.xlane.f32.xlu1 %v1616_v50  ;;  %v1732_v60 = vpop.xlane.xlu0 %1731 }
 0x2a7   : > { %v15321_v1 = vpop.xlane.xlu1 %789 }
 0x2a9   : > { %1695 = vmax.xlane.f32.xlu0 %v1694_v2  ;;  %v15359_v2 = vsel %vm1952_vm7, %v15284_v4, %v1732_v60  ;;  %v1697_v4 = vsel %vm754_vm0, %v11257_v7, -inf  ;;  %v11163_v60 = vld [vmem:[%s14646_s3 + $0x478] sm:$0xff] }
 0x2aa   : > { %1059 = vmax.xlane.f32.xlu1 %v1058_v6  ;;  %v15327_v9 = vpop.xlane.xlu0 %918 }
 0x2ab   : > { %v15329_v11 = vpop.xlane.xlu1 %1095 }
 0x2ad   : > { %1236 = vmax.xlane.f32.xlu0 %v1235_v14 }
 0x2ae   : > { %1314 = vmax.xlane.f32.xlu1 %v1313_v15  ;;  %v15335_v20 = vpop.xlane.xlu0 %1173  ;;  %v1619_v15 = vsel %vm754_vm0, %v11242_v3, -inf }
 0x2af   : > { %v15337_v13 = vpop.xlane.xlu1 %1350 }
 0x2b1   : > { %1491 = vmax.xlane.f32.xlu0 %v1490_v26 }
 0x2b2   : > { %1569 = vmax.xlane.f32.xlu1 %v1568_v25  ;;  %v15343_v31 = vpop.xlane.xlu0 %1428  ;;  %v1316_v25 = vsel %vm754_vm0, %v11163_v60, -inf  ;;  %v11227_v60 = vld [vmem:[%s14646_s3 + $0x678] sm:$0xff] }
 0x2b3   : > { %v15345_v36 = vpop.xlane.xlu1 %1605  ;;  %v1574_v24 = vsel %vm754_vm0, %v11227_v60, -inf  ;;  %v1912_v60 = vsel %vm1886_vm5, %v15274_v63, %v15315_v44  ;;  %v13044_v63 = vld [vmem:[#allocation2 + $0x24] ss:$8 sps:$4 sm:$0xff]  }
 0x2b5   : > { %1746 = vmax.xlane.f32.xlu0 %v1745_v38  ;;  %v11274_v38 = vld [vmem:[%s14646_s3 + $0x7f0] sm:$0xff] }
 0x2b6   : > { %1188 = vmax.xlane.f32.xlu1 %v1187_v35  ;;  %v1684_v46 = vpop.xlane.xlu0 %1683 }
 0x2b7   : > { %v15353_v50 = vpop.xlane.xlu1 %840  ;;  %v15362_v6 = vsel %vm1952_vm7, %v1928_v47, %v1684_v46  ;;  %v1748_v47 = vsel %vm754_vm0, %v11274_v38, -inf  ;;  %v11195_v46 = vld [vmem:[%s14646_s3 + $0x578] sm:$0xff] }
 0x2b8   : > { %v1445_v7 = vsel %vm754_vm0, %v11195_v46, -inf  ;;  %v11275_v38 = vld [vmem:[%s14646_s3 + $0x7f8] sm:$0xff] }
 0x2b9   : > { %1365 = vmax.xlane.f32.xlu0 %v1364_v51  ;;  %v11243_v51 = vld [vmem:[%s14646_s3 + $0x6f8] sm:$0xff] }
 0x2ba   : > { %1443 = vmax.xlane.f32.xlu1 %v1442_v58  ;;  %v15368_v49 = vpop.xlane.xlu0 %969 }
 0x2bb   : > { %v15370_v14 = vpop.xlane.xlu1 %1047 }
 0x2bd   : > { %1620 = vmax.xlane.f32.xlu0 %v1619_v15  ;;  %v1622_v15 = vsel %vm754_vm0, %v11243_v51, -inf  ;;  %v1751_v51 = vsel %vm754_vm0, %v11275_v38, -inf }
 0x2be   : > { %1698 = vmax.xlane.f32.xlu1 %v1697_v4  ;;  %v15376_v18 = vpop.xlane.xlu0 %1224  ;;  %v11258_v4 = vld [vmem:[%s14646_s3 + $0x770] sm:$0xff] }
 0x2bf   : > { %v15378_v26 = vpop.xlane.xlu1 %1302 }
 0x2c1   : > { %1317 = vmax.xlane.f32.xlu0 %v1316_v25 }
 0x2c2   : > { %1494 = vmax.xlane.f32.xlu1 %v1493_v30  ;;  %v15384_v35 = vpop.xlane.xlu0 %1479  ;;  %v1700_v30 = vsel %vm754_vm0, %v11258_v4, -inf  ;;  %v1863_v4 = vsel %vm1853_vm4, %v15271_v62, %v15309_v42 }
 0x2c3   : > { %v1558_v43 = vpop.xlane.xlu1 %1557 }
 0x2c5   : > { %1572 = vmax.xlane.f32.xlu0 %v1571_v45  ;;  %v11259_v45 = vld [vmem:[%s14646_s3 + $0x778] sm:$0xff] }
 0x2c6   : > { %1749 = vmax.xlane.f32.xlu1 %v1748_v47  ;;  %v1735_v58 = vpop.xlane.xlu0 %1734 }
 0x2c7   : > { %v15390_v3 = vpop.xlane.xlu1 %792 }
 0x2c9   : > { %1446 = vmax.xlane.f32.xlu0 %v1445_v7  ;;  %v1703_v7 = vsel %vm754_vm0, %v11259_v45, -inf }
 0x2ca   : > { %1623 = vmax.xlane.f32.xlu1 %v1622_v15  ;;  %v15396_v17 = vpop.xlane.xlu0 %921 }
 0x2cb   : > { %v15398_v25 = vpop.xlane.xlu1 %1098 }
 0x2cd   : > { %1701 = vmax.xlane.f32.xlu0 %v1700_v30  ;;  %v1896_v30 = vsel %vm1886_vm5, %v1863_v4, %v15343_v31 }
 0x2ce   : > { %1575 = vmax.xlane.f32.xlu1 %v1574_v24  ;;  %v15404_v47 = vpop.xlane.xlu0 %1176  ;;  %v1945_v24 = vsel %vm1919_vm6, %v1912_v60, %v15345_v36  ;;  %v1929_v38 = vsel %vm1919_vm6, %v1896_v30, %v1558_v43  ;;  %v13038_v60 = vld [vmem:[#allocation2 + $0x4] ss:$8 sps:$4 sm:$0xff]   ;;  %v13041_v30 = vld [vmem:[#allocation2 + $0x14] ss:$8 sps:$4 sm:$0xff]  }
 0x2cf   : > { %v15406_v46 = vpop.xlane.xlu1 %1353  ;;  %2255 = vmatprep.subr.bf16.mxu0 %v13038_v60 }
 0x2d1   : > { %1752 = vmax.xlane.f32.xlu0 %v1751_v51 }
 0x2d2   : > { %1704 = vmax.xlane.f32.xlu1 %v1703_v7  ;;  %v1432_v15 = vpop.xlane.xlu0 %1431  ;;  %v15424_v7 = vsel %vm1952_vm7, %v1945_v24, %v1735_v58  ;;  %v13040_v58 = vld [vmem:[#allocation2] ss:$8 sps:$4 sm:$0xff]   ;;  %v13043_v24 = vld [vmem:[#allocation2 + $0x10] ss:$8 sps:$4 sm:$0xff]  }
 0x2d3   : > { %v1609_v10 = vpop.xlane.xlu1 %1608  ;;  %2256 = vmatpush1.bf16.msra.mxu0 %v13040_v58  ;;  %v13050_v58 = vld [vmem:[#allocation2 + $0x44] ss:$8 sps:$4 sm:$0xff]  }
 0x2d4   : > { %2257 = vmatprep.subr.bf16.mxu0 %v13041_v30 }
 0x2d6   : > { %v1687_v45 = vpop.xlane.xlu0 %1686 }
 0x2d7   : > { %v15421_v51 = vpop.xlane.xlu1 %843  ;;  %v15427_v62 = vsel %vm1952_vm7, %v1929_v38, %v1687_v45  ;;  %2258 = vmatpush1.bf16.msra.mxu0 %v13043_v24 }
 0x2d8   : > { %18757 = vst [vmem:[#allocation27_spill] sm:$0xff] %v15421_v51  ;;  %2259 = vmatprep.subr.bf16.mxu0 %v13044_v63  ;;  %v1847_v63 = vsel %vm1820_vm3, %v15264_v48, %v15307_v40 }
 0x2da   : > { %v15431_v42 = vpop.xlane.xlu0 %972 }
 0x2db   : > { %v15433_v44 = vpop.xlane.xlu1 %1050  ;;  %2260 = vmatpush1.bf16.msra.mxu0 %v13046_v27  ;;  %v1831_v27 = vsel %vm1820_vm3, %v15303_v29, %v15335_v20  ;;  %v13056_v29 = vld [vmem:[#allocation2 + $0x64] ss:$8 sps:$4 sm:$0xff]  }
 0x2dc   : > { %2261 = vmatprep.subr.bf16.mxu0 %v13047_v19  ;;  %v1880_v19 = vsel %vm1853_vm4, %v1847_v63, %v15337_v13 }
 0x2de   : > { %v15435_v31 = vpop.xlane.xlu0 %1227 }
 0x2df   : > { %v15437_v36 = vpop.xlane.xlu1 %1305  ;;  %2262 = vmatpush1.bf16.msra.mxu0 %v13049_v8  ;;  %v1864_v8 = vsel %vm1853_vm4, %v1831_v27, %v15378_v26  ;;  %v18762_v27 = vpack.i.bf16 %v14969_v55, %v14944_v22  ;;  %v18764_v22 = vpack.i.bf16 %v15073_v5, %v15048_v32  ;;  %v18766_v5 = vpack.i.bf16 %v15177_v34, %v15152_v53 }
 0x2e0   : > { %2263 = vmatprep.subr.bf16.mxu0 %v13050_v58  ;;  %v1897_v58 = vsel %vm1886_vm5, %v1864_v8, %v1432_v15  ;;  %v13065_v8 = vld [vmem:[#allocation2 + $0x94] ss:$8 sps:$4 sm:$0xff]   ;;  %v18768_v53 = vpack.i.bf16 %v15291_v21, %v15256_v39 }
 0x2e2   : > { %v15439_v43 = vpop.xlane.xlu0 %1482 }
 0x2e3   : > { %v1561_v4 = vpop.xlane.xlu1 %1560  ;;  %2264 = vmatpush1.bf16.msra.mxu0 %v13052_v59  ;;  %v13058_v59 = vld [vmem:[#allocation2 + $0x60] ss:$8 sps:$4 sm:$0xff]  }
 0x2e4   : > { %v1930_v48 = vsel %vm1919_vm6, %v1897_v58, %v1561_v4  ;;  %2265 = vmatprep.subr.bf16.mxu0 %v13053_v57  ;;  %v13061_v57 = vld [vmem:[#allocation2 + $0x70] ss:$8 sps:$4 sm:$0xff]  }
 0x2e5   : > { %v13067_v58 = vld [vmem:[#allocation2 + $0x90] ss:$8 sps:$4 sm:$0xff]  }
 0x2e6   : > { %v1738_v38 = vpop.xlane.xlu0 %1737 }
 0x2e7   : > { %v15441_v45 = vpop.xlane.xlu1 %795 }
 0x2e8   : > { %18758 = vst [vmem:[#allocation28_spill] sm:$0xff] %v15441_v45  ;;  %v13055_v45 = vld [vmem:[#allocation2 + $0x50] ss:$8 sps:$4 sm:$0xff]  }
 0x2e9   : > { %2266 = vmatpush1.bf16.msra.mxu0 %v13055_v45  ;;  %v13064_v45 = vld [vmem:[#allocation2 + $0x80] ss:$8 sps:$4 sm:$0xff]  }
 0x2ea   : > { %v15443_v52 = vpop.xlane.xlu0 %924  ;;  %2267 = vmatprep.subr.bf16.mxu0 %v13056_v29  ;;  %v13070_v29 = vld [vmem:[#allocation2 + $0xa0] ss:$8 sps:$4 sm:$0xff]  }
 0x2eb   : > { %18759 = vst [vmem:[#allocation29_spill] sm:$0xff] %v15443_v52  ;;  %v15445_v37 = vpop.xlane.xlu1 %1101 }
 0x2ec   : > { %18760 = vst [vmem:[#allocation30_spill] sm:$0xff] %v15445_v37  ;;  %v1913_v37 = vsel %vm1886_vm5, %v1880_v19, %v15384_v35 }
 0x2ed   : > { %v1946_v52 = vsel %vm1919_vm6, %v1913_v37, %v1609_v10  ;;  %v13059_v10 = vld [vmem:[#allocation2 + $0x74] ss:$8 sps:$4 sm:$0xff]   ;;  %2268 = vmatpush1.bf16.msra.mxu0 %v13058_v59 }
 0x2ee   : > { %v15447_v0 = vpop.xlane.xlu0 %1179  ;;  %v15473_v20 = vsel %vm1952_vm7, %v1946_v52, %v1738_v38  ;;  %v18761_v52 = vpack.i.bf16 %v14917_v54, %v14892_v23  ;;  %2269 = vmatprep.subr.bf16.mxu0 %v13059_v10  ;;  %v13062_v38 = vld [vmem:[#allocation2 + $0x84] ss:$8 sps:$4 sm:$0xff]   ;;  %v18763_v23 = vpack.i.bf16 %v15021_v61, %v14998_v28  ;;  %v13071_v10 = vld [vmem:[#allocation2 + $0xb4] ss:$8 sps:$4 sm:$0xff]   ;;  %v18765_v61 = vpack.i.bf16 %v15125_v16, %v15100_v41 }
 0x2ef   : > { %v15449_v60 = vpop.xlane.xlu1 %1356  ;;  %v18767_v16 = vpack.i.bf16 %v15229_v56, %v15204_v12  ;;  %v18769_v12 = vpack.i.bf16 %v15362_v6, %v15359_v2 }
 0x2f1   : > { %2270 = vmatpush1.bf16.msra.mxu0 %v13061_v57  ;;  %v13073_v57 = vld [vmem:[#allocation2 + $0xb0] ss:$8 sps:$4 sm:$0xff]  }
 0x2f2   : > { %v15451_v30 = vpop.xlane.xlu0 %1434  ;;  %2271 = vmatprep.subr.bf16.mxu0 %v13062_v38  ;;  %v13074_v38 = vld [vmem:[#allocation2 + $0xc4] ss:$8 sps:$4 sm:$0xff]  }
 0x2f3   : > { %v15453_v24 = vpop.xlane.xlu1 %1611 }
 0x2f5   : > { %2272 = vmatpush1.bf16.msra.mxu0 %v13064_v45  ;;  %v13076_v45 = vld [vmem:[#allocation2 + $0xc0] ss:$8 sps:$4 sm:$0xff]  }
 0x2f6   : > { %v1690_v40 = vpop.xlane.xlu0 %1689  ;;  %2273 = vmatprep.subr.bf16.mxu0 %v13065_v8  ;;  %v13077_v8 = vld [vmem:[#allocation2 + $0xd4] ss:$8 sps:$4 sm:$0xff]  }
 0x2f7   : > { %v15470_v51 = vpop.xlane.xlu1 %846  ;;  %v15476_v13 = vsel %vm1952_vm7, %v1930_v48, %v1690_v40  ;;  %v13068_v40 = vld [vmem:[#allocation2 + $0xa4] ss:$8 sps:$4 sm:$0xff]  }
 0x2f8   : > { %v12991_v26 = vpack.i.bf16 %v15476_v13, %v15473_v20 }
 0x2f9   : > { %2274 = vmatpush1.bf16.msra.mxu0 %v13067_v58  ;;  %v13079_v58 = vld [vmem:[#allocation2 + $0xd0] ss:$8 sps:$4 sm:$0xff]  }
 0x2fa   : > { %v15480_v35 = vpop.xlane.xlu0 %975  ;;  %2275 = vmatprep.subr.bf16.mxu0 %v13068_v40  ;;  %v13080_v40 = vld [vmem:[#allocation2 + $0xe4] ss:$8 sps:$4 sm:$0xff]  }
 0x2fb   : > { %v15482_v37 = vpop.xlane.xlu1 %1053 }
 0x2fd   : > { %2276 = vmatpush1.bf16.msra.mxu0 %v13070_v29  ;;  %v13082_v29 = vld [vmem:[#allocation2 + $0xe0] ss:$8 sps:$4 sm:$0xff]  }
 0x2fe   : > { %v15484_v15 = vpop.xlane.xlu0 %1230  ;;  %12972 = vxpose.xlu0.b32.start [1/16] (narrow) %v18761_v52, 8  ;;  %2277 = vmatprep.subr.bf16.mxu0 %v13071_v10 }
 0x2ff   : > { %v15489_v4 = vpop.xlane.xlu1 %1308 }
 0x301   : > { %2278 = vmatpush1.bf16.msra.mxu0 %v13073_v57  ;;  %v1766_v57 = vsel %vm1754_vm1, %v15321_v1, %v15327_v9 }
 0x302   : > { %v15491_v63 = vpop.xlane.xlu0 %1485  ;;  %12974 = vxpose.xlu0.b32.cont [2/16] (narrow) %v18762_v27, 8  ;;  %2279 = vmatprep.subr.bf16.mxu0 %v13074_v38  ;;  %v1799_v39 = vsel %vm1787_vm2, %v1766_v57, %v15370_v14  ;;  %v18770_v38 = vpack.i.bf16 %v15427_v62, %v15424_v7 }
 0x303   : > { %v1564_v19 = vpop.xlane.xlu1 %1563  ;;  %v1832_v21 = vsel %vm1820_vm3, %v1799_v39, %v15404_v47 }
 0x304   : > { %v1865_v2 = vsel %vm1853_vm4, %v1832_v21, %v15437_v36 }
 0x305   : > { %2280 = vmatpush1.bf16.msra.mxu0 %v13076_v45  ;;  %v1898_v14 = vsel %vm1886_vm5, %v1865_v2, %v15451_v30  ;;  %v13083_v30 = vld [vmem:[#allocation2 + $0xf4] ss:$8 sps:$4 sm:$0xff]   ;;  %v13097_v2 = vld [vmem:[#allocation5 + $0x30] ss:$8 sps:$4 sm:$0xff]  }
 0x306   : > { %v15496_v48 = vpop.xlane.xlu0 %1740  ;;  %12976 = vxpose.xlu0.b32.cont [3/16] (narrow) %v18763_v23, 8  ;;  %2281 = vmatprep.subr.bf16.mxu0 %v13077_v8  ;;  %v13088_v8 = vld [vmem:[#allocation5] ss:$8 sps:$4 sm:$0xff]  }
 0x307   : > { %v15501_v54 = vpop.xlane.xlu1 %798 }
 0x309   : > { %2282 = vmatpush1.bf16.msra.mxu0 %v13079_v58  ;;  %v13089_v58 = vld [vmem:[#allocation5 + $0x14] ss:$8 sps:$4 sm:$0xff]  }
 0x30a   : > { %v15503_v59 = vpop.xlane.xlu0 %927  ;;  %12978 = vxpose.xlu0.b32.cont [4/16] (narrow) %v18764_v22, 8  ;;  %2283 = vmatprep.subr.bf16.mxu0 %v13080_v40 }
 0x30b   : > { %v15508_v55 = vpop.xlane.xlu1 %1104 }
 0x30d   : > { %2284 = vmatpush1.bf16.msra.mxu0 %v13082_v29 }
 0x30e   : > { %v15510_v28 = vpop.xlane.xlu0 %1182  ;;  %12980 = vxpose.xlu0.b32.cont [5/16] (narrow) %v18765_v61, 8  ;;  %v1815_v61 = vsel %vm1787_vm2, %v15300_v33, %v15329_v11  ;;  %v1931_v33 = vsel %vm1919_vm6, %v1898_v14, %v1564_v19  ;;  %v13085_v19 = vld [vmem:[#allocation2 + $0xf0] ss:$8 sps:$4 sm:$0xff]   ;;  %2285 = vmatprep.subr.bf16.mxu0 %v13083_v30  ;;  %v13107_v30 = vld [vmem:[#allocation5 + $0x74] ss:$8 sps:$4 sm:$0xff]  }
 0x30f   : > { %v15515_v52 = vpop.xlane.xlu1 %1359  ;;  %v1848_v9 = vsel %vm1820_vm3, %v1815_v61, %v15376_v18 }
 0x310   : > { %v1881_v47 = vsel %vm1853_vm4, %v1848_v9, %v15406_v46 }
 0x311   : > { %v1914_v11 = vsel %vm1886_vm5, %v1881_v47, %v15439_v43  ;;  %2286 = vmatpush1.bf16.msra.mxu0 %v13085_v19 }
 0x312   : > { %v15517_v32 = vpop.xlane.xlu0 %1437  ;;  %12982 = vxpose.xlu0.b32.cont [6/16] (narrow) %v18766_v5, 8  ;;  %v1947_v7 = vsel %vm1919_vm6, %v1914_v11, %v15453_v24  ;;  %v13086_v24 = vld [vmem:[#allocation5 + $0x4] ss:$8 sps:$4 sm:$0xff]  }
 0x313   : > { %v15522_v27 = vpop.xlane.xlu1 %1614  ;;  %v1980_v46 = vsel %vm1952_vm7, %v1947_v7, %v15496_v48  ;;  %2504 = vmatprep.subr.bf16.mxu1 %v13086_v24  ;;  %v13092_v48 = vld [vmem:[#allocation5 + $0x24] ss:$8 sps:$4 sm:$0xff]  }
 0x314   : > { %2505 = vmatpush1.bf16.msra.mxu1 %v13088_v8  ;;  %v13104_v11 = vld [vmem:[#allocation5 + $0x64] ss:$8 sps:$4 sm:$0xff]  }
 0x315   : > { %2506 = vmatprep.subr.bf16.mxu1 %v13089_v58  ;;  %v18773_v24 = vld [vmem:[#allocation28_spill] sm:$0xff]  ;;  %v18774_v58 = vld [vmem:[#allocation30_spill] sm:$0xff] }
 0x316   : > { %v1693_v41 = vpop.xlane.xlu0 %1692  ;;  %12984 = vxpose.xlu0.b32.cont [7/16] (narrow) %v18767_v16, 8  ;;  %v1767_v16 = vsel %vm1754_vm1, %v15390_v3, %v15396_v17  ;;  %v13095_v17 = vld [vmem:[#allocation5 + $0x34] ss:$8 sps:$4 sm:$0xff]  }
 0x317   : > { %v15527_v23 = vpop.xlane.xlu1 %849  ;;  %v1964_v36 = vsel %vm1952_vm7, %v1931_v33, %v1693_v41  ;;  %v1783_v41 = vsel %vm1754_vm1, %v15353_v50, %v15368_v49  ;;  %v1800_v29 = vsel %vm1787_vm2, %v1767_v16, %v15433_v44  ;;  %v13094_v50 = vld [vmem:[#allocation5 + $0x20] ss:$8 sps:$4 sm:$0xff]   ;;  %v13103_v33 = vld [vmem:[#allocation5 + $0x50] ss:$8 sps:$4 sm:$0xff]  }
 0x318   : > { %v12993_v45 = vpack.i.bf16 %v1964_v36, %v1980_v46  ;;  %v1816_v40 = vsel %vm1787_vm2, %v1783_v41, %v15398_v25  ;;  %v1833_v39 = vsel %vm1820_vm3, %v1800_v29, %v15447_v0  ;;  %v18771_v46 = vld [vmem:[#allocation27_spill] sm:$0xff] }
 0x319   : > { %v1849_v57 = vsel %vm1820_vm3, %v1816_v40, %v15435_v31  ;;  %v1866_v3 = vsel %vm1853_vm4, %v1833_v39, %v15489_v4  ;;  %v1784_v19 = vsel %vm1754_vm1, %v18771_v46, %v15431_v42  ;;  %v13109_v42 = vld [vmem:[#allocation5 + $0x70] ss:$8 sps:$4 sm:$0xff]  }
 0x31a   : > { %v15529_v22 = vpop.xlane.xlu0 %978  ;;  %12986 = vxpose.xlu0.b32.cont [8/16] (narrow) %v18768_v53, 8  ;;  %v1882_v49 = vsel %vm1853_vm4, %v1849_v57, %v15449_v60  ;;  %v1899_v44 = vsel %vm1886_vm5, %v1866_v3, %v15517_v32 }
 0x31b   : > { %v15534_v34 = vpop.xlane.xlu1 %1056  ;;  %v1915_v25 = vsel %vm1886_vm5, %v1882_v49, %v15491_v63  ;;  %v13098_v63 = vld [vmem:[#allocation5 + $0x44] ss:$8 sps:$4 sm:$0xff]  }
 0x31c   : > { %v1948_v31 = vsel %vm1919_vm6, %v1915_v25, %v15522_v27  ;;  %v13100_v27 = vld [vmem:[#allocation5 + $0x40] ss:$8 sps:$4 sm:$0xff]  }
 0x31e   : > { %v15536_v10 = vpop.xlane.xlu0 %1233  ;;  %12988 = vxpose.xlu0.b32.cont [9/16] (narrow) %v18769_v12, 8 }
 0x31f   : > { %v15541_v56 = vpop.xlane.xlu1 %1311 }
 0x322   : > { %v15555_v6 = vpop.xlane.xlu0 %1488  ;;  %12990 = vxpose.xlu0.b32.cont [10/16] (narrow) %v18770_v38, 8 }
 0x323   : > { %v1567_v1 = vpop.xlane.xlu1 %1566 }
 0x324   : > { %v1932_v0 = vsel %vm1919_vm6, %v1899_v44, %v1567_v1  ;;  %v13101_v1 = vld [vmem:[#allocation5 + $0x54] ss:$8 sps:$4 sm:$0xff]   ;;  %v13112_v44 = vld [vmem:[#allocation5 + $0x80] ss:$8 sps:$4 sm:$0xff]  }
 0x326   : > { %v1744_v62 = vpop.xlane.xlu0 %1743  ;;  %12992 = vxpose.xlu0.b32.cont [11/16] (narrow) %v12991_v26, 8  ;;  %v13091_v26 = vld [vmem:[#allocation5 + $0x10] ss:$8 sps:$4 sm:$0xff]  }
 0x327   : > { %v15575_v18 = vpop.xlane.xlu1 %801  ;;  %2507 = vmatpush1.bf16.msra.mxu1 %v13091_v26  ;;  %v1981_v60 = vsel %vm1952_vm7, %v1948_v31, %v1744_v62  ;;  %v13106_v62 = vld [vmem:[#allocation5 + $0x60] ss:$8 sps:$4 sm:$0xff]   ;;  %v1817_v26 = vsel %vm1787_vm2, %v1784_v19, %v18774_v58  ;;  %v13113_v31 = vld [vmem:[#allocation5 + $0x94] ss:$8 sps:$4 sm:$0xff]  }
 0x328   : > { %2508 = vmatprep.subr.bf16.mxu1 %v13092_v48  ;;  %v1850_v40 = vsel %vm1820_vm3, %v1817_v26, %v15484_v15 }
 0x329   : > { %v1883_v57 = vsel %vm1853_vm4, %v1850_v40, %v15515_v52  ;;  %v13127_v40 = vld [vmem:[#allocation5 + $0xd0] ss:$8 sps:$4 sm:$0xff]  }
 0x32a   : > { %v15579_v43 = vpop.xlane.xlu0 %930  ;;  %12994 = vxpose.xlu0.b32.cont [12/16] (narrow) %v12993_v45, 8  ;;  %v18772_v45 = vld [vmem:[#allocation29_spill] sm:$0xff] }
 0x32b   : > { %v15581_v5 = vpop.xlane.xlu1 %1107  ;;  %2509 = vmatpush1.bf16.msra.mxu1 %v13094_v50  ;;  %v1768_v8 = vsel %vm1754_vm1, %v18773_v24, %v18772_v45  ;;  %v13110_v50 = vld [vmem:[#allocation5 + $0x84] ss:$8 sps:$4 sm:$0xff]   ;;  %v13125_v24 = vld [vmem:[#allocation5 + $0xd4] ss:$8 sps:$4 sm:$0xff]  }
 0x32c   : > { %2510 = vmatprep.subr.bf16.mxu1 %v13095_v17  ;;  %v1801_v48 = vsel %vm1787_vm2, %v1768_v8, %v15482_v37  ;;  %v1916_v37 = vsel %vm1886_vm5, %v1883_v57, %v15555_v6 }
 0x32d   : > { %v1834_v29 = vsel %vm1820_vm3, %v1801_v48, %v15510_v28 }
 0x32e   : > { %v15583_v20 = vpop.xlane.xlu0 %1185  ;;  %v1867_v39 = vsel %vm1853_vm4, %v1834_v29, %v15541_v56 }
 0x32f   : > { %v15585_v13 = vpop.xlane.xlu1 %1362  ;;  %2511 = vmatpush1.bf16.msra.mxu1 %v13097_v2  ;;  %v13119_v2 = vld [vmem:[#allocation5 + $0xb4] ss:$8 sps:$4 sm:$0xff]  }
 0x330   : > { %2512 = vmatprep.subr.bf16.mxu1 %v13098_v63  ;;  %v1769_v63 = vsel %vm1754_vm1, %v15501_v54, %v15503_v59  ;;  %v13122_v59 = vld [vmem:[#allocation5 + $0xc4] ss:$8 sps:$4 sm:$0xff]  }
 0x332   : > { %v1441_v53 = vpop.xlane.xlu0 %1440 }
 0x333   : > { %v1618_v12 = vpop.xlane.xlu1 %1617  ;;  %2513 = vmatpush1.bf16.msra.mxu1 %v13100_v27  ;;  %v1900_v49 = vsel %vm1886_vm5, %v1867_v39, %v1441_v53  ;;  %v13115_v53 = vld [vmem:[#allocation5 + $0x90] ss:$8 sps:$4 sm:$0xff]  }
 0x334   : > { %2514 = vmatprep.subr.bf16.mxu1 %v13101_v1  ;;  %v1949_v15 = vsel %vm1919_vm6, %v1916_v37, %v1618_v12  ;;  %v13116_v12 = vld [vmem:[#allocation5 + $0xa4] ss:$8 sps:$4 sm:$0xff]   ;;  %v1802_v1 = vsel %vm1787_vm2, %v1769_v63, %v15534_v34  ;;  %v1770_v34 = vsel %vm1754_vm1, %v15575_v18, %v15579_v43  ;;  %v13155_v63 = vld [vmem:[#allocation7 + $0x70] ss:$8 sps:$4 sm:$0xff]  }
 0x336   : > { %v1696_v21 = vpop.xlane.xlu0 %1695 }
 0x337   : > { %v15612_v61 = vpop.xlane.xlu1 %1059  ;;  %v1965_v4 = vsel %vm1952_vm7, %v1932_v0, %v1696_v21  ;;  %2515 = vmatpush1.bf16.msra.mxu1 %v13103_v33 }
 0x338   : > { %v12995_v38 = vpack.i.bf16 %v1965_v4, %v1981_v60  ;;  %2516 = vmatprep.subr.bf16.mxu1 %v13104_v11  ;;  %v13118_v4 = vld [vmem:[#allocation5 + $0xa0] ss:$8 sps:$4 sm:$0xff]  }
 0x33a   : > { %v15616_v9 = vpop.xlane.xlu0 %1236  ;;  %12996 = vxpose.xlu0.b32.cont [13/16] (narrow) %v12995_v38, 8  ;;  %v1785_v38 = vsel %vm1754_vm1, %v15470_v51, %v15480_v35  ;;  %v13121_v51 = vld [vmem:[#allocation5 + $0xb0] ss:$8 sps:$4 sm:$0xff]  }
 0x33b   : > { %v15618_v32 = vpop.xlane.xlu1 %1314  ;;  %2517 = vmatpush1.bf16.msra.mxu1 %v13106_v62  ;;  %v1818_v27 = vsel %vm1787_vm2, %v1785_v38, %v15508_v55  ;;  %v1786_v55 = vsel %vm1754_vm1, %v15527_v23, %v15529_v22  ;;  %v13157_v38 = vld [vmem:[#allocation7 + $0x74] ss:$8 sps:$4 sm:$0xff]  }
 0x33c   : > { %2518 = vmatprep.subr.bf16.mxu1 %v13107_v30  ;;  %v1851_v11 = vsel %vm1820_vm3, %v1818_v27, %v15536_v10  ;;  %v13160_v27 = vld [vmem:[#allocation7 + $0x84] ss:$8 sps:$4 sm:$0xff]  }
 0x33d   : > { %v1884_v35 = vsel %vm1853_vm4, %v1851_v11, %v15585_v13  ;;  %v1819_v13 = vsel %vm1787_vm2, %v1786_v55, %v15581_v5  ;;  %v13124_v5 = vld [vmem:[#allocation5 + $0xc0] ss:$8 sps:$4 sm:$0xff]   ;;  %v13166_v11 = vld [vmem:[#allocation7 + $0xa4] ss:$8 sps:$4 sm:$0xff]   ;;  %v13175_v55 = vld [vmem:[#allocation7 + $0xd4] ss:$8 sps:$4 sm:$0xff]  }
 0x33e   : > { %v15620_v14 = vpop.xlane.xlu0 %1491  ;;  %v1852_v18 = vsel %vm1820_vm3, %v1819_v13, %v15616_v9 }
 0x33f   : > { %v1570_v47 = vpop.xlane.xlu1 %1569  ;;  %2519 = vmatpush1.bf16.msra.mxu1 %v13109_v42  ;;  %v1917_v10 = vsel %vm1886_vm5, %v1884_v35, %v15620_v14  ;;  %v13167_v35 = vld [vmem:[#allocation7 + $0xb0] ss:$8 sps:$4 sm:$0xff]  }
 0x340   : > { %v1933_v3 = vsel %vm1919_vm6, %v1900_v49, %v1570_v47  ;;  %2520 = vmatprep.subr.bf16.mxu1 %v13110_v50  ;;  %v13128_v49 = vld [vmem:[#allocation5 + $0xe4] ss:$8 sps:$4 sm:$0xff]  }
 0x342   : > { %v1747_v36 = vpop.xlane.xlu0 %1746 }
 0x343   : > { %v15622_v7 = vpop.xlane.xlu1 %1188  ;;  %v1982_v25 = vsel %vm1952_vm7, %v1949_v15, %v1747_v36  ;;  %2521 = vmatpush1.bf16.msra.mxu1 %v13112_v44  ;;  %v1835_v36 = vsel %vm1820_vm3, %v1802_v1, %v15583_v20  ;;  %v13130_v15 = vld [vmem:[#allocation5 + $0xe0] ss:$8 sps:$4 sm:$0xff]   ;;  %v13137_v44 = vld [vmem:[#allocation7 + $0x10] ss:$8 sps:$4 sm:$0xff]  }
 0x344   : > { %2522 = vmatprep.subr.bf16.mxu1 %v13113_v31  ;;  %v1868_v54 = vsel %vm1853_vm4, %v1835_v36, %v15618_v32  ;;  %v1803_v32 = vsel %vm1787_vm2, %v1770_v34, %v15612_v61  ;;  %v13140_v31 = vld [vmem:[#allocation7 + $0x20] ss:$8 sps:$4 sm:$0xff]   ;;  %v13173_v34 = vld [vmem:[#allocation7 + $0xd0] ss:$8 sps:$4 sm:$0xff]  }
 0x345   : > { %v1836_v43 = vsel %vm1820_vm3, %v1803_v32, %v15622_v7  ;;  %v13158_v1 = vld [vmem:[#allocation7 + $0x80] ss:$8 sps:$4 sm:$0xff]  }
 0x346   : > { %v15634_v41 = vpop.xlane.xlu0 %1365  ;;  %v13164_v36 = vld [vmem:[#allocation7 + $0xa0] ss:$8 sps:$4 sm:$0xff]  }
 0x347   : > { %v1444_v16 = vpop.xlane.xlu1 %1443  ;;  %2523 = vmatpush1.bf16.msra.mxu1 %v13115_v53  ;;  %v1885_v61 = vsel %vm1853_vm4, %v1852_v18, %v15634_v41  ;;  %v13148_v53 = vld [vmem:[#allocation7 + $0x44] ss:$8 sps:$4 sm:$0xff]   ;;  %v2083_v32 = vld [vmem:[%s18775_s22] sm:$0x3]  ;;  %s18779_s22 = sld [smem:[#allocation38_spill]] }
 0x348   : > { %2524 = vmatprep.subr.bf16.mxu1 %v13116_v12  ;;  %v1901_v20 = vsel %vm1886_vm5, %v1868_v54, %v1444_v16  ;;  %v13146_v12 = vld [vmem:[#allocation7 + $0x40] ss:$8 sps:$4 sm:$0xff]   ;;  %v13172_v54 = vld [vmem:[#allocation7 + $0xc4] ss:$8 sps:$4 sm:$0xff]  }
 0x34a   : > { %v1621_v28 = vpop.xlane.xlu0 %1620 }
 0x34b   : > { %v1699_v17 = vpop.xlane.xlu1 %1698  ;;  %2525 = vmatpush1.bf16.msra.mxu1 %v13118_v4  ;;  %v1950_v62 = vsel %vm1919_vm6, %v1917_v10, %v1621_v28  ;;  %v13133_v28 = vld [vmem:[#allocation5 + $0xf0] ss:$8 sps:$4 sm:$0xff]   ;;  %v13154_v4 = vld [vmem:[#allocation7 + $0x64] ss:$8 sps:$4 sm:$0xff]   ;;  %v2085_v10 = vlaneseq }
 0x34c   : > { %v1966_v52 = vsel %vm1952_vm7, %v1933_v3, %v1699_v17  ;;  %2526 = vmatprep.subr.bf16.mxu1 %v13119_v2  ;;  %v13131_v3 = vld [vmem:[#allocation5 + $0xf4] ss:$8 sps:$4 sm:$0xff]   ;;  %v13134_v17 = vld [vmem:[#allocation7] ss:$8 sps:$4 sm:$0xff]  }
 0x34d   : > { %v12997_v56 = vpack.i.bf16 %v1966_v52, %v1982_v25  ;;  %v13136_v25 = vld [vmem:[#allocation7 + $0x4] ss:$8 sps:$4 sm:$0xff]   ;;  %v13139_v52 = vld [vmem:[#allocation7 + $0x14] ss:$8 sps:$4 sm:$0xff]   ;;  %v13152_v2 = vld [vmem:[#allocation7 + $0x60] ss:$8 sps:$4 sm:$0xff]   ;;  %s18780_s4 = smov %s18779_s22 }
 0x34e   : > { %v1318_v0 = vpop.xlane.xlu0 %1317  ;;  %2753 = vmatprep.subr.bf16.mxu0 %v13136_v25 }
 0x34f   : > { %12998 = vxpose.xlu0.b32.cont [14/16] (narrow) %v12997_v56, 8  ;;  %v1495_v6 = vpop.xlane.xlu1 %1494  ;;  %2527 = vmatpush1.bf16.msra.mxu1 %v13121_v51  ;;  %v1869_v19 = vsel %vm1853_vm4, %v1836_v43, %v1318_v0  ;;  %v13142_v56 = vld [vmem:[#allocation7 + $0x24] ss:$8 sps:$4 sm:$0xff]   ;;  %v13145_v0 = vld [vmem:[#allocation7 + $0x34] ss:$8 sps:$4 sm:$0xff]  }
 0x350   : > { %2528 = vmatprep.subr.bf16.mxu1 %v13122_v59  ;;  %v1918_v8 = vsel %vm1886_vm5, %v1885_v61, %v1495_v6  ;;  %v13143_v6 = vld [vmem:[#allocation7 + $0x30] ss:$8 sps:$4 sm:$0xff]   ;;  %v13169_v51 = vld [vmem:[#allocation7 + $0xb4] ss:$8 sps:$4 sm:$0xff]   ;;  %v13170_v59 = vld [vmem:[#allocation7 + $0xc0] ss:$8 sps:$4 sm:$0xff]  }
 0x352   : > { %v1573_v21 = vpop.xlane.xlu0 %1572 }
 0x353   : > { %v1750_v60 = vpop.xlane.xlu1 %1749  ;;  %v1934_v30 = vsel %vm1919_vm6, %v1901_v20, %v1573_v21  ;;  %2529 = vmatpush1.bf16.msra.mxu1 %v13124_v5  ;;  %v13151_v21 = vld [vmem:[#allocation7 + $0x54] ss:$8 sps:$4 sm:$0xff]   ;;  %v15699_v20 = vshrl.u32 %v2085_v10, 7 }
 0x354   : > { %v1983_v14 = vsel %vm1952_vm7, %v1950_v62, %v1750_v60  ;;  %2530 = vmatprep.subr.bf16.mxu1 %v13125_v24  ;;  %v13149_v60 = vld [vmem:[#allocation7 + $0x50] ss:$8 sps:$4 sm:$0xff]   ;;  %v13208_v10 = vld [vmem:[%s18678_s10 + $0xc4] ss:$24 sps:$4 sm:$0xff]  }
 0x355   : > { %v15702_v13 = vsub.s32 0, %v15699_v20  ;;  %v15708_v62 = vsub.s32 1, %v15699_v20 }
 0x356   : > { %v1447_v47 = vpop.xlane.xlu0 %1446 }
 0x357   : > { %v1624_v33 = vpop.xlane.xlu1 %1623  ;;  %v1902_v9 = vsel %vm1886_vm5, %v1869_v19, %v1447_v47  ;;  %2531 = vmatpush1.bf16.msra.mxu1 %v13127_v40  ;;  %v13163_v47 = vld [vmem:[#allocation7 + $0x94] ss:$8 sps:$4 sm:$0xff]  }
 0x358   : > { %v1951_v7 = vsel %vm1919_vm6, %v1918_v8, %v1624_v33  ;;  %2532 = vmatprep.subr.bf16.mxu1 %v13128_v49  ;;  %v13161_v33 = vld [vmem:[#allocation7 + $0x90] ss:$8 sps:$4 sm:$0xff]   ;;  %v13178_v8 = vld [vmem:[#allocation7 + $0xe4] ss:$8 sps:$4 sm:$0xff]  }
 0x35a   : > { %v1702_v23 = vpop.xlane.xlu0 %1701 }
 0x35b   : > { %v1576_v22 = vpop.xlane.xlu1 %1575  ;;  %v1967_v46 = vsel %vm1952_vm7, %v1934_v30, %v1702_v23  ;;  %2533 = vmatpush1.bf16.msra.mxu1 %v13130_v15  ;;  %v2088_v30 = vrot.slane %v2083_v32, %v15702_v13  ;;  %v2092_v23 = vrot.slane %v2083_v32, %v15708_v62  ;;  %v13211_v32 = vld [vmem:[%s18678_s10 + $0xcc] ss:$24 sps:$4 sm:$0xff]  }
 0x35c   : > { %v12999_v45 = vpack.i.bf16 %v1967_v46, %v1983_v14  ;;  %v1935_v58 = vsel %vm1919_vm6, %v1902_v9, %v1576_v22  ;;  %2534 = vmatprep.subr.bf16.mxu1 %v13131_v3  ;;  %v13176_v9 = vld [vmem:[#allocation7 + $0xe0] ss:$8 sps:$4 sm:$0xff]  }
 0x35d   : > { %v2581_v3 = vld [vmem:[%s18675_s7] sm:$0x3] }
 0x35e   : > { %v1753_v26 = vpop.xlane.xlu0 %1752  ;;  %13000 = vxpose.xlu0.b32.cont [15/16] (narrow) %v12999_v45, 8 }
 0x35f   : > { %v1705_v48 = vpop.xlane.xlu1 %1704  ;;  %v1984_v16 = vsel %vm1952_vm7, %v1951_v7, %v1753_v26  ;;  %2535 = vmatpush1.bf16.msra.mxu1 %v13133_v28  ;;  %v13181_v7 = vld [vmem:[#allocation7 + $0xf4] ss:$8 sps:$4 sm:$0xff]   ;;  %v2332_v26 = vld [vmem:[%s18673_s5] sm:$0x3]  ;;  %v2586_v28 = vrot.slane %v2581_v3, %v15702_v13 }
 0x360   : > { %v1968_v41 = vsel %vm1952_vm7, %v1935_v58, %v1705_v48  ;;  %v13179_v58 = vld [vmem:[#allocation7 + $0xf0] ss:$8 sps:$4 sm:$0xff]   ;;  %v2337_v48 = vrot.slane %v2332_v26, %v15702_v13 }
 0x361   : > { %v13001_v29 = vpack.i.bf16 %v1968_v41, %v1984_v16  ;;  %v2341_v16 = vrot.slane %v2332_v26, %v15708_v62  ;;  %v13230_v26 = vld [vmem:[%s18678_s10 + $0x180] ss:$24 sps:$4 sm:$0xff]  }
 0x363   : > { %13002 = vxpose.xlu0.b32.end [16/16] (narrow) %v13001_v29, 8 }
 0x3a7   : > { %v13003_v42 = vpop.trf.xlu0 }
 0x3a8   : > { %v13004_v57 = vunpack.i.l.bf16 %v13003_v42  ;;  %v13007_v39 = vunpack.i.h.bf16 %v13003_v42 }
 0x3aa   : > { %v2050_v50 = vpack.c.bf16 %v13004_v57, %v13004_v57  ;;  %v2049_v37 = vpack.c.bf16 %v13007_v39, %v13007_v39 }
 0x3ac   : > { %2287 = vmatprep.mubr.bf16.mxu0 %v2050_v50 }
 0x3ad   : > { %2288 = vmatmul.mubr.bf16.vlgmr.msra.gmra.mrb[0].mxu0 %v2049_v37 }
 0x3ae   : > { %2754 = vmatpush1.bf16.msra.mxu0 %v13134_v17  ;;  %v2590_v17 = vrot.slane %v2581_v3, %v15708_v62 }
 0x3af   : > { %2755 = vmatprep.subr.bf16.mxu0 %v13139_v52  ;;  %v2794_v52 = vld [vmem:[%s18776_s26] sm:$0xff] }
 0x3b2   : > { %2756 = vmatpush1.bf16.msra.mxu0 %v13137_v44 }
 0x3b3   : > { %2757 = vmatprep.subr.bf16.mxu0 %v13142_v56 }
 0x3b6   : > { %2758 = vmatpush1.bf16.msra.mxu0 %v13140_v31  ;;  %v2795_v31 = vld [vmem:[%s18776_s26 + $0x8] sm:$0xff] }
 0x3b7   : > { %2759 = vmatprep.subr.bf16.mxu0 %v13145_v0 }
 0x3ba   : > { %2760 = vmatpush1.bf16.msra.mxu0 %v13143_v6 }
 0x3bb   : > { %2761 = vmatprep.subr.bf16.mxu0 %v13148_v53 }
 0x3be   : > { %2762 = vmatpush1.bf16.msra.mxu0 %v13146_v12 }
 0x3bf   : > { %2763 = vmatprep.subr.bf16.mxu0 %v13151_v21 }
 0x3c2   : > { %2764 = vmatpush1.bf16.msra.mxu0 %v13149_v60 }
 0x3c3   : > { %2765 = vmatprep.subr.bf16.mxu0 %v13154_v4  ;;  %v13182_v4 = vld [vmem:[%s18678_s10] ss:$24 sps:$4 sm:$0xff]  }
 0x3c6   : > { %2766 = vmatpush1.bf16.msra.mxu0 %v13152_v2  ;;  %v13184_v2 = vld [vmem:[%s18678_s10 + $0x4] ss:$24 sps:$4 sm:$0xff]  }
 0x3c7   : > { %2767 = vmatprep.subr.bf16.mxu0 %v13157_v38  ;;  %v13185_v38 = vld [vmem:[%s18678_s10 + $0x8] ss:$24 sps:$4 sm:$0xff]   ;;  %3469 = vmatprep.subr.bf16.mxu1 %v13184_v2  ;;  %v13265_v2 = vld [vmem:[%s18678_s10 + $0x27c] ss:$24 sps:$4 sm:$0xff]  }
 0x3ca   : > { %2768 = vmatpush1.bf16.msra.mxu0 %v13155_v63  ;;  %v13187_v63 = vld [vmem:[%s18678_s10 + $0xc] ss:$24 sps:$4 sm:$0xff]  }
 0x3cb   : > { %2769 = vmatprep.subr.bf16.mxu0 %v13160_v27  ;;  %v13190_v27 = vld [vmem:[%s18678_s10 + $0x34] ss:$24 sps:$4 sm:$0xff]  }
 0x3ce   : > { %2770 = vmatpush1.bf16.msra.mxu0 %v13158_v1  ;;  %v13193_v1 = vld [vmem:[%s18678_s10 + $0x3c] ss:$24 sps:$4 sm:$0xff]  }
 0x3cf   : > { %2771 = vmatprep.subr.bf16.mxu0 %v13163_v47  ;;  %v13188_v47 = vld [vmem:[%s18678_s10 + $0x30] ss:$24 sps:$4 sm:$0xff]  }
 0x3d2   : > { %2772 = vmatpush1.bf16.msra.mxu0 %v13161_v33  ;;  %v13191_v33 = vld [vmem:[%s18678_s10 + $0x38] ss:$24 sps:$4 sm:$0xff]  }
 0x3d3   : > { %2773 = vmatprep.subr.bf16.mxu0 %v13166_v11  ;;  %v13196_v11 = vld [vmem:[%s18678_s10 + $0x64] ss:$24 sps:$4 sm:$0xff]  }
 0x3d6   : > { %2774 = vmatpush1.bf16.msra.mxu0 %v13164_v36  ;;  %v13199_v36 = vld [vmem:[%s18678_s10 + $0x6c] ss:$24 sps:$4 sm:$0xff]  }
 0x3d7   : > { %2775 = vmatprep.subr.bf16.mxu0 %v13169_v51  ;;  %v13194_v51 = vld [vmem:[%s18678_s10 + $0x60] ss:$24 sps:$4 sm:$0xff]  }
 0x3da   : > { %2776 = vmatpush1.bf16.msra.mxu0 %v13167_v35  ;;  %v13197_v35 = vld [vmem:[%s18678_s10 + $0x68] ss:$24 sps:$4 sm:$0xff]  }
 0x3db   : > { %2777 = vmatprep.subr.bf16.mxu0 %v13172_v54  ;;  %v13202_v54 = vld [vmem:[%s18678_s10 + $0x94] ss:$24 sps:$4 sm:$0xff]  }
 0x3de   : > { %2778 = vmatpush1.bf16.msra.mxu0 %v13170_v59  ;;  %v13205_v59 = vld [vmem:[%s18678_s10 + $0x9c] ss:$24 sps:$4 sm:$0xff]  }
 0x3df   : > { %2779 = vmatprep.subr.bf16.mxu0 %v13175_v55  ;;  %v13200_v55 = vld [vmem:[%s18678_s10 + $0x90] ss:$24 sps:$4 sm:$0xff]  }
 0x3e2   : > { %2780 = vmatpush1.bf16.msra.mxu0 %v13173_v34  ;;  %v13203_v34 = vld [vmem:[%s18678_s10 + $0x98] ss:$24 sps:$4 sm:$0xff]  }
 0x3e3   : > { %2781 = vmatprep.subr.bf16.mxu0 %v13178_v8  ;;  %v13224_v8 = vld [vmem:[%s18678_s10 + $0x150] ss:$24 sps:$4 sm:$0xff]  }
 0x3e6   : > { %2782 = vmatpush1.bf16.msra.mxu0 %v13176_v9  ;;  %v13227_v9 = vld [vmem:[%s18678_s10 + $0x158] ss:$24 sps:$4 sm:$0xff]  }
 0x3e7   : > { %2783 = vmatprep.subr.bf16.mxu0 %v13181_v7  ;;  %v13232_v7 = vld [vmem:[%s18678_s10 + $0x184] ss:$24 sps:$4 sm:$0xff]  }
 0x3ea   : > { %2784 = vmatpush1.bf16.msra.mxu0 %v13179_v58  ;;  %v13235_v58 = vld [vmem:[%s18678_s10 + $0x18c] ss:$24 sps:$4 sm:$0xff]  }
 0x3eb   : > { %3510 = vmatprep.subr.bf16.mxu0 %v13187_v63  ;;  %v13263_v63 = vld [vmem:[%s18678_s10 + $0x278] ss:$24 sps:$4 sm:$0xff]  }
 0x480   : > { %v2289_v22 = vpop.f32.mrb[0].mxu0 }
 0x481   : > { %v2290_v18 = vadd.f32 %v2289_v22, %v2088_v30  ;;  %v2291_v43 = vpop.f32.mrb[1].mxu0  ;;  %v13206_v30 = vld [vmem:[%s18678_s10 + $0xc0] ss:$24 sps:$4 sm:$0xff]   ;;  %v13214_v22 = vld [vmem:[%s18678_s10 + $0xf4] ss:$24 sps:$4 sm:$0xff]  }
 0x482   : > { %v2292_v14 = vadd.f32 %v2291_v43, %v2092_v23  ;;  %v2293_v46 = vpop.f32.mrb[2].mxu0  ;;  %v13209_v23 = vld [vmem:[%s18678_s10 + $0xc8] ss:$24 sps:$4 sm:$0xff]  }
 0x483   : > { %v2296_v5 = vmax.f32 %v2290_v18, 0.0  ;;  %v2294_v61 = vpop.f32.mrb[3].mxu0  ;;  %v13217_v18 = vld [vmem:[%s18678_s10 + $0xfc] ss:$24 sps:$4 sm:$0xff]   ;;  %v13212_v43 = vld [vmem:[%s18678_s10 + $0xf0] ss:$24 sps:$4 sm:$0xff]  }
 0x484   : > { %v2297_v19 = vmax.f32 %v2292_v14, 0.0  ;;  %v13215_v14 = vld [vmem:[%s18678_s10 + $0xf8] ss:$24 sps:$4 sm:$0xff]   ;;  %v13220_v46 = vld [vmem:[%s18678_s10 + $0x124] ss:$24 sps:$4 sm:$0xff]  }
 0x485   : > { %v2298_v24 = vpack.c.bf16 %v2296_v5, %v2296_v5  ;;  %v13223_v5 = vld [vmem:[%s18678_s10 + $0x12c] ss:$24 sps:$4 sm:$0xff]   ;;  %v13218_v61 = vld [vmem:[%s18678_s10 + $0x120] ss:$24 sps:$4 sm:$0xff]  }
 0x486   : > { %v2299_v45 = vpack.c.bf16 %v2297_v19, %v2297_v19  ;;  %v13221_v19 = vld [vmem:[%s18678_s10 + $0x128] ss:$24 sps:$4 sm:$0xff]  }
 0x488   : > { %2536 = vmatprep.mubr.bf16.mxu1 %v2299_v45  ;;  %v13226_v45 = vld [vmem:[%s18678_s10 + $0x154] ss:$24 sps:$4 sm:$0xff]  }
 0x489   : > { %2537 = vmatmul.mubr.bf16.vlgmr.msra.gmra.mrb[0].mxu1 %v2298_v24  ;;  %v13229_v24 = vld [vmem:[%s18678_s10 + $0x15c] ss:$24 sps:$4 sm:$0xff]  }
 0x48a   : > { %3470 = vmatpush1.bf16.msra.mxu1 %v13182_v4  ;;  %v13262_v4 = vld [vmem:[%s18678_s10 + $0x274] ss:$24 sps:$4 sm:$0xff]  }
 0x48b   : > { %3471 = vmatprep.subr.bf16.mxu1 %v13190_v27  ;;  %v13268_v27 = vld [vmem:[%s18678_s10 + $0x2a4] ss:$24 sps:$4 sm:$0xff]  }
 0x48e   : > { %3472 = vmatpush1.bf16.msra.mxu1 %v13188_v47  ;;  %v13266_v47 = vld [vmem:[%s18678_s10 + $0x2a0] ss:$24 sps:$4 sm:$0xff]  }
 0x48f   : > { %3473 = vmatprep.subr.bf16.mxu1 %v13196_v11  ;;  %v13274_v11 = vld [vmem:[%s18678_s10 + $0x2d4] ss:$24 sps:$4 sm:$0xff]  }
 0x492   : > { %3474 = vmatpush1.bf16.msra.mxu1 %v13194_v51  ;;  %v13272_v51 = vld [vmem:[%s18678_s10 + $0x2d0] ss:$24 sps:$4 sm:$0xff]  }
 0x493   : > { %3475 = vmatprep.subr.bf16.mxu1 %v13202_v54  ;;  %v13280_v54 = vld [vmem:[%s18678_s10 + $0x14] ss:$24 sps:$4 sm:$0xff]  }
 0x496   : > { %3476 = vmatpush1.bf16.msra.mxu1 %v13200_v55 }
 0x497   : > { %3477 = vmatprep.subr.bf16.mxu1 %v13208_v10  ;;  %v15940_v10 = vsub.s32 2, %v15699_v20 }
 0x49a   : > { %3478 = vmatpush1.bf16.msra.mxu1 %v13206_v30  ;;  %v2799_v30 = vld [vmem:[%s18677_s9] sm:$0xf] }
 0x49b   : > { %3479 = vmatprep.subr.bf16.mxu1 %v13214_v22 }
 0x49e   : > { %3480 = vmatpush1.bf16.msra.mxu1 %v13212_v43  ;;  %v2842_v43 = vrot.slane %v2799_v30, %v15702_v13 }
 0x49f   : > { %3481 = vmatprep.subr.bf16.mxu1 %v13220_v46 }
 0x4a2   : > { %3482 = vmatpush1.bf16.msra.mxu1 %v13218_v61 }
 0x4a3   : > { %3483 = vmatprep.subr.bf16.mxu1 %v13226_v45 }
 0x4a6   : > { %3484 = vmatpush1.bf16.msra.mxu1 %v13224_v8 }
 0x4a7   : > { %3485 = vmatprep.subr.bf16.mxu1 %v13232_v7 }
 0x4aa   : > { %3486 = vmatpush1.bf16.msra.mxu1 %v13230_v26 }
 0x55c   : > { %v2538_v41 = vpop.f32.mrb[0].mxu1 }
 0x55d   : > { %v2539_v40 = vadd.f32 %v2538_v41, %v2337_v48  ;;  %v2540_v29 = vpop.f32.mrb[1].mxu1  ;;  %v13233_v48 = vld [vmem:[%s18678_s10 + $0x188] ss:$24 sps:$4 sm:$0xff]   ;;  %v13241_v41 = vld [vmem:[%s18678_s10 + $0x1bc] ss:$24 sps:$4 sm:$0xff]  }
 0x55e   : > { %v2541_v42 = vadd.f32 %v2540_v29, %v2341_v16  ;;  %v2542_v57 = vpop.f32.mrb[2].mxu1  ;;  %v13238_v16 = vld [vmem:[%s18678_s10 + $0x1b4] ss:$24 sps:$4 sm:$0xff]   ;;  %v13239_v29 = vld [vmem:[%s18678_s10 + $0x1b8] ss:$24 sps:$4 sm:$0xff]  }
 0x55f   : > { %v2545_v39 = vmax.f32 %v2539_v40, 0.0  ;;  %v2543_v50 = vpop.f32.mrb[3].mxu1  ;;  %v13236_v40 = vld [vmem:[%s18678_s10 + $0x1b0] ss:$24 sps:$4 sm:$0xff]   ;;  %3487 = vmatprep.subr.bf16.mxu1 %v13238_v16  ;;  %v13242_v57 = vld [vmem:[%s18678_s10 + $0x1e0] ss:$24 sps:$4 sm:$0xff]  }
 0x560   : > { %v2546_v37 = vmax.f32 %v2541_v42, 0.0  ;;  %v13244_v42 = vld [vmem:[%s18678_s10 + $0x1e4] ss:$24 sps:$4 sm:$0xff]   ;;  %3488 = vmatpush1.bf16.msra.mxu1 %v13236_v40  ;;  %v13281_v40 = vld [vmem:[%s18678_s10 + $0x40] ss:$24 sps:$4 sm:$0xff]  }
 0x561   : > { %v2547_v15 = vpack.c.bf16 %v2545_v39, %v2545_v39  ;;  %3489 = vmatprep.subr.bf16.mxu1 %v13244_v42  ;;  %v13284_v42 = vld [vmem:[%s18678_s10 + $0x70] ss:$24 sps:$4 sm:$0xff]  }
 0x562   : > { %v2548_v49 = vpack.c.bf16 %v2546_v37, %v2546_v37 }
 0x564   : > { %2785 = vmatprep.mubr.bf16.mxu0 %v2548_v49  ;;  %3490 = vmatpush1.bf16.msra.mxu1 %v13242_v57  ;;  %v13289_v57 = vld [vmem:[%s18678_s10 + $0xa4] ss:$24 sps:$4 sm:$0xff]  }
 0x565   : > { %2786 = vmatmul.mubr.bf16.vlgmr.msra.gmra.mrb[4].mxu0 %v2547_v15 }
 0x566   : > { %3511 = vmatpush1.bf16.msra.mxu0 %v13185_v38  ;;  %v13260_v38 = vld [vmem:[%s18678_s10 + $0x270] ss:$24 sps:$4 sm:$0xff]  }
 0x567   : > { %3512 = vmatprep.subr.bf16.mxu0 %v13193_v1  ;;  %v13271_v1 = vld [vmem:[%s18678_s10 + $0x2ac] ss:$24 sps:$4 sm:$0xff]  }
 0x56a   : > { %3513 = vmatpush1.bf16.msra.mxu0 %v13191_v33  ;;  %v13269_v33 = vld [vmem:[%s18678_s10 + $0x2a8] ss:$24 sps:$4 sm:$0xff]  }
 0x56b   : > { %3514 = vmatprep.subr.bf16.mxu0 %v13199_v36  ;;  %v13277_v36 = vld [vmem:[%s18678_s10 + $0x2dc] ss:$24 sps:$4 sm:$0xff]  }
 0x56e   : > { %3515 = vmatpush1.bf16.msra.mxu0 %v13197_v35  ;;  %v13275_v35 = vld [vmem:[%s18678_s10 + $0x2d8] ss:$24 sps:$4 sm:$0xff]  }
 0x56f   : > { %3516 = vmatprep.subr.bf16.mxu0 %v13205_v59 }
 0x572   : > { %3517 = vmatpush1.bf16.msra.mxu0 %v13203_v34 }
 0x573   : > { %3518 = vmatprep.subr.bf16.mxu0 %v13211_v32  ;;  %v2798_v32 = vld [vmem:[%s18676_s8] sm:$0xf] }
 0x574   : > { %v2821_v22 = vrot.slane %v2798_v32, %v15702_v13 }
 0x576   : > { %3519 = vmatpush1.bf16.msra.mxu0 %v13209_v23  ;;  %v2825_v23 = vrot.slane %v2798_v32, %v15940_v10  ;;  %v2831_v46 = vrot.slane %v2821_v22, %v15702_v13 }
 0x577   : > { %3520 = vmatprep.subr.bf16.mxu0 %v13217_v18  ;;  %v2846_v18 = vrot.slane %v2799_v30, %v15940_v10 }
 0x57a   : > { %3521 = vmatpush1.bf16.msra.mxu0 %v13215_v14  ;;  %v2835_v14 = vrot.slane %v2825_v23, %v15702_v13 }
 0x57b   : > { %3522 = vmatprep.subr.bf16.mxu0 %v13223_v5 }
 0x57e   : > { %3523 = vmatpush1.bf16.msra.mxu0 %v13221_v19  ;;  %v2856_v19 = vrot.slane %v2846_v18, %v15702_v13 }
 0x57f   : > { %3524 = vmatprep.subr.bf16.mxu0 %v13229_v24  ;;  %v2852_v24 = vrot.slane %v2842_v43, %v15702_v13 }
 0x582   : > { %3525 = vmatpush1.bf16.msra.mxu0 %v13227_v9 }
 0x583   : > { %3526 = vmatprep.subr.bf16.mxu0 %v13235_v58 }
 0x586   : > { %3527 = vmatpush1.bf16.msra.mxu0 %v13233_v48  ;;  %v13278_v48 = vld [vmem:[%s18678_s10 + $0x10] ss:$24 sps:$4 sm:$0xff]  }
 0x587   : > { %3528 = vmatprep.subr.bf16.mxu0 %v13241_v41  ;;  %v13283_v41 = vld [vmem:[%s18678_s10 + $0x44] ss:$24 sps:$4 sm:$0xff]  }
 0x58a   : > { %3529 = vmatpush1.bf16.msra.mxu0 %v13239_v29  ;;  %v13286_v29 = vld [vmem:[%s18678_s10 + $0x74] ss:$24 sps:$4 sm:$0xff]  }
 0x638   : > { %v2787_v25 = vpop.f32.mrb[4].mxu0 }
 0x639   : > { %v2788_v44 = vadd.f32 %v2787_v25, %v2586_v28  ;;  %v2789_v56 = vpop.f32.mrb[5].mxu0  ;;  %v13245_v25 = vld [vmem:[%s18678_s10 + $0x1e8] ss:$24 sps:$4 sm:$0xff]  }
 0x63a   : > { %v2790_v0 = vadd.f32 %v2789_v56, %v2590_v17  ;;  %v2791_v6 = vpop.f32.mrb[6].mxu0  ;;  %v13247_v17 = vld [vmem:[%s18678_s10 + $0x1ec] ss:$24 sps:$4 sm:$0xff]   ;;  %v13253_v56 = vld [vmem:[%s18678_s10 + $0x21c] ss:$24 sps:$4 sm:$0xff]  }
 0x63b   : > { %v15728_v53 = vadd.f32 %v2794_v52, %v2788_v44  ;;  %v2792_v12 = vpop.f32.mrb[7].mxu0  ;;  %3530 = vmatprep.subr.bf16.mxu0 %v13247_v17  ;;  %v13250_v52 = vld [vmem:[%s18678_s10 + $0x214] ss:$24 sps:$4 sm:$0xff]   ;;  %v13248_v44 = vld [vmem:[%s18678_s10 + $0x210] ss:$24 sps:$4 sm:$0xff]  }
 0x63c   : > { %v15730_v21 = vadd.f32 %v2795_v31, %v2790_v0  ;;  %3531 = vmatpush1.bf16.msra.mxu0 %v13245_v25  ;;  %3491 = vmatprep.subr.bf16.mxu1 %v13250_v52  ;;  %v13251_v31 = vld [vmem:[%s18678_s10 + $0x218] ss:$24 sps:$4 sm:$0xff]   ;;  %v13256_v6 = vld [vmem:[%s18678_s10 + $0x244] ss:$24 sps:$4 sm:$0xff]   ;;  %v13257_v12 = vld [vmem:[%s18678_s10 + $0x248] ss:$24 sps:$4 sm:$0xff]  }
 0x63d   : > { %3492 = vmatpush1.bf16.msra.mxu1 %v13248_v44  ;;  %3532 = vmatprep.subr.bf16.mxu0 %v13253_v56  ;;  %v13254_v0 = vld [vmem:[%s18678_s10 + $0x240] ss:$24 sps:$4 sm:$0xff]   ;;  %v13301_v17 = vld [vmem:[%s18678_s10 + $0x164] ss:$24 sps:$4 sm:$0xff]   ;;  %v13304_v52 = vld [vmem:[%s18678_s10 + $0x194] ss:$24 sps:$4 sm:$0xff]  }
 0x63e   : > { %v2800_v60 = vadd.f32 %v15730_v21, %v15728_v53  ;;  %3493 = vmatprep.subr.bf16.mxu1 %v13256_v6  ;;  %v13299_v25 = vld [vmem:[%s18678_s10 + $0x160] ss:$24 sps:$4 sm:$0xff]   ;;  %v13302_v44 = vld [vmem:[%s18678_s10 + $0x190] ss:$24 sps:$4 sm:$0xff]   ;;  %v13307_v56 = vld [vmem:[%s18678_s10 + $0x1c4] ss:$24 sps:$4 sm:$0xff]  }
 0x63f   : > { %v13308_v6 = vld [vmem:[%s18678_s10 + $0x1f0] ss:$24 sps:$4 sm:$0xff]  }
 0x640   : > { %2801 = vadd.xlane.f32.xlu1 %v2800_v60  ;;  %3533 = vmatpush1.bf16.msra.mxu0 %v13251_v31  ;;  %v13259_v60 = vld [vmem:[%s18678_s10 + $0x24c] ss:$24 sps:$4 sm:$0xff]   ;;  %v13305_v31 = vld [vmem:[%s18678_s10 + $0x1c0] ss:$24 sps:$4 sm:$0xff]  }
 0x641   : > { %3534 = vmatprep.subr.bf16.mxu0 %v13259_v60  ;;  %3494 = vmatpush1.bf16.msra.mxu1 %v13254_v0  ;;  %v13310_v0 = vld [vmem:[%s18678_s10 + $0x1f4] ss:$24 sps:$4 sm:$0xff]   ;;  %v13311_v60 = vld [vmem:[%s18678_s10 + $0x220] ss:$24 sps:$4 sm:$0xff]  }
 0x642   : > { %3495 = vmatprep.subr.bf16.mxu1 %v13262_v4  ;;  %v13316_v4 = vld [vmem:[%s18678_s10 + $0x254] ss:$24 sps:$4 sm:$0xff]  }
 0x644   : > { %3535 = vmatpush1.bf16.msra.mxu0 %v13257_v12  ;;  %v13313_v12 = vld [vmem:[%s18678_s10 + $0x224] ss:$24 sps:$4 sm:$0xff]  }
 0x645   : > { %3536 = vmatprep.subr.bf16.mxu0 %v13265_v2  ;;  %3496 = vmatpush1.bf16.msra.mxu1 %v13260_v38  ;;  %v13314_v2 = vld [vmem:[%s18678_s10 + $0x250] ss:$24 sps:$4 sm:$0xff]   ;;  %v13319_v38 = vld [vmem:[%s18678_s10 + $0x284] ss:$24 sps:$4 sm:$0xff]  }
 0x646   : > { %3497 = vmatprep.subr.bf16.mxu1 %v13268_v27  ;;  %v13322_v27 = vld [vmem:[%s18678_s10 + $0x2b4] ss:$24 sps:$4 sm:$0xff]  }
 0x648   : > { %3537 = vmatpush1.bf16.msra.mxu0 %v13263_v63  ;;  %v13317_v63 = vld [vmem:[%s18678_s10 + $0x280] ss:$24 sps:$4 sm:$0xff]  }
 0x649   : > { %3538 = vmatprep.subr.bf16.mxu0 %v13271_v1  ;;  %3498 = vmatpush1.bf16.msra.mxu1 %v13266_v47  ;;  %v13320_v1 = vld [vmem:[%s18678_s10 + $0x2b0] ss:$24 sps:$4 sm:$0xff]   ;;  %v13325_v47 = vld [vmem:[%s18678_s10 + $0x2e4] ss:$24 sps:$4 sm:$0xff]  }
 0x64a   : > { %3499 = vmatprep.subr.bf16.mxu1 %v13274_v11  ;;  %v14302_v11 = vmov 0.0  }
 0x64c   : > { %3539 = vmatpush1.bf16.msra.mxu0 %v13269_v33  ;;  %v13323_v33 = vld [vmem:[%s18678_s10 + $0x2e0] ss:$24 sps:$4 sm:$0xff]  }
 0x64d   : > { %3540 = vmatprep.subr.bf16.mxu0 %v13277_v36  ;;  %3500 = vmatpush1.bf16.msra.mxu1 %v13272_v51  ;;  %v16065_v36 = vld [vmem:[%s18679_s11] sm:$0x3f] }
 0x64e   : > { %3551 = vmatprep.subr.bf16.mxu1 %v13280_v54  ;;  %v2970_v51 = vrot.slane %v16065_v36, %v15940_v10  ;;  %v2962_v23 = vrot.slane %v16065_v36, %v15702_v13 }
 0x650   : > { %3541 = vmatpush1.bf16.msra.mxu0 %v13275_v35 }
 0x651   : > { %12692 = vmatprep.subr.bf16.mxu0 %v14302_v11 }
 0x6cd   : > { %v2802_v39 = vpop.xlane.xlu1 %2801 }
 0x6ce   : > { %v2804_v50 = vmul.f32 0.00390625, %v2802_v39  ;;  %v13287_v39 = vld [vmem:[%s18678_s10 + $0xa0] ss:$24 sps:$4 sm:$0xff]  }
 0x6d0   : > { %v15861_v37 = vsub.f32 %v15728_v53, %v2804_v50  ;;  %v15864_v49 = vsub.f32 %v15730_v21, %v2804_v50  ;;  %v13292_v50 = vld [vmem:[%s18678_s10 + $0xd4] ss:$24 sps:$4 sm:$0xff]  }
 0x6d2   : > { %v2807_v15 = vmul.f32 %v15861_v37, %v15861_v37  ;;  %v2808_v3 = vmul.f32 %v15864_v49, %v15864_v49 }
 0x6d4   : > { %v2809_v28 = vadd.f32 %v2808_v3, %v2807_v15  ;;  %v13293_v15 = vld [vmem:[%s18678_s10 + $0x100] ss:$24 sps:$4 sm:$0xff]   ;;  %v13298_v3 = vld [vmem:[%s18678_s10 + $0x134] ss:$24 sps:$4 sm:$0xff]  }
 0x6d6   : > { %2810 = vadd.xlane.f32.xlu1 %v2809_v28  ;;  %v13296_v28 = vld [vmem:[%s18678_s10 + $0x130] ss:$24 sps:$4 sm:$0xff]  }
 0x763   : > { %v2811_v59 = vpop.xlane.xlu1 %2810 }
 0x764   : > { %v2812_v55 = vmul.f32 0.00390625, %v2811_v59 }
 0x766   : > { %v2813_v34 = vadd.f32 1e-05, %v2812_v55 }
 0x768   : > { %13966 = vrsqrt.f32 %v2813_v34 }
 0x772   : > { %v13967_v5 = vpop.eup %13966 }
 0x773   : > { %v2816_v61 = vmul.f32 %v13967_v5, %v15864_v49  ;;  %v2815_v45 = vmul.f32 %v13967_v5, %v15861_v37  ;;  %v13290_v37 = vld [vmem:[%s18678_s10 + $0xd0] ss:$24 sps:$4 sm:$0xff]   ;;  %v13295_v49 = vld [vmem:[%s18678_s10 + $0x104] ss:$24 sps:$4 sm:$0xff]  }
 0x775   : > { %v2837_v8 = vmul.f32 %v2835_v14, %v2816_v61  ;;  %v2836_v9 = vmul.f32 %v2831_v46, %v2815_v45  ;;  %v16077_v61 = vsub.s32 4, %v15699_v20 }
 0x777   : > { %v2858_v7 = vadd.f32 %v2856_v19, %v2837_v8  ;;  %v2857_v58 = vadd.f32 %v2852_v24, %v2836_v9  ;;  %v2978_v19 = vrot.slane %v16065_v36, %v16077_v61 }
 0x779   : > { %v2860_v26 = vpack.c.bf16 %v2858_v7, %v2858_v7  ;;  %v15961_v16 = vpack.c.bf16 %v2857_v58, %v2857_v58 }
 0x77b   : > { %3501 = vmatprep.mubr.bf16.mxu1 %v2860_v26  ;;  %3542 = vmatprep.mubr.bf16.mxu0 %v2860_v26 }
 0x77c   : > { %3502 = vmatmul.mubr.bf16.vlgmr.msra.gmra.mrb[4].mxu1 %v15961_v16  ;;  %3543 = vmatmul.mubr.bf16.vlgmr.msra.gmra.mrb[8].mxu0 %v15961_v16 }
 0x77d   : > { %3552 = vmatpush1.bf16.msra.mxu1 %v13278_v48  ;;  %3583 = vmatprep.mubr.bf16.mxu1 %v2860_v26 }
 0x77e   : > { %3553 = vmatprep.subr.bf16.mxu1 %v13283_v41  ;;  %12694 = vmatprep.mubr.msk.bf16.mxu0 %vm14303_vm8, %v14302_v11 }
 0x781   : > { %3554 = vmatpush1.bf16.msra.mxu1 %v13281_v40 }
 0x782   : > { %3555 = vmatprep.subr.bf16.mxu1 %v13286_v29 }
 0x785   : > { %3556 = vmatpush1.bf16.msra.mxu1 %v13284_v42 }
 0x786   : > { %3557 = vmatprep.subr.bf16.mxu1 %v13289_v57 }
 0x789   : > { %3558 = vmatpush1.bf16.msra.mxu1 %v13287_v39 }
 0x78a   : > { %3559 = vmatprep.subr.bf16.mxu1 %v13292_v50 }
 0x78d   : > { %3560 = vmatpush1.bf16.msra.mxu1 %v13290_v37 }
 0x78e   : > { %3561 = vmatprep.subr.bf16.mxu1 %v13295_v49 }
 0x791   : > { %3562 = vmatpush1.bf16.msra.mxu1 %v13293_v15  ;;  %v16094_v15 = vsub.s32 3, %v15699_v20 }
 0x792   : > { %3563 = vmatprep.subr.bf16.mxu1 %v13298_v3 }
 0x793   : > { %v2974_v3 = vrot.slane %v16065_v36, %v16094_v15 }
 0x795   : > { %3564 = vmatpush1.bf16.msra.mxu1 %v13296_v28  ;;  %v2966_v28 = vrot.slane %v16065_v36, %v15708_v62 }
 0x796   : > { %3565 = vmatprep.subr.bf16.mxu1 %v13301_v17 }
 0x799   : > { %3566 = vmatpush1.bf16.msra.mxu1 %v13299_v25 }
 0x79a   : > { %3567 = vmatprep.subr.bf16.mxu1 %v13304_v52 }
 0x79d   : > { %3568 = vmatpush1.bf16.msra.mxu1 %v13302_v44 }
 0x79e   : > { %3569 = vmatprep.subr.bf16.mxu1 %v13307_v56 }
 0x7a1   : > { %3570 = vmatpush1.bf16.msra.mxu1 %v13305_v31 }
 0x7a2   : > { %3571 = vmatprep.subr.bf16.mxu1 %v13310_v0 }
 0x7a5   : > { %3572 = vmatpush1.bf16.msra.mxu1 %v13308_v6 }
 0x7a6   : > { %3573 = vmatprep.subr.bf16.mxu1 %v13313_v12 }
 0x7a9   : > { %3574 = vmatpush1.bf16.msra.mxu1 %v13311_v60 }
 0x7aa   : > { %3575 = vmatprep.subr.bf16.mxu1 %v13316_v4 }
 0x7ad   : > { %3576 = vmatpush1.bf16.msra.mxu1 %v13314_v2 }
 0x7ae   : > { %3577 = vmatprep.subr.bf16.mxu1 %v13319_v38 }
 0x7b1   : > { %3578 = vmatpush1.bf16.msra.mxu1 %v13317_v63 }
 0x7b2   : > { %3579 = vmatprep.subr.bf16.mxu1 %v13322_v27 }
 0x7b5   : > { %3580 = vmatpush1.bf16.msra.mxu1 %v13320_v1 }
 0x7b6   : > { %3581 = vmatprep.subr.bf16.mxu1 %v13325_v47 }
 0x7b9   : > { %3582 = vmatpush1.bf16.msra.mxu1 %v13323_v33 }
 0x7ba   : > { %12668 = vmatprep.subr.bf16.mxu1 %v14302_v11 }
 0x7bc   : > { %3584 = vmatmul.mubr.bf16.vlgmr.msra.gmra.mrb[8].mxu1 %v15961_v16 }
 0x7bd   : > { %12670 = vmatprep.mubr.msk.bf16.mxu1 %vm14303_vm8, %v14302_v11 }
 0x84f   : > { %v3503_v35 = vpop.f32.mrb[4].mxu1  ;;  %v3544_v54 = vpop.f32.mrb[8].mxu0 }
 0x850   : > { %v3545_v59 = vadd.f32 %v3544_v54, %v2970_v51  ;;  %v3505_v55 = vpop.f32.mrb[5].mxu1  ;;  %v3546_v34 = vpop.f32.mrb[9].mxu0  ;;  %v3504_v46 = vadd.f32 %v3503_v35, %v2962_v23 }
 0x851   : > { %v3507_v32 = vpop.f32.mrb[6].mxu1  ;;  %v3548_v30 = vpop.f32.mrb[10].mxu0  ;;  %v3547_v17 = vadd.f32 %v3546_v34, %v2974_v3  ;;  %v3506_v25 = vadd.f32 %v3505_v55, %v2966_v28 }
 0x852   : > { %v3593_v22 = vpack.c.bf16 %v3545_v59, %v3545_v59  ;;  %v3508_v18 = vpop.f32.mrb[7].mxu1  ;;  %v3549_v43 = vpop.f32.mrb[11].mxu0  ;;  %v3592_v5 = vpack.c.bf16 %v3504_v46, %v3504_v46 }
 0x853   : > { %v4040_v52 = vpack.c.bf16 %v3547_v17, %v3547_v17  ;;  %v4039_v44 = vpack.c.bf16 %v3506_v25, %v3506_v25 }
 0x854   : > { %v3600_v14 = vsel %vm3595_vm9, %v3593_v22, 0 }
 0x855   : > { %12669 = vmatpush3.bf16.xpose.msra.mxu1 %v3600_v14  ;;  %v4046_v51 = vsel %vm3595_vm9, %v4040_v52, 0 }
 0x856   : > { %12674 = vmatprep.subr.bf16.mxu1 %v14302_v11 }
 0x85c   : > { %12671 = vmatmul.mubr.msk.bf16.vlgmr.msra.gmra.mrb[12].mxu1 %vm3595_vm9, %v3592_v5 }
 0x85d   : > { %12676 = vmatprep.mubr.msk.bf16.mxu1 %vm14303_vm8, %v14302_v11 }
 0x88f   : > { %v3585_v45 = vpop.f32.mrb[8].mxu1 }
 0x890   : > { %v3586_v24 = vadd.f32 %v3585_v45, %v2978_v19  ;;  %v16081_v8 = vpop.f32.mrb[9].mxu1 }
 0x891   : > { %v3589_v9 = vpop.f32.mrb[10].mxu1 }
 0x892   : > { %v16083_v7 = vpack.c.bf16 %v3586_v24, %v3586_v24  ;;  %v3590_v58 = vpop.f32.mrb[11].mxu1 }
 0x894   : > { %v3661_v26 = vsel %vm3659_vm10, %v16083_v7, 0 }
 0x895   : > { %12675 = vmatpush3.bf16.msra.mxu1 %v3661_v26 }
 0x896   : > { %12680 = vmatprep.subr.bf16.mxu1 %v14302_v11 }
 0x92f   : > { %v3636_v48 = vpop.f32.mrb[12].mxu1 }
 0x930   : > { %v3642_v16 = vmul.f32 0.17677669, %v3636_v48  ;;  %v12672_v41 = vpop.f32.mrb[13].mxu1 }
 0x931   : > { %v3639_v40 = vpop.f32.mrb[14].mxu1 }
 0x932   : > { %v12673_v29 = vpop.f32.mrb[15].mxu1  ;;  %v3644_v42 = vsel %vm3643_vm11, %v3642_v16, -inf }
 0x933   : > { %3645 = vmax.xlane.f32.xlu1 %v3644_v42 }
 0x944   : > { %3707 = vrot.lane.b32.xlu1 %v3593_v22, %s14304_s28 }
 0x9c0   : > { %v3646_v57 = vpop.xlane.xlu1 %3645 }
 0x9c1   : > { %v3647_v39 = vsub.f32 %v3642_v16, %v3646_v57 }
 0x9c3   : > { %v3648_v50 = vmul.f32 1.442695, %v3647_v39 }
 0x9c4   : > { %v3708_v56 = vpop.permute.xlu1 %3707 }
 0x9c5   : > { %13968 = vpow2.f32 %v3648_v50  ;;  %v3713_v63 = vsel %vm3595_vm9, %v3708_v56, 0 }
 0x9cf   : > { %v13969_v37 = vpop.eup %13968 }
 0x9d0   : > { %v3650_v49 = vsel %vm3643_vm11, %v13969_v37, 0.0 }
 0x9d1   : > { %3651 = vadd.xlane.f32.xlu1 %v3650_v49 }
 0x9e2   : > { %3704 = vrot.lane.b32.xlu1 %v3592_v5, %s14304_s28 }
 0x9e6   : > { %3819 = vrot.lane.b32.xlu1 %v3593_v22, %s14305_s1 }
 0x9ea   : > { %3817 = vrot.lane.b32.xlu1 %v3592_v5, %s14305_s1 }
 0x9ee   : > { %3930 = vrot.lane.b32.xlu1 %v3593_v22, %s14306_s15 }
 0x9f2   : > { %3928 = vrot.lane.b32.xlu1 %v3592_v5, %s14306_s15 }
 0x9f6   : > { %4151 = vrot.lane.b32.xlu1 %v4040_v52, %s14304_s28 }
 0x9fa   : > { %4148 = vrot.lane.b32.xlu1 %v4039_v44, %s14304_s28 }
 0x9fe   : > { %4263 = vrot.lane.b32.xlu1 %v4040_v52, %s14305_s1 }
 0xa02   : > { %4261 = vrot.lane.b32.xlu1 %v4039_v44, %s14305_s1 }
 0xa06   : > { %4374 = vrot.lane.b32.xlu1 %v4040_v52, %s14306_s15 }
 0xa0a   : > { %4372 = vrot.lane.b32.xlu1 %v4039_v44, %s14306_s15 }
 0xa5e   : > { %v3652_v31 = vpop.xlane.xlu1 %3651 }
 0xa5f   : > { %13970 = vrcp.f32 %v3652_v31 }
 0xa62   : > { %v3705_v0 = vpop.permute.xlu1 %3704 }
 0xa66   : > { %v3820_v6 = vpop.permute.xlu1 %3819 }
 0xa67   : > { %v3825_v12 = vsel %vm3595_vm9, %v3820_v6, 0 }
 0xa68   : > { %12693 = vmatpush3.bf16.xpose.msra.mxu0 %v3825_v12 }
 0xa69   : > { %v13971_v60 = vpop.eup %13970  ;;  %12704 = vmatprep.subr.bf16.mxu0 %v14302_v11 }
 0xa6a   : > { %v3818_v4 = vpop.permute.xlu1 %3817  ;;  %v3654_v2 = vmul.f32 %v13971_v60, %v13969_v37 }
 0xa6c   : > { %v3655_v38 = vpack.c.bf16 %v3654_v2, %v3654_v2 }
 0xa6e   : > { %12677 = vmatmul.mubr.msk.bf16.vlgmr.msra.gmra.mrb[16].mxu1 %vm3643_vm11, %v3655_v38  ;;  %v3931_v27 = vpop.permute.xlu1 %3930 }
 0xa6f   : > { %12681 = vmatpush3.bf16.xpose.msra.mxu1 %v3713_v63  ;;  %v3936_v1 = vsel %vm3595_vm9, %v3931_v27, 0  ;;  %12695 = vmatmul.mubr.msk.bf16.vlgmr.msra.gmra.mrb[12].mxu0 %vm3595_vm9, %v3818_v4 }
 0xa70   : > { %12705 = vmatpush3.bf16.xpose.msra.mxu0 %v3936_v1  ;;  %12682 = vmatprep.mubr.msk.bf16.mxu1 %vm14303_vm8, %v14302_v11 }
 0xa71   : > { %12706 = vmatprep.mubr.msk.bf16.mxu0 %vm14303_vm8, %v14302_v11  ;;  %12716 = vmatprep.subr.bf16.mxu0 %v14302_v11 }
 0xa72   : > { %v3929_v47 = vpop.permute.xlu1 %3928  ;;  %12686 = vmatprep.subr.bf16.mxu1 %v14302_v11 }
 0xa76   : > { %12683 = vmatmul.mubr.msk.bf16.vlgmr.msra.gmra.mrb[20].mxu1 %vm3595_vm9, %v3705_v0  ;;  %v4152_v33 = vpop.permute.xlu1 %4151 }
 0xa77   : > { %12707 = vmatmul.mubr.msk.bf16.vlgmr.msra.gmra.mrb[16].mxu0 %vm3595_vm9, %v3929_v47  ;;  %12688 = vmatprep.mubr.msk.bf16.mxu1 %vm14303_vm8, %v14302_v11  ;;  %v4157_v54 = vsel %vm3595_vm9, %v4152_v33, 0 }
 0xa78   : > { %12717 = vmatpush3.bf16.xpose.msra.mxu0 %v4046_v51  ;;  %12718 = vmatprep.mubr.msk.bf16.mxu0 %vm14303_vm8, %v14302_v11 }
 0xa79   : > { %12728 = vmatprep.subr.bf16.mxu0 %v14302_v11 }
 0xa7a   : > { %v4149_v35 = vpop.permute.xlu1 %4148 }
 0xa7e   : > { %v4264_v59 = vpop.permute.xlu1 %4263 }
 0xa7f   : > { %12719 = vmatmul.mubr.msk.bf16.vlgmr.msra.gmra.mrb[20].mxu0 %vm3595_vm9, %v4039_v44  ;;  %v4269_v34 = vsel %vm3595_vm9, %v4264_v59, 0 }
 0xa80   : > { %12729 = vmatpush3.bf16.xpose.msra.mxu0 %v4157_v54  ;;  %12730 = vmatprep.mubr.msk.bf16.mxu0 %vm14303_vm8, %v14302_v11 }
 0xa81   : > { %12740 = vmatprep.subr.bf16.mxu0 %v14302_v11 }
 0xa82   : > { %v4262_v55 = vpop.permute.xlu1 %4261 }
 0xa86   : > { %v4375_v32 = vpop.permute.xlu1 %4374 }
 0xa87   : > { %12731 = vmatmul.mubr.msk.bf16.vlgmr.msra.gmra.mrb[24].mxu0 %vm3595_vm9, %v4149_v35  ;;  %v4380_v30 = vsel %vm3595_vm9, %v4375_v32, 0 }
 0xa88   : > { %12741 = vmatpush3.bf16.xpose.msra.mxu0 %v4269_v34  ;;  %12742 = vmatprep.mubr.msk.bf16.mxu0 %vm14303_vm8, %v14302_v11 }
 0xa89   : > { %12752 = vmatprep.subr.bf16.mxu0 %v14302_v11 }
 0xa8a   : > { %v4373_v23 = vpop.permute.xlu1 %4372 }
 0xa8f   : > { %12743 = vmatmul.mubr.msk.bf16.vlgmr.msra.gmra.mrb[28].mxu0 %vm3595_vm9, %v4262_v55 }
 0xa90   : > { %12753 = vmatpush3.bf16.xpose.msra.mxu0 %v4380_v30  ;;  %12754 = vmatprep.mubr.msk.bf16.mxu0 %vm14303_vm8, %v14302_v11 }
 0xa97   : > { %12755 = vmatmul.mubr.msk.bf16.vlgmr.msra.gmra.mrb[32].mxu0 %vm3595_vm9, %v4373_v23 }
 0xb41   : > { %v16144_v22 = vpop.f32.mrb[16].mxu1 }
 0xb42   : > { %v12678_v18 = vpop.f32.mrb[17].mxu1  ;;  %v3861_v43 = vpop.f32.mrb[12].mxu0 }
 0xb43   : > { %v3867_v14 = vmul.f32 0.17677669, %v3861_v43  ;;  %v3700_v46 = vpop.f32.mrb[18].mxu1  ;;  %v12696_v5 = vpop.f32.mrb[13].mxu0 }
 0xb44   : > { %v12679_v19 = vpop.f32.mrb[19].mxu1  ;;  %v3864_v45 = vpop.f32.mrb[14].mxu0 }
 0xb45   : > { %v12697_v24 = vpop.f32.mrb[15].mxu0  ;;  %v3868_v9 = vsel %vm3643_vm11, %v3867_v14, -inf }
 0xb46   : > { %3869 = vmax.xlane.f32.xlu0 %v3868_v9 }
 0xb49   : > { %v3749_v58 = vpop.f32.mrb[20].mxu1 }
 0xb4a   : > { %v3755_v26 = vmul.f32 0.17677669, %v3749_v58  ;;  %v12684_v48 = vpop.f32.mrb[21].mxu1  ;;  %v3972_v16 = vpop.f32.mrb[16].mxu0 }
 0xb4b   : > { %v3752_v41 = vpop.f32.mrb[22].mxu1  ;;  %v12708_v40 = vpop.f32.mrb[17].mxu0  ;;  %v3978_v29 = vmul.f32 0.17677669, %v3972_v16 }
 0xb4c   : > { %v12685_v42 = vpop.f32.mrb[23].mxu1  ;;  %v3975_v57 = vpop.f32.mrb[18].mxu0  ;;  %v3756_v39 = vsel %vm3643_vm11, %v3755_v26, -inf }
 0xb4d   : > { %v12709_v50 = vpop.f32.mrb[19].mxu0  ;;  %3757 = vmax.xlane.f32.xlu1 %v3756_v39  ;;  %v3979_v37 = vsel %vm3643_vm11, %v3978_v29, -inf }
 0xb51   : > { %3980 = vmax.xlane.f32.xlu1 %v3979_v37 }
 0xb52   : > { %v4082_v49 = vpop.f32.mrb[20].mxu0 }
 0xb53   : > { %v4088_v3 = vmul.f32 0.17677669, %v4082_v49  ;;  %v12720_v28 = vpop.f32.mrb[21].mxu0 }
 0xb54   : > { %v4085_v17 = vpop.f32.mrb[22].mxu0 }
 0xb55   : > { %v12721_v25 = vpop.f32.mrb[23].mxu0  ;;  %v4089_v52 = vsel %vm3643_vm11, %v4088_v3, -inf }
 0xb56   : > { %4090 = vmax.xlane.f32.xlu1 %v4089_v52 }
 0xb5a   : > { %v4193_v44 = vpop.f32.mrb[24].mxu0 }
 0xb5b   : > { %v4199_v56 = vmul.f32 0.17677669, %v4193_v44  ;;  %v12732_v31 = vpop.f32.mrb[25].mxu0  ;;  %v16181_v44 = vsub.s32 5, %v15699_v20 }
 0xb5c   : > { %v4196_v0 = vpop.f32.mrb[26].mxu0 }
 0xb5d   : > { %v12733_v6 = vpop.f32.mrb[27].mxu0  ;;  %v4200_v12 = vsel %vm3643_vm11, %v4199_v56, -inf }
 0xb5e   : > { %4201 = vmax.xlane.f32.xlu1 %v4200_v12 }
 0xb62   : > { %v4305_v60 = vpop.f32.mrb[28].mxu0 }
 0xb63   : > { %v4311_v4 = vmul.f32 0.17677669, %v4305_v60  ;;  %v12744_v2 = vpop.f32.mrb[29].mxu0 }
 0xb64   : > { %v4308_v38 = vpop.f32.mrb[30].mxu0 }
 0xb65   : > { %v12745_v63 = vpop.f32.mrb[31].mxu0  ;;  %v4312_v27 = vsel %vm3643_vm11, %v4311_v4, -inf }
 0xb66   : > { %4313 = vmax.xlane.f32.xlu1 %v4312_v27 }
 0xb6a   : > { %v4416_v1 = vpop.f32.mrb[32].mxu0 }
 0xb6b   : > { %v4422_v47 = vmul.f32 0.17677669, %v4416_v1  ;;  %v12756_v33 = vpop.f32.mrb[33].mxu0 }
 0xb6c   : > { %v4419_v51 = vpop.f32.mrb[34].mxu0 }
 0xb6d   : > { %v12757_v35 = vpop.f32.mrb[35].mxu0  ;;  %v4423_v54 = vsel %vm3643_vm11, %v4422_v47, -inf }
 0xb6e   : > { %4424 = vmax.xlane.f32.xlu1 %v4423_v54 }
 0xbd3   : > { %v3870_v59 = vpop.xlane.xlu0 %3869 }
 0xbd4   : > { %v3871_v55 = vsub.f32 %v3867_v14, %v3870_v59 }
 0xbd6   : > { %v3872_v34 = vmul.f32 1.442695, %v3871_v55 }
 0xbd8   : > { %13972 = vpow2.f32 %v3872_v34 }
 0xbda   : > { %v3758_v32 = vpop.xlane.xlu1 %3757 }
 0xbdb   : > { %v3759_v46 = vsub.f32 %v3755_v26, %v3758_v32 }
 0xbdd   : > { %v3760_v24 = vmul.f32 1.442695, %v3759_v46 }
 0xbde   : > { %v3981_v30 = vpop.xlane.xlu1 %3980 }
 0xbdf   : > { %v3982_v23 = vsub.f32 %v3978_v29, %v3981_v30 }
 0xbe1   : > { %v3983_v18 = vmul.f32 1.442695, %v3982_v23 }
 0xbe2   : > { %v16153_v43 = vpop.eup %13972 }
 0xbe3   : > { %13974 = vpow2.f32 %v3983_v18  ;;  %v4091_v5 = vpop.xlane.xlu1 %4090  ;;  %v3874_v19 = vsel %vm3643_vm11, %v16153_v43, 0.0 }
 0xbe4   : > { %v4092_v45 = vsub.f32 %v4088_v3, %v4091_v5  ;;  %3875 = vadd.xlane.f32.xlu1 %v3874_v19 }
 0xbe6   : > { %v4093_v9 = vmul.f32 1.442695, %v4092_v45 }
 0xbe8   : > { %13976 = vpow2.f32 %v4093_v9 }
 0xbe9   : > { %13978 = vpow2.f32 %v3760_v24 }
 0xbeb   : > { %v4202_v14 = vpop.xlane.xlu1 %4201 }
 0xbec   : > { %v4203_v58 = vsub.f32 %v4199_v56, %v4202_v14 }
 0xbed   : > { %v16157_v48 = vpop.eup %13974 }
 0xbee   : > { %v4204_v16 = vmul.f32 1.442695, %v4203_v58  ;;  %v3985_v41 = vsel %vm3643_vm11, %v16157_v48, 0.0 }
 0xbef   : > { %3986 = vadd.xlane.f32.xlu1 %v3985_v41 }
 0xbf0   : > { %13980 = vpow2.f32 %v4204_v16 }
 0xbf2   : > { %v16161_v26 = vpop.eup %13976 }
 0xbf3   : > { %v4095_v40 = vsel %vm3643_vm11, %v16161_v26, 0.0  ;;  %v13979_v29 = vpop.eup %13978  ;;  %v4314_v50 = vpop.xlane.xlu1 %4313 }
 0xbf4   : > { %4096 = vadd.xlane.f32.xlu1 %v4095_v40  ;;  %v3762_v42 = vsel %vm3643_vm11, %v13979_v29, 0.0  ;;  %v4315_v37 = vsub.f32 %v4311_v4, %v4314_v50 }
 0xbf6   : > { %v4316_v49 = vmul.f32 1.442695, %v4315_v37  ;;  %v13326_v37 = vld [vmem:[%s18680_s12] ss:$8 sps:$4 sm:$0xff]  }
 0xbf8   : > { %3763 = vadd.xlane.f32.xlu1 %v3762_v42  ;;  %13982 = vpow2.f32 %v4316_v49  ;;  %v13328_v49 = vld [vmem:[%s18680_s12 + $0x4] ss:$8 sps:$4 sm:$0xff]  }
 0xbf9   : > { %4720 = vmatprep.subr.bf16.mxu0 %v13328_v49 }
 0xbfa   : > { %v16166_v57 = vpop.eup %13980  ;;  %4721 = vmatpush1.bf16.msra.mxu0 %v13326_v37  ;;  %v13371_v37 = vld [vmem:[%s18680_s12 + $0xf0] ss:$8 sps:$4 sm:$0xff]  }
 0xbfb   : > { %v4206_v39 = vsel %vm3643_vm11, %v16166_v57, 0.0  ;;  %v4425_v3 = vpop.xlane.xlu1 %4424 }
 0xbfc   : > { %4207 = vadd.xlane.f32.xlu0 %v4206_v39  ;;  %v4426_v28 = vsub.f32 %v4422_v47, %v4425_v3  ;;  %v13331_v3 = vld [vmem:[%s18680_s12 + $0x14] ss:$8 sps:$4 sm:$0xff]  }
 0xbfd   : > { %4722 = vmatprep.subr.bf16.mxu0 %v13331_v3 }
 0xbfe   : > { %v4427_v17 = vmul.f32 1.442695, %v4426_v28  ;;  %v13329_v28 = vld [vmem:[%s18680_s12 + $0x10] ss:$8 sps:$4 sm:$0xff]  }
 0xbff   : > { %4723 = vmatpush1.bf16.msra.mxu0 %v13329_v28 }
 0xc00   : > { %13984 = vpow2.f32 %v4427_v17  ;;  %v13334_v17 = vld [vmem:[%s18680_s12 + $0x24] ss:$8 sps:$4 sm:$0xff]  }
 0xc01   : > { %4724 = vmatprep.subr.bf16.mxu0 %v13334_v17 }
 0xc02   : > { %v16176_v25 = vpop.eup %13982 }
 0xc03   : > { %v4318_v52 = vsel %vm3643_vm11, %v16176_v25, 0.0 }
 0xc09   : > { %3769 = vrot.lane.b32.xlu1 %v16083_v7, %s14304_s28 }
 0xc0a   : > { %v16183_v56 = vpop.eup %13984 }
 0xc0b   : > { %v4429_v31 = vsel %vm3643_vm11, %v16183_v56, 0.0 }
 0xc12   : > { %3880 = vrot.lane.b32.xlu0 %v16083_v7, %s14305_s1 }
 0xc16   : > { %3991 = vrot.lane.b32.xlu0 %v16083_v7, %s14306_s15  ;;  %v2982_v7 = vrot.slane %v16065_v36, %v16181_v44 }
 0xc18   : > { %v3588_v0 = vadd.f32 %v16081_v8, %v2982_v7  ;;  %v13340_v7 = vld [vmem:[%s18680_s12 + $0x44] ss:$8 sps:$4 sm:$0xff]  }
 0xc1a   : > { %v4041_v6 = vpack.c.bf16 %v3588_v0, %v3588_v0  ;;  %v13343_v0 = vld [vmem:[%s18680_s12 + $0x54] ss:$8 sps:$4 sm:$0xff]  }
 0xc1c   : > { %v4105_v18 = vsel %vm3659_vm10, %v4041_v6, 0 }
 0xc2d   : > { %4319 = vadd.xlane.f32.xlu1 %v4318_v52  ;;  %v13337_v52 = vld [vmem:[%s18680_s12 + $0x34] ss:$8 sps:$4 sm:$0xff]  }
 0xc35   : > { %4430 = vadd.xlane.f32.xlu0 %v4429_v31  ;;  %v13338_v31 = vld [vmem:[%s18680_s12 + $0x40] ss:$8 sps:$4 sm:$0xff]  }
 0xc3e   : > { %4213 = vrot.lane.b32.xlu1 %v4041_v6, %s14304_s28 }
 0xc42   : > { %4435 = vrot.lane.b32.xlu1 %v4041_v6, %s14306_s15 }
 0xc4b   : > { %4324 = vrot.lane.b32.xlu0 %v4041_v6, %s14305_s1  ;;  %v13341_v6 = vld [vmem:[%s18680_s12 + $0x50] ss:$8 sps:$4 sm:$0xff]  }
 0xc71   : > { %v3876_v12 = vpop.xlane.xlu1 %3875 }
 0xc7c   : > { %v3987_v60 = vpop.xlane.xlu1 %3986 }
 0xc81   : > { %v4097_v4 = vpop.xlane.xlu1 %4096 }
 0xc85   : > { %v3764_v2 = vpop.xlane.xlu1 %3763 }
 0xc86   : > { %13986 = vrcp.f32 %v3764_v2  ;;  %v13347_v2 = vld [vmem:[%s18680_s12 + $0x70] ss:$8 sps:$4 sm:$0xff]  }
 0xc87   : > { %13988 = vrcp.f32 %v3876_v12  ;;  %v13346_v12 = vld [vmem:[%s18680_s12 + $0x64] ss:$8 sps:$4 sm:$0xff]  }
 0xc88   : > { %13990 = vrcp.f32 %v3987_v60  ;;  %v13344_v60 = vld [vmem:[%s18680_s12 + $0x60] ss:$8 sps:$4 sm:$0xff]  }
 0xc89   : > { %v3770_v38 = vpop.permute.xlu1 %3769  ;;  %v4208_v63 = vpop.xlane.xlu0 %4207  ;;  %13992 = vrcp.f32 %v4097_v4  ;;  %v13349_v4 = vld [vmem:[%s18680_s12 + $0x74] ss:$8 sps:$4 sm:$0xff]  }
 0xc8a   : > { %v3775_v36 = vsel %vm3659_vm10, %v3770_v38, 0  ;;  %13994 = vrcp.f32 %v4208_v63  ;;  %v13352_v38 = vld [vmem:[%s18680_s12 + $0x84] ss:$8 sps:$4 sm:$0xff]   ;;  %v13355_v63 = vld [vmem:[%s18680_s12 + $0x94] ss:$8 sps:$4 sm:$0xff]  }
 0xc8b   : > { %12687 = vmatpush3.bf16.msra.mxu1 %v3775_v36  ;;  %v13350_v36 = vld [vmem:[%s18680_s12 + $0x80] ss:$8 sps:$4 sm:$0xff]  }
 0xc8c   : > { %12698 = vmatprep.subr.bf16.mxu1 %v14302_v11 }
 0xc8d   : > { %v3881_v1 = vpop.permute.xlu0 %3880 }
 0xc8e   : > { %v3886_v51 = vsel %vm3659_vm10, %v3881_v1, 0  ;;  %v13356_v1 = vld [vmem:[%s18680_s12 + $0xa0] ss:$8 sps:$4 sm:$0xff]  }
 0xc90   : > { %v13987_v8 = vpop.eup %13986 }
 0xc91   : > { %v3766_v27 = vmul.f32 %v13987_v8, %v13979_v29  ;;  %v13989_v33 = vpop.eup %13988  ;;  %v3992_v54 = vpop.permute.xlu0 %3991  ;;  %v13353_v8 = vld [vmem:[%s18680_s12 + $0x90] ss:$8 sps:$4 sm:$0xff]  }
 0xc92   : > { %v3878_v35 = vmul.f32 %v13989_v33, %v16153_v43  ;;  %v13991_v55 = vpop.eup %13990  ;;  %v3997_v34 = vsel %vm3659_vm10, %v3992_v54, 0 }
 0xc93   : > { %v3767_v47 = vpack.c.bf16 %v3766_v27, %v3766_v27  ;;  %v3989_v32 = vmul.f32 %v13991_v55, %v16157_v48  ;;  %v13993_v23 = vpop.eup %13992  ;;  %v13358_v27 = vld [vmem:[%s18680_s12 + $0xa4] ss:$8 sps:$4 sm:$0xff]  }
 0xc94   : > { %v3879_v59 = vpack.c.bf16 %v3878_v35, %v3878_v35  ;;  %v4099_v43 = vmul.f32 %v13993_v23, %v16161_v26  ;;  %v13995_v5 = vpop.eup %13994 }
 0xc95   : > { %12689 = vmatmul.mubr.msk.bf16.vlgmr.msra.gmra.mrb[24].mxu1 %vm3643_vm11, %v3767_v47  ;;  %v3990_v30 = vpack.c.bf16 %v3989_v32, %v3989_v32  ;;  %v4210_v45 = vmul.f32 %v13995_v5, %v16166_v57 }
 0xc96   : > { %12699 = vmatpush3.bf16.msra.mxu1 %v3886_v51  ;;  %12700 = vmatprep.mubr.msk.bf16.mxu1 %vm14303_vm8, %v14302_v11  ;;  %v4100_v46 = vpack.c.bf16 %v4099_v43, %v4099_v43 }
 0xc97   : > { %12710 = vmatprep.subr.bf16.mxu1 %v14302_v11  ;;  %v4211_v14 = vpack.c.bf16 %v4210_v45, %v4210_v45  ;;  %v13361_v45 = vld [vmem:[%s18680_s12 + $0xb4] ss:$8 sps:$4 sm:$0xff]  }
 0xc9d   : > { %12701 = vmatmul.mubr.msk.bf16.vlgmr.msra.gmra.mrb[28].mxu1 %vm3643_vm11, %v3879_v59 }
 0xc9e   : > { %12711 = vmatpush3.bf16.msra.mxu1 %v3997_v34  ;;  %12712 = vmatprep.mubr.msk.bf16.mxu1 %vm14303_vm8, %v14302_v11 }
 0xc9f   : > { %12722 = vmatprep.subr.bf16.mxu1 %v14302_v11 }
 0xca5   : > { %12713 = vmatmul.mubr.msk.bf16.vlgmr.msra.gmra.mrb[32].mxu1 %vm3643_vm11, %v3990_v30 }
 0xca6   : > { %12723 = vmatpush3.bf16.msra.mxu1 %v4105_v18  ;;  %12724 = vmatprep.mubr.msk.bf16.mxu1 %vm14303_vm8, %v14302_v11 }
 0xca7   : > { %12734 = vmatprep.subr.bf16.mxu1 %v14302_v11 }
 0xcad   : > { %12725 = vmatmul.mubr.msk.bf16.vlgmr.msra.gmra.mrb[36].mxu1 %vm3643_vm11, %v4100_v46 }
 0xcae   : > { %12736 = vmatprep.mubr.msk.bf16.mxu1 %vm14303_vm8, %v14302_v11 }
 0xcba   : > { %v4320_v19 = vpop.xlane.xlu1 %4319 }
 0xcbb   : > { %13996 = vrcp.f32 %v4320_v19 }
 0xcbe   : > { %v4214_v24 = vpop.permute.xlu1 %4213 }
 0xcbf   : > { %v4219_v9 = vsel %vm3659_vm10, %v4214_v24, 0  ;;  %v13359_v24 = vld [vmem:[%s18680_s12 + $0xb0] ss:$8 sps:$4 sm:$0xff]  }
 0xcc0   : > { %12735 = vmatpush3.bf16.msra.mxu1 %v4219_v9  ;;  %v13364_v9 = vld [vmem:[%s18680_s12 + $0xc4] ss:$8 sps:$4 sm:$0xff]  }
 0xcc1   : > { %12746 = vmatprep.subr.bf16.mxu1 %v14302_v11 }
 0xcc2   : > { %v4431_v58 = vpop.xlane.xlu0 %4430  ;;  %v4436_v40 = vpop.permute.xlu1 %4435 }
 0xcc3   : > { %13998 = vrcp.f32 %v4431_v58  ;;  %12737 = vmatmul.mubr.msk.bf16.vlgmr.msra.gmra.mrb[40].mxu1 %vm3643_vm11, %v4211_v14  ;;  %v4441_v42 = vsel %vm3659_vm10, %v4436_v40, 0  ;;  %v13362_v14 = vld [vmem:[%s18680_s12 + $0xc0] ss:$8 sps:$4 sm:$0xff]   ;;  %v13367_v58 = vld [vmem:[%s18680_s12 + $0xd4] ss:$8 sps:$4 sm:$0xff]  }
 0xcc4   : > { %12748 = vmatprep.mubr.msk.bf16.mxu1 %vm14303_vm8, %v14302_v11  ;;  %v13370_v40 = vld [vmem:[%s18680_s12 + $0xe4] ss:$8 sps:$4 sm:$0xff]  }
 0xcc5   : > { %v13997_v48 = vpop.eup %13996 }
 0xcc6   : > { %v4322_v16 = vmul.f32 %v13997_v48, %v16176_v25  ;;  %v4325_v41 = vpop.permute.xlu0 %4324  ;;  %v13332_v25 = vld [vmem:[%s18680_s12 + $0x20] ss:$8 sps:$4 sm:$0xff]  }
 0xcc7   : > { %v4330_v26 = vsel %vm3659_vm10, %v4325_v41, 0  ;;  %4725 = vmatpush1.bf16.msra.mxu0 %v13332_v25 }
 0xcc8   : > { %12747 = vmatpush3.bf16.msra.mxu1 %v4330_v26  ;;  %v4323_v29 = vpack.c.bf16 %v4322_v16, %v4322_v16  ;;  %4726 = vmatprep.subr.bf16.mxu0 %v13337_v52  ;;  %v13365_v16 = vld [vmem:[%s18680_s12 + $0xd0] ss:$8 sps:$4 sm:$0xff]  }
 0xcc9   : > { %12758 = vmatprep.subr.bf16.mxu1 %v14302_v11 }
 0xccb   : > { %12749 = vmatmul.mubr.msk.bf16.vlgmr.msra.gmra.mrb[44].mxu1 %vm3643_vm11, %v4323_v29 }
 0xccc   : > { %12759 = vmatpush3.bf16.msra.mxu1 %v4441_v42  ;;  %12760 = vmatprep.mubr.msk.bf16.mxu1 %vm14303_vm8, %v14302_v11  ;;  %v13368_v42 = vld [vmem:[%s18680_s12 + $0xe0] ss:$8 sps:$4 sm:$0xff]  }
 0xccd   : > { %v13999_v57 = vpop.eup %13998 }
 0xcce   : > { %v4433_v39 = vmul.f32 %v13999_v57, %v16183_v56  ;;  %v13335_v56 = vld [vmem:[%s18680_s12 + $0x30] ss:$8 sps:$4 sm:$0xff]  }
 0xccf   : > { %4727 = vmatpush1.bf16.msra.mxu0 %v13335_v56 }
 0xcd0   : > { %v4434_v50 = vpack.c.bf16 %v4433_v39, %v4433_v39  ;;  %4728 = vmatprep.subr.bf16.mxu0 %v13340_v7  ;;  %v13373_v39 = vld [vmem:[%s18680_s12 + $0xf4] ss:$8 sps:$4 sm:$0xff]  }
 0xcd3   : > { %12761 = vmatmul.mubr.msk.bf16.vlgmr.msra.gmra.mrb[48].mxu1 %vm3643_vm11, %v4434_v50  ;;  %4729 = vmatpush1.bf16.msra.mxu0 %v13338_v31 }
 0xcd4   : > { %4730 = vmatprep.subr.bf16.mxu0 %v13343_v0 }
 0xcd7   : > { %4731 = vmatpush1.bf16.msra.mxu0 %v13341_v6 }
 0xcd8   : > { %4732 = vmatprep.subr.bf16.mxu0 %v13346_v12 }
 0xcdb   : > { %4733 = vmatpush1.bf16.msra.mxu0 %v13344_v60 }
 0xcdc   : > { %4734 = vmatprep.subr.bf16.mxu0 %v13349_v4 }
 0xcdf   : > { %4735 = vmatpush1.bf16.msra.mxu0 %v13347_v2 }
 0xce0   : > { %4736 = vmatprep.subr.bf16.mxu0 %v13352_v38 }
 0xce3   : > { %4737 = vmatpush1.bf16.msra.mxu0 %v13350_v36 }
 0xce4   : > { %4738 = vmatprep.subr.bf16.mxu0 %v13355_v63 }
 0xce7   : > { %4739 = vmatpush1.bf16.msra.mxu0 %v13353_v8 }
 0xce8   : > { %4740 = vmatprep.subr.bf16.mxu0 %v13358_v27 }
 0xceb   : > { %4741 = vmatpush1.bf16.msra.mxu0 %v13356_v1 }
 0xcec   : > { %4742 = vmatprep.subr.bf16.mxu0 %v13361_v45  ;;  %v4821_v45 = vld [vmem:[%s18777_s23] sm:$0xff] }
 0xcef   : > { %4743 = vmatpush1.bf16.msra.mxu0 %v13359_v24  ;;  %v4825_v24 = vld [vmem:[%s18778_s27 + $0x20] sm:$0xff] }
 0xcf0   : > { %4744 = vmatprep.subr.bf16.mxu0 %v13364_v9  ;;  %v11516_v9 = vcombine.low %v4821_v45, %v4825_v24 }
 0xcf3   : > { %4745 = vmatpush1.bf16.msra.mxu0 %v13362_v14  ;;  %v11517_v14 = vcombine.high %v4821_v45, %v4825_v24  ;;  %v4877_v45 = vld [vmem:[%s18778_s27 + $0x1c0] sm:$0xff] }
 0xcf4   : > { %4746 = vmatprep.subr.bf16.mxu0 %v13367_v58  ;;  %v4829_v58 = vld [vmem:[%s18778_s27 + $0x40] sm:$0xff] }
 0xcf5   : > { %5631 = vmatprep.subr.bf16.mxu1 %v11517_v14  ;;  %v4881_v24 = vld [vmem:[%s18778_s27 + $0x1e0] sm:$0xff] }
 0xcf6   : > { %5632 = vmatpush1.bf16.msra.mxu1 %v11516_v9  ;;  %v4882_v9 = vld [vmem:[%s18778_s27 + $0x1e8] sm:$0xff] }
 0xcf7   : > { %4747 = vmatpush1.bf16.msra.mxu0 %v13365_v16 }
 0xcf8   : > { %4748 = vmatprep.subr.bf16.mxu0 %v13370_v40  ;;  %v4830_v40 = vld [vmem:[%s18778_s27 + $0x48] sm:$0xff] }
 0xcfb   : > { %4749 = vmatpush1.bf16.msra.mxu0 %v13368_v42  ;;  %v4837_v42 = vld [vmem:[%s18778_s27 + $0x80] sm:$0xff] }
 0xcfc   : > { %4750 = vmatprep.subr.bf16.mxu0 %v13373_v39  ;;  %v4841_v39 = vld [vmem:[%s18778_s27 + $0xa0] sm:$0xff] }
 0xcff   : > { %4751 = vmatpush1.bf16.msra.mxu0 %v13371_v37  ;;  %v4842_v37 = vld [vmem:[%s18778_s27 + $0xa8] sm:$0xff] }
 0xd68   : > { %v3811_v47 = vpop.f32.mrb[24].mxu1 }
 0xd69   : > { %v12690_v33 = vpop.f32.mrb[25].mxu1 }
 0xd6a   : > { %v3814_v51 = vpop.f32.mrb[26].mxu1 }
 0xd6b   : > { %v12691_v35 = vpop.f32.mrb[27].mxu1 }
 0xd70   : > { %v3922_v54 = vpop.f32.mrb[28].mxu1 }
 0xd71   : > { %v12702_v59 = vpop.f32.mrb[29].mxu1 }
 0xd72   : > { %v3925_v55 = vpop.f32.mrb[30].mxu1  ;;  %v4548_v59 = vld [vmem:[#allocation8] sm:$0x3] }
 0xd73   : > { %v12703_v34 = vpop.f32.mrb[31].mxu1  ;;  %v4553_v55 = vrot.slane %v4548_v59, %v15702_v13 }
 0xd78   : > { %v4033_v32 = vpop.f32.mrb[32].mxu1 }
 0xd79   : > { %v12714_v30 = vpop.f32.mrb[33].mxu1 }
 0xd7a   : > { %v4036_v23 = vpop.f32.mrb[34].mxu1 }
 0xd7b   : > { %v12715_v18 = vpop.f32.mrb[35].mxu1 }
 0xd80   : > { %v4141_v43 = vpop.f32.mrb[36].mxu1 }
 0xd81   : > { %v12726_v46 = vpop.f32.mrb[37].mxu1 }
 0xd82   : > { %v4144_v5 = vpop.f32.mrb[38].mxu1 }
 0xd83   : > { %v12727_v19 = vpop.f32.mrb[39].mxu1 }
 0xd96   : > { %v4255_v48 = vpop.f32.mrb[40].mxu1 }
 0xd97   : > { %v13008_v41 = vpack.i.bf16 %v3811_v47, %v4255_v48  ;;  %v12738_v26 = vpop.f32.mrb[41].mxu1  ;;  %v4833_v48 = vld [vmem:[%s18778_s27 + $0x60] sm:$0xff] }
 0xd98   : > { %v4258_v29 = vpop.f32.mrb[42].mxu1  ;;  %v11525_v26 = vcombine.high %v4829_v58, %v4833_v48 }
 0xd99   : > { %13009 = vrot.lane.b32.xlu1 %v13008_v41, %s14306_s15  ;;  %v12739_v57 = vpop.f32.mrb[43].mxu1  ;;  %v4834_v29 = vld [vmem:[%s18778_s27 + $0x68] sm:$0xff] }
 0xd9a   : > { %v11527_v57 = vcombine.high %v4830_v40, %v4834_v29  ;;  %5633 = vmatprep.subr.bf16.mxu1 %v11525_v26  ;;  %v4886_v26 = vld [vmem:[%s18778_s27 + $0x208] sm:$0xff] }
 0xd9e   : > { %v4366_v50 = vpop.f32.mrb[44].mxu1 }
 0xd9f   : > { %v13013_v49 = vpack.i.bf16 %v3922_v54, %v4366_v50  ;;  %v12750_v3 = vpop.f32.mrb[45].mxu1  ;;  %v4838_v50 = vld [vmem:[%s18778_s27 + $0x88] sm:$0xff] }
 0xda0   : > { %v4369_v28 = vpop.f32.mrb[46].mxu1  ;;  %v11526_v3 = vcombine.low %v4830_v40, %v4834_v29  ;;  %v4890_v40 = vld [vmem:[%s18778_s27 + $0x228] sm:$0xff]  ;;  %v11572_v29 = vcombine.low %v4877_v45, %v4881_v24 }
 0xda1   : > { %13014 = vrot.lane.b32.xlu1 %v13013_v49, %s14305_s1  ;;  %v12751_v17 = vpop.f32.mrb[47].mxu1  ;;  %v11524_v49 = vcombine.low %v4829_v58, %v4833_v48  ;;  %v11533_v28 = vcombine.high %v4837_v42, %v4841_v39  ;;  %v11573_v58 = vcombine.high %v4877_v45, %v4881_v24  ;;  %v4922_v45 = vld [vmem:[%s18778_s27 + $0x328] sm:$0xff]  ;;  %v4925_v24 = vld [vmem:[%s18778_s27 + $0x340] sm:$0xff] }
 0xda2   : > { %v11535_v17 = vcombine.high %v4838_v50, %v4842_v37 }
 0xda3   : > { %5634 = vmatpush1.bf16.msra.mxu1 %v11524_v49  ;;  %v4894_v49 = vld [vmem:[%s18778_s27 + $0x248] sm:$0xff] }
 0xda4   : > { %5635 = vmatprep.subr.bf16.mxu1 %v11533_v28 }
 0xda6   : > { %v4477_v25 = vpop.f32.mrb[48].mxu1 }
 0xda7   : > { %v13018_v52 = vpack.i.bf16 %v4033_v32, %v4477_v25  ;;  %v12762_v56 = vpop.f32.mrb[49].mxu1  ;;  %v4845_v25 = vld [vmem:[%s18778_s27 + $0xc0] sm:$0xff] }
 0xda8   : > { %v4480_v7 = vpop.f32.mrb[50].mxu1  ;;  %v4846_v56 = vld [vmem:[%s18778_s27 + $0xc8] sm:$0xff] }
 0xda9   : > { %13019 = vrot.lane.b32.xlu1 %v13018_v52, %s14304_s28  ;;  %v12763_v31 = vpop.f32.mrb[51].mxu1  ;;  %v4849_v52 = vld [vmem:[%s18778_s27 + $0xe0] sm:$0xff]  ;;  %v4850_v7 = vld [vmem:[%s18778_s27 + $0xe8] sm:$0xff] }
 0xdaa   : > { %v11532_v31 = vcombine.low %v4837_v42, %v4841_v39  ;;  %v11583_v39 = vcombine.high %v4886_v26, %v4890_v40 }
 0xdac   : > { %5636 = vmatpush1.bf16.msra.mxu1 %v11532_v31  ;;  %v4902_v31 = vld [vmem:[%s18778_s27 + $0x288] sm:$0xff] }
 0xe0b   : > { %v13010_v0 = vpop.permute.xlu1 %13009 }
 0xe0c   : > { %v13012_v12 = vunpack.i.h.bf16 %v13010_v0  ;;  %v13011_v60 = vunpack.i.l.bf16 %v13010_v0  ;;  %v11534_v0 = vcombine.low %v4838_v50, %v4842_v37  ;;  %v4893_v50 = vld [vmem:[%s18778_s27 + $0x240] sm:$0xff] }
 0xe0d   : > { %v4897_v37 = vld [vmem:[%s18778_s27 + $0x260] sm:$0xff] }
 0xe0e   : > { %v4507_v36 = vsel %vm3595_vm9, %v16144_v22, %v13012_v12  ;;  %v4511_v63 = vsel %vm3595_vm9, %v4141_v43, %v13011_v60  ;;  %v4557_v22 = vrot.slane %v4548_v59, %v15708_v62  ;;  %v11543_v12 = vcombine.high %v4846_v56, %v4850_v7  ;;  %v4853_v60 = vld [vmem:[%s18778_s27 + $0x100] sm:$0xff] }
 0xe13   : > { %v13015_v6 = vpop.permute.xlu1 %13014 }
 0xe14   : > { %v13017_v4 = vunpack.i.h.bf16 %v13015_v6  ;;  %v13016_v2 = vunpack.i.l.bf16 %v13015_v6  ;;  %v11541_v6 = vcombine.high %v4845_v25, %v4849_v52 }
 0xe16   : > { %v4508_v1 = vsel %vm754_vm0, %v4507_v36, %v13017_v4  ;;  %v4512_v47 = vsel %vm754_vm0, %v4511_v63, %v13016_v2  ;;  %v4857_v4 = vld [vmem:[%s18778_s27 + $0x120] sm:$0xff]  ;;  %v4854_v2 = vld [vmem:[%s18778_s27 + $0x108] sm:$0xff]  ;;  %v11540_v36 = vcombine.low %v4845_v25, %v4849_v52  ;;  %5637 = vmatprep.subr.bf16.mxu1 %v11541_v6  ;;  %v11542_v63 = vcombine.low %v4846_v56, %v4850_v7 }
 0xe17   : > { %v11589_v25 = vcombine.high %v4893_v50, %v4897_v37  ;;  %v4901_v56 = vld [vmem:[%s18778_s27 + $0x280] sm:$0xff]  ;;  %v11588_v6 = vcombine.low %v4893_v50, %v4897_v37 }
 0xe18   : > { %5638 = vmatpush1.bf16.msra.mxu1 %v11540_v36  ;;  %v4905_v7 = vld [vmem:[%s18778_s27 + $0x2a0] sm:$0xff] }
 0xe19   : > { %v4941_v37 = vld [vmem:[%s18778_s27 + $0x3c0] sm:$0xff] }
 0xe1b   : > { %v13020_v38 = vpop.permute.xlu1 %13019 }
 0xe1c   : > { %v13022_v8 = vunpack.i.h.bf16 %v13020_v38  ;;  %v13021_v27 = vunpack.i.l.bf16 %v13020_v38  ;;  %v4858_v38 = vld [vmem:[%s18778_s27 + $0x128] sm:$0xff] }
 0xe1e   : > { %v4510_v33 = vsel %vm4509_vm12, %v4508_v1, %v13022_v8  ;;  %v4513_v51 = vsel %vm4509_vm12, %v4512_v47, %v13021_v27  ;;  %v11549_v8 = vcombine.high %v4853_v60, %v4857_v4  ;;  %v11551_v27 = vcombine.high %v4854_v2, %v4858_v38  ;;  %v4861_v1 = vld [vmem:[%s18778_s27 + $0x140] sm:$0xff] }
 0xe1f   : > { %v4514_v35 = vpack.c.bf16 %v4510_v33, %v4510_v33  ;;  %v4515_v54 = vpack.c.bf16 %v4513_v51, %v4513_v51  ;;  %v4865_v47 = vld [vmem:[%s18778_s27 + $0x160] sm:$0xff]  ;;  %v4862_v33 = vld [vmem:[%s18778_s27 + $0x148] sm:$0xff] }
 0xe20   : > { %v4866_v51 = vld [vmem:[%s18778_s27 + $0x168] sm:$0xff]  ;;  %5639 = vmatprep.subr.bf16.mxu1 %v11549_v8  ;;  %v11557_v59 = vcombine.high %v4861_v1, %v4865_v47 }
 0xe21   : > { %4752 = vmatprep.mubr.bf16.mxu0 %v4515_v54  ;;  %v11550_v54 = vcombine.low %v4854_v2, %v4858_v38  ;;  %v11596_v2 = vcombine.low %v4901_v56, %v4905_v7 }
 0xe22   : > { %4753 = vmatmul.mubr.bf16.vlgmr.msra.gmra.mrb[36].mxu0 %v4514_v35  ;;  %v11548_v35 = vcombine.low %v4853_v60, %v4857_v4  ;;  %v11597_v60 = vcombine.high %v4901_v56, %v4905_v7 }
 0xe24   : > { %5640 = vmatpush1.bf16.msra.mxu1 %v11548_v35  ;;  %v4913_v35 = vld [vmem:[%s18778_s27 + $0x2e0] sm:$0xff] }
 0xe25   : > { %5641 = vmatprep.subr.bf16.mxu1 %v11557_v59 }
 0xef5   : > { %v4754_v34 = vpop.f32.mrb[36].mxu0 }
 0xef6   : > { %v4755_v32 = vadd.f32 %v4754_v34, %v4553_v55  ;;  %v4756_v30 = vpop.f32.mrb[37].mxu0  ;;  %v11559_v55 = vcombine.high %v4862_v33, %v4866_v51  ;;  %v4873_v34 = vld [vmem:[%s18778_s27 + $0x1a0] sm:$0xff] }
 0xef7   : > { %v4757_v23 = vadd.f32 %v4756_v30, %v4557_v22  ;;  %v4758_v18 = vpop.f32.mrb[38].mxu0  ;;  %v4869_v22 = vld [vmem:[%s18778_s27 + $0x180] sm:$0xff]  ;;  %v4874_v30 = vld [vmem:[%s18778_s27 + $0x1a8] sm:$0xff] }
 0xef8   : > { %v16340_v43 = vadd.f32 %v4755_v32, %v15728_v53  ;;  %v4759_v46 = vpop.f32.mrb[39].mxu0  ;;  %v4822_v53 = vld [vmem:[%s18778_s27 + $0x8] sm:$0xff]  ;;  %v11558_v18 = vcombine.low %v4862_v33, %v4866_v51  ;;  %v11564_v14 = vcombine.low %v4869_v22, %v4873_v34  ;;  %v4909_v51 = vld [vmem:[%s18778_s27 + $0x2c0] sm:$0xff] }
 0xef9   : > { %v16343_v5 = vadd.f32 %v4757_v23, %v15730_v21  ;;  %v4826_v21 = vld [vmem:[%s18778_s27 + $0x28] sm:$0xff]  ;;  %v11556_v23 = vcombine.low %v4861_v1, %v4865_v47  ;;  %v11565_v46 = vcombine.high %v4869_v22, %v4873_v34  ;;  %v11605_v59 = vcombine.high %v4909_v51, %v4913_v35 }
 0xefa   : > { %v11518_v16 = vcombine.low %v4822_v53, %v4826_v21  ;;  %v11519_v41 = vcombine.high %v4822_v53, %v4826_v21  ;;  %v4870_v32 = vld [vmem:[%s18778_s27 + $0x188] sm:$0xff]  ;;  %v11604_v22 = vcombine.low %v4909_v51, %v4913_v35 }
 0xefb   : > { %v4763_v19 = vadd.f32 %v16343_v5, %v16340_v43  ;;  %v4878_v53 = vld [vmem:[%s18778_s27 + $0x1c8] sm:$0xff]  ;;  %5642 = vmatpush1.bf16.msra.mxu1 %v11556_v23  ;;  %v11566_v21 = vcombine.low %v4870_v32, %v4874_v30  ;;  %v4921_v23 = vld [vmem:[%s18778_s27 + $0x320] sm:$0xff] }
 0xefc   : > { %5672 = vmatprep.subr.bf16.mxu0 %v11519_v41  ;;  %5643 = vmatprep.subr.bf16.mxu1 %v11565_v46  ;;  %v11575_v48 = vcombine.high %v4878_v53, %v4882_v9  ;;  %v4889_v41 = vld [vmem:[%s18778_s27 + $0x220] sm:$0xff]  ;;  %v11574_v42 = vcombine.low %v4878_v53, %v4882_v9 }
 0xefd   : > { %4764 = vadd.xlane.f32.xlu0 %v4763_v19  ;;  %5673 = vmatpush1.bf16.msra.mxu0 %v11518_v16  ;;  %v11567_v19 = vcombine.high %v4870_v32, %v4874_v30  ;;  %v4885_v16 = vld [vmem:[%s18778_s27 + $0x200] sm:$0xff] }
 0xefe   : > { %5674 = vmatprep.subr.bf16.mxu0 %v11527_v57  ;;  %v11581_v57 = vcombine.high %v4885_v16, %v4889_v41  ;;  %v11580_v28 = vcombine.low %v4885_v16, %v4889_v41  ;;  %v4917_v30 = vld [vmem:[%s18778_s27 + $0x300] sm:$0xff] }
 0xeff   : > { %5644 = vmatpush1.bf16.msra.mxu1 %v11564_v14  ;;  %v11612_v46 = vcombine.low %v4917_v30, %v4921_v23  ;;  %v4929_v53 = vld [vmem:[%s18778_s27 + $0x360] sm:$0xff] }
 0xf00   : > { %5645 = vmatprep.subr.bf16.mxu1 %v11573_v58  ;;  %v4926_v58 = vld [vmem:[%s18778_s27 + $0x348] sm:$0xff]  ;;  %v4933_v41 = vld [vmem:[%s18778_s27 + $0x380] sm:$0xff] }
 0xf01   : > { %5675 = vmatpush1.bf16.msra.mxu0 %v11526_v3  ;;  %v4898_v3 = vld [vmem:[%s18778_s27 + $0x268] sm:$0xff] }
 0xf02   : > { %5676 = vmatprep.subr.bf16.mxu0 %v11535_v17  ;;  %v11582_v17 = vcombine.low %v4886_v26, %v4890_v40  ;;  %v11591_v52 = vcombine.high %v4894_v49, %v4898_v3  ;;  %v4937_v26 = vld [vmem:[%s18778_s27 + $0x3a0] sm:$0xff]  ;;  %v4934_v40 = vld [vmem:[%s18778_s27 + $0x388] sm:$0xff] }
 0xf03   : > { %5646 = vmatpush1.bf16.msra.mxu1 %v11572_v29  ;;  %v4938_v29 = vld [vmem:[%s18778_s27 + $0x3a8] sm:$0xff] }
 0xf04   : > { %5647 = vmatprep.subr.bf16.mxu1 %v11581_v57  ;;  %v11631_v50 = vcombine.high %v4934_v40, %v4938_v29 }
 0xf05   : > { %5677 = vmatpush1.bf16.msra.mxu0 %v11534_v0  ;;  %v4906_v0 = vld [vmem:[%s18778_s27 + $0x2a8] sm:$0xff] }
 0xf06   : > { %5678 = vmatprep.subr.bf16.mxu0 %v11543_v12  ;;  %v11590_v12 = vcombine.low %v4894_v49, %v4898_v3  ;;  %v11599_v4 = vcombine.high %v4902_v31, %v4906_v0  ;;  %v11598_v38 = vcombine.low %v4902_v31, %v4906_v0  ;;  %v4945_v49 = vld [vmem:[%s18778_s27 + $0x3e0] sm:$0xff]  ;;  %v4942_v3 = vld [vmem:[%s18778_s27 + $0x3c8] sm:$0xff]  ;;  %v4823_v0 = vld [vmem:[%s18778_s27 + $0x10] sm:$0xff] }
 0xf07   : > { %5648 = vmatpush1.bf16.msra.mxu1 %v11580_v28  ;;  %v4946_v28 = vld [vmem:[%s18778_s27 + $0x3e8] sm:$0xff]  ;;  %v11636_v7 = vcombine.low %v4941_v37, %v4945_v49 }
 0xf08   : > { %5649 = vmatprep.subr.bf16.mxu1 %v11589_v25  ;;  %v11630_v25 = vcombine.low %v4934_v40, %v4938_v29  ;;  %v11639_v56 = vcombine.high %v4942_v3, %v4946_v28  ;;  %v11638_v31 = vcombine.low %v4942_v3, %v4946_v28  ;;  %v4840_v40 = vld [vmem:[%s18778_s27 + $0x98] sm:$0xff] }
 0xf09   : > { %5679 = vmatpush1.bf16.msra.mxu0 %v11542_v63  ;;  %v4844_v29 = vld [vmem:[%s18778_s27 + $0xb8] sm:$0xff] }
 0xf0a   : > { %5680 = vmatprep.subr.bf16.mxu0 %v11551_v27  ;;  %v4848_v3 = vld [vmem:[%s18778_s27 + $0xd8] sm:$0xff] }
 0xf0b   : > { %5650 = vmatpush1.bf16.msra.mxu1 %v11588_v6  ;;  %v4827_v6 = vld [vmem:[%s18778_s27 + $0x30] sm:$0xff]  ;;  %v4852_v28 = vld [vmem:[%s18778_s27 + $0xf8] sm:$0xff] }
 0xf0c   : > { %5651 = vmatprep.subr.bf16.mxu1 %v11597_v60  ;;  %v11521_v60 = vcombine.high %v4823_v0, %v4827_v6 }
 0xf0d   : > { %5681 = vmatpush1.bf16.msra.mxu0 %v11550_v54  ;;  %v4910_v54 = vld [vmem:[%s18778_s27 + $0x2c8] sm:$0xff] }
 0xf0e   : > { %5682 = vmatprep.subr.bf16.mxu0 %v11559_v55  ;;  %v4914_v55 = vld [vmem:[%s18778_s27 + $0x2e8] sm:$0xff] }
 0xf0f   : > { %5652 = vmatpush1.bf16.msra.mxu1 %v11596_v2  ;;  %v11606_v34 = vcombine.low %v4910_v54, %v4914_v55  ;;  %v11607_v32 = vcombine.high %v4910_v54, %v4914_v55  ;;  %v11520_v2 = vcombine.low %v4823_v0, %v4827_v6  ;;  %v14039_v54 = vld [vmem:[%s18677_s9] sm:$0xf]  ;;  %v4856_v0 = vld [vmem:[%s18778_s27 + $0x118] sm:$0xff] }
 0xf10   : > { %5653 = vmatprep.subr.bf16.mxu1 %v11605_v59  ;;  %v4806_v59 = vrot.slane %v14039_v54, %v16094_v15  ;;  %v4802_v55 = vrot.slane %v14039_v54, %v15708_v62  ;;  %v4860_v6 = vld [vmem:[%s18778_s27 + $0x138] sm:$0xff]  ;;  %v4871_v54 = vld [vmem:[%s18778_s27 + $0x190] sm:$0xff] }
 0xf11   : > { %5683 = vmatpush1.bf16.msra.mxu0 %v11558_v18  ;;  %v4918_v18 = vld [vmem:[%s18778_s27 + $0x308] sm:$0xff] }
 0xf12   : > { %5684 = vmatprep.subr.bf16.mxu0 %v11567_v19  ;;  %v11613_v19 = vcombine.high %v4917_v30, %v4921_v23  ;;  %v11614_v9 = vcombine.low %v4918_v18, %v4922_v45  ;;  %v11615_v14 = vcombine.high %v4918_v18, %v4922_v45  ;;  %v4816_v23 = vrot.slane %v4806_v59, %v15708_v62  ;;  %v4875_v59 = vld [vmem:[%s18778_s27 + $0x1b0] sm:$0xff] }
 0xf13   : > { %5654 = vmatpush1.bf16.msra.mxu1 %v11604_v22 }
 0xf14   : > { %5655 = vmatprep.subr.bf16.mxu1 %v11613_v19 }
 0xf15   : > { %5685 = vmatpush1.bf16.msra.mxu0 %v11566_v21  ;;  %v11621_v21 = vcombine.high %v4925_v24, %v4929_v53 }
 0xf16   : > { %5686 = vmatprep.subr.bf16.mxu0 %v11575_v48  ;;  %v4930_v48 = vld [vmem:[%s18778_s27 + $0x368] sm:$0xff] }
 0xf17   : > { %v11623_v16 = vcombine.high %v4926_v58, %v4930_v48  ;;  %5656 = vmatpush1.bf16.msra.mxu1 %v11612_v46  ;;  %v11622_v57 = vcombine.low %v4926_v58, %v4930_v48  ;;  %v4812_v46 = vrot.slane %v4802_v55, %v15708_v62  ;;  %v4839_v48 = vld [vmem:[%s18778_s27 + $0x90] sm:$0xff]  ;;  %v4872_v55 = vld [vmem:[%s18778_s27 + $0x198] sm:$0xff] }
 0xf18   : > { %5657 = vmatprep.subr.bf16.mxu1 %v11621_v21 }
 0xf19   : > { %5687 = vmatpush1.bf16.msra.mxu0 %v11574_v42  ;;  %v11620_v42 = vcombine.low %v4925_v24, %v4929_v53 }
 0xf1a   : > { %5688 = vmatprep.subr.bf16.mxu0 %v11583_v39  ;;  %v11629_v39 = vcombine.high %v4933_v41, %v4937_v26 }
 0xf1b   : > { %5658 = vmatpush1.bf16.msra.mxu1 %v11620_v42 }
 0xf1c   : > { %5659 = vmatprep.subr.bf16.mxu1 %v11629_v39 }
 0xf1d   : > { %5689 = vmatpush1.bf16.msra.mxu0 %v11582_v17  ;;  %v11628_v17 = vcombine.low %v4933_v41, %v4937_v26  ;;  %v4843_v26 = vld [vmem:[%s18778_s27 + $0xb0] sm:$0xff] }
 0xf1e   : > { %5690 = vmatprep.subr.bf16.mxu0 %v11591_v52  ;;  %v11637_v52 = vcombine.high %v4941_v37, %v4945_v49  ;;  %v11537_v39 = vcombine.high %v4839_v48, %v4843_v26  ;;  %v4847_v37 = vld [vmem:[%s18778_s27 + $0xd0] sm:$0xff] }
 0xf1f   : > { %5660 = vmatpush1.bf16.msra.mxu1 %v11628_v17  ;;  %v4851_v49 = vld [vmem:[%s18778_s27 + $0xf0] sm:$0xff]  ;;  %v11536_v17 = vcombine.low %v4839_v48, %v4843_v26  ;;  %v4892_v48 = vld [vmem:[%s18778_s27 + $0x238] sm:$0xff] }
 0xf20   : > { %5661 = vmatprep.subr.bf16.mxu1 %v11637_v52  ;;  %v11545_v52 = vcombine.high %v4847_v37, %v4851_v49 }
 0xf21   : > { %5691 = vmatpush1.bf16.msra.mxu0 %v11590_v12  ;;  %v4824_v12 = vld [vmem:[%s18778_s27 + $0x18] sm:$0xff] }
 0xf22   : > { %5692 = vmatprep.subr.bf16.mxu0 %v11599_v4  ;;  %v4828_v4 = vld [vmem:[%s18778_s27 + $0x38] sm:$0xff] }
 0xf23   : > { %5662 = vmatpush1.bf16.msra.mxu1 %v11636_v7  ;;  %v4855_v7 = vld [vmem:[%s18778_s27 + $0x110] sm:$0xff] }
 0xf24   : > { %5713 = vmatprep.subr.bf16.mxu1 %v11521_v60  ;;  %v11546_v60 = vcombine.low %v4848_v3, %v4852_v28 }
 0xf25   : > { %5693 = vmatpush1.bf16.msra.mxu0 %v11598_v38  ;;  %v11522_v38 = vcombine.low %v4824_v12, %v4828_v4 }
 0xf26   : > { %5694 = vmatprep.subr.bf16.mxu0 %v11607_v32 }
 0xf29   : > { %5695 = vmatpush1.bf16.msra.mxu0 %v11606_v34 }
 0xf2a   : > { %5696 = vmatprep.subr.bf16.mxu0 %v11615_v14  ;;  %v4835_v14 = vld [vmem:[%s18778_s27 + $0x70] sm:$0xff] }
 0xf2d   : > { %5697 = vmatpush1.bf16.msra.mxu0 %v11614_v9  ;;  %v4831_v9 = vld [vmem:[%s18778_s27 + $0x50] sm:$0xff] }
 0xf2e   : > { %5698 = vmatprep.subr.bf16.mxu0 %v11623_v16  ;;  %v11529_v16 = vcombine.high %v4831_v9, %v4835_v14  ;;  %v11528_v42 = vcombine.low %v4831_v9, %v4835_v14 }
 0xf31   : > { %5699 = vmatpush1.bf16.msra.mxu0 %v11622_v57 }
 0xf32   : > { %5700 = vmatprep.subr.bf16.mxu0 %v11631_v50  ;;  %v11539_v50 = vcombine.high %v4840_v40, %v4844_v29 }
 0xf35   : > { %5701 = vmatpush1.bf16.msra.mxu0 %v11630_v25  ;;  %v11538_v25 = vcombine.low %v4840_v40, %v4844_v29  ;;  %v4895_v29 = vld [vmem:[%s18778_s27 + $0x250] sm:$0xff] }
 0xf36   : > { %5702 = vmatprep.subr.bf16.mxu0 %v11639_v56  ;;  %v11547_v56 = vcombine.high %v4848_v3, %v4852_v28  ;;  %v4903_v28 = vld [vmem:[%s18778_s27 + $0x290] sm:$0xff] }
 0xf39   : > { %5703 = vmatpush1.bf16.msra.mxu0 %v11638_v31  ;;  %v4859_v31 = vld [vmem:[%s18778_s27 + $0x130] sm:$0xff] }
 0xf8a   : > { %v4765_v36 = vpop.xlane.xlu0 %4764 }
 0xf8b   : > { %v4766_v63 = vmul.f32 0.00390625, %v4765_v36  ;;  %v11523_v36 = vcombine.high %v4824_v12, %v4828_v4  ;;  %v11544_v12 = vcombine.low %v4847_v37, %v4851_v49  ;;  %v11553_v4 = vcombine.high %v4855_v7, %v4859_v31 }
 0xf8d   : > { %v16480_v8 = vsub.f32 %v16340_v43, %v4766_v63  ;;  %v16483_v27 = vsub.f32 %v16343_v5, %v4766_v63  ;;  %5754 = vmatprep.subr.bf16.mxu0 %v11523_v36  ;;  %v4867_v36 = vld [vmem:[%s18778_s27 + $0x170] sm:$0xff] }
 0xf8f   : > { %v4769_v1 = vmul.f32 %v16480_v8, %v16480_v8  ;;  %v4770_v47 = vmul.f32 %v16483_v27, %v16483_v27 }
 0xf91   : > { %v4771_v33 = vadd.f32 %v4770_v47, %v4769_v1 }
 0xf93   : > { %4772 = vadd.xlane.f32.xlu1 %v4771_v33  ;;  %v14038_v33 = vld [vmem:[%s18676_s8] sm:$0xf] }
 0xf94   : > { %v4786_v51 = vrot.slane %v14038_v33, %v16094_v15  ;;  %v4782_v35 = vrot.slane %v14038_v33, %v15708_v62  ;;  %v11554_v33 = vcombine.low %v4856_v0, %v4860_v6 }
 0xf96   : > { %v4796_v22 = vrot.slane %v4786_v51, %v15708_v62  ;;  %v4792_v34 = vrot.slane %v4782_v35, %v15708_v62 }
0x1020   : > { %v4773_v63 = vpop.xlane.xlu1 %4772 }
0x1021   : > { %v4774_v1 = vmul.f32 0.00390625, %v4773_v63  ;;  %v4864_v63 = vld [vmem:[%s18778_s27 + $0x158] sm:$0xff] }
0x1023   : > { %v4775_v47 = vadd.f32 1e-05, %v4774_v1  ;;  %v4868_v1 = vld [vmem:[%s18778_s27 + $0x178] sm:$0xff] }
0x1024   : > { %v11563_v35 = vcombine.high %v4864_v63, %v4868_v1 }
0x1025   : > { %14000 = vrsqrt.f32 %v4775_v47  ;;  %v11552_v47 = vcombine.low %v4855_v7, %v4859_v31 }
0x102f   : > { %v14001_v32 = vpop.eup %14000 }
0x1030   : > { %v4778_v30 = vmul.f32 %v14001_v32, %v16483_v27  ;;  %v4777_v18 = vmul.f32 %v14001_v32, %v16480_v8  ;;  %v4832_v27 = vld [vmem:[%s18778_s27 + $0x58] sm:$0xff]  ;;  %v11562_v32 = vcombine.low %v4864_v63, %v4868_v1  ;;  %v4919_v1 = vld [vmem:[%s18778_s27 + $0x310] sm:$0xff] }
0x1031   : > { %v4836_v8 = vld [vmem:[%s18778_s27 + $0x78] sm:$0xff] }
0x1032   : > { %v4798_v19 = vmul.f32 %v4796_v22, %v4778_v30  ;;  %v4797_v45 = vmul.f32 %v4792_v34, %v4777_v18  ;;  %v11531_v41 = vcombine.high %v4832_v27, %v4836_v8  ;;  %v11530_v57 = vcombine.low %v4832_v27, %v4836_v8  ;;  %v4876_v22 = vld [vmem:[%s18778_s27 + $0x1b8] sm:$0xff]  ;;  %v4879_v18 = vld [vmem:[%s18778_s27 + $0x1d0] sm:$0xff] }
0x1033   : > { %v11569_v30 = vcombine.high %v4871_v54, %v4875_v59  ;;  %v4887_v27 = vld [vmem:[%s18778_s27 + $0x210] sm:$0xff] }
0x1034   : > { %v4818_v24 = vadd.f32 %v4816_v23, %v4798_v19  ;;  %v4817_v53 = vadd.f32 %v4812_v46, %v4797_v45  ;;  %v11571_v23 = vcombine.high %v4872_v55, %v4876_v22  ;;  %v4883_v46 = vld [vmem:[%s18778_s27 + $0x1f0] sm:$0xff]  ;;  %v4880_v19 = vld [vmem:[%s18778_s27 + $0x1d8] sm:$0xff] }
0x1035   : > { %v4884_v45 = vld [vmem:[%s18778_s27 + $0x1f8] sm:$0xff]  ;;  %v11577_v9 = vcombine.high %v4879_v18, %v4883_v46  ;;  %v4891_v8 = vld [vmem:[%s18778_s27 + $0x230] sm:$0xff] }
0x1036   : > { %v4820_v21 = vpack.c.bf16 %v4818_v24, %v4818_v24  ;;  %v16589_v58 = vpack.c.bf16 %v4817_v53, %v4817_v53  ;;  %v11568_v24 = vcombine.low %v4871_v54, %v4875_v59  ;;  %v11570_v53 = vcombine.low %v4872_v55, %v4876_v22  ;;  %v4927_v22 = vld [vmem:[%s18778_s27 + $0x350] sm:$0xff] }
0x1037   : > { %v11579_v14 = vcombine.high %v4880_v19, %v4884_v45  ;;  %v11585_v26 = vcombine.high %v4887_v27, %v4891_v8 }
0x1038   : > { %5663 = vmatprep.mubr.bf16.mxu1 %v4820_v21  ;;  %5704 = vmatprep.mubr.bf16.mxu0 %v4820_v21 }
0x1039   : > { %5664 = vmatmul.mubr.bf16.vlgmr.msra.gmra.mrb[52].mxu1 %v16589_v58  ;;  %5705 = vmatmul.mubr.bf16.vlgmr.msra.gmra.mrb[40].mxu0 %v16589_v58 }
0x103a   : > { %5714 = vmatpush1.bf16.msra.mxu1 %v11520_v2  ;;  %5755 = vmatpush1.bf16.msra.mxu0 %v11522_v38  ;;  %v11555_v2 = vcombine.high %v4856_v0, %v4860_v6  ;;  %v4863_v38 = vld [vmem:[%s18778_s27 + $0x150] sm:$0xff] }
0x103b   : > { %5745 = vmatprep.mubr.bf16.mxu1 %v4820_v21  ;;  %5786 = vmatprep.mubr.bf16.mxu0 %v4820_v21  ;;  %v11561_v51 = vcombine.high %v4863_v38, %v4867_v36  ;;  %v11560_v34 = vcombine.low %v4863_v38, %v4867_v36  ;;  %v4888_v21 = vld [vmem:[%s18778_s27 + $0x218] sm:$0xff]  ;;  %v4911_v6 = vld [vmem:[%s18778_s27 + $0x2d0] sm:$0xff] }
0x103c   : > { %5715 = vmatprep.subr.bf16.mxu1 %v11529_v16  ;;  %5756 = vmatprep.subr.bf16.mxu0 %v11531_v41  ;;  %v11576_v16 = vcombine.low %v4879_v18, %v4883_v46  ;;  %v11578_v41 = vcombine.low %v4880_v19, %v4884_v45  ;;  %v11587_v40 = vcombine.high %v4888_v21, %v4892_v48  ;;  %v4935_v45 = vld [vmem:[%s18778_s27 + $0x390] sm:$0xff] }
0x103d   : > { %v11586_v37 = vcombine.low %v4888_v21, %v4892_v48  ;;  %v4943_v48 = vld [vmem:[%s18778_s27 + $0x3d0] sm:$0xff] }
0x103e   : > { %5716 = vmatpush1.bf16.msra.mxu1 %v11528_v42  ;;  %5757 = vmatpush1.bf16.msra.mxu0 %v11530_v57  ;;  %v4899_v42 = vld [vmem:[%s18778_s27 + $0x270] sm:$0xff]  ;;  %v4896_v57 = vld [vmem:[%s18778_s27 + $0x258] sm:$0xff] }
0x103f   : > { %5717 = vmatprep.subr.bf16.mxu1 %v11537_v39  ;;  %5758 = vmatprep.subr.bf16.mxu0 %v11539_v50  ;;  %v4900_v39 = vld [vmem:[%s18778_s27 + $0x278] sm:$0xff]  ;;  %v11584_v50 = vcombine.low %v4887_v27, %v4891_v8  ;;  %v11593_v49 = vcombine.high %v4895_v29, %v4899_v42 }
0x1040   : > { %v11595_v3 = vcombine.high %v4896_v57, %v4900_v39  ;;  %v11594_v7 = vcombine.low %v4896_v57, %v4900_v39 }
0x1042   : > { %5718 = vmatpush1.bf16.msra.mxu1 %v11536_v17  ;;  %5759 = vmatpush1.bf16.msra.mxu0 %v11538_v25  ;;  %v4907_v17 = vld [vmem:[%s18778_s27 + $0x2b0] sm:$0xff]  ;;  %v4904_v25 = vld [vmem:[%s18778_s27 + $0x298] sm:$0xff] }
0x1043   : > { %5719 = vmatprep.subr.bf16.mxu1 %v11545_v52  ;;  %5760 = vmatprep.subr.bf16.mxu0 %v11547_v56  ;;  %v4908_v52 = vld [vmem:[%s18778_s27 + $0x2b8] sm:$0xff]  ;;  %v11592_v56 = vcombine.low %v4895_v29, %v4899_v42  ;;  %v11601_v31 = vcombine.high %v4903_v28, %v4907_v17 }
0x1044   : > { %v11603_v0 = vcombine.high %v4904_v25, %v4908_v52  ;;  %v11602_v38 = vcombine.low %v4904_v25, %v4908_v52  ;;  %v13385_v25 = vld [vmem:[%s18780_s4 + $0x114] ss:$8 sps:$4 sm:$0xff]   ;;  %v13380_v52 = vld [vmem:[%s18780_s4 + $0x10] ss:$8 sps:$4 sm:$0xff]  }
0x1046   : > { %5720 = vmatpush1.bf16.msra.mxu1 %v11544_v12  ;;  %5761 = vmatpush1.bf16.msra.mxu0 %v11546_v60  ;;  %v4915_v12 = vld [vmem:[%s18778_s27 + $0x2f0] sm:$0xff]  ;;  %v4912_v60 = vld [vmem:[%s18778_s27 + $0x2d8] sm:$0xff] }
0x1047   : > { %5721 = vmatprep.subr.bf16.mxu1 %v11553_v4  ;;  %5762 = vmatprep.subr.bf16.mxu0 %v11555_v2  ;;  %v4916_v4 = vld [vmem:[%s18778_s27 + $0x2f8] sm:$0xff]  ;;  %v11600_v2 = vcombine.low %v4903_v28, %v4907_v17  ;;  %v11609_v36 = vcombine.high %v4911_v6, %v4915_v12  ;;  %v13377_v28 = vld [vmem:[%s18780_s4 + $0x100] ss:$8 sps:$4 sm:$0xff]  }
0x1048   : > { %v11611_v63 = vcombine.high %v4912_v60, %v4916_v4  ;;  %v11610_v54 = vcombine.low %v4912_v60, %v4916_v4  ;;  %v13382_v17 = vld [vmem:[%s18780_s4 + $0x14] ss:$8 sps:$4 sm:$0xff]   ;;  %v13392_v60 = vld [vmem:[%s18780_s4 + $0x30] ss:$8 sps:$4 sm:$0xff]  }
0x1049   : > { %v13395_v4 = vld [vmem:[%s18780_s4 + $0x130] ss:$8 sps:$4 sm:$0xff]  }
0x104a   : > { %5722 = vmatpush1.bf16.msra.mxu1 %v11552_v47  ;;  %5763 = vmatpush1.bf16.msra.mxu0 %v11554_v33  ;;  %v4923_v47 = vld [vmem:[%s18778_s27 + $0x330] sm:$0xff]  ;;  %v4920_v33 = vld [vmem:[%s18778_s27 + $0x318] sm:$0xff] }
0x104b   : > { %5723 = vmatprep.subr.bf16.mxu1 %v11561_v51  ;;  %5764 = vmatprep.subr.bf16.mxu0 %v11563_v35  ;;  %v4924_v51 = vld [vmem:[%s18778_s27 + $0x338] sm:$0xff]  ;;  %v11608_v35 = vcombine.low %v4911_v6, %v4915_v12  ;;  %v11617_v59 = vcombine.high %v4919_v1, %v4923_v47 }
0x104c   : > { %v11619_v55 = vcombine.high %v4920_v33, %v4924_v51  ;;  %v11618_v18 = vcombine.low %v4920_v33, %v4924_v51  ;;  %v13394_v6 = vld [vmem:[%s18780_s4 + $0x34] ss:$8 sps:$4 sm:$0xff]   ;;  %v13404_v33 = vld [vmem:[%s18780_s4 + $0x50] ss:$8 sps:$4 sm:$0xff]  }
0x104d   : > { %v13397_v12 = vld [vmem:[%s18780_s4 + $0x134] ss:$8 sps:$4 sm:$0xff]   ;;  %v13407_v51 = vld [vmem:[%s18780_s4 + $0x150] ss:$8 sps:$4 sm:$0xff]  }
0x104e   : > { %5724 = vmatpush1.bf16.msra.mxu1 %v11560_v34  ;;  %5765 = vmatpush1.bf16.msra.mxu0 %v11562_v32  ;;  %v4931_v34 = vld [vmem:[%s18778_s27 + $0x370] sm:$0xff]  ;;  %v4928_v32 = vld [vmem:[%s18778_s27 + $0x358] sm:$0xff] }
0x104f   : > { %5725 = vmatprep.subr.bf16.mxu1 %v11569_v30  ;;  %5766 = vmatprep.subr.bf16.mxu0 %v11571_v23  ;;  %v4932_v30 = vld [vmem:[%s18778_s27 + $0x378] sm:$0xff]  ;;  %v11616_v23 = vcombine.low %v4919_v1, %v4923_v47  ;;  %v11625_v46 = vcombine.high %v4927_v22, %v4931_v34 }
0x1050   : > { %v11627_v19 = vcombine.high %v4928_v32, %v4932_v30  ;;  %v11626_v27 = vcombine.low %v4928_v32, %v4932_v30  ;;  %v13406_v1 = vld [vmem:[%s18780_s4 + $0x54] ss:$8 sps:$4 sm:$0xff]   ;;  %v13416_v32 = vld [vmem:[%s18780_s4 + $0x70] ss:$8 sps:$4 sm:$0xff]  }
0x1051   : > { %v13409_v47 = vld [vmem:[%s18780_s4 + $0x154] ss:$8 sps:$4 sm:$0xff]   ;;  %v13419_v30 = vld [vmem:[%s18780_s4 + $0x170] ss:$8 sps:$4 sm:$0xff]  }
0x1052   : > { %5726 = vmatpush1.bf16.msra.mxu1 %v11568_v24  ;;  %5767 = vmatpush1.bf16.msra.mxu0 %v11570_v53  ;;  %v4939_v24 = vld [vmem:[%s18778_s27 + $0x3b0] sm:$0xff]  ;;  %v4936_v53 = vld [vmem:[%s18778_s27 + $0x398] sm:$0xff] }
0x1053   : > { %5727 = vmatprep.subr.bf16.mxu1 %v11577_v9  ;;  %5768 = vmatprep.subr.bf16.mxu0 %v11579_v14  ;;  %v4940_v9 = vld [vmem:[%s18778_s27 + $0x3b8] sm:$0xff]  ;;  %v11624_v14 = vcombine.low %v4927_v22, %v4931_v34  ;;  %v11633_v8 = vcombine.high %v4935_v45, %v4939_v24 }
0x1054   : > { %v11635_v21 = vcombine.high %v4936_v53, %v4940_v9  ;;  %v11634_v29 = vcombine.low %v4936_v53, %v4940_v9  ;;  %v13418_v22 = vld [vmem:[%s18780_s4 + $0x74] ss:$8 sps:$4 sm:$0xff]   ;;  %v13428_v53 = vld [vmem:[%s18780_s4 + $0x90] ss:$8 sps:$4 sm:$0xff]  }
0x1055   : > { %v13421_v34 = vld [vmem:[%s18780_s4 + $0x174] ss:$8 sps:$4 sm:$0xff]   ;;  %v13431_v9 = vld [vmem:[%s18780_s4 + $0x190] ss:$8 sps:$4 sm:$0xff]  }
0x1056   : > { %5728 = vmatpush1.bf16.msra.mxu1 %v11576_v16  ;;  %5769 = vmatpush1.bf16.msra.mxu0 %v11578_v41  ;;  %v4947_v16 = vld [vmem:[%s18778_s27 + $0x3f0] sm:$0xff]  ;;  %v4944_v41 = vld [vmem:[%s18778_s27 + $0x3d8] sm:$0xff] }
0x1057   : > { %5729 = vmatprep.subr.bf16.mxu1 %v11585_v26  ;;  %5770 = vmatprep.subr.bf16.mxu0 %v11587_v40  ;;  %v4948_v26 = vld [vmem:[%s18778_s27 + $0x3f8] sm:$0xff]  ;;  %v11632_v40 = vcombine.low %v4935_v45, %v4939_v24  ;;  %v11641_v42 = vcombine.high %v4943_v48, %v4947_v16  ;;  %v11640_v39 = vcombine.low %v4943_v48, %v4947_v16 }
0x1058   : > { %v11643_v57 = vcombine.high %v4944_v41, %v4948_v26  ;;  %v13430_v45 = vld [vmem:[%s18780_s4 + $0x94] ss:$8 sps:$4 sm:$0xff]  }
0x1059   : > { %v13433_v24 = vld [vmem:[%s18780_s4 + $0x194] ss:$8 sps:$4 sm:$0xff]  }
0x105a   : > { %5730 = vmatpush1.bf16.msra.mxu1 %v11584_v50  ;;  %5771 = vmatpush1.bf16.msra.mxu0 %v11586_v37  ;;  %v11642_v50 = vcombine.low %v4944_v41, %v4948_v26  ;;  %v13376_v37 = vld [vmem:[%s18779_s22 + $0x4] ss:$8 sps:$4 sm:$0xff]   ;;  %v13442_v48 = vld [vmem:[%s18780_s4 + $0xb4] ss:$8 sps:$4 sm:$0xff]   ;;  %v13440_v41 = vld [vmem:[%s18780_s4 + $0xb0] ss:$8 sps:$4 sm:$0xff]  }
0x105b   : > { %5731 = vmatprep.subr.bf16.mxu1 %v11593_v49  ;;  %5772 = vmatprep.subr.bf16.mxu0 %v11595_v3  ;;  %v13379_v49 = vld [vmem:[%s18780_s4 + $0x104] ss:$8 sps:$4 sm:$0xff]   ;;  %v13374_v3 = vld [vmem:[%s18780_s4] ss:$8 sps:$4 sm:$0xff]   ;;  %v13445_v16 = vld [vmem:[%s18780_s4 + $0x1b4] ss:$8 sps:$4 sm:$0xff]  }
0x105c   : > { %v13443_v26 = vld [vmem:[%s18780_s4 + $0x1b0] ss:$8 sps:$4 sm:$0xff]   ;;  %s18785_s22 = sld [smem:[#allocation40_spill]] }
0x105e   : > { %5732 = vmatpush1.bf16.msra.mxu1 %v11592_v56  ;;  %5773 = vmatpush1.bf16.msra.mxu0 %v11594_v7  ;;  %v13383_v56 = vld [vmem:[%s18780_s4 + $0x110] ss:$8 sps:$4 sm:$0xff]   ;;  %v13388_v7 = vld [vmem:[%s18780_s4 + $0x24] ss:$8 sps:$4 sm:$0xff]  }
0x105f   : > { %5733 = vmatprep.subr.bf16.mxu1 %v11601_v31  ;;  %5774 = vmatprep.subr.bf16.mxu0 %v11603_v0  ;;  %v13386_v31 = vld [vmem:[%s18780_s4 + $0x20] ss:$8 sps:$4 sm:$0xff]  }
0x1060   : > { %v13389_v0 = vld [vmem:[%s18780_s4 + $0x120] ss:$8 sps:$4 sm:$0xff]  }
0x1062   : > { %5734 = vmatpush1.bf16.msra.mxu1 %v11600_v2  ;;  %5775 = vmatpush1.bf16.msra.mxu0 %v11602_v38  ;;  %v13400_v2 = vld [vmem:[%s18780_s4 + $0x44] ss:$8 sps:$4 sm:$0xff]   ;;  %s18786_s14 = smov %s18785_s22 }
0x1063   : > { %5735 = vmatprep.subr.bf16.mxu1 %v11609_v36  ;;  %5776 = vmatprep.subr.bf16.mxu0 %v11611_v63  ;;  %v13403_v38 = vld [vmem:[%s18780_s4 + $0x144] ss:$8 sps:$4 sm:$0xff]   ;;  %v13398_v36 = vld [vmem:[%s18780_s4 + $0x40] ss:$8 sps:$4 sm:$0xff]  }
0x1064   : > { %v13401_v63 = vld [vmem:[%s18780_s4 + $0x140] ss:$8 sps:$4 sm:$0xff]  }
0x1066   : > { %5736 = vmatpush1.bf16.msra.mxu1 %v11608_v35  ;;  %5777 = vmatpush1.bf16.msra.mxu0 %v11610_v54  ;;  %v13412_v35 = vld [vmem:[%s18780_s4 + $0x64] ss:$8 sps:$4 sm:$0xff]  }
0x1067   : > { %5737 = vmatprep.subr.bf16.mxu1 %v11617_v59  ;;  %5778 = vmatprep.subr.bf16.mxu0 %v11619_v55  ;;  %v13415_v54 = vld [vmem:[%s18780_s4 + $0x164] ss:$8 sps:$4 sm:$0xff]   ;;  %v13410_v59 = vld [vmem:[%s18780_s4 + $0x60] ss:$8 sps:$4 sm:$0xff]  }
0x1068   : > { %v13413_v55 = vld [vmem:[%s18780_s4 + $0x160] ss:$8 sps:$4 sm:$0xff]  }
0x106a   : > { %5738 = vmatpush1.bf16.msra.mxu1 %v11616_v23  ;;  %5779 = vmatpush1.bf16.msra.mxu0 %v11618_v18  ;;  %v13424_v23 = vld [vmem:[%s18780_s4 + $0x84] ss:$8 sps:$4 sm:$0xff]  }
0x106b   : > { %5739 = vmatprep.subr.bf16.mxu1 %v11625_v46  ;;  %5780 = vmatprep.subr.bf16.mxu0 %v11627_v19  ;;  %v13427_v18 = vld [vmem:[%s18780_s4 + $0x184] ss:$8 sps:$4 sm:$0xff]   ;;  %v13422_v46 = vld [vmem:[%s18780_s4 + $0x80] ss:$8 sps:$4 sm:$0xff]  }
0x106c   : > { %v13425_v19 = vld [vmem:[%s18780_s4 + $0x180] ss:$8 sps:$4 sm:$0xff]  }
0x106e   : > { %5740 = vmatpush1.bf16.msra.mxu1 %v11624_v14  ;;  %5781 = vmatpush1.bf16.msra.mxu0 %v11626_v27  ;;  %v13436_v14 = vld [vmem:[%s18780_s4 + $0xa4] ss:$8 sps:$4 sm:$0xff]  }
0x106f   : > { %5741 = vmatprep.subr.bf16.mxu1 %v11633_v8  ;;  %5782 = vmatprep.subr.bf16.mxu0 %v11635_v21  ;;  %v13439_v27 = vld [vmem:[%s18780_s4 + $0x1a4] ss:$8 sps:$4 sm:$0xff]   ;;  %v13434_v8 = vld [vmem:[%s18780_s4 + $0xa0] ss:$8 sps:$4 sm:$0xff]  }
0x1070   : > { %v13437_v21 = vld [vmem:[%s18780_s4 + $0x1a0] ss:$8 sps:$4 sm:$0xff]  }
0x1072   : > { %5742 = vmatpush1.bf16.msra.mxu1 %v11632_v40  ;;  %5783 = vmatpush1.bf16.msra.mxu0 %v11634_v29  ;;  %v13448_v40 = vld [vmem:[%s18780_s4 + $0xc4] ss:$8 sps:$4 sm:$0xff]  }
0x1073   : > { %5743 = vmatprep.subr.bf16.mxu1 %v11641_v42  ;;  %5784 = vmatprep.subr.bf16.mxu0 %v11643_v57  ;;  %v13451_v29 = vld [vmem:[%s18780_s4 + $0x1c4] ss:$8 sps:$4 sm:$0xff]   ;;  %v13446_v42 = vld [vmem:[%s18780_s4 + $0xc0] ss:$8 sps:$4 sm:$0xff]  }
0x1074   : > { %v13449_v57 = vld [vmem:[%s18780_s4 + $0x1c0] ss:$8 sps:$4 sm:$0xff]  }
0x1076   : > { %5744 = vmatpush1.bf16.msra.mxu1 %v11640_v39  ;;  %5785 = vmatpush1.bf16.msra.mxu0 %v11642_v50  ;;  %v13454_v39 = vld [vmem:[%s18780_s4 + $0xd4] ss:$8 sps:$4 sm:$0xff]  }
0x1077   : > { %6591 = vmatprep.subr.bf16.mxu1 %v13376_v37  ;;  %6632 = vmatprep.subr.bf16.mxu0 %v13379_v49  ;;  %v13457_v50 = vld [vmem:[%s18780_s4 + $0x1d4] ss:$8 sps:$4 sm:$0xff]   ;;  %v13452_v37 = vld [vmem:[%s18780_s4 + $0xd0] ss:$8 sps:$4 sm:$0xff]  }
0x1078   : > { %v13455_v49 = vld [vmem:[%s18780_s4 + $0x1d0] ss:$8 sps:$4 sm:$0xff]  }
0x1079   : > { %5746 = vmatmul.mubr.bf16.vlgmr.msra.gmra.mrb[56].mxu1 %v16589_v58  ;;  %5787 = vmatmul.mubr.bf16.vlgmr.msra.gmra.mrb[44].mxu0 %v16589_v58  ;;  %v13391_v58 = vld [vmem:[%s18780_s4 + $0x124] ss:$8 sps:$4 sm:$0xff]  }
0x107a   : > { %6592 = vmatpush1.bf16.msra.mxu1 %v13374_v3  ;;  %6633 = vmatpush1.bf16.msra.mxu0 %v13377_v28  ;;  %v13460_v3 = vld [vmem:[%s18780_s4 + $0xe4] ss:$8 sps:$4 sm:$0xff]  }
0x107b   : > { %6593 = vmatprep.subr.bf16.mxu1 %v13382_v17  ;;  %6634 = vmatprep.subr.bf16.mxu0 %v13385_v25  ;;  %v13463_v28 = vld [vmem:[%s18780_s4 + $0x1e4] ss:$8 sps:$4 sm:$0xff]   ;;  %v13458_v17 = vld [vmem:[%s18780_s4 + $0xe0] ss:$8 sps:$4 sm:$0xff]  }
0x107c   : > { %v13461_v25 = vld [vmem:[%s18780_s4 + $0x1e0] ss:$8 sps:$4 sm:$0xff]  }
0x107e   : > { %6594 = vmatpush1.bf16.msra.mxu1 %v13380_v52  ;;  %6635 = vmatpush1.bf16.msra.mxu0 %v13383_v56  ;;  %v13466_v52 = vld [vmem:[%s18780_s4 + $0xf4] ss:$8 sps:$4 sm:$0xff]  }
0x107f   : > { %6595 = vmatprep.subr.bf16.mxu1 %v13388_v7  ;;  %6636 = vmatprep.subr.bf16.mxu0 %v13391_v58  ;;  %v13469_v56 = vld [vmem:[%s18780_s4 + $0x1f4] ss:$8 sps:$4 sm:$0xff]   ;;  %v13464_v7 = vld [vmem:[%s18780_s4 + $0xf0] ss:$8 sps:$4 sm:$0xff]  }
0x1080   : > { %v13467_v58 = vld [vmem:[%s18780_s4 + $0x1f0] ss:$8 sps:$4 sm:$0xff]  }
0x1082   : > { %6596 = vmatpush1.bf16.msra.mxu1 %v13386_v31  ;;  %6637 = vmatpush1.bf16.msra.mxu0 %v13389_v0  ;;  %v13472_v31 = vld [vmem:[%s18780_s4 + $0x204] ss:$8 sps:$4 sm:$0xff]  }
0x1083   : > { %6597 = vmatprep.subr.bf16.mxu1 %v13394_v6  ;;  %6638 = vmatprep.subr.bf16.mxu0 %v13397_v12  ;;  %v13475_v0 = vld [vmem:[%s18780_s4 + $0x304] ss:$8 sps:$4 sm:$0xff]  }
0x1084   : > { %v16964_v6 = vld [vmem:[%s18781_s29] sm:$0xff] }
0x1085   : > { %v4954_v12 = vrot.slane %v16964_v6, %v15702_v13 }
0x1086   : > { %6598 = vmatpush1.bf16.msra.mxu1 %v13392_v60  ;;  %6639 = vmatpush1.bf16.msra.mxu0 %v13395_v4  ;;  %v4962_v60 = vrot.slane %v16964_v6, %v15940_v10  ;;  %v4958_v4 = vrot.slane %v16964_v6, %v15708_v62 }
0x1087   : > { %6599 = vmatprep.subr.bf16.mxu1 %v13400_v2  ;;  %6640 = vmatprep.subr.bf16.mxu0 %v13403_v38  ;;  %v4966_v2 = vrot.slane %v16964_v6, %v16094_v15 }
0x108a   : > { %6600 = vmatpush1.bf16.msra.mxu1 %v13398_v36  ;;  %6641 = vmatpush1.bf16.msra.mxu0 %v13401_v63 }
0x108b   : > { %6601 = vmatprep.subr.bf16.mxu1 %v13406_v1  ;;  %6642 = vmatprep.subr.bf16.mxu0 %v13409_v47 }
0x108e   : > { %6602 = vmatpush1.bf16.msra.mxu1 %v13404_v33  ;;  %6643 = vmatpush1.bf16.msra.mxu0 %v13407_v51 }
0x108f   : > { %6603 = vmatprep.subr.bf16.mxu1 %v13412_v35  ;;  %6644 = vmatprep.subr.bf16.mxu0 %v13415_v54 }
0x1092   : > { %6604 = vmatpush1.bf16.msra.mxu1 %v13410_v59  ;;  %6645 = vmatpush1.bf16.msra.mxu0 %v13413_v55 }
0x1093   : > { %6605 = vmatprep.subr.bf16.mxu1 %v13418_v22  ;;  %6646 = vmatprep.subr.bf16.mxu0 %v13421_v34 }
0x1096   : > { %6606 = vmatpush1.bf16.msra.mxu1 %v13416_v32  ;;  %6647 = vmatpush1.bf16.msra.mxu0 %v13419_v30 }
0x1097   : > { %6607 = vmatprep.subr.bf16.mxu1 %v13424_v23  ;;  %6648 = vmatprep.subr.bf16.mxu0 %v13427_v18 }
0x109a   : > { %6608 = vmatpush1.bf16.msra.mxu1 %v13422_v46  ;;  %6649 = vmatpush1.bf16.msra.mxu0 %v13425_v19  ;;  %v13470_v19 = vld [vmem:[%s18780_s4 + $0x200] ss:$8 sps:$4 sm:$0xff]  }
0x109b   : > { %6609 = vmatprep.subr.bf16.mxu1 %v13430_v45  ;;  %6650 = vmatprep.subr.bf16.mxu0 %v13433_v24  ;;  %v13473_v45 = vld [vmem:[%s18780_s4 + $0x300] ss:$8 sps:$4 sm:$0xff]  }
0x109e   : > { %6610 = vmatpush1.bf16.msra.mxu1 %v13428_v53  ;;  %6651 = vmatpush1.bf16.msra.mxu0 %v13431_v9  ;;  %v13478_v9 = vld [vmem:[%s18780_s4 + $0x214] ss:$8 sps:$4 sm:$0xff]  }
0x109f   : > { %6611 = vmatprep.subr.bf16.mxu1 %v13436_v14  ;;  %6652 = vmatprep.subr.bf16.mxu0 %v13439_v27  ;;  %v13481_v14 = vld [vmem:[%s18780_s4 + $0x314] ss:$8 sps:$4 sm:$0xff]   ;;  %v13476_v27 = vld [vmem:[%s18780_s4 + $0x210] ss:$8 sps:$4 sm:$0xff]  }
0x10a2   : > { %6612 = vmatpush1.bf16.msra.mxu1 %v13434_v8  ;;  %6653 = vmatpush1.bf16.msra.mxu0 %v13437_v21  ;;  %v13479_v8 = vld [vmem:[%s18780_s4 + $0x310] ss:$8 sps:$4 sm:$0xff]   ;;  %v13484_v21 = vld [vmem:[%s18780_s4 + $0x224] ss:$8 sps:$4 sm:$0xff]  }
0x10a3   : > { %6613 = vmatprep.subr.bf16.mxu1 %v13442_v48  ;;  %6654 = vmatprep.subr.bf16.mxu0 %v13445_v16  ;;  %v13487_v48 = vld [vmem:[%s18780_s4 + $0x324] ss:$8 sps:$4 sm:$0xff]   ;;  %v13482_v16 = vld [vmem:[%s18780_s4 + $0x220] ss:$8 sps:$4 sm:$0xff]  }
0x10a6   : > { %6614 = vmatpush1.bf16.msra.mxu1 %v13440_v41  ;;  %6655 = vmatpush1.bf16.msra.mxu0 %v13443_v26  ;;  %v13485_v41 = vld [vmem:[%s18780_s4 + $0x320] ss:$8 sps:$4 sm:$0xff]   ;;  %v13490_v26 = vld [vmem:[%s18780_s4 + $0x234] ss:$8 sps:$4 sm:$0xff]  }
0x10a7   : > { %6615 = vmatprep.subr.bf16.mxu1 %v13448_v40  ;;  %6656 = vmatprep.subr.bf16.mxu0 %v13451_v29  ;;  %v13493_v40 = vld [vmem:[%s18780_s4 + $0x334] ss:$8 sps:$4 sm:$0xff]   ;;  %v13488_v29 = vld [vmem:[%s18780_s4 + $0x230] ss:$8 sps:$4 sm:$0xff]  }
0x10aa   : > { %6616 = vmatpush1.bf16.msra.mxu1 %v13446_v42  ;;  %6657 = vmatpush1.bf16.msra.mxu0 %v13449_v57  ;;  %v13491_v42 = vld [vmem:[%s18780_s4 + $0x330] ss:$8 sps:$4 sm:$0xff]   ;;  %v13496_v57 = vld [vmem:[%s18780_s4 + $0x244] ss:$8 sps:$4 sm:$0xff]  }
0x10ab   : > { %6617 = vmatprep.subr.bf16.mxu1 %v13454_v39  ;;  %6658 = vmatprep.subr.bf16.mxu0 %v13457_v50  ;;  %v13499_v39 = vld [vmem:[%s18780_s4 + $0x344] ss:$8 sps:$4 sm:$0xff]   ;;  %v13494_v50 = vld [vmem:[%s18780_s4 + $0x240] ss:$8 sps:$4 sm:$0xff]  }
0x10ae   : > { %6618 = vmatpush1.bf16.msra.mxu1 %v13452_v37  ;;  %6659 = vmatpush1.bf16.msra.mxu0 %v13455_v49  ;;  %v13497_v37 = vld [vmem:[%s18780_s4 + $0x340] ss:$8 sps:$4 sm:$0xff]   ;;  %v13502_v49 = vld [vmem:[%s18780_s4 + $0x254] ss:$8 sps:$4 sm:$0xff]  }
0x10af   : > { %6619 = vmatprep.subr.bf16.mxu1 %v13460_v3  ;;  %6660 = vmatprep.subr.bf16.mxu0 %v13463_v28  ;;  %v13505_v3 = vld [vmem:[%s18780_s4 + $0x354] ss:$8 sps:$4 sm:$0xff]   ;;  %v13500_v28 = vld [vmem:[%s18780_s4 + $0x250] ss:$8 sps:$4 sm:$0xff]  }
0x10b2   : > { %6620 = vmatpush1.bf16.msra.mxu1 %v13458_v17  ;;  %6661 = vmatpush1.bf16.msra.mxu0 %v13461_v25  ;;  %v13503_v17 = vld [vmem:[%s18780_s4 + $0x350] ss:$8 sps:$4 sm:$0xff]   ;;  %v13508_v25 = vld [vmem:[%s18780_s4 + $0x264] ss:$8 sps:$4 sm:$0xff]  }
0x10b3   : > { %6621 = vmatprep.subr.bf16.mxu1 %v13466_v52  ;;  %6662 = vmatprep.subr.bf16.mxu0 %v13469_v56  ;;  %v13511_v52 = vld [vmem:[%s18780_s4 + $0x364] ss:$8 sps:$4 sm:$0xff]   ;;  %v13506_v56 = vld [vmem:[%s18780_s4 + $0x260] ss:$8 sps:$4 sm:$0xff]  }
0x10b6   : > { %6622 = vmatpush1.bf16.msra.mxu1 %v13464_v7  ;;  %6663 = vmatpush1.bf16.msra.mxu0 %v13467_v58  ;;  %v13509_v7 = vld [vmem:[%s18780_s4 + $0x360] ss:$8 sps:$4 sm:$0xff]   ;;  %v13514_v58 = vld [vmem:[%s18780_s4 + $0x274] ss:$8 sps:$4 sm:$0xff]  }
0x10b7   : > { %6673 = vmatprep.subr.bf16.mxu1 %v13472_v31  ;;  %6714 = vmatprep.subr.bf16.mxu0 %v13475_v0  ;;  %v13517_v31 = vld [vmem:[%s18780_s4 + $0x374] ss:$8 sps:$4 sm:$0xff]   ;;  %v13512_v0 = vld [vmem:[%s18780_s4 + $0x270] ss:$8 sps:$4 sm:$0xff]  }
0x110c   : > { %v5665_v38 = vpop.f32.mrb[52].mxu1  ;;  %v5706_v36 = vpop.f32.mrb[40].mxu0 }
0x110d   : > { %v5666_v63 = vadd.f32 %v5665_v38, %v4954_v12  ;;  %v5707_v1 = vadd.f32 %v5706_v36, %v4962_v60  ;;  %v5667_v47 = vpop.f32.mrb[53].mxu1  ;;  %v5708_v33 = vpop.f32.mrb[41].mxu0  ;;  %v13515_v12 = vld [vmem:[%s18780_s4 + $0x370] ss:$8 sps:$4 sm:$0xff]   ;;  %v13520_v60 = vld [vmem:[%s18780_s4 + $0x284] ss:$8 sps:$4 sm:$0xff]  }
0x110e   : > { %v5668_v51 = vadd.f32 %v5667_v47, %v4958_v4  ;;  %v5709_v35 = vadd.f32 %v5708_v33, %v4966_v2  ;;  %v5669_v54 = vpop.f32.mrb[54].mxu1  ;;  %v5710_v59 = vpop.f32.mrb[42].mxu0  ;;  %v13523_v4 = vld [vmem:[%s18780_s4 + $0x384] ss:$8 sps:$4 sm:$0xff]   ;;  %v13518_v2 = vld [vmem:[%s18780_s4 + $0x280] ss:$8 sps:$4 sm:$0xff]  }
0x110f   : > { %v5795_v55 = vmax.f32 %v5666_v63, 0.0  ;;  %v5797_v22 = vmax.f32 %v5707_v1, 0.0  ;;  %v5670_v34 = vpop.f32.mrb[55].mxu1  ;;  %v5711_v32 = vpop.f32.mrb[43].mxu0  ;;  %v13521_v38 = vld [vmem:[%s18780_s4 + $0x380] ss:$8 sps:$4 sm:$0xff]  }
0x1110   : > { %v5796_v30 = vmax.f32 %v5668_v51, 0.0  ;;  %v5798_v23 = vmax.f32 %v5709_v35, 0.0  ;;  %v13526_v36 = vld [vmem:[%s18780_s4 + $0x294] ss:$8 sps:$4 sm:$0xff]   ;;  %v13524_v1 = vld [vmem:[%s18780_s4 + $0x290] ss:$8 sps:$4 sm:$0xff]  }
0x1111   : > { %v5803_v24 = vpack.c.bf16 %v5795_v55, %v5795_v55  ;;  %v5805_v53 = vpack.c.bf16 %v5797_v22, %v5797_v22  ;;  %v13529_v63 = vld [vmem:[%s18780_s4 + $0x394] ss:$8 sps:$4 sm:$0xff]   ;;  %v13527_v47 = vld [vmem:[%s18780_s4 + $0x390] ss:$8 sps:$4 sm:$0xff]   ;;  %v13532_v33 = vld [vmem:[%s18780_s4 + $0x2a4] ss:$8 sps:$4 sm:$0xff]  }
0x1112   : > { %v5804_v18 = vpack.c.bf16 %v5796_v30, %v5796_v30  ;;  %v5806_v46 = vpack.c.bf16 %v5798_v23, %v5798_v23  ;;  %v13535_v51 = vld [vmem:[%s18780_s4 + $0x3a4] ss:$8 sps:$4 sm:$0xff]   ;;  %v13530_v35 = vld [vmem:[%s18780_s4 + $0x2a0] ss:$8 sps:$4 sm:$0xff]   ;;  %v13538_v59 = vld [vmem:[%s18780_s4 + $0x2b4] ss:$8 sps:$4 sm:$0xff]  }
0x1113   : > { %v13533_v54 = vld [vmem:[%s18780_s4 + $0x3a0] ss:$8 sps:$4 sm:$0xff]   ;;  %v13541_v55 = vld [vmem:[%s18780_s4 + $0x3b4] ss:$8 sps:$4 sm:$0xff]   ;;  %v13536_v22 = vld [vmem:[%s18780_s4 + $0x2b0] ss:$8 sps:$4 sm:$0xff]  }
0x1114   : > { %6623 = vmatprep.mubr.bf16.mxu1 %v5804_v18  ;;  %6664 = vmatprep.mubr.bf16.mxu0 %v5806_v46  ;;  %v13539_v34 = vld [vmem:[%s18780_s4 + $0x3b0] ss:$8 sps:$4 sm:$0xff]   ;;  %v13544_v32 = vld [vmem:[%s18780_s4 + $0x2c4] ss:$8 sps:$4 sm:$0xff]   ;;  %v13542_v23 = vld [vmem:[%s18780_s4 + $0x2c0] ss:$8 sps:$4 sm:$0xff]  }
0x1115   : > { %6624 = vmatmul.mubr.bf16.vlgmr.msra.gmra.mrb[60].mxu1 %v5803_v24  ;;  %6665 = vmatmul.mubr.bf16.vlgmr.msra.gmra.mrb[48].mxu0 %v5805_v53  ;;  %v13547_v30 = vld [vmem:[%s18780_s4 + $0x3c4] ss:$8 sps:$4 sm:$0xff]   ;;  %v13545_v18 = vld [vmem:[%s18780_s4 + $0x3c0] ss:$8 sps:$4 sm:$0xff]   ;;  %v13550_v46 = vld [vmem:[%s18780_s4 + $0x2d4] ss:$8 sps:$4 sm:$0xff]  }
0x1116   : > { %6674 = vmatpush1.bf16.msra.mxu1 %v13470_v19  ;;  %6715 = vmatpush1.bf16.msra.mxu0 %v13473_v45  ;;  %v13553_v19 = vld [vmem:[%s18780_s4 + $0x3d4] ss:$8 sps:$4 sm:$0xff]   ;;  %v4977_v45 = vsub.s32 6, %v15699_v20  ;;  %v13548_v24 = vld [vmem:[%s18780_s4 + $0x2d0] ss:$8 sps:$4 sm:$0xff]  }
0x1117   : > { %6675 = vmatprep.subr.bf16.mxu1 %v13478_v9  ;;  %6716 = vmatprep.subr.bf16.mxu0 %v13481_v14  ;;  %v13551_v53 = vld [vmem:[%s18780_s4 + $0x3d0] ss:$8 sps:$4 sm:$0xff]   ;;  %v4981_v9 = vsub.s32 7, %v15699_v20  ;;  %v13556_v14 = vld [vmem:[%s18780_s4 + $0x2e4] ss:$8 sps:$4 sm:$0xff]  }
0x1118   : > { %v13949_v20 = vld [vmem:[%s18780_s4 + $0x7f4] ss:$8 sps:$4 sm:$0xff]  }
0x111a   : > { %6676 = vmatpush1.bf16.msra.mxu1 %v13476_v27  ;;  %6717 = vmatpush1.bf16.msra.mxu0 %v13479_v8  ;;  %v13559_v27 = vld [vmem:[%s18780_s4 + $0x3e4] ss:$8 sps:$4 sm:$0xff]   ;;  %v4970_v8 = vrot.slane %v16964_v6, %v16077_v61 }
0x111b   : > { %6677 = vmatprep.subr.bf16.mxu1 %v13484_v21  ;;  %6718 = vmatprep.subr.bf16.mxu0 %v13487_v48  ;;  %v4978_v21 = vrot.slane %v16964_v6, %v4977_v45  ;;  %v4974_v48 = vrot.slane %v16964_v6, %v16181_v44 }
0x111e   : > { %6678 = vmatpush1.bf16.msra.mxu1 %v13482_v16  ;;  %6719 = vmatpush1.bf16.msra.mxu0 %v13485_v41  ;;  %v4982_v16 = vrot.slane %v16964_v6, %v4981_v9  ;;  %v13554_v41 = vld [vmem:[%s18780_s4 + $0x2e0] ss:$8 sps:$4 sm:$0xff]  }
0x111f   : > { %6679 = vmatprep.subr.bf16.mxu1 %v13490_v26  ;;  %6720 = vmatprep.subr.bf16.mxu0 %v13493_v40  ;;  %v13557_v26 = vld [vmem:[%s18780_s4 + $0x3e0] ss:$8 sps:$4 sm:$0xff]   ;;  %v13562_v40 = vld [vmem:[%s18780_s4 + $0x2f4] ss:$8 sps:$4 sm:$0xff]  }
0x1122   : > { %6680 = vmatpush1.bf16.msra.mxu1 %v13488_v29  ;;  %6721 = vmatpush1.bf16.msra.mxu0 %v13491_v42  ;;  %v13565_v29 = vld [vmem:[%s18780_s4 + $0x3f4] ss:$8 sps:$4 sm:$0xff]  }
0x1123   : > { %6681 = vmatprep.subr.bf16.mxu1 %v13496_v57  ;;  %6722 = vmatprep.subr.bf16.mxu0 %v13499_v39 }
0x1126   : > { %6682 = vmatpush1.bf16.msra.mxu1 %v13494_v50  ;;  %6723 = vmatpush1.bf16.msra.mxu0 %v13497_v37 }
0x1127   : > { %6683 = vmatprep.subr.bf16.mxu1 %v13502_v49  ;;  %6724 = vmatprep.subr.bf16.mxu0 %v13505_v3 }
0x112a   : > { %6684 = vmatpush1.bf16.msra.mxu1 %v13500_v28  ;;  %6725 = vmatpush1.bf16.msra.mxu0 %v13503_v17 }
0x112b   : > { %6685 = vmatprep.subr.bf16.mxu1 %v13508_v25  ;;  %6726 = vmatprep.subr.bf16.mxu0 %v13511_v52  ;;  %v13560_v25 = vld [vmem:[%s18780_s4 + $0x2f0] ss:$8 sps:$4 sm:$0xff]  }
0x112c   : > { %v13563_v52 = vld [vmem:[%s18780_s4 + $0x3f0] ss:$8 sps:$4 sm:$0xff]  }
0x112e   : > { %6686 = vmatpush1.bf16.msra.mxu1 %v13506_v56  ;;  %6727 = vmatpush1.bf16.msra.mxu0 %v13509_v7 }
0x112f   : > { %6687 = vmatprep.subr.bf16.mxu1 %v13514_v58  ;;  %6728 = vmatprep.subr.bf16.mxu0 %v13517_v31 }
0x1132   : > { %6688 = vmatpush1.bf16.msra.mxu1 %v13512_v0  ;;  %6729 = vmatpush1.bf16.msra.mxu0 %v13515_v12 }
0x1133   : > { %6689 = vmatprep.subr.bf16.mxu1 %v13520_v60  ;;  %6730 = vmatprep.subr.bf16.mxu0 %v13523_v4 }
0x1136   : > { %6690 = vmatpush1.bf16.msra.mxu1 %v13518_v2  ;;  %6731 = vmatpush1.bf16.msra.mxu0 %v13521_v38 }
0x1137   : > { %6691 = vmatprep.subr.bf16.mxu1 %v13526_v36  ;;  %6732 = vmatprep.subr.bf16.mxu0 %v13529_v63  ;;  %v5939_v36 = vld [vmem:[#allocation10] sm:$0x3] }
0x1138   : > { %v5944_v63 = vrot.slane %v5939_v36, %v15702_v13 }
0x113a   : > { %6692 = vmatpush1.bf16.msra.mxu1 %v13524_v1  ;;  %6733 = vmatpush1.bf16.msra.mxu0 %v13527_v47  ;;  %v5948_v1 = vrot.slane %v5939_v36, %v15708_v62  ;;  %v13604_v36 = vld [vmem:[%s18678_s10 + $0x424] ss:$24 sps:$4 sm:$0xff]  }
0x113b   : > { %6693 = vmatprep.subr.bf16.mxu1 %v13532_v33  ;;  %6734 = vmatprep.subr.bf16.mxu0 %v13535_v51 }
0x113e   : > { %6694 = vmatpush1.bf16.msra.mxu1 %v13530_v35  ;;  %6735 = vmatpush1.bf16.msra.mxu0 %v13533_v54 }
0x113f   : > { %6695 = vmatprep.subr.bf16.mxu1 %v13538_v59  ;;  %6736 = vmatprep.subr.bf16.mxu0 %v13541_v55 }
0x1142   : > { %6696 = vmatpush1.bf16.msra.mxu1 %v13536_v22  ;;  %6737 = vmatpush1.bf16.msra.mxu0 %v13539_v34 }
0x1143   : > { %6697 = vmatprep.subr.bf16.mxu1 %v13544_v32  ;;  %6738 = vmatprep.subr.bf16.mxu0 %v13547_v30 }
0x1146   : > { %6698 = vmatpush1.bf16.msra.mxu1 %v13542_v23  ;;  %6739 = vmatpush1.bf16.msra.mxu0 %v13545_v18 }
0x1147   : > { %6699 = vmatprep.subr.bf16.mxu1 %v13550_v46  ;;  %6740 = vmatprep.subr.bf16.mxu0 %v13553_v19 }
0x114a   : > { %6700 = vmatpush1.bf16.msra.mxu1 %v13548_v24  ;;  %6741 = vmatpush1.bf16.msra.mxu0 %v13551_v53 }
0x114b   : > { %6701 = vmatprep.subr.bf16.mxu1 %v13556_v14  ;;  %6742 = vmatprep.subr.bf16.mxu0 %v13559_v27 }
0x114c   : > { %v5747_v42 = vpop.f32.mrb[56].mxu1  ;;  %v5788_v6 = vpop.f32.mrb[44].mxu0 }
0x114d   : > { %v5748_v57 = vadd.f32 %v5747_v42, %v4970_v8  ;;  %v5789_v39 = vadd.f32 %v5788_v6, %v4978_v21  ;;  %v5749_v50 = vpop.f32.mrb[57].mxu1  ;;  %v5790_v37 = vpop.f32.mrb[45].mxu0  ;;  %v13566_v42 = vld [vmem:[%s18678_s10 + $0x300] ss:$24 sps:$4 sm:$0xff]   ;;  %v13568_v6 = vld [vmem:[%s18678_s10 + $0x304] ss:$24 sps:$4 sm:$0xff]  }
0x114e   : > { %v5750_v49 = vadd.f32 %v5749_v50, %v4974_v48  ;;  %v5791_v3 = vadd.f32 %v5790_v37, %v4982_v16  ;;  %v5751_v28 = vpop.f32.mrb[58].mxu1  ;;  %v5792_v17 = vpop.f32.mrb[46].mxu0  ;;  %6702 = vmatpush1.bf16.msra.mxu1 %v13554_v41  ;;  %6743 = vmatpush1.bf16.msra.mxu0 %v13557_v26  ;;  %v13572_v50 = vld [vmem:[%s18678_s10 + $0x330] ss:$24 sps:$4 sm:$0xff]  }
0x114f   : > { %v5799_v56 = vmax.f32 %v5748_v57, 0.0  ;;  %v5801_v7 = vmax.f32 %v5789_v39, 0.0  ;;  %v5752_v58 = vpop.f32.mrb[59].mxu1  ;;  %v5793_v31 = vpop.f32.mrb[47].mxu0  ;;  %6703 = vmatprep.subr.bf16.mxu1 %v13562_v40  ;;  %6744 = vmatprep.subr.bf16.mxu0 %v13565_v29  ;;  %v13574_v57 = vld [vmem:[%s18678_s10 + $0x334] ss:$24 sps:$4 sm:$0xff]  }
0x1150   : > { %v5800_v0 = vmax.f32 %v5750_v49, 0.0  ;;  %v5802_v12 = vmax.f32 %v5791_v3, 0.0  ;;  %v13577_v39 = vld [vmem:[%s18678_s10 + $0x33c] ss:$24 sps:$4 sm:$0xff]   ;;  %v13575_v37 = vld [vmem:[%s18678_s10 + $0x338] ss:$24 sps:$4 sm:$0xff]  }
0x1151   : > { %v5807_v2 = vpack.c.bf16 %v5799_v56, %v5799_v56  ;;  %v5809_v38 = vpack.c.bf16 %v5801_v7, %v5801_v7  ;;  %v13580_v49 = vld [vmem:[%s18678_s10 + $0x364] ss:$24 sps:$4 sm:$0xff]   ;;  %v13578_v28 = vld [vmem:[%s18678_s10 + $0x360] ss:$24 sps:$4 sm:$0xff]   ;;  %v13584_v56 = vld [vmem:[%s18678_s10 + $0x390] ss:$24 sps:$4 sm:$0xff]  }
0x1152   : > { %v5808_v60 = vpack.c.bf16 %v5800_v0, %v5800_v0  ;;  %v5810_v4 = vpack.c.bf16 %v5802_v12, %v5802_v12  ;;  %6704 = vmatpush1.bf16.msra.mxu1 %v13560_v25  ;;  %6745 = vmatpush1.bf16.msra.mxu0 %v13563_v52  ;;  %v13583_v3 = vld [vmem:[%s18678_s10 + $0x36c] ss:$24 sps:$4 sm:$0xff]   ;;  %v13581_v17 = vld [vmem:[%s18678_s10 + $0x368] ss:$24 sps:$4 sm:$0xff]   ;;  %v13589_v52 = vld [vmem:[%s18678_s10 + $0x39c] ss:$24 sps:$4 sm:$0xff]  }
0x1153   : > { %7431 = vmatprep.subr.bf16.mxu1 %v13568_v6  ;;  %v13586_v25 = vld [vmem:[%s18678_s10 + $0x394] ss:$24 sps:$4 sm:$0xff]   ;;  %v13587_v7 = vld [vmem:[%s18678_s10 + $0x398] ss:$24 sps:$4 sm:$0xff]   ;;  %v13592_v58 = vld [vmem:[%s18678_s10 + $0x3c4] ss:$24 sps:$4 sm:$0xff]  }
0x1154   : > { %6705 = vmatprep.mubr.bf16.mxu1 %v5808_v60  ;;  %6746 = vmatprep.mubr.bf16.mxu0 %v5810_v4  ;;  %v13595_v31 = vld [vmem:[%s18678_s10 + $0x3cc] ss:$24 sps:$4 sm:$0xff]   ;;  %v13590_v0 = vld [vmem:[%s18678_s10 + $0x3c0] ss:$24 sps:$4 sm:$0xff]   ;;  %v13601_v4 = vld [vmem:[%s18678_s10 + $0x3fc] ss:$24 sps:$4 sm:$0xff]  }
0x1155   : > { %6706 = vmatmul.mubr.bf16.vlgmr.msra.gmra.mrb[64].mxu1 %v5807_v2  ;;  %6747 = vmatmul.mubr.bf16.vlgmr.msra.gmra.mrb[52].mxu0 %v5809_v38  ;;  %v13593_v12 = vld [vmem:[%s18678_s10 + $0x3c8] ss:$24 sps:$4 sm:$0xff]   ;;  %v13598_v60 = vld [vmem:[%s18678_s10 + $0x3f4] ss:$24 sps:$4 sm:$0xff]   ;;  %v13599_v38 = vld [vmem:[%s18678_s10 + $0x3f8] ss:$24 sps:$4 sm:$0xff]  }
0x1156   : > { %7432 = vmatpush1.bf16.msra.mxu1 %v13566_v42  ;;  %v13596_v2 = vld [vmem:[%s18678_s10 + $0x3f0] ss:$24 sps:$4 sm:$0xff]   ;;  %v13637_v6 = vld [vmem:[%s18678_s10 + $0x51c] ss:$24 sps:$4 sm:$0xff]  }
0x1157   : > { %7433 = vmatprep.subr.bf16.mxu1 %v13574_v57  ;;  %v13632_v42 = vld [vmem:[%s18678_s10 + $0x510] ss:$24 sps:$4 sm:$0xff]   ;;  %v13640_v57 = vld [vmem:[%s18678_s10 + $0x544] ss:$24 sps:$4 sm:$0xff]  }
0x115a   : > { %7434 = vmatpush1.bf16.msra.mxu1 %v13572_v50  ;;  %v13643_v50 = vld [vmem:[%s18678_s10 + $0x54c] ss:$24 sps:$4 sm:$0xff]  }
0x115b   : > { %7435 = vmatprep.subr.bf16.mxu1 %v13580_v49  ;;  %v13649_v49 = vld [vmem:[%s18678_s10 + $0x57c] ss:$24 sps:$4 sm:$0xff]  }
0x115e   : > { %7436 = vmatpush1.bf16.msra.mxu1 %v13578_v28  ;;  %v13647_v28 = vld [vmem:[%s18678_s10 + $0x578] ss:$24 sps:$4 sm:$0xff]  }
0x115f   : > { %7437 = vmatprep.subr.bf16.mxu1 %v13586_v25  ;;  %v13655_v25 = vld [vmem:[%s18678_s10 + $0x5ac] ss:$24 sps:$4 sm:$0xff]  }
0x1162   : > { %7438 = vmatpush1.bf16.msra.mxu1 %v13584_v56  ;;  %v13653_v56 = vld [vmem:[%s18678_s10 + $0x5a8] ss:$24 sps:$4 sm:$0xff]  }
0x1163   : > { %7439 = vmatprep.subr.bf16.mxu1 %v13592_v58  ;;  %v13661_v58 = vld [vmem:[%s18678_s10 + $0x5dc] ss:$24 sps:$4 sm:$0xff]  }
0x1166   : > { %7440 = vmatpush1.bf16.msra.mxu1 %v13590_v0  ;;  %v13659_v0 = vld [vmem:[%s18678_s10 + $0x5d8] ss:$24 sps:$4 sm:$0xff]  }
0x1167   : > { %7441 = vmatprep.subr.bf16.mxu1 %v13598_v60 }
0x116a   : > { %7442 = vmatpush1.bf16.msra.mxu1 %v13596_v2 }
0x116b   : > { %7443 = vmatprep.subr.bf16.mxu1 %v13604_v36  ;;  %v11773_v36 = vld [vmem:[%s18677_s9 + $0x4] sm:$0xf] }
0x11e8   : > { %v6625_v47 = vpop.f32.mrb[60].mxu1  ;;  %v6666_v33 = vpop.f32.mrb[48].mxu0 }
0x11e9   : > { %v6626_v51 = vadd.f32 %v6625_v47, %v5944_v63  ;;  %v6627_v35 = vpop.f32.mrb[61].mxu1  ;;  %v6668_v54 = vpop.f32.mrb[49].mxu0  ;;  %v13607_v63 = vld [vmem:[%s18678_s10 + $0x42c] ss:$24 sps:$4 sm:$0xff]   ;;  %v13605_v47 = vld [vmem:[%s18678_s10 + $0x428] ss:$24 sps:$4 sm:$0xff]  }
0x11ea   : > { %v6628_v59 = vadd.f32 %v6627_v35, %v5948_v1  ;;  %v6629_v55 = vpop.f32.mrb[62].mxu1  ;;  %v6670_v22 = vpop.f32.mrb[50].mxu0  ;;  %v13602_v1 = vld [vmem:[%s18678_s10 + $0x420] ss:$24 sps:$4 sm:$0xff]   ;;  %v13608_v35 = vld [vmem:[%s18678_s10 + $0x450] ss:$24 sps:$4 sm:$0xff]  }
0x11eb   : > { %v6667_v34 = vadd.f32 %v6666_v33, %v6626_v51  ;;  %v6630_v32 = vpop.f32.mrb[63].mxu1  ;;  %v6671_v30 = vpop.f32.mrb[51].mxu0  ;;  %v13610_v33 = vld [vmem:[%s18678_s10 + $0x454] ss:$24 sps:$4 sm:$0xff]   ;;  %7444 = vmatpush1.bf16.msra.mxu1 %v13602_v1  ;;  %v13614_v22 = vld [vmem:[%s18678_s10 + $0x480] ss:$24 sps:$4 sm:$0xff]  }
0x11ec   : > { %v6669_v23 = vadd.f32 %v6668_v54, %v6628_v59  ;;  %v13613_v51 = vld [vmem:[%s18678_s10 + $0x45c] ss:$24 sps:$4 sm:$0xff]   ;;  %7445 = vmatprep.subr.bf16.mxu1 %v13610_v33  ;;  %v13611_v54 = vld [vmem:[%s18678_s10 + $0x458] ss:$24 sps:$4 sm:$0xff]   ;;  %v13619_v55 = vld [vmem:[%s18678_s10 + $0x48c] ss:$24 sps:$4 sm:$0xff]   ;;  %v6802_v33 = vrot.slane %v11773_v36, %v15702_v13 }
0x11ed   : > { %v13616_v59 = vld [vmem:[%s18678_s10 + $0x484] ss:$24 sps:$4 sm:$0xff]   ;;  %v13622_v32 = vld [vmem:[%s18678_s10 + $0x4b4] ss:$24 sps:$4 sm:$0xff]  }
0x11ee   : > { %v13625_v30 = vld [vmem:[%s18678_s10 + $0x4bc] ss:$24 sps:$4 sm:$0xff]  }
0x11ef   : > { %7446 = vmatpush1.bf16.msra.mxu1 %v13608_v35 }
0x11f0   : > { %7447 = vmatprep.subr.bf16.mxu1 %v13616_v59 }
0x11f3   : > { %7448 = vmatpush1.bf16.msra.mxu1 %v13614_v22 }
0x11f4   : > { %7449 = vmatprep.subr.bf16.mxu1 %v13622_v32 }
0x1228   : > { %v6707_v18 = vpop.f32.mrb[64].mxu1  ;;  %v6748_v46 = vpop.f32.mrb[52].mxu0 }
0x1229   : > { %v6708_v19 = vadd.f32 %v6707_v18, %v6667_v34  ;;  %v6709_v24 = vpop.f32.mrb[65].mxu1  ;;  %v6750_v53 = vpop.f32.mrb[53].mxu0  ;;  %v13617_v34 = vld [vmem:[%s18678_s10 + $0x488] ss:$24 sps:$4 sm:$0xff]   ;;  %v13623_v18 = vld [vmem:[%s18678_s10 + $0x4b8] ss:$24 sps:$4 sm:$0xff]  }
0x122a   : > { %v6710_v14 = vadd.f32 %v6709_v24, %v6669_v23  ;;  %v6711_v27 = vpop.f32.mrb[66].mxu1  ;;  %v6752_v8 = vpop.f32.mrb[54].mxu0  ;;  %v13620_v23 = vld [vmem:[%s18678_s10 + $0x4b0] ss:$24 sps:$4 sm:$0xff]  }
0x122b   : > { %v6749_v21 = vadd.f32 %v6748_v46, %v6708_v19  ;;  %v6712_v48 = vpop.f32.mrb[67].mxu1  ;;  %v6753_v16 = vpop.f32.mrb[55].mxu0  ;;  %v13628_v46 = vld [vmem:[%s18678_s10 + $0x4e4] ss:$24 sps:$4 sm:$0xff]   ;;  %7450 = vmatpush1.bf16.msra.mxu1 %v13620_v23  ;;  %v13626_v19 = vld [vmem:[%s18678_s10 + $0x4e0] ss:$24 sps:$4 sm:$0xff]  }
0x122c   : > { %v6751_v41 = vadd.f32 %v6750_v53, %v6710_v14  ;;  %7451 = vmatprep.subr.bf16.mxu1 %v13628_v46  ;;  %v13631_v16 = vld [vmem:[%s18678_s10 + $0x4ec] ss:$24 sps:$4 sm:$0xff]  }
0x122d   : > { %v17175_v26 = vadd.f32 %v6749_v21, %v16340_v43  ;;  %v13569_v43 = vld [vmem:[%s18678_s10 + $0x308] ss:$24 sps:$4 sm:$0xff]  }
0x122e   : > { %v17178_v40 = vadd.f32 %v6751_v41, %v16343_v5  ;;  %v13571_v5 = vld [vmem:[%s18678_s10 + $0x30c] ss:$24 sps:$4 sm:$0xff]   ;;  %v13629_v41 = vld [vmem:[%s18678_s10 + $0x4e8] ss:$24 sps:$4 sm:$0xff]  }
0x122f   : > { %7472 = vmatprep.subr.bf16.mxu0 %v13571_v5  ;;  %7452 = vmatpush1.bf16.msra.mxu1 %v13626_v19  ;;  %v13638_v5 = vld [vmem:[%s18678_s10 + $0x540] ss:$24 sps:$4 sm:$0xff]   ;;  %v13662_v19 = vld [vmem:[%s18678_s10 + $0x310] ss:$24 sps:$4 sm:$0xff]  }
0x1230   : > { %v6761_v29 = vadd.f32 %v17178_v40, %v17175_v26  ;;  %7473 = vmatpush1.bf16.msra.mxu0 %v13569_v43  ;;  %v13635_v43 = vld [vmem:[%s18678_s10 + $0x518] ss:$24 sps:$4 sm:$0xff]  }
0x1231   : > { %7474 = vmatprep.subr.bf16.mxu0 %v13577_v39  ;;  %v13641_v39 = vld [vmem:[%s18678_s10 + $0x548] ss:$24 sps:$4 sm:$0xff]  }
0x1232   : > { %6762 = vadd.xlane.f32.xlu0 %v6761_v29  ;;  %v13634_v29 = vld [vmem:[%s18678_s10 + $0x514] ss:$24 sps:$4 sm:$0xff]  }
0x1233   : > { %7453 = vmatprep.subr.bf16.mxu1 %v13634_v29  ;;  %v13679_v29 = vld [vmem:[%s18678_s10 + $0x404] ss:$24 sps:$4 sm:$0xff]  }
0x1234   : > { %7475 = vmatpush1.bf16.msra.mxu0 %v13575_v37  ;;  %7454 = vmatpush1.bf16.msra.mxu1 %v13632_v42  ;;  %v13646_v37 = vld [vmem:[%s18678_s10 + $0x574] ss:$24 sps:$4 sm:$0xff]   ;;  %v13677_v42 = vld [vmem:[%s18678_s10 + $0x400] ss:$24 sps:$4 sm:$0xff]  }
0x1235   : > { %7476 = vmatprep.subr.bf16.mxu0 %v13583_v3  ;;  %7455 = vmatprep.subr.bf16.mxu1 %v13640_v57  ;;  %v13644_v3 = vld [vmem:[%s18678_s10 + $0x570] ss:$24 sps:$4 sm:$0xff]   ;;  %v13683_v57 = vld [vmem:[%s18678_s10 + $0x460] ss:$24 sps:$4 sm:$0xff]  }
0x1238   : > { %7477 = vmatpush1.bf16.msra.mxu0 %v13581_v17  ;;  %7456 = vmatpush1.bf16.msra.mxu1 %v13638_v5  ;;  %v13652_v17 = vld [vmem:[%s18678_s10 + $0x5a4] ss:$24 sps:$4 sm:$0xff]  }
0x1239   : > { %7478 = vmatprep.subr.bf16.mxu0 %v13589_v52  ;;  %7457 = vmatprep.subr.bf16.mxu1 %v13646_v37  ;;  %v13650_v52 = vld [vmem:[%s18678_s10 + $0x5a0] ss:$24 sps:$4 sm:$0xff]   ;;  %v13685_v5 = vld [vmem:[%s18678_s10 + $0x464] ss:$24 sps:$4 sm:$0xff]  }
0x123a   : > { %v13691_v37 = vld [vmem:[%s18678_s10 + $0x4c4] ss:$24 sps:$4 sm:$0xff]  }
0x123c   : > { %7479 = vmatpush1.bf16.msra.mxu0 %v13587_v7  ;;  %7458 = vmatpush1.bf16.msra.mxu1 %v13644_v3  ;;  %v13658_v7 = vld [vmem:[%s18678_s10 + $0x5d4] ss:$24 sps:$4 sm:$0xff]  }
0x123d   : > { %7480 = vmatprep.subr.bf16.mxu0 %v13595_v31  ;;  %7459 = vmatprep.subr.bf16.mxu1 %v13652_v17  ;;  %v13656_v31 = vld [vmem:[%s18678_s10 + $0x5d0] ss:$24 sps:$4 sm:$0xff]   ;;  %v13694_v3 = vld [vmem:[%s18678_s10 + $0x4f4] ss:$24 sps:$4 sm:$0xff]   ;;  %v13697_v17 = vld [vmem:[%s18678_s10 + $0x524] ss:$24 sps:$4 sm:$0xff]  }
0x1240   : > { %7481 = vmatpush1.bf16.msra.mxu0 %v13593_v12  ;;  %7460 = vmatpush1.bf16.msra.mxu1 %v13650_v52  ;;  %v13664_v12 = vld [vmem:[%s18678_s10 + $0x314] ss:$24 sps:$4 sm:$0xff]  }
0x1241   : > { %7482 = vmatprep.subr.bf16.mxu0 %v13601_v4  ;;  %7461 = vmatprep.subr.bf16.mxu1 %v13658_v7  ;;  %v13700_v52 = vld [vmem:[%s18678_s10 + $0x554] ss:$24 sps:$4 sm:$0xff]   ;;  %v13703_v7 = vld [vmem:[%s18678_s10 + $0x584] ss:$24 sps:$4 sm:$0xff]  }
0x1244   : > { %7483 = vmatpush1.bf16.msra.mxu0 %v13599_v38  ;;  %7462 = vmatpush1.bf16.msra.mxu1 %v13656_v31  ;;  %v11772_v38 = vld [vmem:[%s18676_s8 + $0x4] sm:$0xf]  ;;  %v13706_v31 = vld [vmem:[%s18678_s10 + $0x5b4] ss:$24 sps:$4 sm:$0xff]  }
0x1245   : > { %7484 = vmatprep.subr.bf16.mxu0 %v13607_v63  ;;  %7513 = vmatprep.subr.bf16.mxu1 %v13664_v12  ;;  %v6785_v63 = vrot.slane %v11772_v38, %v15940_v10  ;;  %v6781_v1 = vrot.slane %v11772_v38, %v15702_v13  ;;  %v13709_v12 = vld [vmem:[%s18678_s10 + $0x5e4] ss:$24 sps:$4 sm:$0xff]  }
0x1247   : > { %v6791_v35 = vrot.slane %v6781_v1, %v15702_v13 }
0x1248   : > { %7485 = vmatpush1.bf16.msra.mxu0 %v13605_v47  ;;  %v6806_v47 = vrot.slane %v11773_v36, %v15940_v10 }
0x1249   : > { %7486 = vmatprep.subr.bf16.mxu0 %v13613_v51  ;;  %v6795_v51 = vrot.slane %v6785_v63, %v15702_v13 }
0x124c   : > { %7487 = vmatpush1.bf16.msra.mxu0 %v13611_v54 }
0x124d   : > { %7488 = vmatprep.subr.bf16.mxu0 %v13619_v55  ;;  %v6816_v55 = vrot.slane %v6806_v47, %v15702_v13 }
0x1250   : > { %7489 = vmatpush1.bf16.msra.mxu0 %v13617_v34  ;;  %v6812_v34 = vrot.slane %v6802_v33, %v15702_v13 }
0x1251   : > { %7490 = vmatprep.subr.bf16.mxu0 %v13625_v30 }
0x1254   : > { %7491 = vmatpush1.bf16.msra.mxu0 %v13623_v18 }
0x1255   : > { %7492 = vmatprep.subr.bf16.mxu0 %v13631_v16  ;;  %v13676_v16 = vld [vmem:[%s18678_s10 + $0x3d4] ss:$24 sps:$4 sm:$0xff]  }
0x1258   : > { %7493 = vmatpush1.bf16.msra.mxu0 %v13629_v41  ;;  %v13674_v41 = vld [vmem:[%s18678_s10 + $0x3d0] ss:$24 sps:$4 sm:$0xff]  }
0x1259   : > { %7494 = vmatprep.subr.bf16.mxu0 %v13637_v6  ;;  %v13682_v6 = vld [vmem:[%s18678_s10 + $0x434] ss:$24 sps:$4 sm:$0xff]  }
0x125c   : > { %7495 = vmatpush1.bf16.msra.mxu0 %v13635_v43  ;;  %v13680_v43 = vld [vmem:[%s18678_s10 + $0x430] ss:$24 sps:$4 sm:$0xff]  }
0x125d   : > { %7496 = vmatprep.subr.bf16.mxu0 %v13643_v50  ;;  %v13686_v50 = vld [vmem:[%s18678_s10 + $0x490] ss:$24 sps:$4 sm:$0xff]  }
0x1260   : > { %7497 = vmatpush1.bf16.msra.mxu0 %v13641_v39  ;;  %v13688_v39 = vld [vmem:[%s18678_s10 + $0x494] ss:$24 sps:$4 sm:$0xff]  }
0x1261   : > { %7498 = vmatprep.subr.bf16.mxu0 %v13649_v49  ;;  %v13689_v49 = vld [vmem:[%s18678_s10 + $0x4c0] ss:$24 sps:$4 sm:$0xff]  }
0x1264   : > { %7499 = vmatpush1.bf16.msra.mxu0 %v13647_v28  ;;  %v13692_v28 = vld [vmem:[%s18678_s10 + $0x4f0] ss:$24 sps:$4 sm:$0xff]  }
0x1265   : > { %7500 = vmatprep.subr.bf16.mxu0 %v13655_v25  ;;  %v13695_v25 = vld [vmem:[%s18678_s10 + $0x520] ss:$24 sps:$4 sm:$0xff]  }
0x1268   : > { %7501 = vmatpush1.bf16.msra.mxu0 %v13653_v56  ;;  %v13698_v56 = vld [vmem:[%s18678_s10 + $0x550] ss:$24 sps:$4 sm:$0xff]  }
0x1269   : > { %7502 = vmatprep.subr.bf16.mxu0 %v13661_v58  ;;  %v13701_v58 = vld [vmem:[%s18678_s10 + $0x580] ss:$24 sps:$4 sm:$0xff]  }
0x126c   : > { %7503 = vmatpush1.bf16.msra.mxu0 %v13659_v0  ;;  %v13704_v0 = vld [vmem:[%s18678_s10 + $0x5b0] ss:$24 sps:$4 sm:$0xff]  }
0x126d   : > { %12764 = vmatprep.subr.bf16.mxu0 %v14302_v11 }
0x12bf   : > { %v6763_v24 = vpop.xlane.xlu0 %6762 }
0x12c0   : > { %v6764_v53 = vmul.f32 0.00390625, %v6763_v24 }
0x12c2   : > { %v17309_v14 = vsub.f32 %v17175_v26, %v6764_v53  ;;  %v17312_v27 = vsub.f32 %v17178_v40, %v6764_v53  ;;  %v13667_v53 = vld [vmem:[%s18678_s10 + $0x344] ss:$24 sps:$4 sm:$0xff]  }
0x12c4   : > { %v6767_v8 = vmul.f32 %v17309_v14, %v17309_v14  ;;  %v6768_v21 = vmul.f32 %v17312_v27, %v17312_v27 }
0x12c6   : > { %v6769_v48 = vadd.f32 %v6768_v21, %v6767_v8  ;;  %v13668_v8 = vld [vmem:[%s18678_s10 + $0x370] ss:$24 sps:$4 sm:$0xff]   ;;  %v13673_v21 = vld [vmem:[%s18678_s10 + $0x3a4] ss:$24 sps:$4 sm:$0xff]  }
0x12c8   : > { %6770 = vadd.xlane.f32.xlu0 %v6769_v48  ;;  %v13671_v48 = vld [vmem:[%s18678_s10 + $0x3a0] ss:$24 sps:$4 sm:$0xff]  }
0x1355   : > { %v6771_v60 = vpop.xlane.xlu0 %6770 }
0x1356   : > { %v6772_v4 = vmul.f32 0.00390625, %v6771_v60  ;;  %v13707_v60 = vld [vmem:[%s18678_s10 + $0x5e0] ss:$24 sps:$4 sm:$0xff]  }
0x1358   : > { %v6773_v2 = vadd.f32 1e-05, %v6772_v4  ;;  %v17510_v4 = vld [vmem:[%s18679_s11 + $0x6] sm:$0x3f] }
0x1359   : > { %v6932_v38 = vrot.slane %v17510_v4, %v15940_v10 }
0x135a   : > { %14002 = vrsqrt.f32 %v6773_v2  ;;  %v6924_v2 = vrot.slane %v17510_v4, %v15702_v13 }
0x1364   : > { %v14003_v54 = vpop.eup %14002 }
0x1365   : > { %v6776_v59 = vmul.f32 %v14003_v54, %v17312_v27  ;;  %v6775_v22 = vmul.f32 %v14003_v54, %v17309_v14  ;;  %v13665_v14 = vld [vmem:[%s18678_s10 + $0x340] ss:$24 sps:$4 sm:$0xff]   ;;  %v13670_v27 = vld [vmem:[%s18678_s10 + $0x374] ss:$24 sps:$4 sm:$0xff]  }
0x1367   : > { %v6797_v32 = vmul.f32 %v6795_v51, %v6776_v59  ;;  %v6796_v30 = vmul.f32 %v6791_v35, %v6775_v22  ;;  %v6936_v22 = vrot.slane %v17510_v4, %v16094_v15 }
0x1369   : > { %v6818_v23 = vadd.f32 %v6816_v55, %v6797_v32  ;;  %v6817_v18 = vadd.f32 %v6812_v34, %v6796_v30 }
0x136b   : > { %v6820_v46 = vpack.c.bf16 %v6818_v23, %v6818_v23  ;;  %v17407_v24 = vpack.c.bf16 %v6817_v18, %v6817_v18  ;;  %v6928_v18 = vrot.slane %v17510_v4, %v15708_v62 }
0x136d   : > { %7463 = vmatprep.mubr.bf16.mxu1 %v6820_v46  ;;  %7504 = vmatprep.mubr.bf16.mxu0 %v6820_v46 }
0x136e   : > { %7464 = vmatmul.mubr.bf16.vlgmr.msra.gmra.mrb[68].mxu1 %v17407_v24  ;;  %7505 = vmatmul.mubr.bf16.vlgmr.msra.gmra.mrb[56].mxu0 %v17407_v24 }
0x136f   : > { %7514 = vmatpush1.bf16.msra.mxu1 %v13662_v19  ;;  %7545 = vmatprep.mubr.bf16.mxu1 %v6820_v46 }
0x1370   : > { %7515 = vmatprep.subr.bf16.mxu1 %v13667_v53  ;;  %12766 = vmatprep.mubr.msk.bf16.mxu0 %vm14303_vm8, %v14302_v11  ;;  %v6940_v53 = vrot.slane %v17510_v4, %v16077_v61 }
0x1373   : > { %7516 = vmatpush1.bf16.msra.mxu1 %v13665_v14 }
0x1374   : > { %7517 = vmatprep.subr.bf16.mxu1 %v13670_v27 }
0x1377   : > { %7518 = vmatpush1.bf16.msra.mxu1 %v13668_v8 }
0x1378   : > { %7519 = vmatprep.subr.bf16.mxu1 %v13673_v21 }
0x137b   : > { %7520 = vmatpush1.bf16.msra.mxu1 %v13671_v48 }
0x137c   : > { %7521 = vmatprep.subr.bf16.mxu1 %v13676_v16 }
0x137f   : > { %7522 = vmatpush1.bf16.msra.mxu1 %v13674_v41 }
0x1380   : > { %7523 = vmatprep.subr.bf16.mxu1 %v13679_v29 }
0x1383   : > { %7524 = vmatpush1.bf16.msra.mxu1 %v13677_v42 }
0x1384   : > { %7525 = vmatprep.subr.bf16.mxu1 %v13682_v6 }
0x1387   : > { %7526 = vmatpush1.bf16.msra.mxu1 %v13680_v43 }
0x1388   : > { %7527 = vmatprep.subr.bf16.mxu1 %v13685_v5 }
0x138b   : > { %7528 = vmatpush1.bf16.msra.mxu1 %v13683_v57 }
0x138c   : > { %7529 = vmatprep.subr.bf16.mxu1 %v13688_v39 }
0x138f   : > { %7530 = vmatpush1.bf16.msra.mxu1 %v13686_v50 }
0x1390   : > { %7531 = vmatprep.subr.bf16.mxu1 %v13691_v37 }
0x1393   : > { %7532 = vmatpush1.bf16.msra.mxu1 %v13689_v49 }
0x1394   : > { %7533 = vmatprep.subr.bf16.mxu1 %v13694_v3 }
0x1397   : > { %7534 = vmatpush1.bf16.msra.mxu1 %v13692_v28 }
0x1398   : > { %7535 = vmatprep.subr.bf16.mxu1 %v13697_v17 }
0x139b   : > { %7536 = vmatpush1.bf16.msra.mxu1 %v13695_v25 }
0x139c   : > { %7537 = vmatprep.subr.bf16.mxu1 %v13700_v52 }
0x139f   : > { %7538 = vmatpush1.bf16.msra.mxu1 %v13698_v56 }
0x13a0   : > { %7539 = vmatprep.subr.bf16.mxu1 %v13703_v7 }
0x13a3   : > { %7540 = vmatpush1.bf16.msra.mxu1 %v13701_v58 }
0x13a4   : > { %7541 = vmatprep.subr.bf16.mxu1 %v13706_v31 }
0x13a7   : > { %7542 = vmatpush1.bf16.msra.mxu1 %v13704_v0 }
0x13a8   : > { %7543 = vmatprep.subr.bf16.mxu1 %v13709_v12 }
0x13ab   : > { %7544 = vmatpush1.bf16.msra.mxu1 %v13707_v60 }
0x13ac   : > { %12770 = vmatprep.subr.bf16.mxu1 %v14302_v11 }
0x13ae   : > { %7546 = vmatmul.mubr.bf16.vlgmr.msra.gmra.mrb[72].mxu1 %v17407_v24 }
0x13af   : > { %12772 = vmatprep.mubr.msk.bf16.mxu1 %vm14303_vm8, %v14302_v11 }
0x1441   : > { %v7465_v36 = vpop.f32.mrb[68].mxu1  ;;  %v7506_v63 = vpop.f32.mrb[56].mxu0 }
0x1442   : > { %v7466_v1 = vadd.f32 %v7465_v36, %v6924_v2  ;;  %v7507_v47 = vadd.f32 %v7506_v63, %v6932_v38  ;;  %v7467_v33 = vpop.f32.mrb[69].mxu1  ;;  %v7508_v51 = vpop.f32.mrb[57].mxu0 }
0x1443   : > { %v7469_v35 = vpop.f32.mrb[70].mxu1  ;;  %v7510_v54 = vpop.f32.mrb[58].mxu0  ;;  %v7509_v23 = vadd.f32 %v7508_v51, %v6936_v22  ;;  %v7468_v19 = vadd.f32 %v7467_v33, %v6928_v18 }
0x1444   : > { %v7554_v59 = vpack.c.bf16 %v7466_v1, %v7466_v1  ;;  %v7555_v55 = vpack.c.bf16 %v7507_v47, %v7507_v47  ;;  %v7470_v34 = vpop.f32.mrb[71].mxu1  ;;  %v7511_v32 = vpop.f32.mrb[59].mxu0 }
0x1445   : > { %v7999_v46 = vpack.c.bf16 %v7509_v23, %v7509_v23  ;;  %v7998_v24 = vpack.c.bf16 %v7468_v19, %v7468_v19 }
0x1446   : > { %7666 = vrot.lane.b32.xlu1 %v7555_v55, %s14304_s28  ;;  %7663 = vrot.lane.b32.xlu0 %v7554_v59, %s14304_s28  ;;  %v7561_v30 = vsel %vm3595_vm9, %v7555_v55, 0 }
0x1447   : > { %12765 = vmatpush3.bf16.xpose.msra.mxu0 %v7561_v30  ;;  %v8005_v49 = vsel %vm3595_vm9, %v7999_v46, 0 }
0x1448   : > { %12776 = vmatprep.subr.bf16.mxu0 %v14302_v11 }
0x144a   : > { %7778 = vrot.lane.b32.xlu1 %v7555_v55, %s14305_s1  ;;  %7889 = vrot.lane.b32.xlu0 %v7555_v55, %s14306_s15 }
0x144e   : > { %7776 = vrot.lane.b32.xlu1 %v7554_v59, %s14305_s1  ;;  %8110 = vrot.lane.b32.xlu0 %v7999_v46, %s14304_s28 }
0x144f   : > { %12767 = vmatmul.mubr.msk.bf16.vlgmr.msra.gmra.mrb[60].mxu0 %vm3595_vm9, %v7554_v59 }
0x1450   : > { %12778 = vmatprep.mubr.msk.bf16.mxu0 %vm14303_vm8, %v14302_v11 }
0x1452   : > { %7887 = vrot.lane.b32.xlu1 %v7554_v59, %s14306_s15  ;;  %8222 = vrot.lane.b32.xlu0 %v7999_v46, %s14305_s1 }
0x1456   : > { %8107 = vrot.lane.b32.xlu1 %v7998_v24, %s14304_s28  ;;  %8333 = vrot.lane.b32.xlu0 %v7999_v46, %s14306_s15 }
0x145a   : > { %8220 = vrot.lane.b32.xlu1 %v7998_v24, %s14305_s1 }
0x145e   : > { %8331 = vrot.lane.b32.xlu1 %v7998_v24, %s14306_s15 }
0x1481   : > { %v7547_v14 = vpop.f32.mrb[72].mxu1 }
0x1482   : > { %v7548_v27 = vadd.f32 %v7547_v14, %v6940_v53  ;;  %v17539_v8 = vpop.f32.mrb[73].mxu1 }
0x1483   : > { %v7551_v21 = vpop.f32.mrb[74].mxu1 }
0x1484   : > { %v17541_v48 = vpack.c.bf16 %v7548_v27, %v7548_v27  ;;  %v7552_v16 = vpop.f32.mrb[75].mxu1 }
0x1486   : > { %v7620_v41 = vsel %vm3659_vm10, %v17541_v48, 0 }
0x1487   : > { %12771 = vmatpush3.bf16.msra.mxu1 %v7620_v41 }
0x1488   : > { %12782 = vmatprep.subr.bf16.mxu1 %v14302_v11 }
0x14b8   : > { %v7667_v29 = vpop.permute.xlu1 %7666  ;;  %v7664_v43 = vpop.permute.xlu0 %7663 }
0x14b9   : > { %v7672_v42 = vsel %vm3595_vm9, %v7667_v29, 0 }
0x14ba   : > { %12777 = vmatpush3.bf16.xpose.msra.mxu0 %v7672_v42 }
0x14bb   : > { %12788 = vmatprep.subr.bf16.mxu0 %v14302_v11 }
0x14bc   : > { %v7779_v6 = vpop.permute.xlu1 %7778  ;;  %v7890_v57 = vpop.permute.xlu0 %7889 }
0x14bd   : > { %v7784_v5 = vsel %vm3595_vm9, %v7779_v6, 0  ;;  %v7895_v50 = vsel %vm3595_vm9, %v7890_v57, 0 }
0x14c0   : > { %v7777_v39 = vpop.permute.xlu1 %7776  ;;  %v8111_v3 = vpop.permute.xlu0 %8110 }
0x14c1   : > { %12779 = vmatmul.mubr.msk.bf16.vlgmr.msra.gmra.mrb[64].mxu0 %vm3595_vm9, %v7664_v43  ;;  %v8116_v28 = vsel %vm3595_vm9, %v8111_v3, 0 }
0x14c2   : > { %12789 = vmatpush3.bf16.xpose.msra.mxu0 %v7784_v5  ;;  %12790 = vmatprep.mubr.msk.bf16.mxu0 %vm14303_vm8, %v14302_v11 }
0x14c3   : > { %12800 = vmatprep.subr.bf16.mxu0 %v14302_v11 }
0x14c4   : > { %v7888_v37 = vpop.permute.xlu1 %7887  ;;  %v8223_v17 = vpop.permute.xlu0 %8222 }
0x14c5   : > { %v8228_v52 = vsel %vm3595_vm9, %v8223_v17, 0 }
0x14c8   : > { %v8108_v25 = vpop.permute.xlu1 %8107  ;;  %v8334_v56 = vpop.permute.xlu0 %8333 }
0x14c9   : > { %12791 = vmatmul.mubr.msk.bf16.vlgmr.msra.gmra.mrb[68].mxu0 %vm3595_vm9, %v7777_v39  ;;  %v8339_v58 = vsel %vm3595_vm9, %v8334_v56, 0 }
0x14ca   : > { %12801 = vmatpush3.bf16.xpose.msra.mxu0 %v7895_v50  ;;  %12802 = vmatprep.mubr.msk.bf16.mxu0 %vm14303_vm8, %v14302_v11 }
0x14cb   : > { %12812 = vmatprep.subr.bf16.mxu0 %v14302_v11 }
0x14cc   : > { %v8221_v7 = vpop.permute.xlu1 %8220 }
0x14d0   : > { %v8332_v31 = vpop.permute.xlu1 %8331 }
0x14d1   : > { %12803 = vmatmul.mubr.msk.bf16.vlgmr.msra.gmra.mrb[72].mxu0 %vm3595_vm9, %v7888_v37 }
0x14d2   : > { %12813 = vmatpush3.bf16.xpose.msra.mxu0 %v8005_v49  ;;  %12814 = vmatprep.mubr.msk.bf16.mxu0 %vm14303_vm8, %v14302_v11 }
0x14d3   : > { %12824 = vmatprep.subr.bf16.mxu0 %v14302_v11 }
0x14d9   : > { %12815 = vmatmul.mubr.msk.bf16.vlgmr.msra.gmra.mrb[76].mxu0 %vm3595_vm9, %v7998_v24 }
0x14da   : > { %12825 = vmatpush3.bf16.xpose.msra.mxu0 %v8116_v28  ;;  %12826 = vmatprep.mubr.msk.bf16.mxu0 %vm14303_vm8, %v14302_v11 }
0x14db   : > { %12836 = vmatprep.subr.bf16.mxu0 %v14302_v11 }
0x14e1   : > { %12827 = vmatmul.mubr.msk.bf16.vlgmr.msra.gmra.mrb[80].mxu0 %vm3595_vm9, %v8108_v25 }
0x14e2   : > { %12837 = vmatpush3.bf16.xpose.msra.mxu0 %v8228_v52  ;;  %12838 = vmatprep.mubr.msk.bf16.mxu0 %vm14303_vm8, %v14302_v11 }
0x14e3   : > { %12848 = vmatprep.subr.bf16.mxu0 %v14302_v11 }
0x14e9   : > { %12839 = vmatmul.mubr.msk.bf16.vlgmr.msra.gmra.mrb[84].mxu0 %vm3595_vm9, %v8221_v7 }
0x14ea   : > { %12849 = vmatpush3.bf16.xpose.msra.mxu0 %v8339_v58  ;;  %12850 = vmatprep.mubr.msk.bf16.mxu0 %vm14303_vm8, %v14302_v11 }
0x14f1   : > { %12851 = vmatmul.mubr.msk.bf16.vlgmr.msra.gmra.mrb[88].mxu0 %vm3595_vm9, %v8332_v31 }
0x1522   : > { %v7597_v0 = vpop.f32.mrb[60].mxu0 }
0x1523   : > { %v7603_v12 = vmul.f32 0.17677669, %v7597_v0  ;;  %v12768_v60 = vpop.f32.mrb[61].mxu0 }
0x1524   : > { %v7600_v2 = vpop.f32.mrb[62].mxu0 }
0x1525   : > { %v12769_v38 = vpop.f32.mrb[63].mxu0  ;;  %v7604_v36 = vsel %vm3643_vm11, %v7603_v12, -inf }
0x1526   : > { %7605 = vmax.xlane.f32.xlu0 %v7604_v36 }
0x1594   : > { %v7708_v63 = vpop.f32.mrb[64].mxu0 }
0x1595   : > { %v7714_v1 = vmul.f32 0.17677669, %v7708_v63  ;;  %v12780_v47 = vpop.f32.mrb[65].mxu0 }
0x1596   : > { %v7711_v33 = vpop.f32.mrb[66].mxu0 }
0x1597   : > { %v12781_v51 = vpop.f32.mrb[67].mxu0  ;;  %v7715_v35 = vsel %vm3643_vm11, %v7714_v1, -inf }
0x1598   : > { %7716 = vmax.xlane.f32.xlu1 %v7715_v35 }
0x159c   : > { %v7820_v54 = vpop.f32.mrb[68].mxu0 }
0x159d   : > { %v7826_v59 = vmul.f32 0.17677669, %v7820_v54  ;;  %v12792_v55 = vpop.f32.mrb[69].mxu0 }
0x159e   : > { %v7823_v22 = vpop.f32.mrb[70].mxu0 }
0x159f   : > { %v12793_v34 = vpop.f32.mrb[71].mxu0  ;;  %v7827_v32 = vsel %vm3643_vm11, %v7826_v59, -inf }
0x15a0   : > { %7828 = vmax.xlane.f32.xlu0 %v7827_v32 }
0x15a4   : > { %v7931_v30 = vpop.f32.mrb[72].mxu0 }
0x15a5   : > { %v7937_v23 = vmul.f32 0.17677669, %v7931_v30  ;;  %v12804_v18 = vpop.f32.mrb[73].mxu0 }
0x15a6   : > { %v7934_v46 = vpop.f32.mrb[74].mxu0 }
0x15a7   : > { %v12805_v19 = vpop.f32.mrb[75].mxu0  ;;  %v7938_v24 = vsel %vm3643_vm11, %v7937_v23, -inf }
0x15a8   : > { %7939 = vmax.xlane.f32.xlu0 %v7938_v24 }
0x15ac   : > { %v8041_v53 = vpop.f32.mrb[76].mxu0 }
0x15ad   : > { %v17582_v14 = vmul.f32 0.17677669, %v8041_v53  ;;  %v12816_v27 = vpop.f32.mrb[77].mxu0 }
0x15ae   : > { %v8044_v21 = vpop.f32.mrb[78].mxu0 }
0x15af   : > { %v12817_v16 = vpop.f32.mrb[79].mxu0  ;;  %v8048_v41 = vsel %vm3643_vm11, %v17582_v14, -inf }
0x15b0   : > { %8049 = vmax.xlane.f32.xlu1 %v8048_v41 }
0x15b3   : > { %v7606_v29 = vpop.xlane.xlu0 %7605 }
0x15b4   : > { %v7607_v42 = vsub.f32 %v7603_v12, %v7606_v29  ;;  %v8152_v6 = vpop.f32.mrb[80].mxu0 }
0x15b5   : > { %v17586_v43 = vmul.f32 0.17677669, %v8152_v6  ;;  %v12828_v5 = vpop.f32.mrb[81].mxu0 }
0x15b6   : > { %v7608_v57 = vmul.f32 1.442695, %v7607_v42  ;;  %v8155_v39 = vpop.f32.mrb[82].mxu0 }
0x15b7   : > { %v12829_v50 = vpop.f32.mrb[83].mxu0  ;;  %v8159_v37 = vsel %vm3643_vm11, %v17586_v43, -inf }
0x15b8   : > { %14004 = vpow2.f32 %v7608_v57  ;;  %8160 = vmax.xlane.f32.xlu0 %v8159_v37 }
0x15bc   : > { %v8264_v49 = vpop.f32.mrb[84].mxu0 }
0x15bd   : > { %v8270_v3 = vmul.f32 0.17677669, %v8264_v49  ;;  %v12840_v28 = vpop.f32.mrb[85].mxu0 }
0x15be   : > { %v8267_v17 = vpop.f32.mrb[86].mxu0 }
0x15bf   : > { %v12841_v25 = vpop.f32.mrb[87].mxu0  ;;  %v8271_v52 = vsel %vm3643_vm11, %v8270_v3, -inf  ;;  %v6944_v17 = vrot.slane %v17510_v4, %v16181_v44 }
0x15c0   : > { %8272 = vmax.xlane.f32.xlu1 %v8271_v52 }
0x15c1   : > { %v7550_v25 = vadd.f32 %v17539_v8, %v6944_v17  ;;  %v13716_v17 = vld [vmem:[%s18680_s12 + $0x120] ss:$8 sps:$4 sm:$0xff]  }
0x15c2   : > { %v14005_v56 = vpop.eup %14004 }
0x15c3   : > { %v7610_v7 = vsel %vm3643_vm11, %v14005_v56, 0.0  ;;  %v8000_v52 = vpack.c.bf16 %v7550_v25, %v7550_v25  ;;  %v13721_v25 = vld [vmem:[%s18680_s12 + $0x134] ss:$8 sps:$4 sm:$0xff]  }
0x15c4   : > { %7611 = vadd.xlane.f32.xlu1 %v7610_v7  ;;  %v8375_v58 = vpop.f32.mrb[88].mxu0 }
0x15c5   : > { %v8381_v31 = vmul.f32 0.17677669, %v8375_v58  ;;  %v12852_v0 = vpop.f32.mrb[89].mxu0 }
0x15c6   : > { %v8378_v12 = vpop.f32.mrb[90].mxu0 }
0x15c7   : > { %v12853_v60 = vpop.f32.mrb[91].mxu0  ;;  %v8382_v2 = vsel %vm3643_vm11, %v8381_v31, -inf }
0x15c8   : > { %8383 = vmax.xlane.f32.xlu0 %v8382_v2 }
0x1625   : > { %v7717_v38 = vpop.xlane.xlu1 %7716 }
0x1626   : > { %v7718_v36 = vsub.f32 %v7714_v1, %v7717_v38 }
0x1628   : > { %v7719_v63 = vmul.f32 1.442695, %v7718_v36 }
0x162a   : > { %14006 = vpow2.f32 %v7719_v63 }
0x162d   : > { %v7829_v47 = vpop.xlane.xlu0 %7828 }
0x162e   : > { %v7830_v33 = vsub.f32 %v7826_v59, %v7829_v47 }
0x1630   : > { %v7831_v51 = vmul.f32 1.442695, %v7830_v33 }
0x1632   : > { %14008 = vpow2.f32 %v7831_v51 }
0x1634   : > { %v17593_v35 = vpop.eup %14006 }
0x1635   : > { %v7940_v54 = vpop.xlane.xlu0 %7939  ;;  %v7721_v55 = vsel %vm3643_vm11, %v17593_v35, 0.0 }
0x1636   : > { %v7941_v22 = vsub.f32 %v7937_v23, %v7940_v54  ;;  %7722 = vadd.xlane.f32.xlu0 %v7721_v55  ;;  %v8064_v55 = vsel %vm3659_vm10, %v8000_v52, 0 }
0x1638   : > { %v7942_v34 = vmul.f32 1.442695, %v7941_v22 }
0x163a   : > { %14010 = vpow2.f32 %v7942_v34 }
0x163c   : > { %v17597_v32 = vpop.eup %14008 }
0x163d   : > { %v7833_v1 = vsel %vm3643_vm11, %v17597_v32, 0.0  ;;  %v8050_v18 = vpop.xlane.xlu1 %8049 }
0x163e   : > { %7834 = vadd.xlane.f32.xlu1 %v7833_v1  ;;  %v8051_v27 = vsub.f32 %v17582_v14, %v8050_v18 }
0x1640   : > { %v8052_v41 = vmul.f32 1.442695, %v8051_v27 }
0x1644   : > { %v17601_v30 = vpop.eup %14010 }
0x1645   : > { %v7944_v59 = vsel %vm3643_vm11, %v17601_v30, 0.0  ;;  %v8161_v21 = vpop.xlane.xlu0 %8160 }
0x1646   : > { %7945 = vadd.xlane.f32.xlu0 %v7944_v59  ;;  %v8162_v16 = vsub.f32 %v17586_v43, %v8161_v21 }
0x1648   : > { %v8163_v6 = vmul.f32 1.442695, %v8162_v16 }
0x164d   : > { %v8273_v46 = vpop.xlane.xlu1 %8272 }
0x164e   : > { %v8274_v29 = vsub.f32 %v8270_v3, %v8273_v46 }
0x164f   : > { %7839 = vrot.lane.b32.xlu1 %v17541_v48, %s14305_s1 }
0x1650   : > { %v8275_v5 = vmul.f32 1.442695, %v8274_v29 }
0x1651   : > { %v7612_v23 = vpop.xlane.xlu1 %7611 }
0x1652   : > { %14012 = vrcp.f32 %v7612_v23 }
0x1653   : > { %7950 = vrot.lane.b32.xlu1 %v17541_v48, %s14306_s15  ;;  %14014 = vpow2.f32 %v8052_v41 }
0x1654   : > { %14016 = vpow2.f32 %v8163_v6 }
0x1655   : > { %v8384_v42 = vpop.xlane.xlu0 %8383  ;;  %14018 = vpow2.f32 %v8275_v5 }
0x165c   : > { %7728 = vrot.lane.b32.xlu0 %v17541_v48, %s14304_s28  ;;  %v14013_v19 = vpop.eup %14012  ;;  %v8385_v48 = vsub.f32 %v8381_v31, %v8384_v42 }
0x165d   : > { %v7614_v24 = vmul.f32 %v14013_v19, %v14005_v56  ;;  %v14015_v14 = vpop.eup %14014 }
0x165e   : > { %v8386_v57 = vmul.f32 1.442695, %v8385_v48  ;;  %v17616_v39 = vpop.eup %14016  ;;  %v8054_v50 = vsel %vm3643_vm11, %v14015_v14, 0.0 }
0x165f   : > { %v7615_v53 = vpack.c.bf16 %v7614_v24, %v7614_v24  ;;  %v17619_v37 = vpop.eup %14018  ;;  %v8165_v43 = vsel %vm3643_vm11, %v17616_v39, 0.0 }
0x1660   : > { %14020 = vpow2.f32 %v8386_v57  ;;  %v8277_v49 = vsel %vm3643_vm11, %v17619_v37, 0.0 }
0x1661   : > { %12773 = vmatmul.mubr.msk.bf16.vlgmr.msra.gmra.mrb[76].mxu1 %vm3643_vm11, %v7615_v53 }
0x1662   : > { %12784 = vmatprep.mubr.msk.bf16.mxu1 %vm14303_vm8, %v14302_v11 }
0x166a   : > { %v17625_v3 = vpop.eup %14020 }
0x166b   : > { %v8388_v28 = vsel %vm3643_vm11, %v17625_v3, 0.0 }
0x1677   : > { %8055 = vadd.xlane.f32.xlu1 %v8054_v50 }
0x167b   : > { %8166 = vadd.xlane.f32.xlu1 %v8165_v43  ;;  %8278 = vadd.xlane.f32.xlu0 %v8277_v49  ;;  %v13710_v43 = vld [vmem:[%s18680_s12 + $0x100] ss:$8 sps:$4 sm:$0xff]   ;;  %v13712_v49 = vld [vmem:[%s18680_s12 + $0x104] ss:$8 sps:$4 sm:$0xff]  }
0x167c   : > { %8680 = vmatprep.subr.bf16.mxu0 %v13712_v49  ;;  %v13755_v49 = vld [vmem:[%s18680_s12 + $0x1f0] ss:$8 sps:$4 sm:$0xff]  }
0x167d   : > { %8681 = vmatpush1.bf16.msra.mxu0 %v13710_v43 }
0x167f   : > { %8389 = vadd.xlane.f32.xlu1 %v8388_v28  ;;  %v13718_v28 = vld [vmem:[%s18680_s12 + $0x124] ss:$8 sps:$4 sm:$0xff]  }
0x1690   : > { %8283 = vrot.lane.b32.xlu1 %v8000_v52, %s14305_s1 }
0x1691   : > { %8172 = vrot.lane.b32.xlu0 %v8000_v52, %s14304_s28 }
0x1695   : > { %8394 = vrot.lane.b32.xlu0 %v8000_v52, %s14306_s15  ;;  %v13719_v52 = vld [vmem:[%s18680_s12 + $0x130] ss:$8 sps:$4 sm:$0xff]  }
0x16c3   : > { %v7723_v56 = vpop.xlane.xlu0 %7722 }
0x16c4   : > { %14022 = vrcp.f32 %v7723_v56  ;;  %v13724_v56 = vld [vmem:[%s18680_s12 + $0x144] ss:$8 sps:$4 sm:$0xff]  }
0x16cb   : > { %v7835_v7 = vpop.xlane.xlu1 %7834 }
0x16cc   : > { %14024 = vrcp.f32 %v7835_v7  ;;  %v13722_v7 = vld [vmem:[%s18680_s12 + $0x140] ss:$8 sps:$4 sm:$0xff]  }
0x16ce   : > { %v14023_v58 = vpop.eup %14022 }
0x16cf   : > { %v7725_v0 = vmul.f32 %v14023_v58, %v17593_v35  ;;  %v7840_v60 = vpop.permute.xlu1 %7839  ;;  %v13727_v58 = vld [vmem:[%s18680_s12 + $0x154] ss:$8 sps:$4 sm:$0xff]  }
0x16d0   : > { %v7845_v38 = vsel %vm3659_vm10, %v7840_v60, 0  ;;  %v13731_v60 = vld [vmem:[%s18680_s12 + $0x170] ss:$8 sps:$4 sm:$0xff]  }
0x16d1   : > { %v7726_v8 = vpack.c.bf16 %v7725_v0, %v7725_v0  ;;  %v13730_v0 = vld [vmem:[%s18680_s12 + $0x164] ss:$8 sps:$4 sm:$0xff]  }
0x16d3   : > { %v7946_v31 = vpop.xlane.xlu0 %7945  ;;  %v7951_v63 = vpop.permute.xlu1 %7950 }
0x16d4   : > { %14026 = vrcp.f32 %v7946_v31  ;;  %v7956_v51 = vsel %vm3659_vm10, %v7951_v63, 0  ;;  %v13725_v31 = vld [vmem:[%s18680_s12 + $0x150] ss:$8 sps:$4 sm:$0xff]   ;;  %v13742_v63 = vld [vmem:[%s18680_s12 + $0x1a4] ss:$8 sps:$4 sm:$0xff]  }
0x16d6   : > { %v14025_v2 = vpop.eup %14024 }
0x16d7   : > { %v7729_v12 = vpop.permute.xlu0 %7728  ;;  %v7837_v36 = vmul.f32 %v14025_v2, %v17597_v32  ;;  %v13734_v2 = vld [vmem:[%s18680_s12 + $0x180] ss:$8 sps:$4 sm:$0xff]  }
0x16d8   : > { %v7734_v4 = vsel %vm3659_vm10, %v7729_v12, 0  ;;  %v13728_v12 = vld [vmem:[%s18680_s12 + $0x160] ss:$8 sps:$4 sm:$0xff]  }
0x16d9   : > { %12783 = vmatpush3.bf16.msra.mxu1 %v7734_v4  ;;  %v7838_v47 = vpack.c.bf16 %v7837_v36, %v7837_v36  ;;  %v13733_v4 = vld [vmem:[%s18680_s12 + $0x174] ss:$8 sps:$4 sm:$0xff]   ;;  %v13737_v36 = vld [vmem:[%s18680_s12 + $0x190] ss:$8 sps:$4 sm:$0xff]  }
0x16da   : > { %12794 = vmatprep.subr.bf16.mxu1 %v14302_v11 }
0x16dc   : > { %12785 = vmatmul.mubr.msk.bf16.vlgmr.msra.gmra.mrb[80].mxu1 %vm3643_vm11, %v7726_v8  ;;  %v13736_v8 = vld [vmem:[%s18680_s12 + $0x184] ss:$8 sps:$4 sm:$0xff]  }
0x16dd   : > { %12795 = vmatpush3.bf16.msra.mxu1 %v7845_v38  ;;  %12796 = vmatprep.mubr.msk.bf16.mxu1 %vm14303_vm8, %v14302_v11  ;;  %v13739_v38 = vld [vmem:[%s18680_s12 + $0x194] ss:$8 sps:$4 sm:$0xff]  }
0x16de   : > { %12806 = vmatprep.subr.bf16.mxu1 %v14302_v11  ;;  %v14027_v33 = vpop.eup %14026 }
0x16df   : > { %v7948_v35 = vmul.f32 %v14027_v33, %v17601_v30 }
0x16e1   : > { %v7949_v54 = vpack.c.bf16 %v7948_v35, %v7948_v35 }
0x16e4   : > { %12797 = vmatmul.mubr.msk.bf16.vlgmr.msra.gmra.mrb[84].mxu1 %vm3643_vm11, %v7838_v47  ;;  %v13740_v47 = vld [vmem:[%s18680_s12 + $0x1a0] ss:$8 sps:$4 sm:$0xff]  }
0x16e5   : > { %12807 = vmatpush3.bf16.msra.mxu1 %v7956_v51  ;;  %12808 = vmatprep.mubr.msk.bf16.mxu1 %vm14303_vm8, %v14302_v11 }
0x16e6   : > { %12818 = vmatprep.subr.bf16.mxu1 %v14302_v11 }
0x16ec   : > { %12809 = vmatmul.mubr.msk.bf16.vlgmr.msra.gmra.mrb[88].mxu1 %vm3643_vm11, %v7949_v54 }
0x16ed   : > { %12819 = vmatpush3.bf16.msra.mxu1 %v8064_v55  ;;  %12820 = vmatprep.mubr.msk.bf16.mxu1 %vm14303_vm8, %v14302_v11 }
0x16ee   : > { %12830 = vmatprep.subr.bf16.mxu1 %v14302_v11 }
0x1704   : > { %v8056_v22 = vpop.xlane.xlu1 %8055 }
0x1705   : > { %14028 = vrcp.f32 %v8056_v22 }
0x1708   : > { %v8167_v34 = vpop.xlane.xlu1 %8166  ;;  %v8279_v32 = vpop.xlane.xlu0 %8278 }
0x1709   : > { %14030 = vrcp.f32 %v8167_v34 }
0x170a   : > { %14032 = vrcp.f32 %v8279_v32 }
0x170c   : > { %v8173_v59 = vpop.permute.xlu0 %8172  ;;  %v8390_v23 = vpop.xlane.xlu1 %8389 }
0x170d   : > { %v8178_v19 = vsel %vm3659_vm10, %v8173_v59, 0  ;;  %14034 = vrcp.f32 %v8390_v23 }
0x170f   : > { %v14029_v1 = vpop.eup %14028 }
0x1710   : > { %v8058_v30 = vmul.f32 %v14029_v1, %v14015_v14  ;;  %v8284_v53 = vpop.permute.xlu1 %8283  ;;  %v8395_v29 = vpop.permute.xlu0 %8394 }
0x1711   : > { %v8289_v16 = vsel %vm3659_vm10, %v8284_v53, 0  ;;  %v8400_v5 = vsel %vm3659_vm10, %v8395_v29, 0  ;;  %v13748_v53 = vld [vmem:[%s18680_s12 + $0x1c4] ss:$8 sps:$4 sm:$0xff]  }
0x1712   : > { %v8059_v18 = vpack.c.bf16 %v8058_v30, %v8058_v30 }
0x1713   : > { %v14031_v46 = vpop.eup %14030 }
0x1714   : > { %12821 = vmatmul.mubr.msk.bf16.vlgmr.msra.gmra.mrb[92].mxu1 %vm3643_vm11, %v8059_v18  ;;  %v8169_v24 = vmul.f32 %v14031_v46, %v17616_v39  ;;  %v14033_v21 = vpop.eup %14032  ;;  %v13745_v46 = vld [vmem:[%s18680_s12 + $0x1b4] ss:$8 sps:$4 sm:$0xff]  }
0x1715   : > { %12831 = vmatpush3.bf16.msra.mxu1 %v8178_v19  ;;  %12832 = vmatprep.mubr.msk.bf16.mxu1 %vm14303_vm8, %v14302_v11  ;;  %v8281_v41 = vmul.f32 %v14033_v21, %v17619_v37  ;;  %v13743_v19 = vld [vmem:[%s18680_s12 + $0x1b0] ss:$8 sps:$4 sm:$0xff]   ;;  %v13746_v21 = vld [vmem:[%s18680_s12 + $0x1c0] ss:$8 sps:$4 sm:$0xff]  }
0x1716   : > { %12842 = vmatprep.subr.bf16.mxu1 %v14302_v11  ;;  %v8170_v27 = vpack.c.bf16 %v8169_v24, %v8169_v24 }
0x1717   : > { %v8282_v42 = vpack.c.bf16 %v8281_v41, %v8281_v41  ;;  %v14035_v6 = vpop.eup %14034  ;;  %v13751_v41 = vld [vmem:[%s18680_s12 + $0x1d4] ss:$8 sps:$4 sm:$0xff]  }
0x1718   : > { %v8392_v48 = vmul.f32 %v14035_v6, %v17625_v3  ;;  %v13713_v3 = vld [vmem:[%s18680_s12 + $0x110] ss:$8 sps:$4 sm:$0xff]  }
0x171a   : > { %v8393_v57 = vpack.c.bf16 %v8392_v48, %v8392_v48  ;;  %v13754_v48 = vld [vmem:[%s18680_s12 + $0x1e4] ss:$8 sps:$4 sm:$0xff]  }
0x171c   : > { %12833 = vmatmul.mubr.msk.bf16.vlgmr.msra.gmra.mrb[96].mxu1 %vm3643_vm11, %v8170_v27 }
0x171d   : > { %12843 = vmatpush3.bf16.msra.mxu1 %v8289_v16  ;;  %12844 = vmatprep.mubr.msk.bf16.mxu1 %vm14303_vm8, %v14302_v11 }
0x171e   : > { %12854 = vmatprep.subr.bf16.mxu1 %v14302_v11 }
0x1724   : > { %12845 = vmatmul.mubr.msk.bf16.vlgmr.msra.gmra.mrb[100].mxu1 %vm3643_vm11, %v8282_v42  ;;  %v13749_v42 = vld [vmem:[%s18680_s12 + $0x1d0] ss:$8 sps:$4 sm:$0xff]  }
0x1725   : > { %12855 = vmatpush3.bf16.msra.mxu1 %v8400_v5  ;;  %12856 = vmatprep.mubr.msk.bf16.mxu1 %vm14303_vm8, %v14302_v11  ;;  %v13715_v11 = vld [vmem:[%s18680_s12 + $0x114] ss:$8 sps:$4 sm:$0xff]  }
0x1726   : > { %8682 = vmatprep.subr.bf16.mxu0 %v13715_v11 }
0x1727   : > { %8683 = vmatpush1.bf16.msra.mxu0 %v13713_v3 }
0x1728   : > { %8684 = vmatprep.subr.bf16.mxu0 %v13718_v28 }
0x172b   : > { %8685 = vmatpush1.bf16.msra.mxu0 %v13716_v17 }
0x172c   : > { %12857 = vmatmul.mubr.msk.bf16.vlgmr.msra.gmra.mrb[104].mxu1 %vm3643_vm11, %v8393_v57  ;;  %8686 = vmatprep.subr.bf16.mxu0 %v13721_v25 }
0x172f   : > { %8687 = vmatpush1.bf16.msra.mxu0 %v13719_v52 }
0x1730   : > { %8688 = vmatprep.subr.bf16.mxu0 %v13724_v56 }
0x1733   : > { %8689 = vmatpush1.bf16.msra.mxu0 %v13722_v7 }
0x1734   : > { %v17673_v14 = vpop.f32.mrb[76].mxu1  ;;  %8690 = vmatprep.subr.bf16.mxu0 %v13727_v58 }
0x1735   : > { %v12774_v39 = vpop.f32.mrb[77].mxu1 }
0x1736   : > { %v7659_v50 = vpop.f32.mrb[78].mxu1  ;;  %v13752_v39 = vld [vmem:[%s18680_s12 + $0x1e0] ss:$8 sps:$4 sm:$0xff]  }
0x1737   : > { %v12775_v37 = vpop.f32.mrb[79].mxu1  ;;  %8691 = vmatpush1.bf16.msra.mxu0 %v13725_v31 }
0x1738   : > { %8692 = vmatprep.subr.bf16.mxu0 %v13730_v0  ;;  %v13757_v37 = vld [vmem:[%s18680_s12 + $0x1f4] ss:$8 sps:$4 sm:$0xff]  }
0x173b   : > { %8693 = vmatpush1.bf16.msra.mxu0 %v13728_v12 }
0x173c   : > { %8694 = vmatprep.subr.bf16.mxu0 %v13733_v4 }
0x173f   : > { %8695 = vmatpush1.bf16.msra.mxu0 %v13731_v60 }
0x1740   : > { %8696 = vmatprep.subr.bf16.mxu0 %v13736_v8 }
0x1743   : > { %8697 = vmatpush1.bf16.msra.mxu0 %v13734_v2 }
0x1744   : > { %8698 = vmatprep.subr.bf16.mxu0 %v13739_v38 }
0x1747   : > { %8699 = vmatpush1.bf16.msra.mxu0 %v13737_v36 }
0x1748   : > { %8700 = vmatprep.subr.bf16.mxu0 %v13742_v63 }
0x174b   : > { %8701 = vmatpush1.bf16.msra.mxu0 %v13740_v47 }
0x174c   : > { %8702 = vmatprep.subr.bf16.mxu0 %v13745_v46 }
0x174f   : > { %8703 = vmatpush1.bf16.msra.mxu0 %v13743_v19 }
0x1750   : > { %8704 = vmatprep.subr.bf16.mxu0 %v13748_v53 }
0x1753   : > { %8705 = vmatpush1.bf16.msra.mxu0 %v13746_v21  ;;  %v12051_v21 = vld [vmem:[%s18778_s27 + $0x420] sm:$0xff] }
0x1754   : > { %8706 = vmatprep.subr.bf16.mxu0 %v13751_v41 }
0x1757   : > { %8707 = vmatpush1.bf16.msra.mxu0 %v13749_v42  ;;  %v12059_v42 = vld [vmem:[%s18778_s27 + $0x460] sm:$0xff] }
0x1758   : > { %8708 = vmatprep.subr.bf16.mxu0 %v13754_v48 }
0x175b   : > { %8709 = vmatpush1.bf16.msra.mxu0 %v13752_v39  ;;  %v12060_v39 = vld [vmem:[%s18778_s27 + $0x468] sm:$0xff] }
0x175c   : > { %8710 = vmatprep.subr.bf16.mxu0 %v13757_v37 }
0x175f   : > { %8711 = vmatpush1.bf16.msra.mxu0 %v13755_v49  ;;  %v12064_v49 = vld [vmem:[%s18778_s27 + $0x488] sm:$0xff] }
0x17af   : > { %v7770_v33 = vpop.f32.mrb[80].mxu1 }
0x17b0   : > { %v12786_v51 = vpop.f32.mrb[81].mxu1 }
0x17b1   : > { %v7773_v35 = vpop.f32.mrb[82].mxu1 }
0x17b2   : > { %v12787_v54 = vpop.f32.mrb[83].mxu1 }
0x17b7   : > { %v7881_v55 = vpop.f32.mrb[84].mxu1 }
0x17b8   : > { %v12798_v22 = vpop.f32.mrb[85].mxu1 }
0x17b9   : > { %v7884_v34 = vpop.f32.mrb[86].mxu1 }
0x17ba   : > { %v12799_v32 = vpop.f32.mrb[87].mxu1  ;;  %v8508_v34 = vld [vmem:[#allocation8 + $0x2] sm:$0x3] }
0x17bb   : > { %v8513_v32 = vrot.slane %v8508_v34, %v15702_v13 }
0x17bf   : > { %v7992_v1 = vpop.f32.mrb[88].mxu1 }
0x17c0   : > { %v12810_v30 = vpop.f32.mrb[89].mxu1 }
0x17c1   : > { %v7995_v59 = vpop.f32.mrb[90].mxu1 }
0x17c2   : > { %v12811_v18 = vpop.f32.mrb[91].mxu1 }
0x17e7   : > { %v8100_v23 = vpop.f32.mrb[92].mxu1 }
0x17e8   : > { %v12822_v24 = vpop.f32.mrb[93].mxu1 }
0x17e9   : > { %v8103_v27 = vpop.f32.mrb[94].mxu1 }
0x17ea   : > { %v12823_v16 = vpop.f32.mrb[95].mxu1  ;;  %v12047_v27 = vld [vmem:[%s18778_s27 + $0x400] sm:$0xff] }
0x17eb   : > { %v12176_v16 = vcombine.low %v12047_v27, %v12051_v21  ;;  %v12177_v41 = vcombine.high %v12047_v27, %v12051_v21  ;;  %v12103_v21 = vld [vmem:[%s18778_s27 + $0x5c0] sm:$0xff] }
0x17ed   : > { %9593 = vmatprep.subr.bf16.mxu1 %v12177_v41  ;;  %v12108_v41 = vld [vmem:[%s18778_s27 + $0x5e8] sm:$0xff] }
0x17ee   : > { %9594 = vmatpush1.bf16.msra.mxu1 %v12176_v16  ;;  %v12104_v16 = vld [vmem:[%s18778_s27 + $0x5c8] sm:$0xff] }
0x17ef   : > { %v8214_v29 = vpop.f32.mrb[96].mxu1 }
0x17f0   : > { %v13023_v6 = vpack.i.bf16 %v7770_v33, %v8214_v29  ;;  %v12834_v5 = vpop.f32.mrb[97].mxu1  ;;  %v12055_v29 = vld [vmem:[%s18778_s27 + $0x440] sm:$0xff] }
0x17f1   : > { %v8217_v57 = vpop.f32.mrb[98].mxu1  ;;  %v12185_v48 = vcombine.high %v12055_v29, %v12059_v42 }
0x17f2   : > { %13024 = vrot.lane.b32.xlu0 %v13023_v6, %s14306_s15  ;;  %v12835_v50 = vpop.f32.mrb[99].mxu1  ;;  %v12056_v57 = vld [vmem:[%s18778_s27 + $0x448] sm:$0xff] }
0x17f3   : > { %v12063_v50 = vld [vmem:[%s18778_s27 + $0x480] sm:$0xff]  ;;  %v12187_v37 = vcombine.high %v12056_v57, %v12060_v39  ;;  %9595 = vmatprep.subr.bf16.mxu1 %v12185_v48 }
0x17f4   : > { %v12115_v48 = vld [vmem:[%s18778_s27 + $0x620] sm:$0xff] }
0x17f7   : > { %v8325_v43 = vpop.f32.mrb[100].mxu1 }
0x17f8   : > { %v13028_v11 = vpack.i.bf16 %v7881_v55, %v8325_v43  ;;  %v12846_v3 = vpop.f32.mrb[101].mxu1  ;;  %v12067_v43 = vld [vmem:[%s18778_s27 + $0x4a0] sm:$0xff] }
0x17f9   : > { %v8328_v28 = vpop.f32.mrb[102].mxu1  ;;  %v12184_v3 = vcombine.low %v12055_v29, %v12059_v42 }
0x17fa   : > { %13029 = vrot.lane.b32.xlu1 %v13028_v11, %s14305_s1  ;;  %v12847_v17 = vpop.f32.mrb[103].mxu1  ;;  %v12068_v11 = vld [vmem:[%s18778_s27 + $0x4a8] sm:$0xff]  ;;  %v12186_v28 = vcombine.low %v12056_v57, %v12060_v39 }
0x17fb   : > { %v12193_v17 = vcombine.high %v12063_v50, %v12067_v43  ;;  %9596 = vmatpush1.bf16.msra.mxu1 %v12184_v3  ;;  %v12112_v57 = vld [vmem:[%s18778_s27 + $0x608] sm:$0xff]  ;;  %v12123_v3 = vld [vmem:[%s18778_s27 + $0x660] sm:$0xff] }
0x17fc   : > { %v12116_v39 = vld [vmem:[%s18778_s27 + $0x628] sm:$0xff] }
0x17fd   : > { %9597 = vmatprep.subr.bf16.mxu1 %v12193_v17  ;;  %v12124_v17 = vld [vmem:[%s18778_s27 + $0x668] sm:$0xff] }
0x17ff   : > { %v8436_v25 = vpop.f32.mrb[104].mxu1 }
0x1800   : > { %v13033_v52 = vpack.i.bf16 %v7992_v1, %v8436_v25  ;;  %v12858_v56 = vpop.f32.mrb[105].mxu1  ;;  %v12195_v25 = vcombine.high %v12064_v49, %v12068_v11 }
0x1801   : > { %v8439_v7 = vpop.f32.mrb[106].mxu1  ;;  %v12075_v56 = vld [vmem:[%s18778_s27 + $0x4e0] sm:$0xff] }
0x1802   : > { %13034 = vrot.lane.b32.xlu0 %v13033_v52, %s14304_s28  ;;  %v12859_v58 = vpop.f32.mrb[107].mxu1  ;;  %v12071_v52 = vld [vmem:[%s18778_s27 + $0x4c0] sm:$0xff]  ;;  %v12072_v7 = vld [vmem:[%s18778_s27 + $0x4c8] sm:$0xff]  ;;  %s18782_s28 = sld [smem:[#allocation20_spill]] }
0x1803   : > { %v12076_v58 = vld [vmem:[%s18778_s27 + $0x4e8] sm:$0xff] }
0x1808   : > { %s711_s1 = sand.u32 1, %s18782_s28  }
0x1809   : > { %s11048_s15 = sshll.u32 %s711_s1, 3  ;;  %s10900_s28 = scalar_lea.sflag [#allocation4], %s711_s1 }
0x180a   : > { %s713_s16 = scalar_lea.vmem [#allocation13], %s11048_s15  ;;  %s14214_s15 = sshll.u32 %s14307_s2, 4  ;;  %s14215_s15 = int_to_ptr.vmem [resolvable:$false] %s14214_s15 }
0x180b   : > { %s10913_s3 = sshll.u32 %s713_s16, 4  ;;  %s14216_s30 = scalar_lea.vmem %s14215_s15, 256  ;;  %s18628_s3 = int_to_ptr.vmem [resolvable:$true] %s10913_s3 }
0x180c   : > { %s14210_s19 = scalar_lea.vmem %s18628_s3, 128  ;;  %p14217_p5 = scmp.lt.s32.totalorder %s18628_s3, %s14215_s15 }
0x180d   : > { %p14211_p4 = scmp.ne.s32.totalorder %s18628_s3, %s14210_s19  ;;  %p14218_p0 = scmp.lt.s32.totalorder %s14216_s30, %s14210_s19 }
0x180f   : > { %p14212_p8 = pnand %p14211_p4, %p18787_p7  ;;  %p14219_p6 = por %p14218_p0, %p14217_p5 }
0x1811   : > { %p14213_p11 = pneg %p14212_p8 }
0x1813   : > { %p14220_p9 = pnand %p14219_p6, %p14213_p11 }
0x1864   : > { %v13025_v31 = vpop.permute.xlu0 %13024 }
0x1865   : > { %v13027_v12 = vunpack.i.h.bf16 %v13025_v31  ;;  %v13026_v4 = vunpack.i.l.bf16 %v13025_v31  ;;  %v12192_v31 = vcombine.low %v12063_v50, %v12067_v43 }
0x1867   : > { %v8466_v38 = vsel %vm3595_vm9, %v17673_v14, %v13027_v12  ;;  %v8469_v36 = vsel %vm3595_vm9, %v8100_v23, %v13026_v4  ;;  %v8517_v14 = vrot.slane %v8508_v34, %v15708_v62  ;;  %v12201_v12 = vcombine.high %v12071_v52, %v12075_v56  ;;  %9598 = vmatpush1.bf16.msra.mxu1 %v12192_v31  ;;  %v12131_v31 = vld [vmem:[%s18778_s27 + $0x6a0] sm:$0xff] }
0x1868   : > { %v12203_v4 = vcombine.high %v12072_v7, %v12076_v58 }
0x1869   : > { %9599 = vmatprep.subr.bf16.mxu1 %v12201_v12  ;;  %v12132_v12 = vld [vmem:[%s18778_s27 + $0x6a8] sm:$0xff] }
0x186c   : > { %v13030_v0 = vpop.permute.xlu1 %13029 }
0x186d   : > { %v13032_v60 = vunpack.i.h.bf16 %v13030_v0  ;;  %v13031_v8 = vunpack.i.l.bf16 %v13030_v0  ;;  %v12194_v0 = vcombine.low %v12064_v49, %v12068_v11  ;;  %v12243_v49 = vcombine.high %v12112_v57, %v12116_v39  ;;  %v12119_v11 = vld [vmem:[%s18778_s27 + $0x640] sm:$0xff] }
0x186f   : > { %v8467_v33 = vsel %vm754_vm0, %v8466_v38, %v13032_v60  ;;  %v8470_v51 = vsel %vm754_vm0, %v8469_v36, %v13031_v8  ;;  %v12079_v60 = vld [vmem:[%s18778_s27 + $0x500] sm:$0xff]  ;;  %v12084_v38 = vld [vmem:[%s18778_s27 + $0x528] sm:$0xff]  ;;  %v12200_v36 = vcombine.low %v12071_v52, %v12075_v56  ;;  %v12242_v52 = vcombine.low %v12112_v57, %v12116_v39 }
0x1870   : > { %v12083_v8 = vld [vmem:[%s18778_s27 + $0x520] sm:$0xff]  ;;  %v12249_v56 = vcombine.high %v12119_v11, %v12123_v3 }
0x1871   : > { %9600 = vmatpush1.bf16.msra.mxu1 %v12200_v36 }
0x1874   : > { %v13035_v2 = vpop.permute.xlu0 %13034 }
0x1875   : > { %v13037_v63 = vunpack.i.h.bf16 %v13035_v2  ;;  %v13036_v47 = vunpack.i.l.bf16 %v13035_v2  ;;  %v12080_v2 = vld [vmem:[%s18778_s27 + $0x508] sm:$0xff] }
0x1876   : > { %v12210_v34 = vcombine.low %v12080_v2, %v12084_v38 }
0x1877   : > { %v8468_v35 = vsel %vm4509_vm12, %v8467_v33, %v13037_v63  ;;  %v8471_v54 = vsel %vm4509_vm12, %v8470_v51, %v13036_v47  ;;  %v12202_v63 = vcombine.low %v12072_v7, %v12076_v58  ;;  %v12209_v47 = vcombine.high %v12079_v60, %v12083_v8  ;;  %v12087_v51 = vld [vmem:[%s18778_s27 + $0x540] sm:$0xff] }
0x1878   : > { %v8472_v55 = vpack.c.bf16 %v8468_v35, %v8468_v35  ;;  %v8473_v22 = vpack.c.bf16 %v8471_v54, %v8471_v54  ;;  %v12211_v33 = vcombine.high %v12080_v2, %v12084_v38  ;;  %v12091_v35 = vld [vmem:[%s18778_s27 + $0x560] sm:$0xff]  ;;  %v12088_v54 = vld [vmem:[%s18778_s27 + $0x548] sm:$0xff] }
0x1879   : > { %9601 = vmatprep.subr.bf16.mxu1 %v12209_v47  ;;  %v12127_v58 = vld [vmem:[%s18778_s27 + $0x680] sm:$0xff] }
0x187a   : > { %8712 = vmatprep.mubr.bf16.mxu0 %v8473_v22  ;;  %v12208_v22 = vcombine.low %v12079_v60, %v12083_v8  ;;  %v12257_v8 = vcombine.high %v12127_v58, %v12131_v31  ;;  %v12256_v38 = vcombine.low %v12127_v58, %v12131_v31  ;;  %v12172_v58 = vld [vmem:[%s18778_s27 + $0x7e8] sm:$0xff] }
0x187b   : > { %8713 = vmatmul.mubr.bf16.vlgmr.msra.gmra.mrb[92].mxu0 %v8472_v55  ;;  %v12092_v55 = vld [vmem:[%s18778_s27 + $0x568] sm:$0xff] }
0x187c   : > { %9602 = vmatpush1.bf16.msra.mxu1 %v12208_v22  ;;  %v12135_v22 = vld [vmem:[%s18778_s27 + $0x6c0] sm:$0xff] }
0x194e   : > { %v8714_v1 = vpop.f32.mrb[92].mxu0 }
0x194f   : > { %v8715_v30 = vadd.f32 %v8714_v1, %v8513_v32  ;;  %v8716_v59 = vpop.f32.mrb[93].mxu0  ;;  %v12217_v32 = vcombine.high %v12087_v51, %v12091_v35  ;;  %v12095_v1 = vld [vmem:[%s18778_s27 + $0x580] sm:$0xff] }
0x1950   : > { %v8717_v18 = vadd.f32 %v8716_v59, %v8517_v14  ;;  %v8718_v46 = vpop.f32.mrb[94].mxu0  ;;  %v12219_v14 = vcombine.high %v12088_v54, %v12092_v55  ;;  %v12096_v59 = vld [vmem:[%s18778_s27 + $0x588] sm:$0xff] }
0x1951   : > { %v17784_v23 = vadd.f32 %v8715_v30, %v17175_v26  ;;  %v8719_v19 = vpop.f32.mrb[95].mxu0  ;;  %v12048_v26 = vld [vmem:[%s18778_s27 + $0x408] sm:$0xff]  ;;  %v12099_v30 = vld [vmem:[%s18778_s27 + $0x5a0] sm:$0xff]  ;;  %v12216_v46 = vcombine.low %v12087_v51, %v12091_v35  ;;  %9603 = vmatprep.subr.bf16.mxu1 %v12217_v32 }
0x1952   : > { %v17787_v24 = vadd.f32 %v8717_v18, %v17178_v40  ;;  %v12052_v40 = vld [vmem:[%s18778_s27 + $0x428] sm:$0xff]  ;;  %v12218_v19 = vcombine.low %v12088_v54, %v12092_v55 }
0x1953   : > { %v12178_v6 = vcombine.low %v12048_v26, %v12052_v40  ;;  %v12179_v5 = vcombine.high %v12048_v26, %v12052_v40  ;;  %v12100_v18 = vld [vmem:[%s18778_s27 + $0x5a8] sm:$0xff]  ;;  %v12107_v26 = vld [vmem:[%s18778_s27 + $0x5e0] sm:$0xff]  ;;  %9604 = vmatpush1.bf16.msra.mxu1 %v12216_v46  ;;  %v12224_v40 = vcombine.low %v12095_v1, %v12099_v30 }
0x1954   : > { %v8723_v53 = vadd.f32 %v17787_v24, %v17784_v23  ;;  %v12227_v27 = vcombine.high %v12096_v59, %v12100_v18  ;;  %v12226_v29 = vcombine.low %v12096_v59, %v12100_v18  ;;  %v12233_v42 = vcombine.high %v12103_v21, %v12107_v26  ;;  %v12136_v32 = vld [vmem:[%s18778_s27 + $0x6c8] sm:$0xff]  ;;  %v12143_v46 = vld [vmem:[%s18778_s27 + $0x700] sm:$0xff] }
0x1955   : > { %9634 = vmatprep.subr.bf16.mxu0 %v12179_v5  ;;  %v12111_v5 = vld [vmem:[%s18778_s27 + $0x600] sm:$0xff]  ;;  %v12232_v50 = vcombine.low %v12103_v21, %v12107_v26  ;;  %v12148_v21 = vld [vmem:[%s18778_s27 + $0x728] sm:$0xff] }
0x1956   : > { %8724 = vadd.xlane.f32.xlu1 %v8723_v53  ;;  %9635 = vmatpush1.bf16.msra.mxu0 %v12178_v6  ;;  %v12225_v53 = vcombine.high %v12095_v1, %v12099_v30  ;;  %v12235_v6 = vcombine.high %v12104_v16, %v12108_v41  ;;  %v12241_v43 = vcombine.high %v12111_v5, %v12115_v48  ;;  %v12140_v1 = vld [vmem:[%s18778_s27 + $0x6e8] sm:$0xff] }
0x1957   : > { %9636 = vmatprep.subr.bf16.mxu0 %v12187_v37  ;;  %v12234_v37 = vcombine.low %v12104_v16, %v12108_v41  ;;  %v12266_v59 = vcombine.low %v12136_v32, %v12140_v1  ;;  %v12267_v18 = vcombine.high %v12136_v32, %v12140_v1 }
0x1958   : > { %9605 = vmatprep.subr.bf16.mxu1 %v12225_v53  ;;  %v12144_v53 = vld [vmem:[%s18778_s27 + $0x708] sm:$0xff] }
0x1959   : > { %9606 = vmatpush1.bf16.msra.mxu1 %v12224_v40  ;;  %v12274_v16 = vcombine.low %v12144_v53, %v12148_v21  ;;  %v12275_v41 = vcombine.high %v12144_v53, %v12148_v21  ;;  %v12151_v40 = vld [vmem:[%s18778_s27 + $0x740] sm:$0xff] }
0x195a   : > { %9637 = vmatpush1.bf16.msra.mxu0 %v12186_v28  ;;  %9607 = vmatprep.subr.bf16.mxu1 %v12233_v42  ;;  %v12120_v28 = vld [vmem:[%s18778_s27 + $0x648] sm:$0xff] }
0x195b   : > { %9638 = vmatprep.subr.bf16.mxu0 %v12195_v25  ;;  %v12240_v25 = vcombine.low %v12111_v5, %v12115_v48  ;;  %v12251_v7 = vcombine.high %v12120_v28, %v12124_v17  ;;  %v12250_v60 = vcombine.low %v12120_v28, %v12124_v17  ;;  %v12152_v42 = vld [vmem:[%s18778_s27 + $0x748] sm:$0xff] }
0x195c   : > { %v12156_v5 = vld [vmem:[%s18778_s27 + $0x768] sm:$0xff] }
0x195d   : > { %9608 = vmatpush1.bf16.msra.mxu1 %v12232_v50  ;;  %v12282_v57 = vcombine.low %v12152_v42, %v12156_v5  ;;  %v12283_v39 = vcombine.high %v12152_v42, %v12156_v5  ;;  %v12159_v50 = vld [vmem:[%s18778_s27 + $0x780] sm:$0xff]  ;;  %v12061_v42 = vld [vmem:[%s18778_s27 + $0x470] sm:$0xff] }
0x195e   : > { %9639 = vmatpush1.bf16.msra.mxu0 %v12194_v0  ;;  %9609 = vmatprep.subr.bf16.mxu1 %v12241_v43  ;;  %v12128_v0 = vld [vmem:[%s18778_s27 + $0x688] sm:$0xff] }
0x195f   : > { %9640 = vmatprep.subr.bf16.mxu0 %v12203_v4  ;;  %v12248_v4 = vcombine.low %v12119_v11, %v12123_v3  ;;  %v12259_v2 = vcombine.high %v12128_v0, %v12132_v12  ;;  %v12258_v36 = vcombine.low %v12128_v0, %v12132_v12  ;;  %v12160_v43 = vld [vmem:[%s18778_s27 + $0x788] sm:$0xff] }
0x1960   : > { %v12164_v11 = vld [vmem:[%s18778_s27 + $0x7a8] sm:$0xff] }
0x1961   : > { %9610 = vmatpush1.bf16.msra.mxu1 %v12240_v25  ;;  %v12290_v28 = vcombine.low %v12160_v43, %v12164_v11  ;;  %v12291_v17 = vcombine.high %v12160_v43, %v12164_v11  ;;  %v12167_v25 = vld [vmem:[%s18778_s27 + $0x7c0] sm:$0xff]  ;;  %v12070_v43 = vld [vmem:[%s18778_s27 + $0x4b8] sm:$0xff] }
0x1962   : > { %9641 = vmatpush1.bf16.msra.mxu0 %v12202_v63  ;;  %9611 = vmatprep.subr.bf16.mxu1 %v12249_v56  ;;  %v12168_v56 = vld [vmem:[%s18778_s27 + $0x7c8] sm:$0xff] }
0x1963   : > { %9642 = vmatprep.subr.bf16.mxu0 %v12211_v33  ;;  %v12299_v0 = vcombine.high %v12168_v56, %v12172_v58  ;;  %v12298_v12 = vcombine.low %v12168_v56, %v12172_v58  ;;  %v12078_v56 = vld [vmem:[%s18778_s27 + $0x4f8] sm:$0xff] }
0x1965   : > { %9612 = vmatpush1.bf16.msra.mxu1 %v12248_v4  ;;  %v12049_v4 = vld [vmem:[%s18778_s27 + $0x410] sm:$0xff] }
0x1966   : > { %9643 = vmatpush1.bf16.msra.mxu0 %v12210_v34  ;;  %9613 = vmatprep.subr.bf16.mxu1 %v12257_v8  ;;  %v12139_v34 = vld [vmem:[%s18778_s27 + $0x6e0] sm:$0xff]  ;;  %v12050_v8 = vld [vmem:[%s18778_s27 + $0x418] sm:$0xff] }
0x1967   : > { %9644 = vmatprep.subr.bf16.mxu0 %v12219_v14  ;;  %v12265_v14 = vcombine.high %v12135_v22, %v12139_v34  ;;  %v12264_v30 = vcombine.low %v12135_v22, %v12139_v34  ;;  %v14040_v22 = vld [vmem:[%s18676_s8 + $0x4] sm:$0xf] }
0x1968   : > { %v8746_v34 = vrot.slane %v14040_v22, %v16094_v15  ;;  %v8742_v32 = vrot.slane %v14040_v22, %v15708_v62 }
0x1969   : > { %9614 = vmatpush1.bf16.msra.mxu1 %v12256_v38  ;;  %v12054_v38 = vld [vmem:[%s18778_s27 + $0x438] sm:$0xff] }
0x196a   : > { %9645 = vmatpush1.bf16.msra.mxu0 %v12218_v19  ;;  %9615 = vmatprep.subr.bf16.mxu1 %v12265_v14  ;;  %v12147_v19 = vld [vmem:[%s18778_s27 + $0x720] sm:$0xff] }
0x196b   : > { %9646 = vmatprep.subr.bf16.mxu0 %v12227_v27  ;;  %v12273_v27 = vcombine.high %v12143_v46, %v12147_v19  ;;  %v12272_v26 = vcombine.low %v12143_v46, %v12147_v19  ;;  %v14041_v14 = vld [vmem:[%s18677_s9 + $0x4] sm:$0xf] }
0x196c   : > { %v8766_v1 = vrot.slane %v14041_v14, %v16094_v15 }
0x196d   : > { %9616 = vmatpush1.bf16.msra.mxu1 %v12264_v30  ;;  %v8762_v30 = vrot.slane %v14041_v14, %v15708_v62 }
0x196e   : > { %9647 = vmatpush1.bf16.msra.mxu0 %v12226_v29  ;;  %9617 = vmatprep.subr.bf16.mxu1 %v12273_v27  ;;  %v12155_v29 = vld [vmem:[%s18778_s27 + $0x760] sm:$0xff]  ;;  %v8776_v27 = vrot.slane %v8766_v1, %v15708_v62  ;;  %v12097_v1 = vld [vmem:[%s18778_s27 + $0x590] sm:$0xff] }
0x196f   : > { %9648 = vmatprep.subr.bf16.mxu0 %v12235_v6  ;;  %v12281_v6 = vcombine.high %v12151_v40, %v12155_v29  ;;  %v12280_v48 = vcombine.low %v12151_v40, %v12155_v29  ;;  %v8772_v21 = vrot.slane %v8762_v30, %v15708_v62  ;;  %v12057_v29 = vld [vmem:[%s18778_s27 + $0x450] sm:$0xff] }
0x1970   : > { %v12101_v30 = vld [vmem:[%s18778_s27 + $0x5b0] sm:$0xff] }
0x1971   : > { %9618 = vmatpush1.bf16.msra.mxu1 %v12272_v26 }
0x1972   : > { %9649 = vmatpush1.bf16.msra.mxu0 %v12234_v37  ;;  %9619 = vmatprep.subr.bf16.mxu1 %v12281_v6  ;;  %v12163_v37 = vld [vmem:[%s18778_s27 + $0x7a0] sm:$0xff] }
0x1973   : > { %9650 = vmatprep.subr.bf16.mxu0 %v12243_v49  ;;  %v12289_v49 = vcombine.high %v12159_v50, %v12163_v37  ;;  %v12288_v3 = vcombine.low %v12159_v50, %v12163_v37  ;;  %v12069_v50 = vld [vmem:[%s18778_s27 + $0x4b0] sm:$0xff]  ;;  %v12066_v37 = vld [vmem:[%s18778_s27 + $0x498] sm:$0xff] }
0x1974   : > { %v12198_v58 = vcombine.low %v12066_v37, %v12070_v43 }
0x1975   : > { %9620 = vmatpush1.bf16.msra.mxu1 %v12280_v48  ;;  %v12065_v48 = vld [vmem:[%s18778_s27 + $0x490] sm:$0xff] }
0x1976   : > { %9651 = vmatpush1.bf16.msra.mxu0 %v12242_v52  ;;  %v12171_v52 = vld [vmem:[%s18778_s27 + $0x7e0] sm:$0xff]  ;;  %9621 = vmatprep.subr.bf16.mxu1 %v12289_v49  ;;  %v12188_v49 = vcombine.low %v12057_v29, %v12061_v42 }
0x1977   : > { %9652 = vmatprep.subr.bf16.mxu0 %v12251_v7  ;;  %v12297_v7 = vcombine.high %v12167_v25, %v12171_v52  ;;  %v12296_v31 = vcombine.low %v12167_v25, %v12171_v52  ;;  %v12077_v25 = vld [vmem:[%s18778_s27 + $0x4f0] sm:$0xff]  ;;  %v12074_v52 = vld [vmem:[%s18778_s27 + $0x4d8] sm:$0xff] }
0x1979   : > { %9622 = vmatpush1.bf16.msra.mxu1 %v12288_v3  ;;  %v12197_v3 = vcombine.high %v12065_v48, %v12069_v50 }
0x197a   : > { %9653 = vmatpush1.bf16.msra.mxu0 %v12250_v60  ;;  %9623 = vmatprep.subr.bf16.mxu1 %v12297_v7  ;;  %v12053_v60 = vld [vmem:[%s18778_s27 + $0x430] sm:$0xff]  ;;  %v12196_v7 = vcombine.low %v12065_v48, %v12069_v50  ;;  %v12114_v48 = vld [vmem:[%s18778_s27 + $0x618] sm:$0xff] }
0x197b   : > { %9654 = vmatprep.subr.bf16.mxu0 %v12259_v2  ;;  %v12181_v2 = vcombine.high %v12049_v4, %v12053_v60 }
0x197d   : > { %9624 = vmatpush1.bf16.msra.mxu1 %v12296_v31 }
0x197e   : > { %9655 = vmatpush1.bf16.msra.mxu0 %v12258_v36  ;;  %v12180_v36 = vcombine.low %v12049_v4, %v12053_v60  ;;  %9675 = vmatprep.subr.bf16.mxu1 %v12181_v2  ;;  %v12085_v4 = vld [vmem:[%s18778_s27 + $0x530] sm:$0xff]  ;;  %v12082_v60 = vld [vmem:[%s18778_s27 + $0x518] sm:$0xff] }
0x197f   : > { %9656 = vmatprep.subr.bf16.mxu0 %v12267_v18  ;;  %v8752_v18 = vrot.slane %v8742_v32, %v15708_v62 }
0x1982   : > { %9657 = vmatpush1.bf16.msra.mxu0 %v12266_v59  ;;  %v8756_v59 = vrot.slane %v8746_v34, %v15708_v62 }
0x1983   : > { %9658 = vmatprep.subr.bf16.mxu0 %v12275_v41 }
0x1986   : > { %9659 = vmatpush1.bf16.msra.mxu0 %v12274_v16 }
0x1987   : > { %9660 = vmatprep.subr.bf16.mxu0 %v12283_v39 }
0x198a   : > { %9661 = vmatpush1.bf16.msra.mxu0 %v12282_v57  ;;  %v12189_v57 = vcombine.high %v12057_v29, %v12061_v42 }
0x198b   : > { %9662 = vmatprep.subr.bf16.mxu0 %v12291_v17  ;;  %v12073_v17 = vld [vmem:[%s18778_s27 + $0x4d0] sm:$0xff] }
0x198c   : > { %v12205_v31 = vcombine.high %v12073_v17, %v12077_v25  ;;  %v12204_v2 = vcombine.low %v12073_v17, %v12077_v25 }
0x198e   : > { %9663 = vmatpush1.bf16.msra.mxu0 %v12290_v28  ;;  %v12199_v28 = vcombine.high %v12066_v37, %v12070_v43 }
0x198f   : > { %9664 = vmatprep.subr.bf16.mxu0 %v12299_v0  ;;  %v12207_v0 = vcombine.high %v12074_v52, %v12078_v56 }
0x1992   : > { %9665 = vmatpush1.bf16.msra.mxu0 %v12298_v12  ;;  %v12081_v12 = vld [vmem:[%s18778_s27 + $0x510] sm:$0xff] }
0x1993   : > { %v12212_v22 = vcombine.low %v12081_v12, %v12085_v4 }
0x19e3   : > { %v8725_v63 = vpop.xlane.xlu1 %8724 }
0x19e4   : > { %v8726_v47 = vmul.f32 0.00390625, %v8725_v63  ;;  %v12182_v63 = vcombine.low %v12050_v8, %v12054_v38 }
0x19e6   : > { %v17924_v33 = vsub.f32 %v17784_v23, %v8726_v47  ;;  %v17927_v51 = vsub.f32 %v17787_v24, %v8726_v47  ;;  %v12183_v47 = vcombine.high %v12050_v8, %v12054_v38  ;;  %v12086_v8 = vld [vmem:[%s18778_s27 + $0x538] sm:$0xff]  ;;  %v12206_v38 = vcombine.low %v12074_v52, %v12078_v56 }
0x19e7   : > { %v12214_v34 = vcombine.low %v12082_v60, %v12086_v8 }
0x19e8   : > { %v8729_v35 = vmul.f32 %v17924_v33, %v17924_v33  ;;  %v8730_v54 = vmul.f32 %v17927_v51, %v17927_v51  ;;  %9716 = vmatprep.subr.bf16.mxu0 %v12183_v47  ;;  %v12089_v47 = vld [vmem:[%s18778_s27 + $0x550] sm:$0xff] }
0x19ea   : > { %v8731_v55 = vadd.f32 %v8730_v54, %v8729_v35 }
0x19ec   : > { %8732 = vadd.xlane.f32.xlu0 %v8731_v55 }
0x1a79   : > { %v8733_v35 = vpop.xlane.xlu0 %8732 }
0x1a7a   : > { %v8734_v54 = vmul.f32 0.00390625, %v8733_v35  ;;  %v12093_v35 = vld [vmem:[%s18778_s27 + $0x570] sm:$0xff] }
0x1a7b   : > { %v12221_v32 = vcombine.high %v12089_v47, %v12093_v35 }
0x1a7c   : > { %v8735_v55 = vadd.f32 1e-05, %v8734_v54  ;;  %v12090_v54 = vld [vmem:[%s18778_s27 + $0x558] sm:$0xff] }
0x1a7e   : > { %14036 = vrsqrt.f32 %v8735_v55  ;;  %v12094_v55 = vld [vmem:[%s18778_s27 + $0x578] sm:$0xff] }
0x1a7f   : > { %v12223_v14 = vcombine.high %v12090_v54, %v12094_v55 }
0x1a88   : > { %v14037_v46 = vpop.eup %14036 }
0x1a89   : > { %v8737_v19 = vmul.f32 %v14037_v46, %v17924_v33  ;;  %v8738_v53 = vmul.f32 %v14037_v46, %v17927_v51  ;;  %v12058_v33 = vld [vmem:[%s18778_s27 + $0x458] sm:$0xff]  ;;  %v12220_v46 = vcombine.low %v12089_v47, %v12093_v35 }
0x1a8a   : > { %v12062_v51 = vld [vmem:[%s18778_s27 + $0x478] sm:$0xff] }
0x1a8b   : > { %v8758_v26 = vmul.f32 %v8756_v59, %v8738_v53  ;;  %v8757_v16 = vmul.f32 %v8752_v18, %v8737_v19  ;;  %v12191_v39 = vcombine.high %v12058_v33, %v12062_v51  ;;  %v12190_v11 = vcombine.low %v12058_v33, %v12062_v51  ;;  %v12098_v59 = vld [vmem:[%s18778_s27 + $0x598] sm:$0xff]  ;;  %v12113_v51 = vld [vmem:[%s18778_s27 + $0x610] sm:$0xff] }
0x1a8c   : > { %v12102_v18 = vld [vmem:[%s18778_s27 + $0x5b8] sm:$0xff]  ;;  %v12222_v19 = vcombine.low %v12090_v54, %v12094_v55  ;;  %v12229_v53 = vcombine.high %v12097_v1, %v12101_v30 }
0x1a8d   : > { %v8778_v41 = vadd.f32 %v8776_v27, %v8758_v26  ;;  %v8777_v40 = vadd.f32 %v8772_v21, %v8757_v16  ;;  %v12231_v27 = vcombine.high %v12098_v59, %v12102_v18  ;;  %v12105_v21 = vld [vmem:[%s18778_s27 + $0x5d0] sm:$0xff]  ;;  %v12106_v16 = vld [vmem:[%s18778_s27 + $0x5d8] sm:$0xff]  ;;  %v12230_v29 = vcombine.low %v12098_v59, %v12102_v18 }
0x1a8e   : > { %v12109_v26 = vld [vmem:[%s18778_s27 + $0x5f0] sm:$0xff] }
0x1a8f   : > { %v8780_v6 = vpack.c.bf16 %v8778_v41, %v8778_v41  ;;  %v18033_v5 = vpack.c.bf16 %v8777_v40, %v8777_v40  ;;  %v12110_v41 = vld [vmem:[%s18778_s27 + $0x5f8] sm:$0xff]  ;;  %v12228_v40 = vcombine.low %v12097_v1, %v12101_v30  ;;  %v12237_v42 = vcombine.high %v12105_v21, %v12109_v26 }
0x1a90   : > { %v12239_v33 = vcombine.high %v12106_v16, %v12110_v41  ;;  %v12238_v50 = vcombine.low %v12106_v16, %v12110_v41 }
0x1a91   : > { %9625 = vmatprep.mubr.bf16.mxu1 %v8780_v6  ;;  %9666 = vmatprep.mubr.bf16.mxu0 %v8780_v6 }
0x1a92   : > { %9626 = vmatmul.mubr.bf16.vlgmr.msra.gmra.mrb[108].mxu1 %v18033_v5  ;;  %9667 = vmatmul.mubr.bf16.vlgmr.msra.gmra.mrb[96].mxu0 %v18033_v5 }
0x1a93   : > { %9676 = vmatpush1.bf16.msra.mxu1 %v12180_v36  ;;  %9717 = vmatpush1.bf16.msra.mxu0 %v12182_v63  ;;  %v12213_v36 = vcombine.high %v12081_v12, %v12085_v4  ;;  %v12215_v63 = vcombine.high %v12082_v60, %v12086_v8 }
0x1a94   : > { %9707 = vmatprep.mubr.bf16.mxu1 %v8780_v6  ;;  %9748 = vmatprep.mubr.bf16.mxu0 %v8780_v6  ;;  %v12117_v6 = vld [vmem:[%s18778_s27 + $0x630] sm:$0xff] }
0x1a95   : > { %9677 = vmatprep.subr.bf16.mxu1 %v12189_v57  ;;  %9718 = vmatprep.subr.bf16.mxu0 %v12191_v39  ;;  %v12118_v57 = vld [vmem:[%s18778_s27 + $0x638] sm:$0xff]  ;;  %v12236_v39 = vcombine.low %v12105_v21, %v12109_v26  ;;  %v12245_v37 = vcombine.high %v12113_v51, %v12117_v6  ;;  %v12244_v17 = vcombine.low %v12113_v51, %v12117_v6 }
0x1a96   : > { %v12247_v43 = vcombine.high %v12114_v48, %v12118_v57  ;;  %v12246_v25 = vcombine.low %v12114_v48, %v12118_v57 }
0x1a97   : > { %9678 = vmatpush1.bf16.msra.mxu1 %v12188_v49  ;;  %9719 = vmatpush1.bf16.msra.mxu0 %v12190_v11  ;;  %v12121_v49 = vld [vmem:[%s18778_s27 + $0x650] sm:$0xff] }
0x1a98   : > { %9679 = vmatprep.subr.bf16.mxu1 %v12197_v3  ;;  %9720 = vmatprep.subr.bf16.mxu0 %v12199_v28  ;;  %v12125_v11 = vld [vmem:[%s18778_s27 + $0x670] sm:$0xff]  ;;  %v12122_v3 = vld [vmem:[%s18778_s27 + $0x658] sm:$0xff] }
0x1a99   : > { %v12126_v28 = vld [vmem:[%s18778_s27 + $0x678] sm:$0xff]  ;;  %v12253_v52 = vcombine.high %v12121_v49, %v12125_v11  ;;  %v12252_v12 = vcombine.low %v12121_v49, %v12125_v11 }
0x1a9a   : > { %v12255_v56 = vcombine.high %v12122_v3, %v12126_v28  ;;  %v12254_v4 = vcombine.low %v12122_v3, %v12126_v28 }
0x1a9b   : > { %9680 = vmatpush1.bf16.msra.mxu1 %v12196_v7  ;;  %9721 = vmatpush1.bf16.msra.mxu0 %v12198_v58  ;;  %v12129_v7 = vld [vmem:[%s18778_s27 + $0x690] sm:$0xff] }
0x1a9c   : > { %9681 = vmatprep.subr.bf16.mxu1 %v12205_v31  ;;  %9722 = vmatprep.subr.bf16.mxu0 %v12207_v0  ;;  %v12133_v58 = vld [vmem:[%s18778_s27 + $0x6b0] sm:$0xff]  ;;  %v12130_v31 = vld [vmem:[%s18778_s27 + $0x698] sm:$0xff] }
0x1a9d   : > { %v12134_v0 = vld [vmem:[%s18778_s27 + $0x6b8] sm:$0xff]  ;;  %v12261_v60 = vcombine.high %v12129_v7, %v12133_v58  ;;  %v12260_v47 = vcombine.low %v12129_v7, %v12133_v58  ;;  %v13758_v7 = vld [vmem:[%s18780_s4 + $0x400] ss:$8 sps:$4 sm:$0xff]  }
0x1a9e   : > { %v12263_v8 = vcombine.high %v12130_v31, %v12134_v0  ;;  %v12262_v35 = vcombine.low %v12130_v31, %v12134_v0  ;;  %v13761_v58 = vld [vmem:[%s18780_s4 + $0x500] ss:$8 sps:$4 sm:$0xff]   ;;  %v13766_v31 = vld [vmem:[%s18780_s4 + $0x414] ss:$8 sps:$4 sm:$0xff]  }
0x1a9f   : > { %9682 = vmatpush1.bf16.msra.mxu1 %v12204_v2  ;;  %9723 = vmatpush1.bf16.msra.mxu0 %v12206_v38  ;;  %v12137_v2 = vld [vmem:[%s18778_s27 + $0x6d0] sm:$0xff] }
0x1aa0   : > { %9683 = vmatprep.subr.bf16.mxu1 %v12213_v36  ;;  %9724 = vmatprep.subr.bf16.mxu0 %v12215_v63  ;;  %v12141_v38 = vld [vmem:[%s18778_s27 + $0x6f0] sm:$0xff]  ;;  %v12138_v36 = vld [vmem:[%s18778_s27 + $0x6d8] sm:$0xff] }
0x1aa1   : > { %v12142_v63 = vld [vmem:[%s18778_s27 + $0x6f8] sm:$0xff]  ;;  %v12269_v54 = vcombine.high %v12137_v2, %v12141_v38  ;;  %v12268_v1 = vcombine.low %v12137_v2, %v12141_v38  ;;  %v13773_v2 = vld [vmem:[%s18780_s4 + $0x520] ss:$8 sps:$4 sm:$0xff]  }
0x1aa2   : > { %v12271_v55 = vcombine.high %v12138_v36, %v12142_v63  ;;  %v12270_v30 = vcombine.low %v12138_v36, %v12142_v63  ;;  %v13769_v0 = vld [vmem:[%s18780_s4 + $0x514] ss:$8 sps:$4 sm:$0xff]   ;;  %v13776_v63 = vld [vmem:[%s18780_s4 + $0x430] ss:$8 sps:$4 sm:$0xff]  }
0x1aa3   : > { %9684 = vmatpush1.bf16.msra.mxu1 %v12212_v22  ;;  %9725 = vmatpush1.bf16.msra.mxu0 %v12214_v34  ;;  %v12145_v22 = vld [vmem:[%s18778_s27 + $0x710] sm:$0xff] }
0x1aa4   : > { %9685 = vmatprep.subr.bf16.mxu1 %v12221_v32  ;;  %9726 = vmatprep.subr.bf16.mxu0 %v12223_v14  ;;  %v12149_v34 = vld [vmem:[%s18778_s27 + $0x730] sm:$0xff]  ;;  %v12146_v32 = vld [vmem:[%s18778_s27 + $0x718] sm:$0xff] }
0x1aa5   : > { %v12150_v14 = vld [vmem:[%s18778_s27 + $0x738] sm:$0xff]  ;;  %v12277_v59 = vcombine.high %v12145_v22, %v12149_v34  ;;  %v12276_v21 = vcombine.low %v12145_v22, %v12149_v34  ;;  %v13785_v22 = vld [vmem:[%s18780_s4 + $0x540] ss:$8 sps:$4 sm:$0xff]  }
0x1aa6   : > { %v12279_v18 = vcombine.high %v12146_v32, %v12150_v14  ;;  %v12278_v26 = vcombine.low %v12146_v32, %v12150_v14  ;;  %v13778_v38 = vld [vmem:[%s18780_s4 + $0x434] ss:$8 sps:$4 sm:$0xff]   ;;  %v13788_v14 = vld [vmem:[%s18780_s4 + $0x450] ss:$8 sps:$4 sm:$0xff]  }
0x1aa7   : > { %9686 = vmatpush1.bf16.msra.mxu1 %v12220_v46  ;;  %9727 = vmatpush1.bf16.msra.mxu0 %v12222_v19  ;;  %v12153_v46 = vld [vmem:[%s18778_s27 + $0x750] sm:$0xff] }
0x1aa8   : > { %9687 = vmatprep.subr.bf16.mxu1 %v12229_v53  ;;  %9728 = vmatprep.subr.bf16.mxu0 %v12231_v27  ;;  %v12157_v19 = vld [vmem:[%s18778_s27 + $0x770] sm:$0xff]  ;;  %v12154_v53 = vld [vmem:[%s18778_s27 + $0x758] sm:$0xff] }
0x1aa9   : > { %v12158_v27 = vld [vmem:[%s18778_s27 + $0x778] sm:$0xff]  ;;  %v12285_v16 = vcombine.high %v12153_v46, %v12157_v19  ;;  %v12284_v51 = vcombine.low %v12153_v46, %v12157_v19  ;;  %v13797_v46 = vld [vmem:[%s18780_s4 + $0x560] ss:$8 sps:$4 sm:$0xff]  }
0x1aaa   : > { %v12287_v41 = vcombine.high %v12154_v53, %v12158_v27  ;;  %v12286_v6 = vcombine.low %v12154_v53, %v12158_v27  ;;  %v13781_v36 = vld [vmem:[%s18780_s4 + $0x534] ss:$8 sps:$4 sm:$0xff]   ;;  %v13800_v27 = vld [vmem:[%s18780_s4 + $0x470] ss:$8 sps:$4 sm:$0xff]  }
0x1aab   : > { %9688 = vmatpush1.bf16.msra.mxu1 %v12228_v40  ;;  %9729 = vmatpush1.bf16.msra.mxu0 %v12230_v29  ;;  %v12161_v40 = vld [vmem:[%s18778_s27 + $0x790] sm:$0xff] }
0x1aac   : > { %9689 = vmatprep.subr.bf16.mxu1 %v12237_v42  ;;  %9730 = vmatprep.subr.bf16.mxu0 %v12239_v33  ;;  %v12165_v29 = vld [vmem:[%s18778_s27 + $0x7b0] sm:$0xff]  ;;  %v12162_v42 = vld [vmem:[%s18778_s27 + $0x798] sm:$0xff] }
0x1aad   : > { %v12166_v33 = vld [vmem:[%s18778_s27 + $0x7b8] sm:$0xff]  ;;  %v12293_v48 = vcombine.high %v12161_v40, %v12165_v29  ;;  %v12292_v49 = vcombine.low %v12161_v40, %v12165_v29  ;;  %v13809_v40 = vld [vmem:[%s18780_s4 + $0x580] ss:$8 sps:$4 sm:$0xff]  }
0x1aae   : > { %v12295_v57 = vcombine.high %v12162_v42, %v12166_v33  ;;  %v12294_v11 = vcombine.low %v12162_v42, %v12166_v33  ;;  %v13790_v34 = vld [vmem:[%s18780_s4 + $0x454] ss:$8 sps:$4 sm:$0xff]   ;;  %v13812_v33 = vld [vmem:[%s18780_s4 + $0x490] ss:$8 sps:$4 sm:$0xff]  }
0x1aaf   : > { %9690 = vmatpush1.bf16.msra.mxu1 %v12236_v39  ;;  %9731 = vmatpush1.bf16.msra.mxu0 %v12238_v50  ;;  %v12169_v39 = vld [vmem:[%s18778_s27 + $0x7d0] sm:$0xff] }
0x1ab0   : > { %9691 = vmatprep.subr.bf16.mxu1 %v12245_v37  ;;  %9732 = vmatprep.subr.bf16.mxu0 %v12247_v43  ;;  %v12173_v50 = vld [vmem:[%s18778_s27 + $0x7f0] sm:$0xff]  ;;  %v12170_v37 = vld [vmem:[%s18778_s27 + $0x7d8] sm:$0xff] }
0x1ab1   : > { %v12174_v43 = vld [vmem:[%s18778_s27 + $0x7f8] sm:$0xff]  ;;  %v12301_v3 = vcombine.high %v12169_v39, %v12173_v50 }
0x1ab2   : > { %v12303_v28 = vcombine.high %v12170_v37, %v12174_v43  ;;  %v13793_v32 = vld [vmem:[%s18780_s4 + $0x554] ss:$8 sps:$4 sm:$0xff]  }
0x1ab3   : > { %9692 = vmatpush1.bf16.msra.mxu1 %v12244_v17  ;;  %9733 = vmatpush1.bf16.msra.mxu0 %v12246_v25  ;;  %v12300_v17 = vcombine.low %v12169_v39, %v12173_v50  ;;  %v12302_v25 = vcombine.low %v12170_v37, %v12174_v43  ;;  %v13802_v19 = vld [vmem:[%s18780_s4 + $0x474] ss:$8 sps:$4 sm:$0xff]   ;;  %v13821_v39 = vld [vmem:[%s18780_s4 + $0x5a0] ss:$8 sps:$4 sm:$0xff]   ;;  %v13824_v43 = vld [vmem:[%s18780_s4 + $0x4b0] ss:$8 sps:$4 sm:$0xff]  }
0x1ab4   : > { %9693 = vmatprep.subr.bf16.mxu1 %v12253_v52  ;;  %9734 = vmatprep.subr.bf16.mxu0 %v12255_v56  ;;  %v13760_v52 = vld [vmem:[%s18780_s4 + $0x404] ss:$8 sps:$4 sm:$0xff]   ;;  %v13805_v53 = vld [vmem:[%s18780_s4 + $0x574] ss:$8 sps:$4 sm:$0xff]  }
0x1ab5   : > { %v13763_v56 = vld [vmem:[%s18780_s4 + $0x504] ss:$8 sps:$4 sm:$0xff]   ;;  %v13814_v29 = vld [vmem:[%s18780_s4 + $0x494] ss:$8 sps:$4 sm:$0xff]  }
0x1ab6   : > { %v13817_v42 = vld [vmem:[%s18780_s4 + $0x594] ss:$8 sps:$4 sm:$0xff]  }
0x1ab7   : > { %9694 = vmatpush1.bf16.msra.mxu1 %v12252_v12  ;;  %9735 = vmatpush1.bf16.msra.mxu0 %v12254_v4  ;;  %v13764_v12 = vld [vmem:[%s18780_s4 + $0x410] ss:$8 sps:$4 sm:$0xff]   ;;  %v13826_v50 = vld [vmem:[%s18780_s4 + $0x4b4] ss:$8 sps:$4 sm:$0xff]  }
0x1ab8   : > { %9695 = vmatprep.subr.bf16.mxu1 %v12261_v60  ;;  %9736 = vmatprep.subr.bf16.mxu0 %v12263_v8  ;;  %v13767_v4 = vld [vmem:[%s18780_s4 + $0x510] ss:$8 sps:$4 sm:$0xff]   ;;  %v13772_v60 = vld [vmem:[%s18780_s4 + $0x424] ss:$8 sps:$4 sm:$0xff]   ;;  %v13770_v8 = vld [vmem:[%s18780_s4 + $0x420] ss:$8 sps:$4 sm:$0xff]  }
0x1ab9   : > { %v13829_v37 = vld [vmem:[%s18780_s4 + $0x5b4] ss:$8 sps:$4 sm:$0xff]  }
0x1abb   : > { %9696 = vmatpush1.bf16.msra.mxu1 %v12260_v47  ;;  %9737 = vmatpush1.bf16.msra.mxu0 %v12262_v35  ;;  %v13779_v47 = vld [vmem:[%s18780_s4 + $0x530] ss:$8 sps:$4 sm:$0xff]   ;;  %v13784_v35 = vld [vmem:[%s18780_s4 + $0x444] ss:$8 sps:$4 sm:$0xff]  }
0x1abc   : > { %9697 = vmatprep.subr.bf16.mxu1 %v12269_v54  ;;  %9738 = vmatprep.subr.bf16.mxu0 %v12271_v55  ;;  %v13787_v54 = vld [vmem:[%s18780_s4 + $0x544] ss:$8 sps:$4 sm:$0xff]   ;;  %v13782_v55 = vld [vmem:[%s18780_s4 + $0x440] ss:$8 sps:$4 sm:$0xff]  }
0x1abf   : > { %9698 = vmatpush1.bf16.msra.mxu1 %v12268_v1  ;;  %9739 = vmatpush1.bf16.msra.mxu0 %v12270_v30  ;;  %v13791_v1 = vld [vmem:[%s18780_s4 + $0x550] ss:$8 sps:$4 sm:$0xff]   ;;  %v13796_v30 = vld [vmem:[%s18780_s4 + $0x464] ss:$8 sps:$4 sm:$0xff]  }
0x1ac0   : > { %9699 = vmatprep.subr.bf16.mxu1 %v12277_v59  ;;  %9740 = vmatprep.subr.bf16.mxu0 %v12279_v18  ;;  %v13799_v59 = vld [vmem:[%s18780_s4 + $0x564] ss:$8 sps:$4 sm:$0xff]   ;;  %v13794_v18 = vld [vmem:[%s18780_s4 + $0x460] ss:$8 sps:$4 sm:$0xff]  }
0x1ac3   : > { %9700 = vmatpush1.bf16.msra.mxu1 %v12276_v21  ;;  %9741 = vmatpush1.bf16.msra.mxu0 %v12278_v26  ;;  %v13803_v21 = vld [vmem:[%s18780_s4 + $0x570] ss:$8 sps:$4 sm:$0xff]   ;;  %v13808_v26 = vld [vmem:[%s18780_s4 + $0x484] ss:$8 sps:$4 sm:$0xff]  }
0x1ac4   : > { %9701 = vmatprep.subr.bf16.mxu1 %v12285_v16  ;;  %9742 = vmatprep.subr.bf16.mxu0 %v12287_v41  ;;  %v13811_v16 = vld [vmem:[%s18780_s4 + $0x584] ss:$8 sps:$4 sm:$0xff]   ;;  %v13806_v41 = vld [vmem:[%s18780_s4 + $0x480] ss:$8 sps:$4 sm:$0xff]  }
0x1ac7   : > { %9702 = vmatpush1.bf16.msra.mxu1 %v12284_v51  ;;  %9743 = vmatpush1.bf16.msra.mxu0 %v12286_v6  ;;  %v13815_v51 = vld [vmem:[%s18780_s4 + $0x590] ss:$8 sps:$4 sm:$0xff]   ;;  %v13820_v6 = vld [vmem:[%s18780_s4 + $0x4a4] ss:$8 sps:$4 sm:$0xff]  }
0x1ac8   : > { %9703 = vmatprep.subr.bf16.mxu1 %v12293_v48  ;;  %9744 = vmatprep.subr.bf16.mxu0 %v12295_v57  ;;  %v13823_v48 = vld [vmem:[%s18780_s4 + $0x5a4] ss:$8 sps:$4 sm:$0xff]   ;;  %v13818_v57 = vld [vmem:[%s18780_s4 + $0x4a0] ss:$8 sps:$4 sm:$0xff]  }
0x1acb   : > { %9704 = vmatpush1.bf16.msra.mxu1 %v12292_v49  ;;  %9745 = vmatpush1.bf16.msra.mxu0 %v12294_v11  ;;  %v13827_v49 = vld [vmem:[%s18780_s4 + $0x5b0] ss:$8 sps:$4 sm:$0xff]   ;;  %v13832_v11 = vld [vmem:[%s18780_s4 + $0x4c4] ss:$8 sps:$4 sm:$0xff]  }
0x1acc   : > { %9705 = vmatprep.subr.bf16.mxu1 %v12301_v3  ;;  %9746 = vmatprep.subr.bf16.mxu0 %v12303_v28  ;;  %v13835_v3 = vld [vmem:[%s18780_s4 + $0x5c4] ss:$8 sps:$4 sm:$0xff]   ;;  %v13830_v28 = vld [vmem:[%s18780_s4 + $0x4c0] ss:$8 sps:$4 sm:$0xff]  }
0x1acf   : > { %9706 = vmatpush1.bf16.msra.mxu1 %v12300_v17  ;;  %9747 = vmatpush1.bf16.msra.mxu0 %v12302_v25  ;;  %v13833_v17 = vld [vmem:[%s18780_s4 + $0x5c0] ss:$8 sps:$4 sm:$0xff]   ;;  %v13838_v25 = vld [vmem:[%s18780_s4 + $0x4d4] ss:$8 sps:$4 sm:$0xff]  }
0x1ad0   : > { %10555 = vmatprep.subr.bf16.mxu1 %v13760_v52  ;;  %10596 = vmatprep.subr.bf16.mxu0 %v13763_v56  ;;  %v13841_v52 = vld [vmem:[%s18780_s4 + $0x5d4] ss:$8 sps:$4 sm:$0xff]   ;;  %v13836_v56 = vld [vmem:[%s18780_s4 + $0x4d0] ss:$8 sps:$4 sm:$0xff]  }
0x1ad2   : > { %9708 = vmatmul.mubr.bf16.vlgmr.msra.gmra.mrb[112].mxu1 %v18033_v5  ;;  %9749 = vmatmul.mubr.bf16.vlgmr.msra.gmra.mrb[100].mxu0 %v18033_v5  ;;  %v13775_v5 = vld [vmem:[%s18780_s4 + $0x524] ss:$8 sps:$4 sm:$0xff]  }
0x1ad3   : > { %10556 = vmatpush1.bf16.msra.mxu1 %v13758_v7  ;;  %10597 = vmatpush1.bf16.msra.mxu0 %v13761_v58  ;;  %v13839_v7 = vld [vmem:[%s18780_s4 + $0x5d0] ss:$8 sps:$4 sm:$0xff]   ;;  %v13844_v58 = vld [vmem:[%s18780_s4 + $0x4e4] ss:$8 sps:$4 sm:$0xff]  }
0x1ad4   : > { %10557 = vmatprep.subr.bf16.mxu1 %v13766_v31  ;;  %10598 = vmatprep.subr.bf16.mxu0 %v13769_v0  ;;  %v13847_v31 = vld [vmem:[%s18780_s4 + $0x5e4] ss:$8 sps:$4 sm:$0xff]   ;;  %v13842_v0 = vld [vmem:[%s18780_s4 + $0x4e0] ss:$8 sps:$4 sm:$0xff]  }
0x1ad7   : > { %10558 = vmatpush1.bf16.msra.mxu1 %v13764_v12  ;;  %10599 = vmatpush1.bf16.msra.mxu0 %v13767_v4  ;;  %v13845_v12 = vld [vmem:[%s18780_s4 + $0x5e0] ss:$8 sps:$4 sm:$0xff]   ;;  %v13850_v4 = vld [vmem:[%s18780_s4 + $0x4f4] ss:$8 sps:$4 sm:$0xff]  }
0x1ad8   : > { %10559 = vmatprep.subr.bf16.mxu1 %v13772_v60  ;;  %10600 = vmatprep.subr.bf16.mxu0 %v13775_v5  ;;  %v13853_v60 = vld [vmem:[%s18780_s4 + $0x5f4] ss:$8 sps:$4 sm:$0xff]   ;;  %v13848_v5 = vld [vmem:[%s18780_s4 + $0x4f0] ss:$8 sps:$4 sm:$0xff]  }
0x1adb   : > { %10560 = vmatpush1.bf16.msra.mxu1 %v13770_v8  ;;  %10601 = vmatpush1.bf16.msra.mxu0 %v13773_v2  ;;  %v13851_v8 = vld [vmem:[%s18780_s4 + $0x5f0] ss:$8 sps:$4 sm:$0xff]   ;;  %v13856_v2 = vld [vmem:[%s18780_s4 + $0x604] ss:$8 sps:$4 sm:$0xff]  }
0x1adc   : > { %10561 = vmatprep.subr.bf16.mxu1 %v13778_v38  ;;  %10602 = vmatprep.subr.bf16.mxu0 %v13781_v36  ;;  %v13859_v38 = vld [vmem:[%s18780_s4 + $0x704] ss:$8 sps:$4 sm:$0xff]  }
0x1add   : > { %v18408_v36 = vld [vmem:[%s18781_s29 + $0x8] sm:$0xff] }
0x1adf   : > { %10562 = vmatpush1.bf16.msra.mxu1 %v13776_v63  ;;  %10603 = vmatpush1.bf16.msra.mxu0 %v13779_v47  ;;  %v8916_v63 = vrot.slane %v18408_v36, %v15702_v13  ;;  %v8924_v47 = vrot.slane %v18408_v36, %v15940_v10 }
0x1ae0   : > { %10563 = vmatprep.subr.bf16.mxu1 %v13784_v35  ;;  %10604 = vmatprep.subr.bf16.mxu0 %v13787_v54  ;;  %v8920_v35 = vrot.slane %v18408_v36, %v15708_v62  ;;  %v8928_v54 = vrot.slane %v18408_v36, %v16094_v15  ;;  %v13854_v15 = vld [vmem:[%s18780_s4 + $0x600] ss:$8 sps:$4 sm:$0xff]  }
0x1ae3   : > { %10564 = vmatpush1.bf16.msra.mxu1 %v13782_v55  ;;  %10605 = vmatpush1.bf16.msra.mxu0 %v13785_v22 }
0x1ae4   : > { %10565 = vmatprep.subr.bf16.mxu1 %v13790_v34  ;;  %10606 = vmatprep.subr.bf16.mxu0 %v13793_v32 }
0x1ae7   : > { %10566 = vmatpush1.bf16.msra.mxu1 %v13788_v14  ;;  %10607 = vmatpush1.bf16.msra.mxu0 %v13791_v1 }
0x1ae8   : > { %10567 = vmatprep.subr.bf16.mxu1 %v13796_v30  ;;  %10608 = vmatprep.subr.bf16.mxu0 %v13799_v59 }
0x1aeb   : > { %10568 = vmatpush1.bf16.msra.mxu1 %v13794_v18  ;;  %10609 = vmatpush1.bf16.msra.mxu0 %v13797_v46 }
0x1aec   : > { %10569 = vmatprep.subr.bf16.mxu1 %v13802_v19  ;;  %10610 = vmatprep.subr.bf16.mxu0 %v13805_v53 }
0x1aef   : > { %10570 = vmatpush1.bf16.msra.mxu1 %v13800_v27  ;;  %10611 = vmatpush1.bf16.msra.mxu0 %v13803_v21 }
0x1af0   : > { %10571 = vmatprep.subr.bf16.mxu1 %v13808_v26  ;;  %10612 = vmatprep.subr.bf16.mxu0 %v13811_v16 }
0x1af3   : > { %10572 = vmatpush1.bf16.msra.mxu1 %v13806_v41  ;;  %10613 = vmatpush1.bf16.msra.mxu0 %v13809_v40  ;;  %v13857_v40 = vld [vmem:[%s18780_s4 + $0x700] ss:$8 sps:$4 sm:$0xff]  }
0x1af4   : > { %10573 = vmatprep.subr.bf16.mxu1 %v13814_v29  ;;  %10614 = vmatprep.subr.bf16.mxu0 %v13817_v42 }
0x1af7   : > { %10574 = vmatpush1.bf16.msra.mxu1 %v13812_v33  ;;  %10615 = vmatpush1.bf16.msra.mxu0 %v13815_v51  ;;  %v13862_v33 = vld [vmem:[%s18780_s4 + $0x614] ss:$8 sps:$4 sm:$0xff]  }
0x1af8   : > { %10575 = vmatprep.subr.bf16.mxu1 %v13820_v6  ;;  %10616 = vmatprep.subr.bf16.mxu0 %v13823_v48  ;;  %v13865_v51 = vld [vmem:[%s18780_s4 + $0x714] ss:$8 sps:$4 sm:$0xff]   ;;  %v13860_v6 = vld [vmem:[%s18780_s4 + $0x610] ss:$8 sps:$4 sm:$0xff]  }
0x1af9   : > { %v13863_v48 = vld [vmem:[%s18780_s4 + $0x710] ss:$8 sps:$4 sm:$0xff]  }
0x1afb   : > { %10576 = vmatpush1.bf16.msra.mxu1 %v13818_v57  ;;  %10617 = vmatpush1.bf16.msra.mxu0 %v13821_v39  ;;  %v13868_v57 = vld [vmem:[%s18780_s4 + $0x624] ss:$8 sps:$4 sm:$0xff]  }
0x1afc   : > { %10577 = vmatprep.subr.bf16.mxu1 %v13826_v50  ;;  %10618 = vmatprep.subr.bf16.mxu0 %v13829_v37  ;;  %v13871_v39 = vld [vmem:[%s18780_s4 + $0x724] ss:$8 sps:$4 sm:$0xff]   ;;  %v13866_v50 = vld [vmem:[%s18780_s4 + $0x620] ss:$8 sps:$4 sm:$0xff]  }
0x1afd   : > { %v13869_v37 = vld [vmem:[%s18780_s4 + $0x720] ss:$8 sps:$4 sm:$0xff]  }
0x1aff   : > { %10578 = vmatpush1.bf16.msra.mxu1 %v13824_v43  ;;  %10619 = vmatpush1.bf16.msra.mxu0 %v13827_v49  ;;  %v13874_v43 = vld [vmem:[%s18780_s4 + $0x634] ss:$8 sps:$4 sm:$0xff]  }
0x1b00   : > { %10579 = vmatprep.subr.bf16.mxu1 %v13832_v11  ;;  %10620 = vmatprep.subr.bf16.mxu0 %v13835_v3  ;;  %v13877_v49 = vld [vmem:[%s18780_s4 + $0x734] ss:$8 sps:$4 sm:$0xff]   ;;  %v13872_v11 = vld [vmem:[%s18780_s4 + $0x630] ss:$8 sps:$4 sm:$0xff]  }
0x1b01   : > { %v13875_v3 = vld [vmem:[%s18780_s4 + $0x730] ss:$8 sps:$4 sm:$0xff]  }
0x1b03   : > { %10580 = vmatpush1.bf16.msra.mxu1 %v13830_v28  ;;  %10621 = vmatpush1.bf16.msra.mxu0 %v13833_v17  ;;  %v13880_v28 = vld [vmem:[%s18780_s4 + $0x644] ss:$8 sps:$4 sm:$0xff]  }
0x1b04   : > { %10581 = vmatprep.subr.bf16.mxu1 %v13838_v25  ;;  %10622 = vmatprep.subr.bf16.mxu0 %v13841_v52  ;;  %v13883_v17 = vld [vmem:[%s18780_s4 + $0x744] ss:$8 sps:$4 sm:$0xff]   ;;  %v13878_v25 = vld [vmem:[%s18780_s4 + $0x640] ss:$8 sps:$4 sm:$0xff]  }
0x1b05   : > { %v13881_v52 = vld [vmem:[%s18780_s4 + $0x740] ss:$8 sps:$4 sm:$0xff]  }
0x1b07   : > { %10582 = vmatpush1.bf16.msra.mxu1 %v13836_v56  ;;  %10623 = vmatpush1.bf16.msra.mxu0 %v13839_v7  ;;  %v13886_v56 = vld [vmem:[%s18780_s4 + $0x654] ss:$8 sps:$4 sm:$0xff]  }
0x1b08   : > { %10583 = vmatprep.subr.bf16.mxu1 %v13844_v58  ;;  %10624 = vmatprep.subr.bf16.mxu0 %v13847_v31  ;;  %v13889_v7 = vld [vmem:[%s18780_s4 + $0x754] ss:$8 sps:$4 sm:$0xff]   ;;  %v13884_v58 = vld [vmem:[%s18780_s4 + $0x650] ss:$8 sps:$4 sm:$0xff]  }
0x1b09   : > { %v13887_v31 = vld [vmem:[%s18780_s4 + $0x750] ss:$8 sps:$4 sm:$0xff]  }
0x1b0b   : > { %10584 = vmatpush1.bf16.msra.mxu1 %v13842_v0  ;;  %10625 = vmatpush1.bf16.msra.mxu0 %v13845_v12  ;;  %v13892_v0 = vld [vmem:[%s18780_s4 + $0x664] ss:$8 sps:$4 sm:$0xff]  }
0x1b0c   : > { %10585 = vmatprep.subr.bf16.mxu1 %v13850_v4  ;;  %10626 = vmatprep.subr.bf16.mxu0 %v13853_v60  ;;  %v13895_v12 = vld [vmem:[%s18780_s4 + $0x764] ss:$8 sps:$4 sm:$0xff]   ;;  %v13890_v4 = vld [vmem:[%s18780_s4 + $0x660] ss:$8 sps:$4 sm:$0xff]  }
0x1b0d   : > { %v13893_v60 = vld [vmem:[%s18780_s4 + $0x760] ss:$8 sps:$4 sm:$0xff]  }
0x1b0f   : > { %10586 = vmatpush1.bf16.msra.mxu1 %v13848_v5  ;;  %10627 = vmatpush1.bf16.msra.mxu0 %v13851_v8  ;;  %v13898_v5 = vld [vmem:[%s18780_s4 + $0x674] ss:$8 sps:$4 sm:$0xff]  }
0x1b10   : > { %10637 = vmatprep.subr.bf16.mxu1 %v13856_v2  ;;  %10678 = vmatprep.subr.bf16.mxu0 %v13859_v38  ;;  %v13901_v8 = vld [vmem:[%s18780_s4 + $0x774] ss:$8 sps:$4 sm:$0xff]   ;;  %v13896_v2 = vld [vmem:[%s18780_s4 + $0x670] ss:$8 sps:$4 sm:$0xff]  }
0x1b11   : > { %v13899_v38 = vld [vmem:[%s18780_s4 + $0x770] ss:$8 sps:$4 sm:$0xff]  }
0x1b65   : > { %v9627_v55 = vpop.f32.mrb[108].mxu1  ;;  %v9668_v22 = vpop.f32.mrb[96].mxu0 }
0x1b66   : > { %v9628_v34 = vadd.f32 %v9627_v55, %v8916_v63  ;;  %v9669_v32 = vadd.f32 %v9668_v22, %v8924_v47  ;;  %v9629_v14 = vpop.f32.mrb[109].mxu1  ;;  %v9670_v1 = vpop.f32.mrb[97].mxu0  ;;  %v13904_v63 = vld [vmem:[%s18780_s4 + $0x684] ss:$8 sps:$4 sm:$0xff]   ;;  %v13910_v55 = vld [vmem:[%s18780_s4 + $0x694] ss:$8 sps:$4 sm:$0xff]  }
0x1b67   : > { %v9630_v30 = vadd.f32 %v9629_v14, %v8920_v35  ;;  %v9671_v59 = vadd.f32 %v9670_v1, %v8928_v54  ;;  %v9631_v18 = vpop.f32.mrb[110].mxu1  ;;  %v9672_v46 = vpop.f32.mrb[98].mxu0  ;;  %v13907_v47 = vld [vmem:[%s18780_s4 + $0x784] ss:$8 sps:$4 sm:$0xff]   ;;  %v13902_v35 = vld [vmem:[%s18780_s4 + $0x680] ss:$8 sps:$4 sm:$0xff]  }
0x1b68   : > { %v9757_v19 = vmax.f32 %v9628_v34, 0.0  ;;  %v9759_v53 = vmax.f32 %v9669_v32, 0.0  ;;  %v9632_v27 = vpop.f32.mrb[111].mxu1  ;;  %v9673_v10 = vpop.f32.mrb[99].mxu0  ;;  %v13905_v54 = vld [vmem:[%s18780_s4 + $0x780] ss:$8 sps:$4 sm:$0xff]  }
0x1b69   : > { %v9758_v21 = vmax.f32 %v9630_v30, 0.0  ;;  %v9760_v26 = vmax.f32 %v9671_v59, 0.0  ;;  %v13913_v22 = vld [vmem:[%s18780_s4 + $0x794] ss:$8 sps:$4 sm:$0xff]   ;;  %v13908_v34 = vld [vmem:[%s18780_s4 + $0x690] ss:$8 sps:$4 sm:$0xff]  }
0x1b6a   : > { %v9765_v29 = vpack.c.bf16 %v9757_v19, %v9757_v19  ;;  %v9767_v42 = vpack.c.bf16 %v9759_v53, %v9759_v53  ;;  %v13911_v32 = vld [vmem:[%s18780_s4 + $0x790] ss:$8 sps:$4 sm:$0xff]   ;;  %v13916_v14 = vld [vmem:[%s18780_s4 + $0x6a4] ss:$8 sps:$4 sm:$0xff]   ;;  %v13914_v30 = vld [vmem:[%s18780_s4 + $0x6a0] ss:$8 sps:$4 sm:$0xff]  }
0x1b6b   : > { %v9766_v16 = vpack.c.bf16 %v9758_v21, %v9758_v21  ;;  %v9768_v41 = vpack.c.bf16 %v9760_v26, %v9760_v26  ;;  %v13919_v1 = vld [vmem:[%s18780_s4 + $0x7a4] ss:$8 sps:$4 sm:$0xff]   ;;  %v13917_v59 = vld [vmem:[%s18780_s4 + $0x7a0] ss:$8 sps:$4 sm:$0xff]   ;;  %v13922_v18 = vld [vmem:[%s18780_s4 + $0x6b4] ss:$8 sps:$4 sm:$0xff]  }
0x1b6c   : > { %v13925_v46 = vld [vmem:[%s18780_s4 + $0x7b4] ss:$8 sps:$4 sm:$0xff]   ;;  %v13920_v19 = vld [vmem:[%s18780_s4 + $0x6b0] ss:$8 sps:$4 sm:$0xff]   ;;  %v13928_v27 = vld [vmem:[%s18780_s4 + $0x6c4] ss:$8 sps:$4 sm:$0xff]  }
0x1b6d   : > { %10587 = vmatprep.mubr.bf16.mxu1 %v9766_v16  ;;  %10628 = vmatprep.mubr.bf16.mxu0 %v9768_v41  ;;  %v13923_v53 = vld [vmem:[%s18780_s4 + $0x7b0] ss:$8 sps:$4 sm:$0xff]   ;;  %v13931_v10 = vld [vmem:[%s18780_s4 + $0x7c4] ss:$8 sps:$4 sm:$0xff]   ;;  %v13926_v21 = vld [vmem:[%s18780_s4 + $0x6c0] ss:$8 sps:$4 sm:$0xff]  }
0x1b6e   : > { %10588 = vmatmul.mubr.bf16.vlgmr.msra.gmra.mrb[116].mxu1 %v9765_v29  ;;  %10629 = vmatmul.mubr.bf16.vlgmr.msra.gmra.mrb[104].mxu0 %v9767_v42  ;;  %v13929_v26 = vld [vmem:[%s18780_s4 + $0x7c0] ss:$8 sps:$4 sm:$0xff]   ;;  %v13934_v16 = vld [vmem:[%s18780_s4 + $0x6d4] ss:$8 sps:$4 sm:$0xff]   ;;  %v13940_v29 = vld [vmem:[%s18780_s4 + $0x6e4] ss:$8 sps:$4 sm:$0xff]  }
0x1b6f   : > { %10638 = vmatpush1.bf16.msra.mxu1 %v13854_v15  ;;  %10679 = vmatpush1.bf16.msra.mxu0 %v13857_v40  ;;  %v13937_v41 = vld [vmem:[%s18780_s4 + $0x7d4] ss:$8 sps:$4 sm:$0xff]   ;;  %v13932_v15 = vld [vmem:[%s18780_s4 + $0x6d0] ss:$8 sps:$4 sm:$0xff]   ;;  %v13943_v42 = vld [vmem:[%s18780_s4 + $0x7e4] ss:$8 sps:$4 sm:$0xff]  }
0x1b70   : > { %10639 = vmatprep.subr.bf16.mxu1 %v13862_v33  ;;  %10680 = vmatprep.subr.bf16.mxu0 %v13865_v51  ;;  %v13935_v40 = vld [vmem:[%s18780_s4 + $0x7d0] ss:$8 sps:$4 sm:$0xff]   ;;  %v8932_v33 = vrot.slane %v18408_v36, %v16077_v61  ;;  %v8940_v51 = vrot.slane %v18408_v36, %v4977_v45  ;;  %v13941_v61 = vld [vmem:[%s18780_s4 + $0x7e0] ss:$8 sps:$4 sm:$0xff]   ;;  %v13946_v45 = vld [vmem:[%s18780_s4 + $0x6f4] ss:$8 sps:$4 sm:$0xff]  }
0x1b73   : > { %10640 = vmatpush1.bf16.msra.mxu1 %v13860_v6  ;;  %10681 = vmatpush1.bf16.msra.mxu0 %v13863_v48  ;;  %v8936_v6 = vrot.slane %v18408_v36, %v16181_v44  ;;  %v8944_v48 = vrot.slane %v18408_v36, %v4981_v9 }
0x1b74   : > { %10641 = vmatprep.subr.bf16.mxu1 %v13868_v57  ;;  %10682 = vmatprep.subr.bf16.mxu0 %v13871_v39  ;;  %v13938_v57 = vld [vmem:[%s18780_s4 + $0x6e0] ss:$8 sps:$4 sm:$0xff]  }
0x1b77   : > { %10642 = vmatpush1.bf16.msra.mxu1 %v13866_v50  ;;  %10683 = vmatpush1.bf16.msra.mxu0 %v13869_v37 }
0x1b78   : > { %10643 = vmatprep.subr.bf16.mxu1 %v13874_v43  ;;  %10684 = vmatprep.subr.bf16.mxu0 %v13877_v49 }
0x1b7b   : > { %10644 = vmatpush1.bf16.msra.mxu1 %v13872_v11  ;;  %10685 = vmatpush1.bf16.msra.mxu0 %v13875_v3 }
0x1b7c   : > { %10645 = vmatprep.subr.bf16.mxu1 %v13880_v28  ;;  %10686 = vmatprep.subr.bf16.mxu0 %v13883_v17  ;;  %v13944_v28 = vld [vmem:[%s18780_s4 + $0x6f0] ss:$8 sps:$4 sm:$0xff]  }
0x1b7d   : > { %v13947_v17 = vld [vmem:[%s18780_s4 + $0x7f0] ss:$8 sps:$4 sm:$0xff]   ;;  %s18626_s4 = scalar_lea.hbm %s18785_s22, %s12578_s21 }
0x1b7f   : > { %10646 = vmatpush1.bf16.msra.mxu1 %v13878_v25  ;;  %10687 = vmatpush1.bf16.msra.mxu0 %v13881_v52 }
0x1b80   : > { %10647 = vmatprep.subr.bf16.mxu1 %v13886_v56  ;;  %10688 = vmatprep.subr.bf16.mxu0 %v13889_v7 }
0x1b83   : > { %10648 = vmatpush1.bf16.msra.mxu1 %v13884_v58  ;;  %10689 = vmatpush1.bf16.msra.mxu0 %v13887_v31 }
0x1b84   : > { %10649 = vmatprep.subr.bf16.mxu1 %v13892_v0  ;;  %10690 = vmatprep.subr.bf16.mxu0 %v13895_v12 }
0x1b87   : > { %10650 = vmatpush1.bf16.msra.mxu1 %v13890_v4  ;;  %10691 = vmatpush1.bf16.msra.mxu0 %v13893_v60 }
0x1b88   : > { %10651 = vmatprep.subr.bf16.mxu1 %v13898_v5  ;;  %10692 = vmatprep.subr.bf16.mxu0 %v13901_v8  ;;  %v13950_v5 = vld [vmem:[#allocation11 + $0x40] sm:$0xff]  }
0x1b89   : > { %v13951_v8 = vld [vmem:[#allocation11] sm:$0xff]  }
0x1b8b   : > { %10652 = vmatpush1.bf16.msra.mxu1 %v13896_v2  ;;  %10693 = vmatpush1.bf16.msra.mxu0 %v13899_v38  ;;  %v13952_v2 = vld [vmem:[#allocation11 + $0x48] sm:$0xff]  }
0x1b8c   : > { %10653 = vmatprep.subr.bf16.mxu1 %v13904_v63  ;;  %10694 = vmatprep.subr.bf16.mxu0 %v13907_v47  ;;  %v13953_v38 = vld [vmem:[#allocation11 + $0x8] sm:$0xff]   ;;  %v13954_v63 = vld [vmem:[#allocation11 + $0x50] sm:$0xff]  }
0x1b8d   : > { %v13955_v47 = vld [vmem:[#allocation11 + $0x10] sm:$0xff]  }
0x1b8f   : > { %10654 = vmatpush1.bf16.msra.mxu1 %v13902_v35  ;;  %10695 = vmatpush1.bf16.msra.mxu0 %v13905_v54  ;;  %v13956_v35 = vld [vmem:[#allocation11 + $0x58] sm:$0xff]  }
0x1b90   : > { %10655 = vmatprep.subr.bf16.mxu1 %v13910_v55  ;;  %10696 = vmatprep.subr.bf16.mxu0 %v13913_v22  ;;  %v13957_v54 = vld [vmem:[#allocation11 + $0x18] sm:$0xff]   ;;  %v13958_v55 = vld [vmem:[#allocation11 + $0x60] sm:$0xff]  }
0x1b91   : > { %v13959_v22 = vld [vmem:[#allocation11 + $0x20] sm:$0xff]  }
0x1b93   : > { %10656 = vmatpush1.bf16.msra.mxu1 %v13908_v34  ;;  %10697 = vmatpush1.bf16.msra.mxu0 %v13911_v32  ;;  %v13960_v34 = vld [vmem:[#allocation11 + $0x68] sm:$0xff]  }
0x1b94   : > { %10657 = vmatprep.subr.bf16.mxu1 %v13916_v14  ;;  %10698 = vmatprep.subr.bf16.mxu0 %v13919_v1  ;;  %v13961_v32 = vld [vmem:[#allocation11 + $0x28] sm:$0xff]   ;;  %v13962_v14 = vld [vmem:[#allocation11 + $0x70] sm:$0xff]  }
0x1b95   : > { %v13963_v1 = vld [vmem:[#allocation11 + $0x30] sm:$0xff]  }
0x1b97   : > { %10658 = vmatpush1.bf16.msra.mxu1 %v13914_v30  ;;  %10699 = vmatpush1.bf16.msra.mxu0 %v13917_v59  ;;  %v13964_v30 = vld [vmem:[#allocation11 + $0x78] sm:$0xff]  }
0x1b98   : > { %10659 = vmatprep.subr.bf16.mxu1 %v13922_v18  ;;  %10700 = vmatprep.subr.bf16.mxu0 %v13925_v46  ;;  %v13965_v59 = vld [vmem:[#allocation11 + $0x38] sm:$0xff]  }
0x1b99   : > { %v9903_v18 = vld [vmem:[#allocation10 + $0x2] sm:$0x3] }
0x1b9a   : > { %v9908_v46 = vrot.slane %v9903_v18, %v15702_v13 }
0x1b9b   : > { %10660 = vmatpush1.bf16.msra.mxu1 %v13920_v19  ;;  %10701 = vmatpush1.bf16.msra.mxu0 %v13923_v53  ;;  %v9912_v19 = vrot.slane %v9903_v18, %v15708_v62 }
0x1b9c   : > { %10661 = vmatprep.subr.bf16.mxu1 %v13928_v27  ;;  %10702 = vmatprep.subr.bf16.mxu0 %v13931_v10 }
0x1b9f   : > { %10662 = vmatpush1.bf16.msra.mxu1 %v13926_v21  ;;  %10703 = vmatpush1.bf16.msra.mxu0 %v13929_v26 }
0x1ba0   : > { %10663 = vmatprep.subr.bf16.mxu1 %v13934_v16  ;;  %10704 = vmatprep.subr.bf16.mxu0 %v13937_v41 }
0x1ba3   : > { %10664 = vmatpush1.bf16.msra.mxu1 %v13932_v15  ;;  %10705 = vmatpush1.bf16.msra.mxu0 %v13935_v40 }
0x1ba4   : > { %10665 = vmatprep.subr.bf16.mxu1 %v13940_v29  ;;  %10706 = vmatprep.subr.bf16.mxu0 %v13943_v42 }
0x1ba5   : > { %v9709_v44 = vpop.f32.mrb[112].mxu1  ;;  %v9750_v9 = vpop.f32.mrb[100].mxu0 }
0x1ba6   : > { %v9710_v36 = vadd.f32 %v9709_v44, %v8932_v33  ;;  %v9751_v39 = vadd.f32 %v9750_v9, %v8940_v51  ;;  %v9711_v50 = vpop.f32.mrb[113].mxu1  ;;  %v9752_v37 = vpop.f32.mrb[101].mxu0 }
0x1ba7   : > { %v9712_v43 = vadd.f32 %v9711_v50, %v8936_v6  ;;  %v9753_v49 = vadd.f32 %v9752_v37, %v8944_v48  ;;  %v9713_v11 = vpop.f32.mrb[114].mxu1  ;;  %v9754_v3 = vpop.f32.mrb[102].mxu0  ;;  %10666 = vmatpush1.bf16.msra.mxu1 %v13938_v57  ;;  %10707 = vmatpush1.bf16.msra.mxu0 %v13941_v61 }
0x1ba8   : > { %v9761_v25 = vmax.f32 %v9710_v36, 0.0  ;;  %v9763_v52 = vmax.f32 %v9751_v39, 0.0  ;;  %v9714_v56 = vpop.f32.mrb[115].mxu1  ;;  %v9755_v7 = vpop.f32.mrb[103].mxu0  ;;  %10667 = vmatprep.subr.bf16.mxu1 %v13946_v45  ;;  %10708 = vmatprep.subr.bf16.mxu0 %v13949_v20  ;;  %v12560_v11 = vld [vmem:[%s18783_s25] ss:$0 sm:$0xff] }
0x1ba9   : > { %v9762_v58 = vmax.f32 %v9712_v43, 0.0  ;;  %v9764_v31 = vmax.f32 %v9753_v49, 0.0 }
0x1baa   : > { %v9769_v4 = vpack.c.bf16 %v9761_v25, %v9761_v25  ;;  %v9771_v60 = vpack.c.bf16 %v9763_v52, %v9763_v52 }
0x1bab   : > { %v9770_v0 = vpack.c.bf16 %v9762_v58, %v9762_v58  ;;  %v9772_v12 = vpack.c.bf16 %v9764_v31, %v9764_v31  ;;  %10668 = vmatpush1.bf16.msra.mxu1 %v13944_v28  ;;  %10709 = vmatpush1.bf16.msra.mxu0 %v13947_v17 }
0x1bac   : > { %12646 = vmatprep.subr.bf16.mxu1 %v13950_v5 }
0x1bad   : > { %10669 = vmatprep.mubr.bf16.mxu1 %v9770_v0  ;;  %10710 = vmatprep.mubr.bf16.mxu0 %v9772_v12 }
0x1bae   : > { %10670 = vmatmul.mubr.bf16.vlgmr.msra.gmra.mrb[120].mxu1 %v9769_v4  ;;  %10711 = vmatmul.mubr.bf16.vlgmr.msra.gmra.mrb[108].mxu0 %v9771_v60 }
0x1baf   : > { %12647 = vmatpush3.bf16.msra.mxu1 %v13951_v8 }
0x1bb0   : > { %12648 = vmatprep.subr.bf16.mxu1 %v13952_v2 }
0x1bb3   : > { %12649 = vmatpush3.bf16.msra.mxu1 %v13953_v38 }
0x1bb4   : > { %12650 = vmatprep.subr.bf16.mxu1 %v13954_v63 }
0x1bb7   : > { %12651 = vmatpush3.bf16.msra.mxu1 %v13955_v47 }
0x1bb8   : > { %12652 = vmatprep.subr.bf16.mxu1 %v13956_v35 }
0x1bbb   : > { %12653 = vmatpush3.bf16.msra.mxu1 %v13957_v54 }
0x1bbc   : > { %12654 = vmatprep.subr.bf16.mxu1 %v13958_v55 }
0x1bbf   : > { %12655 = vmatpush3.bf16.msra.mxu1 %v13959_v22 }
0x1bc0   : > { %12656 = vmatprep.subr.bf16.mxu1 %v13960_v34 }
0x1bc3   : > { %12657 = vmatpush3.bf16.msra.mxu1 %v13961_v32 }
0x1bc4   : > { %12658 = vmatprep.subr.bf16.mxu1 %v13962_v14 }
0x1bc7   : > { %12659 = vmatpush3.bf16.msra.mxu1 %v13963_v1 }
0x1bc8   : > { %12660 = vmatprep.subr.bf16.mxu1 %v13964_v30 }
0x1bcb   : > { %12661 = vmatpush3.bf16.msra.mxu1 %v13965_v59 }
0x1c41   : > { %v10589_v53 = vpop.f32.mrb[116].mxu1  ;;  %v10630_v27 = vpop.f32.mrb[104].mxu0 }
0x1c42   : > { %v10590_v10 = vadd.f32 %v10589_v53, %v9908_v46  ;;  %v10591_v21 = vpop.f32.mrb[117].mxu1  ;;  %v10632_v26 = vpop.f32.mrb[105].mxu0 }
0x1c43   : > { %v10592_v16 = vadd.f32 %v10591_v21, %v9912_v19  ;;  %v10593_v41 = vpop.f32.mrb[118].mxu1  ;;  %v10634_v15 = vpop.f32.mrb[106].mxu0 }
0x1c44   : > { %v10631_v40 = vadd.f32 %v10630_v27, %v10590_v10  ;;  %v10594_v29 = vpop.f32.mrb[119].mxu1  ;;  %v10635_v42 = vpop.f32.mrb[107].mxu0 }
0x1c45   : > { %v10633_v33 = vadd.f32 %v10632_v26, %v10592_v16 }
0x1c81   : > { %v10671_v51 = vpop.f32.mrb[120].mxu1  ;;  %v10712_v6 = vpop.f32.mrb[108].mxu0 }
0x1c82   : > { %v10672_v48 = vadd.f32 %v10671_v51, %v10631_v40  ;;  %v10673_v57 = vpop.f32.mrb[121].mxu1  ;;  %v10714_v13 = vpop.f32.mrb[109].mxu0 }
0x1c83   : > { %v10674_v61 = vadd.f32 %v10673_v57, %v10633_v33  ;;  %v10675_v62 = vpop.f32.mrb[122].mxu1  ;;  %v10716_v45 = vpop.f32.mrb[110].mxu0 }
0x1c84   : > { %v10713_v20 = vadd.f32 %v10712_v6, %v10672_v48  ;;  %v10676_v44 = vpop.f32.mrb[123].mxu1  ;;  %v10717_v9 = vpop.f32.mrb[111].mxu0 }
0x1c85   : > { %v10715_v36 = vadd.f32 %v10714_v13, %v10674_v61 }
0x1c86   : > { %v10719_v39 = vadd.f32 %v10713_v20, %v17784_v23 }
0x1c87   : > { %v10720_v50 = vadd.f32 %v10715_v36, %v17787_v24 }
0x1c88   : > { %v10721_v43 = vpack.c.bf16 %v10719_v39, %v10719_v39 }
0x1c89   : > { %v10722_v37 = vpack.c.bf16 %v10720_v50, %v10720_v50 }
0x1c8b   : > { %10890 = vmatprep.mubr.bf16.mxu1 %v10722_v37 }
0x1c8c   : > { %10891 = vmatmul.mubr.bf16.vlgmr.msra.gmra.mrb[124].mxu1 %v10721_v43 }
0x1d5f   : > { %v12662_v49 = vpop.f32.mrb[124].mxu1 }
0x1d60   : > { %v12663_v3 = vpop.f32.mrb[125].mxu1 }
0x1d61   : > { %v12664_v28 = vadd.f32 %v12663_v3, %v12662_v49  ;;  %v12665_v23 = vpop.f32.mrb[126].mxu1 }
0x1d62   : > { %v12666_v17 = vpop.f32.mrb[127].mxu1 }
0x1d63   : > { %v10893_v24 = vadd.f32 %v12664_v28, %v12560_v11 }
0x1d65   : > { %10898 = vst [vmem:[%s713_s16] sm:$0xff] %v10893_v24 }
0x1d66   : > { %14223 = shalt.err (!%p14220_p9)
}
0x1d67   : > { %s14224_s1 = scalar_lea.hbm %s18626_s4, 128  ;;  %s14228_s16 = scalar_lea.hbm %s18786_s14, 256 }
0x1d68   : > { %p14225_p10 = scmp.ne.s32.totalorder %s18626_s4, %s14224_s1  ;;  %p14229_p1 = scmp.lt.u32.totalorder %s18626_s4, %s18786_s14 }
0x1d69   : > { %p14230_p2 = scmp.lt.u32.totalorder %s14228_s16, %s14224_s1  ;;  %p14232_p4 = scmp.lt.u32.totalorder %s14224_s1, %s18626_s4 }
0x1d6a   : > { %p14226_p13 = pnand %p14225_p10, %p18787_p7 }
0x1d6b   : > { %p14231_p3 = por %p14230_p2, %p14229_p1 }
0x1d6c   : > { %p14227_p12 = pneg %p14226_p13 }
0x1d6d   : > { %p14233_p8 = por %p14232_p4, %p14231_p3 }
0x1d6f   : > { %p14234_p11 = pnand %p14233_p8, %p14227_p12 }
0x1d71   : > { %14237 = shalt.err (!%p14234_p11)
}
0x1d72   : > { %12884 = dma.vmem_to_hbm [thread:$0]  (%p18787_p7), %s18628_s3, 128, %s18626_s4, %s10900_s28  }
0x1d73 PF: > { %s18788_s22 = sld [smem:[#allocation22_spill]]  ;;  %s18789_s19 = sld [smem:[#allocation19_spill]] }
0x1d74   : > { %s18790_s2 = sld [smem:[#allocation26_spill]] }
0x1d79   : > { %p12921_p5 = scmp.ge.s32.totalorder %s18788_s22, 2  ;;  %s10925_s15 = sand.u32 1, %s18789_s19  }
0x1d7a   : > { %p18791_p0 = scmp.ne.s32.totalorder %s18790_s2, 0  ;;  %s10926_s30 = scalar_lea.sflag [#allocation4], %s10925_s15 }
0x1d7c   : > { %p12906_p6 = pnand %p12921_p5, %p18791_p0 }
0x1d7e   : > { %14271 = dma.done.wait (!%p12906_p6), %s10926_s30, 128  }
0x1d7f   : > { %14273 = vsyncadd (!%p12906_p6), %s10926_s30, 4294967168  ;;  %s18792_s1 = sld [smem:[#allocation23_spill]]  ;;  %s18793_s25 = sld [smem:[#allocation20_spill]] }
0x1d80   : > { %s18794_s22 = sld [smem:[#allocation21_spill]]  ;;  %s18795_s23 = sld [smem:[#allocation24_spill]] }
0x1d85   : > { %s18796_s21 = smov %s18792_s1  ;;  %p34_p9 = scmp.ge.s32.totalorder %s18792_s1, 4  }
0x1d86   : > { %s18797_s1 = smov %s18793_s25  ;;  %18798 = sst [smem:[#allocation19_spill]] %s18796_s21 }
0x1d87   :  { %36 = sbr.rel (!%p34_p9) target bundleno = 19 (0x13), region = 177 }
0x1d8e   :  { %10931 = vsyncpa [#allocation3], 1 }
0x1d8f   :  { %10933 = vsyncpa [#allocation3 + $0x1], 1 }
0x1d90   :  { %10934 = vsyncpa [#allocation6], 1 }
0x1d91   :  { %10935 = vsyncpa [#allocation9], 1 }
0x1d92   :  { %10936 = vsyncpa [#allocation12], 1 }
0x1d93   :  { %10937 = vsyncpa [#allocation4], 1 }
0x1d94   :  { %10939 = vsyncpa [#allocation4 + $0x1], 1 }

</bundles_post_ra>
